<compile_context>
chip_gen: v7x
topology: tpu7x:2x2x1
jax: 0.10.0
libtpu: 0.0.40
codegen_flags: <defaults>
</compile_context>

<pallas_src>
import jax
import jax.numpy as jnp
from jax.experimental import pallas as pl
from jax.experimental.pallas import tpu as pltpu


def _head_kernel(x_ref, w_emb_ref, b_emb_ref, w_cls_ref, b_cls_ref,
                 emb_ref, out_ref):
    # x_ref: (TN, HW, C) bf16, channel-last -> C on the lane axis.
    # AdaptiveAvgPool2d((1,1)) + flatten == spatial sum here; the 1/(H*W)
    # scale is pre-folded into w_emb.  The sum accumulates in f32 without
    # materializing a full f32 copy of the feature block.
    pooled = jnp.sum(x_ref[...], axis=1, dtype=jnp.float32)          # (TN, C)

    # embedding = pooled @ (W_emb^T / HW) + b  (bf16 MXU inputs, f32 accum)
    emb = jnp.dot(pooled.astype(jnp.bfloat16), w_emb_ref[...],
                  preferred_element_type=jnp.float32) + b_emb_ref[...]
    emb_ref[...] = emb

    # classifier: (TN, E) @ (E, KP) + b, KP = 128 (lane-dense output),
    # bf16 MXU inputs / f32 accumulate.
    out_ref[...] = jnp.dot(emb.astype(jnp.bfloat16), w_cls_ref[...],
                           preferred_element_type=jnp.float32) + b_cls_ref[...]


def prepare_head_params(w_emb, b_emb, w_cls, b_cls, *, hw, kp=128):
    """One-time parameter prep (outside the per-step path):
      - fold the 1/(H*W) avg-pool scale into w_emb and cast it to bf16,
      - pad the K-wide classifier to a lane-dense width KP (multiple of 128)
        and store it in bf16 (accumulation stays f32 in-kernel).
    Weights are expected pre-transposed to (in, out)."""
    E = w_emb.shape[1]
    K = w_cls.shape[1]
    kp = max(kp, K)
    kp = -(-kp // 128) * 128
    w_emb_s = (w_emb.astype(jnp.float32) * (1.0 / hw)).astype(jnp.bfloat16)
    b_emb_2d = b_emb.reshape(1, E).astype(jnp.float32)
    w_cls_p = (jnp.zeros((E, kp), jnp.float32).at[:, :K].set(w_cls)
               .astype(jnp.bfloat16))
    b_cls_p = jnp.zeros((1, kp), jnp.float32).at[0, :K].set(b_cls)
    return w_emb_s, b_emb_2d, w_cls_p, b_cls_p


def _const_spec(shape):
    """Weight/bias block pinned to block 0 -> fetched once, VMEM-resident.
    Buffered(1): a constant-index block needs no double buffer."""
    index_map = lambda i: (0,) * len(shape)
    try:
        return pl.BlockSpec(shape, index_map, pipeline_mode=pl.Buffered(1))
    except (TypeError, AttributeError):
        return pl.BlockSpec(shape, index_map)


def embedding_head(feats_nhwc, w_emb_s, b_emb, w_cls_p, b_cls_p,
                   *, num_classes=13, batch_tile=8):
    """feats_nhwc: (N, H, W, C) backbone features, channel-last (the layout
    XLA convs prefer on TPU).  Other args are outputs of prepare_head_params.
    Returns (embedding (N, 128) f32, logits (N, num_classes) f32)."""
    N, H, W, C = feats_nhwc.shape
    HW = H * W
    E = w_emb_s.shape[1]
    KP = w_cls_p.shape[1]

    # Free reshape; channel-last keeps C=2048 on the lane axis.  Backbone is
    # expected to emit bf16 on TPU; if not, this cast fuses upstream.
    x = feats_nhwc.reshape(N, HW, C).astype(jnp.bfloat16)

    # Batch tile: multiple of 8 (sublane constraint on the output blocks).
    tn = max(8, (batch_tile // 8) * 8)
    # Pad the batch to a multiple of 2*tn so the grid always has >= 2 steps:
    # keeps both v7x TensorCores busy and overlaps DMA with compute.
    n_pad = max(-(-N // (2 * tn)) * (2 * tn), 2 * tn)
    if n_pad != N:
        x = jnp.pad(x, ((0, n_pad - N), (0, 0), (0, 0)))
    grid = (n_pad // tn,)

    cost = pl.CostEstimate(
        flops=n_pad * HW * C + 2 * n_pad * C * E + 2 * n_pad * E * KP,
        transcendentals=0,
        bytes_accessed=(n_pad * HW * C * 2          # features (bf16)
                        + C * E * 2 + E * KP * 2    # weights (bf16)
                        + (E + KP) * 4              # biases (f32)
                        + n_pad * (E + KP) * 4))    # outputs (f32)

    emb, out_p = pl.pallas_call(
        _head_kernel,
        out_shape=(jax.ShapeDtypeStruct((n_pad, E), jnp.float32),
                   jax.ShapeDtypeStruct((n_pad, KP), jnp.float32)),
        grid_spec=pltpu.PrefetchScalarGridSpec(
            num_scalar_prefetch=0,
            grid=grid,
            in_specs=[pl.BlockSpec((tn, HW, C), lambda i: (i, 0, 0)),
                      _const_spec((C, E)),     # weights pinned -> VMEM-resident
                      _const_spec((1, E)),
                      _const_spec((E, KP)),
                      _const_spec((1, KP))],
            out_specs=(pl.BlockSpec((tn, E), lambda i: (i, 0)),
                       pl.BlockSpec((tn, KP), lambda i: (i, 0)))),
        compiler_params=pltpu.CompilerParams(
            dimension_semantics=("parallel",),     # batch split across TCs
            vmem_limit_bytes=32 * 1024 * 1024),    # safe on v7x's 64 MiB VMEM
        cost_estimate=cost,
    )(x, w_emb_s, b_emb, w_cls_p, b_cls_p)

    return emb[:N], out_p[:N, :num_classes]


if __name__ == "__main__":
    key = jax.random.PRNGKey(0)

    # ResNeXt101_32x8d backbone output for a 224x224 image: C=2048, 7x7
    # spatial (channel-last on TPU).
    N, H, W, C = 16, 7, 7, 2048
    E, K = 128, 13  # embedding_dim = 128, classifier -> 13 classes

    k1, k2, k3, k4, k5 = jax.random.split(key, 5)
    # Backbone assumed to emit bf16 features on TPU -> no wrapper cast traffic.
    feats = jax.random.normal(k1, (N, H, W, C), jnp.bfloat16)

    # PyTorch nn.Linear stores (out, in); keep pre-transposed (in, out).
    w_emb = jax.random.normal(k2, (C, E), jnp.float32) * 0.02
    b_emb = jax.random.normal(k3, (E,), jnp.float32) * 0.02
    w_cls = jax.random.normal(k4, (E, K), jnp.float32) * 0.02
    b_cls = jax.random.normal(k5, (K,), jnp.float32) * 0.02

    params = prepare_head_params(w_emb, b_emb, w_cls, b_cls, hw=H * W)
    emb, out = jax.jit(embedding_head)(feats, *params)
    jax.block_until_ready((emb, out))

    # Pure-JAX f32 reference for the implemented part of forward().
    feats_f32 = feats.astype(jnp.float32)
    pooled = feats_f32.mean(axis=(1, 2))          # avgpool + flatten
    ref_emb = pooled @ w_emb + b_emb              # embeddingLayer
    ref_out = ref_emb @ w_cls + b_cls             # classifier

    assert emb.shape == (N, E) and out.shape == (N, K)
    assert jnp.allclose(emb, ref_emb, atol=2e-2, rtol=2e-2)
    assert jnp.allclose(out, ref_out, atol=2e-2, rtol=2e-2)

    print("KERNEL_OK")
</pallas_src>

<mosaic_0001>
module attributes {stable_mosaic.version = 11 : i64} {
  func.func @_head_kernel(%arg0: i32, %arg1: memref<8x49x2048xbf16, #tpu.memory_space<vmem>>, %arg2: memref<2048x128xbf16, #tpu.memory_space<vmem>>, %arg3: memref<1x128xf32, #tpu.memory_space<vmem>>, %arg4: memref<128x128xbf16, #tpu.memory_space<vmem>>, %arg5: memref<1x128xf32, #tpu.memory_space<vmem>>, %arg6: memref<8x128xf32, #tpu.memory_space<vmem>>, %arg7: memref<8x128xf32, #tpu.memory_space<vmem>>) attributes {dimension_semantics = [#tpu.dimension_semantics<parallel>], iteration_bounds = array<i64: 2>, scalar_prefetch = 0 : i64, scratch_operands = 0 : i64, tpu.core_type = #tpu.core_type<tc>, window_params = [{transform_indices = @transform_0, window_bounds = array<i64: 8, 49, 2048>}, {pipeline_mode = #tpu.pipeline_mode<synchronous>, transform_indices = @transform_1, window_bounds = array<i64: 2048, 128>}, {pipeline_mode = #tpu.pipeline_mode<synchronous>, transform_indices = @transform_2, window_bounds = array<i64: 1, 128>}, {pipeline_mode = #tpu.pipeline_mode<synchronous>, transform_indices = @transform_3, window_bounds = array<i64: 128, 128>}, {pipeline_mode = #tpu.pipeline_mode<synchronous>, transform_indices = @transform_4, window_bounds = array<i64: 1, 128>}, {transform_indices = @transform_5, window_bounds = array<i64: 8, 128>}, {transform_indices = @transform_6, window_bounds = array<i64: 8, 128>}]} {
    %c0 = arith.constant 0 : index
    %c0_0 = arith.constant 0 : index
    %c0_1 = arith.constant 0 : index
    %0 = vector.load %arg1[%c0, %c0_0, %c0_1] : memref<8x49x2048xbf16, #tpu.memory_space<vmem>>, vector<8x49x2048xbf16>
    %1 = arith.extf %0 : vector<8x49x2048xbf16> to vector<8x49x2048xf32>
    %cst = arith.constant dense<0.000000e+00> : vector<8x2048xf32>
    %2 = vector.multi_reduction <add>, %1, %cst [1] : vector<8x49x2048xf32> to vector<8x2048xf32>
    %3 = arith.truncf %2 : vector<8x2048xf32> to vector<8x2048xbf16>
    %c0_2 = arith.constant 0 : index
    %c0_3 = arith.constant 0 : index
    %4 = vector.load %arg2[%c0_2, %c0_3] : memref<2048x128xbf16, #tpu.memory_space<vmem>>, vector<2048x128xbf16>
    %cst_4 = arith.constant dense<0.000000e+00> : vector<8x128xf32>
    %5 = tpu.matmul %3, %4, %cst_4 {dimension_numbers = #tpu.dot_dimension_numbers<[1], [0], [0], [1], [0, 0, 1, 1], [], []>} : vector<8x2048xbf16>, vector<2048x128xbf16>, vector<8x128xf32> -> vector<8x128xf32>
    %c0_5 = arith.constant 0 : index
    %c0_6 = arith.constant 0 : index
    %6 = vector.load %arg3[%c0_5, %c0_6] : memref<1x128xf32, #tpu.memory_space<vmem>>, vector<1x128xf32>
    %7 = vector.broadcast %6 : vector<1x128xf32> to vector<8x128xf32>
    %8 = arith.addf %5, %7 : vector<8x128xf32>
    %c0_7 = arith.constant 0 : index
    %c0_8 = arith.constant 0 : index
    %9 = vector.load %arg6[%c0_7, %c0_8] : memref<8x128xf32, #tpu.memory_space<vmem>>, vector<8x128xf32>
    tpu.vector_store %arg6[%c0_7, %c0_8], %8 {strides = array<i32>} : memref<8x128xf32, #tpu.memory_space<vmem>>, vector<8x128xf32>,
    %10 = arith.truncf %8 : vector<8x128xf32> to vector<8x128xbf16>
    %c0_9 = arith.constant 0 : index
    %c0_10 = arith.constant 0 : index
    %11 = vector.load %arg4[%c0_9, %c0_10] : memref<128x128xbf16, #tpu.memory_space<vmem>>, vector<128x128xbf16>
    %cst_11 = arith.constant dense<0.000000e+00> : vector<8x128xf32>
    %12 = tpu.matmul %10, %11, %cst_11 {dimension_numbers = #tpu.dot_dimension_numbers<[1], [0], [0], [1], [0, 0, 1, 1], [], []>} : vector<8x128xbf16>, vector<128x128xbf16>, vector<8x128xf32> -> vector<8x128xf32>
    %c0_12 = arith.constant 0 : index
    %c0_13 = arith.constant 0 : index
    %13 = vector.load %arg5[%c0_12, %c0_13] : memref<1x128xf32, #tpu.memory_space<vmem>>, vector<1x128xf32>
    %14 = vector.broadcast %13 : vector<1x128xf32> to vector<8x128xf32>
    %15 = arith.addf %12, %14 : vector<8x128xf32>
    %c0_14 = arith.constant 0 : index
    %c0_15 = arith.constant 0 : index
    %16 = vector.load %arg7[%c0_14, %c0_15] : memref<8x128xf32, #tpu.memory_space<vmem>>, vector<8x128xf32>
    tpu.vector_store %arg7[%c0_14, %c0_15], %15 {strides = array<i32>} : memref<8x128xf32, #tpu.memory_space<vmem>>, vector<8x128xf32>,
    return
  }
  func.func @transform_0(%arg0: i32) -> (i32, i32, i32) {
    %c0_i32 = arith.constant 0 : i32
    %c0_i32_0 = arith.constant 0 : i32
    %c0_i32_1 = arith.constant 0 : i32
    return %arg0, %c0_i32, %c0_i32_0 : i32, i32, i32
  }
  func.func @transform_1(%arg0: i32) -> (i32, i32) {
    %c0_i32 = arith.constant 0 : i32
    %c0_i32_0 = arith.constant 0 : i32
    %c0_i32_1 = arith.constant 0 : i32
    return %c0_i32, %c0_i32_0 : i32, i32
  }
  func.func @transform_2(%arg0: i32) -> (i32, i32) {
    %c0_i32 = arith.constant 0 : i32
    %c0_i32_0 = arith.constant 0 : i32
    %c0_i32_1 = arith.constant 0 : i32
    return %c0_i32, %c0_i32_0 : i32, i32
  }
  func.func @transform_3(%arg0: i32) -> (i32, i32) {
    %c0_i32 = arith.constant 0 : i32
    %c0_i32_0 = arith.constant 0 : i32
    %c0_i32_1 = arith.constant 0 : i32
    return %c0_i32, %c0_i32_0 : i32, i32
  }
  func.func @transform_4(%arg0: i32) -> (i32, i32) {
    %c0_i32 = arith.constant 0 : i32
    %c0_i32_0 = arith.constant 0 : i32
    %c0_i32_1 = arith.constant 0 : i32
    return %c0_i32, %c0_i32_0 : i32, i32
  }
  func.func @transform_5(%arg0: i32) -> (i32, i32) {
    %c0_i32 = arith.constant 0 : i32
    %c0_i32_0 = arith.constant 0 : i32
    return %arg0, %c0_i32 : i32, i32
  }
  func.func @transform_6(%arg0: i32) -> (i32, i32) {
    %c0_i32 = arith.constant 0 : i32
    %c0_i32_0 = arith.constant 0 : i32
    return %arg0, %c0_i32 : i32, i32
  }
}

</mosaic_0001>

<bundles_post_ra>
// kernel: embedding_head.1
= control target key start
LH: loop header
LB: loop body
LE: loop exit
PB: predicated region body
PF: predicated region fallthrough
CT: control target
= control target key end

     0   :  { %12 = vsyncpa [#allocation3], 0  ;;  %s10776_s0 = inlined_call_operand.vmem [shape: bf16[16,49,2048], index: 0, kind: input, shape index: {}]   ;;  %s10777_s1 = inlined_call_operand.vmem [shape: bf16[2048,128], index: 1, kind: input, shape index: {}]   ;;  %s10778_s2 = inlined_call_operand.vmem [shape: f32[1,128], index: 2, kind: input, shape index: {}]   ;;  %s10779_s3 = inlined_call_operand.vmem [shape: bf16[128,128], index: 3, kind: input, shape index: {}]   ;;  %s10780_s4 = inlined_call_operand.vmem [shape: f32[1,128], index: 4, kind: input, shape index: {}]   ;;  %s10781_s5 = inlined_call_operand.hbm [shape: f32[16,128], index: 5, kind: output, shape index: {0}]   ;;  %s10782_s6 = inlined_call_operand.hbm [shape: f32[16,128], index: 6, kind: output, shape index: {1}]  }
   0x1   :  { %14 = vsyncpa [#allocation3 + $0x1], 0 }
   0x2   :  { %15 = vsyncpa [#allocation5], 0 }
   0x3   :  { %17 = vsyncpa [#allocation5 + $0x1], 0  ;;  %s6074_s21 = smov 0   ;;  %s6076_s22 = smov 0  }
   0x4   :  { %s6078_s23 = smov 0   ;;  %s6080_s24 = smov 0  }
   0x5 LB: > { %s6095_s25 = sadd.s32 4294967295, %s6033_s24   ;;  %s5399_s26 = sadd.s32 4294967294, %s6033_s24   ;;  %s6033_s24 = sphi %s6080_s24, %s12714_s24   ;;  %s6029_s23 = sphi %s6078_s23, %s12713_s23   ;;  %s6025_s22 = sphi %s6076_s22, %s12712_s22   ;;  %s6021_s21 = sphi %s6074_s21, %s12711_s21  }
   0x6   : > { %s6099_s27 = sadd.s32 1, %s6033_s24   ;;  %s140_s28 = sadd.s32 1, %s6029_s23 }
   0x7   : > { %s137_s29 = ssub.s32 %s6033_s24, %s6099_s27  ;;  %p150_p0 = scmp.ne.s32.totalorder %s6029_s23, %s6025_s22 }
   0x8   : > { %p138_p1 = scmp.eq.s32.totalorder %s137_s29, 0  ;;  %p151_p2 = scmp.eq.s32.totalorder %s6095_s25, 1 }
   0x9   : > { %p156_p3 = scmp.ne.s32.totalorder %s6025_s22, %s6021_s21  ;;  %p157_p4 = scmp.eq.s32.totalorder %s5399_s26, 1 }
   0xa   : > { %s6110_s30 = scalar_select %p138_p1, %s6029_s23, %s140_s28  }
   0xb   : > { %p6112_p5 = por %p151_p2, %p150_p0  ;;  %p6116_p6 = por %p157_p4, %p156_p3 }
   0xc   : > { %p5402_p7 = scmp.ge.s32.totalorder %s6033_s24, 1  ;;  %p223_p8 = scmp.lt.s32.totalorder %s6033_s24, 3 }
   0xe   : > { %p224_p9 = pnand %p5402_p7, %p223_p8 }
  0x10   : > { %227 = sbr.rel (%p224_p9) target bundleno = 1428 (0x594), region = 40 }
  0x17   : > { %v5803_v0 = vld [vmem:[%s10777_s1 + $0x40] sm:$0xff]   ;;  %v5807_v4 = vld [vmem:[%s10777_s1 + $0x48] sm:$0xff]   ;;  %v5811_v8 = vld [vmem:[%s10777_s1 + $0x50] sm:$0xff]   ;;  %s5405_s9 = sshll.u32 %s6095_s25, 3  ;;  %vm1616_vm0 = vcmask 1040384   ;;  %vm3923_vm1 = vcmask 1041409  }
  0x18   : > { %v5804_v1 = vld [vmem:[%s10777_s1 + $0xc0] sm:$0xff]   ;;  %5551 = vmatprep.subr.bf16.mxu0 %v5803_v0  ;;  %v5808_v5 = vld [vmem:[%s10777_s1 + $0xc8] sm:$0xff]   ;;  %v5812_v9 = vld [vmem:[%s10777_s1 + $0xd0] sm:$0xff]   ;;  %p260_p10 = scmp.lt.s32.totalorder %s5405_s9, 15  ;;  %vm3925_vm2 = vcmask 1042434   ;;  %vm3927_vm3 = vcmask 1043459  }
  0x19   : > { %v5805_v2 = vld [vmem:[%s10777_s1] sm:$0xff]   ;;  %5573 = vmatprep.subr.bf16.mxu1 %v5804_v1  ;;  %v5809_v6 = vld [vmem:[%s10777_s1 + $0x8] sm:$0xff]   ;;  %v5813_v10 = vld [vmem:[%s10777_s1 + $0x10] sm:$0xff]   ;;  %vm3929_vm4 = vcmask 1044484   ;;  %vm3931_vm5 = vcmask 1045509   ;;  %vm3933_vm6 = vcmask 1046534  }
  0x1a   : > { %v5806_v3 = vld [vmem:[%s10777_s1 + $0x80] sm:$0xff]   ;;  %5552 = vmatpush3.bf16.msra.mxu0 %v5805_v2  ;;  %v5810_v7 = vld [vmem:[%s10777_s1 + $0x88] sm:$0xff]   ;;  %v5814_v11 = vld [vmem:[%s10777_s1 + $0x90] sm:$0xff]   ;;  %s12716_s9 = smov (!%p260_p10, %s5405_s9), 15  ;;  %vm3935_vm7 = vcmask 1047559   ;;  %vm6036_vm8 = vmmov 0  }
  0x1b   : > { %5574 = vmatpush3.bf16.msra.mxu1 %v5806_v3  ;;  %5553 = vmatprep.subr.bf16.mxu0 %v5807_v4  ;;  %v5815_v12 = vld [vmem:[%s10777_s1 + $0x58] sm:$0xff]   ;;  %v5819_v16 = vld [vmem:[%s10777_s1 + $0x60] sm:$0xff]   ;;  %v5823_v20 = vld [vmem:[%s10777_s1 + $0x68] sm:$0xff]   ;;  %s5756_s18 = smul.u32 448, %s12716_s9  ;;  %s10692_s17 = sand.u32 1, %s6025_s22  }
  0x1c   : > { %5575 = vmatprep.subr.bf16.mxu1 %v5808_v5  ;;  %v5816_v13 = vld [vmem:[%s10777_s1 + $0xd8] sm:$0xff]   ;;  %v5820_v17 = vld [vmem:[%s10777_s1 + $0xe0] sm:$0xff]   ;;  %v5824_v21 = vld [vmem:[%s10777_s1 + $0xe8] sm:$0xff]   ;;  %s5403_s19 = sshll.u32 %s10692_s17, 3  ;;  %s5547_s20 = sshll.u32 %s6095_s25, 7 }
  0x1d   : > { %v5817_v14 = vld [vmem:[%s10777_s1 + $0x18] sm:$0xff]   ;;  %v5821_v18 = vld [vmem:[%s10777_s1 + $0x20] sm:$0xff]   ;;  %v5825_v22 = vld [vmem:[%s10777_s1 + $0x28] sm:$0xff]   ;;  %s6216_s14 = scalar_lea.vmem %s10776_s0, %s5756_s18  ;;  %s251_s18 = scalar_lea.vmem [#allocation2], %s5403_s19 }
  0x1e   : > { %5554 = vmatpush3.bf16.msra.mxu0 %v5809_v6  ;;  %v5818_v15 = vld [vmem:[%s10777_s1 + $0x98] sm:$0xff]   ;;  %v5822_v19 = vld [vmem:[%s10777_s1 + $0xa0] sm:$0xff]   ;;  %v5826_v23 = vld [vmem:[%s10777_s1 + $0xa8] sm:$0xff]   ;;  %s10703_s29 = scalar_lea.hbm %s10781_s5, %s5547_s20  ;;  %s5295_s10 = sshll.u32 %s251_s18, 4  ;;  %s5296_s10 = int_to_ptr.vmem [resolvable:$true] %s5295_s10 }
  0x1f   : > { %5576 = vmatpush3.bf16.msra.mxu1 %v5810_v7  ;;  %5555 = vmatprep.subr.bf16.mxu0 %v5811_v8  ;;  %v5827_v24 = vld [vmem:[%s10777_s1 + $0x70] sm:$0xff]   ;;  %v5831_v28 = vld [vmem:[%s10777_s1 + $0x78] sm:$0xff]   ;;  %v6225_v32 = vld [vmem:[%s6216_s14] sm:$0xff]  ;;  %s5277_s11 = scalar_lea.sflag [#allocation3], %s10692_s17  ;;  %s5939_s12 = scalar_lea.vmem %s5296_s10, 128 }
  0x20   : > { %5577 = vmatprep.subr.bf16.mxu1 %v5812_v9  ;;  %v5828_v25 = vld [vmem:[%s10777_s1 + $0xf0] sm:$0xff]   ;;  %v5832_v29 = vld [vmem:[%s10777_s1 + $0xf8] sm:$0xff]   ;;  %11164 = vst [vmem:[#allocation8_spill] sm:$0xff] %v6225_v32  ;;  %v6228_v33 = vld [vmem:[%s6216_s14 + $0x40] sm:$0xff]  ;;  %v11220_v39 = vunpack.c.h.bf16 %v6225_v32  ;;  %p5940_p11 = scmp.ne.s32.totalorder %s5296_s10, %s5939_s12  ;;  %s6037_s9 = smov [#allocation2]  }
  0x21   : > { %v5829_v26 = vld [vmem:[%s10777_s1 + $0x30] sm:$0xff]   ;;  %v5833_v30 = vld [vmem:[%s10777_s1 + $0x38] sm:$0xff]   ;;  %11165 = vst [vmem:[#allocation9_spill] sm:$0xff] %v6228_v33  ;;  %v6231_v34 = vld [vmem:[%s6216_s14 + $0x80] sm:$0xff]  ;;  %s5943_s13 = sshll.u32 %s6037_s9, 4  ;;  %s5944_s13 = int_to_ptr.vmem [resolvable:$false] %s5943_s13 }
  0x22   : > { %5556 = vmatpush3.bf16.msra.mxu0 %v5813_v10  ;;  %v5830_v27 = vld [vmem:[%s10777_s1 + $0xb0] sm:$0xff]   ;;  %v5834_v31 = vld [vmem:[%s10777_s1 + $0xb8] sm:$0xff]   ;;  %11166 = vst [vmem:[#allocation10_spill] sm:$0xff] %v6231_v34  ;;  %v6234_v35 = vld [vmem:[%s6216_s14 + $0xc0] sm:$0xff]  ;;  %p5941_p12 = pnand %p5940_p11, %p6112_p5  ;;  %p5946_p0 = scmp.lt.s32.totalorder %s5296_s10, %s5944_s13 }
  0x23   : > { %5578 = vmatpush3.bf16.msra.mxu1 %v5814_v11  ;;  %5557 = vmatprep.subr.bf16.mxu0 %v5815_v12  ;;  %11167 = vst [vmem:[#allocation11_spill] sm:$0xff] %v6234_v35  ;;  %v6237_v36 = vld [vmem:[%s6216_s14 + $0x100] sm:$0xff] }
  0x24   : > { %5579 = vmatprep.subr.bf16.mxu1 %v5816_v13  ;;  %11168 = vst [vmem:[#allocation12_spill] sm:$0xff] %v6237_v36  ;;  %v6240_v37 = vld [vmem:[%s6216_s14 + $0x140] sm:$0xff]  ;;  %p5942_p13 = pneg %p5941_p12 }
  0x25   : > { %11169 = vst [vmem:[#allocation13_spill] sm:$0xff] %v6240_v37  ;;  %v6247_v42 = vld [vmem:[%s6216_s14 + $0x180] sm:$0x11] }
  0x26   : > { %5558 = vmatpush3.bf16.msra.mxu0 %v5817_v14  ;;  %11170 = vst [vmem:[#allocation14_spill] sm:$0xff] %v6247_v42  ;;  %v6250_v43 = vld [vmem:[%s6216_s14 + $0x1c0] sm:$0xff] }
  0x27   : > { %5580 = vmatpush3.bf16.msra.mxu1 %v5818_v15  ;;  %5559 = vmatprep.subr.bf16.mxu0 %v5819_v16  ;;  %11171 = vst [vmem:[#allocation15_spill] sm:$0xff] %v6250_v43  ;;  %v6253_v44 = vld [vmem:[%s6216_s14 + $0x200] sm:$0xff]  ;;  %v11223_v1 = vunpack.c.h.bf16 %v6250_v43 }
  0x28   : > { %5581 = vmatprep.subr.bf16.mxu1 %v5820_v17  ;;  %11172 = vst [vmem:[#allocation16_spill] sm:$0xff] %v6253_v44  ;;  %v6260_v49 = vld [vmem:[%s6216_s14 + $0x240] sm:$0xff] }
  0x29   : > { %11173 = vst [vmem:[#allocation17_spill] sm:$0xff] %v6260_v49  ;;  %v6263_v50 = vld [vmem:[%s6216_s14 + $0x280] sm:$0xff] }
  0x2a   : > { %5560 = vmatpush3.bf16.msra.mxu0 %v5821_v18  ;;  %11174 = vst [vmem:[#allocation18_spill] sm:$0xff] %v6263_v50  ;;  %v6266_v51 = vld [vmem:[%s6216_s14 + $0x2c0] sm:$0xff] }
  0x2b   : > { %5582 = vmatpush3.bf16.msra.mxu1 %v5822_v19  ;;  %5561 = vmatprep.subr.bf16.mxu0 %v5823_v20  ;;  %11175 = vst [vmem:[#allocation19_spill] sm:$0xff] %v6266_v51  ;;  %v6273_v56 = vld [vmem:[%s6216_s14 + $0x300] sm:$0xff] }
  0x2c   : > { %5583 = vmatprep.subr.bf16.mxu1 %v5824_v21  ;;  %11176 = vst [vmem:[#allocation20_spill] sm:$0xff] %v6273_v56  ;;  %v6276_v57 = vld [vmem:[%s6216_s14 + $0x340] sm:$0x11] }
  0x2d   : > { %11177 = vst [vmem:[#allocation21_spill] sm:$0xff] %v6276_v57  ;;  %v6283_v62 = vld [vmem:[%s6216_s14 + $0x380] sm:$0xff] }
  0x2e   : > { %5562 = vmatpush3.bf16.msra.mxu0 %v5825_v22  ;;  %11178 = vst [vmem:[#allocation22_spill] sm:$0xff] %v6283_v62  ;;  %v6286_v63 = vld [vmem:[%s6216_s14 + $0x3c0] sm:$0xff] }
  0x2f   : > { %5584 = vmatpush3.bf16.msra.mxu1 %v5826_v23  ;;  %5563 = vmatprep.subr.bf16.mxu0 %v5827_v24  ;;  %11179 = vst [vmem:[#allocation23_spill] sm:$0xff] %v6286_v63  ;;  %v6293_v4 = vld [vmem:[%s6216_s14 + $0x400] sm:$0xff]  ;;  %v11227_v32 = vunpack.c.h.bf16 %v6286_v63 }
  0x30   : > { %5585 = vmatprep.subr.bf16.mxu1 %v5828_v25  ;;  %11180 = vst [vmem:[#allocation24_spill] sm:$0xff] %v6293_v4  ;;  %v6296_v5 = vld [vmem:[%s6216_s14 + $0x440] sm:$0xff] }
  0x31   : > { %11181 = vst [vmem:[#allocation25_spill] sm:$0xff] %v6296_v5  ;;  %v6303_v10 = vld [vmem:[%s6216_s14 + $0x480] sm:$0xff] }
  0x32   : > { %5564 = vmatpush3.bf16.msra.mxu0 %v5829_v26  ;;  %11182 = vst [vmem:[#allocation26_spill] sm:$0xff] %v6303_v10  ;;  %v6306_v11 = vld [vmem:[%s6216_s14 + $0x4c0] sm:$0xff] }
  0x33   : > { %5586 = vmatpush3.bf16.msra.mxu1 %v5830_v27  ;;  %5565 = vmatprep.subr.bf16.mxu0 %v5831_v28  ;;  %11183 = vst [vmem:[#allocation27_spill] sm:$0xff] %v6306_v11  ;;  %v6313_v16 = vld [vmem:[%s6216_s14 + $0x500] sm:$0x11] }
  0x34   : > { %5587 = vmatprep.subr.bf16.mxu1 %v5832_v29  ;;  %11184 = vst [vmem:[#allocation28_spill] sm:$0xff] %v6313_v16  ;;  %v6316_v17 = vld [vmem:[%s6216_s14 + $0x540] sm:$0xff] }
  0x35   : > { %11185 = vst [vmem:[#allocation29_spill] sm:$0xff] %v6316_v17  ;;  %v6323_v22 = vld [vmem:[%s6216_s14 + $0x580] sm:$0xff] }
  0x36   : > { %5566 = vmatpush3.bf16.msra.mxu0 %v5833_v30  ;;  %11186 = vst [vmem:[#allocation30_spill] sm:$0xff] %v6323_v22  ;;  %v6326_v23 = vld [vmem:[%s6216_s14 + $0x5c0] sm:$0xff]  ;;  %v11230_v43 = vunpack.c.h.bf16 %v6323_v22 }
  0x37   : > { %5588 = vmatpush3.bf16.msra.mxu1 %v5834_v31  ;;  %11187 = vst [vmem:[#allocation31_spill] sm:$0xff] %v6326_v23  ;;  %v6333_v28 = vld [vmem:[%s6216_s14 + $0x600] sm:$0xff] }
  0x38   : > { %11188 = vst [vmem:[#allocation32_spill] sm:$0xff] %v6333_v28  ;;  %v6336_v29 = vld [vmem:[%s6216_s14 + $0x640] sm:$0xff] }
  0x39   : > { %11189 = vst [vmem:[#allocation33_spill] sm:$0xff] %v6336_v29  ;;  %v6343_v54 = vld [vmem:[%s6216_s14 + $0x680] sm:$0xff] }
  0x3a   : > { %11190 = vst [vmem:[#allocation34_spill] sm:$0xff] %v6343_v54  ;;  %v6346_v6 = vld [vmem:[%s6216_s14 + $0x6c0] sm:$0x11] }
  0x3b   : > { %11191 = vst [vmem:[#allocation35_spill] sm:$0xff] %v6346_v6  ;;  %v6353_v2 = vld [vmem:[%s6216_s14 + $0x700] sm:$0xff] }
  0x3c   : > { %11192 = vst [vmem:[#allocation36_spill] sm:$0xff] %v6353_v2  ;;  %v6356_v47 = vld [vmem:[%s6216_s14 + $0x740] sm:$0xff] }
  0x3d   : > { %11193 = vst [vmem:[#allocation37_spill] sm:$0xff] %v6356_v47  ;;  %v6363_v14 = vld [vmem:[%s6216_s14 + $0x780] sm:$0xff] }
  0x3e   : > { %11194 = vst [vmem:[#allocation38_spill] sm:$0xff] %v6363_v14  ;;  %v6366_v0 = vld [vmem:[%s6216_s14 + $0x7c0] sm:$0xff] }
  0x3f   : > { %11195 = vst [vmem:[#allocation39_spill] sm:$0xff] %v6366_v0  ;;  %v6373_v58 = vld [vmem:[%s6216_s14 + $0x800] sm:$0xff] }
  0x40   : > { %11196 = vst [vmem:[#allocation40_spill] sm:$0xff] %v6373_v58  ;;  %v6376_v40 = vld [vmem:[%s6216_s14 + $0x840] sm:$0xff] }
  0x41   : > { %11197 = vst [vmem:[#allocation41_spill] sm:$0xff] %v6376_v40  ;;  %v6383_v13 = vld [vmem:[%s6216_s14 + $0x880] sm:$0x11] }
  0x42   : > { %11198 = vst [vmem:[#allocation42_spill] sm:$0xff] %v6383_v13  ;;  %v6386_v55 = vld [vmem:[%s6216_s14 + $0x8c0] sm:$0xff] }
  0x43   : > { %11199 = vst [vmem:[#allocation43_spill] sm:$0xff] %v6386_v55  ;;  %v6393_v38 = vld [vmem:[%s6216_s14 + $0x900] sm:$0xff] }
  0x44   : > { %11200 = vst [vmem:[#allocation44_spill] sm:$0xff] %v6393_v38  ;;  %v6396_v9 = vld [vmem:[%s6216_s14 + $0x940] sm:$0xff] }
  0x45   : > { %11201 = vst [vmem:[#allocation45_spill] sm:$0xff] %v6396_v9  ;;  %v6403_v27 = vld [vmem:[%s6216_s14 + $0x980] sm:$0xff] }
  0x46   : > { %11202 = vst [vmem:[#allocation46_spill] sm:$0xff] %v6403_v27  ;;  %v6406_v7 = vld [vmem:[%s6216_s14 + $0x9c0] sm:$0xff] }
  0x47   : > { %11203 = vst [vmem:[#allocation47_spill] sm:$0xff] %v6406_v7  ;;  %v6413_v53 = vld [vmem:[%s6216_s14 + $0xa00] sm:$0xff] }
  0x48   : > { %11204 = vst [vmem:[#allocation48_spill] sm:$0xff] %v6413_v53  ;;  %v6416_v60 = vld [vmem:[%s6216_s14 + $0xa40] sm:$0x11] }
  0x49   : > { %11205 = vst [vmem:[#allocation49_spill] sm:$0xff] %v6416_v60  ;;  %v6423_v48 = vld [vmem:[%s6216_s14 + $0xa80] sm:$0xff]  ;;  %v1372_v24 = vunpack.c.h.bf16 %v6416_v60 }
  0x4a   : > { %11206 = vst [vmem:[#allocation50_spill] sm:$0xff] %v6423_v48  ;;  %v6426_v18 = vld [vmem:[%s6216_s14 + $0xac0] sm:$0xff]  ;;  %v1388_v8 = vunpack.c.h.bf16 %v6423_v48 }
  0x4b   : > { %11207 = vst [vmem:[#allocation51_spill] sm:$0xff] %v6426_v18  ;;  %v6433_v3 = vld [vmem:[%s6216_s14 + $0xb00] sm:$0xff]  ;;  %v1404_v21 = vunpack.c.h.bf16 %v6426_v18 }
  0x4c   : > { %11208 = vst [vmem:[#allocation52_spill] sm:$0xff] %v6433_v3  ;;  %v6436_v31 = vld [vmem:[%s6216_s14 + $0xb40] sm:$0xff]  ;;  %v1420_v15 = vunpack.c.h.bf16 %v6433_v3 }
  0x4d   : > { %11209 = vst [vmem:[#allocation53_spill] sm:$0xff] %v6436_v31  ;;  %v6443_v45 = vld [vmem:[%s6216_s14 + $0xb80] sm:$0xff]  ;;  %v1436_v30 = vunpack.c.h.bf16 %v6436_v31 }
  0x4e   : > { %11210 = vst [vmem:[#allocation54_spill] sm:$0xff] %v6443_v45  ;;  %v6446_v20 = vld [vmem:[%s6216_s14 + $0xbc0] sm:$0xff] }
  0x4f   : > { %11211 = vst [vmem:[#allocation55_spill] sm:$0xff] %v6446_v20  ;;  %v6453_v46 = vld [vmem:[%s6216_s14 + $0xc00] sm:$0x11]  ;;  %v11222_v20 = vunpack.c.h.bf16 %v6247_v42 }
  0x50   : > { %11212 = vst [vmem:[#allocation56_spill] sm:$0xff] %v6453_v46  ;;  %v6456_v52 = vld [vmem:[%s6216_s14 + $0xc40] sm:$0xff]  ;;  %v1484_v31 = vunpack.c.h.bf16 %v6453_v46  ;;  %v11224_v46 = vunpack.c.h.bf16 %v6253_v44 }
  0x51   : > { %11213 = vst [vmem:[#allocation57_spill] sm:$0xff] %v6456_v52  ;;  %v6463_v25 = vld [vmem:[%s6216_s14 + $0xc80] sm:$0xff]  ;;  %v1500_v60 = vunpack.c.h.bf16 %v6456_v52  ;;  %v11225_v52 = vunpack.c.h.bf16 %v6276_v57 }
  0x52   : > { %11214 = vst [vmem:[#allocation58_spill] sm:$0xff] %v6463_v25  ;;  %v6466_v19 = vld [vmem:[%s6216_s14 + $0xcc0] sm:$0xff]  ;;  %v1516_v41 = vunpack.c.h.bf16 %v6463_v25  ;;  %v1833_v3 = vadd.f32 %v11224_v46, %v11223_v1  ;;  %v11226_v25 = vunpack.c.h.bf16 %v6283_v62  ;;  %v11231_v46 = vunpack.c.h.bf16 %v6346_v6 }
  0x53   : > { %11215 = vst [vmem:[#allocation59_spill] sm:$0xff] %v6466_v19  ;;  %v6473_v61 = vld [vmem:[%s6216_s14 + $0xd00] sm:$0xff]  ;;  %v1532_v18 = vunpack.c.h.bf16 %v6466_v19  ;;  %v11221_v19 = vunpack.c.h.bf16 %v6228_v33  ;;  %v1838_v12 = vsel %vm1616_vm0, %v11225_v52, 0.0  ;;  %v11232_v52 = vunpack.c.h.bf16 %v6231_v34  ;;  %v6876_v34 = vld [vmem:[%s6216_s14 + $0xd88] sm:$0xff] }
  0x54   : > { %11216 = vst [vmem:[#allocation60_spill] sm:$0xff] %v6473_v61  ;;  %v6476_v59 = vld [vmem:[%s6216_s14 + $0xd40] sm:$0xff]  ;;  %v1548_v53 = vunpack.c.h.bf16 %v6473_v61  ;;  %v1630_v61 = vsel %vm1616_vm0, %v11222_v20, 0.0  ;;  %v11229_v20 = vunpack.c.h.bf16 %v6316_v17  ;;  %v2254_v1 = vsel %vm1616_vm0, %v11231_v46, 0.0 }
  0x55   : > { %11217 = vst [vmem:[#allocation61_spill] sm:$0xff] %v6476_v59  ;;  %v6483_v48 = vld [vmem:[%s6216_s14 + $0xd80] sm:$0xff]  ;;  %v1625_v45 = vadd.f32 %v11221_v19, %v11220_v39  ;;  %v11228_v39 = vunpack.c.h.bf16 %v6313_v16  ;;  %v11233_v62 = vunpack.c.h.bf16 %v6260_v49  ;;  %v11236_v17 = vunpack.c.h.bf16 %v6383_v13  ;;  %v6866_v49 = vld [vmem:[%s6216_s14 + $0xd08] sm:$0xff] }
  0x56   : > { %11218 = vst [vmem:[#allocation62_spill] sm:$0xff] %v6483_v48  ;;  %v6486_v26 = vld [vmem:[%s6216_s14 + $0xdc0] sm:$0x11]  ;;  %v2249_v42 = vadd.f32 %v11230_v43, %v11229_v20  ;;  %v11237_v43 = vunpack.c.h.bf16 %v6293_v4  ;;  %v11238_v46 = vunpack.c.h.bf16 %v6326_v23  ;;  %v6839_v23 = vld [vmem:[%s6216_s14 + $0xbc8] sm:$0xff]  ;;  %11297 = vst [vmem:[#allocation91_spill] sm:$0xff] %v6866_v49 }
  0x57   : > { %11219 = vst [vmem:[#allocation63_spill] sm:$0xff] %v6486_v26  ;;  %v2041_v26 = vadd.f32 %v11227_v32, %v11226_v25  ;;  %v2046_v19 = vsel %vm1616_vm0, %v11228_v39, 0.0  ;;  %v1626_v57 = vadd.f32 %v1625_v45, %v11232_v52  ;;  %v1834_v63 = vadd.f32 %v1833_v3, %v11233_v62  ;;  %11292 = vst [vmem:[#allocation86_spill] sm:$0xff] %v6839_v23  ;;  %v6859_v4 = vld [vmem:[%s6216_s14 + $0xcc8] sm:$0xff] }
  0x58   : > { %v11234_v32 = vunpack.c.h.bf16 %v6353_v2  ;;  %v11235_v25 = vunpack.c.h.bf16 %v6356_v47  ;;  %v2462_v22 = vsel %vm1616_vm0, %v11236_v17, 0.0  ;;  %v2250_v6 = vadd.f32 %v2249_v42, %v11238_v46  ;;  %11296 = vst [vmem:[#allocation90_spill] sm:$0xff] %v6859_v4 }
  0x59   : > { %v2042_v20 = vadd.f32 %v2041_v26, %v11237_v43  ;;  %v11239_v45 = vunpack.c.h.bf16 %v6386_v55  ;;  %v11240_v52 = vunpack.c.h.bf16 %v6393_v38  ;;  %v2670_v3 = vsel %vm1616_vm0, %v1372_v24, 0.0  ;;  %v6819_v38 = vld [vmem:[%s6216_s14 + $0xac8] sm:$0xff] }
  0x5a   : > { %v2457_v39 = vadd.f32 %v11235_v25, %v11234_v32  ;;  %v11241_v47 = vunpack.c.h.bf16 %v6234_v35  ;;  %v11242_v25 = vunpack.c.h.bf16 %v6263_v50  ;;  %v11243_v17 = vunpack.c.h.bf16 %v6363_v14  ;;  %11288 = vst [vmem:[#allocation82_spill] sm:$0xff] %v6819_v38  ;;  %v6849_v50 = vld [vmem:[%s6216_s14 + $0xc48] sm:$0xff] }
  0x5b   : > { %v2665_v62 = vadd.f32 %v11240_v52, %v11239_v45  ;;  %v2873_v26 = vadd.f32 %v1404_v21, %v1388_v8  ;;  %v11244_v43 = vunpack.c.h.bf16 %v6296_v5  ;;  %v11245_v46 = vunpack.c.h.bf16 %v6333_v28  ;;  %v6809_v28 = vld [vmem:[%s6216_s14 + $0xa48] sm:$0x11]  ;;  %11294 = vst [vmem:[#allocation88_spill] sm:$0xff] %v6849_v50 }
  0x5c   : > { %v1627_v32 = vadd.f32 %v1626_v57, %v11241_v47  ;;  %v1835_v13 = vadd.f32 %v1834_v63, %v11242_v25  ;;  %v2458_v2 = vadd.f32 %v2457_v39, %v11243_v17  ;;  %v11246_v45 = vunpack.c.h.bf16 %v6396_v9  ;;  %11286 = vst [vmem:[#allocation80_spill] sm:$0xff] %v6809_v28  ;;  %v6816_v9 = vld [vmem:[%s6216_s14 + $0xa88] sm:$0xff] }
  0x5d   : > { %v2043_v42 = vadd.f32 %v2042_v20, %v11244_v43  ;;  %v2251_v55 = vadd.f32 %v2250_v6, %v11245_v46  ;;  %v2878_v24 = vsel %vm1616_vm0, %v1484_v31, 0.0  ;;  %v11247_v47 = vunpack.c.h.bf16 %v6237_v36  ;;  %11287 = vst [vmem:[#allocation81_spill] sm:$0xff] %v6816_v9  ;;  %v6856_v14 = vld [vmem:[%s6216_s14 + $0xc88] sm:$0xff] }
  0x5e   : > { %v2666_v52 = vadd.f32 %v2665_v62, %v11246_v45  ;;  %v11248_v63 = vunpack.c.h.bf16 %v6266_v51  ;;  %v11249_v39 = vunpack.c.h.bf16 %v6366_v0  ;;  %v2874_v21 = vadd.f32 %v2873_v26, %v1420_v15  ;;  %v6799_v0 = vld [vmem:[%s6216_s14 + $0x9c8] sm:$0xff]  ;;  %11295 = vst [vmem:[#allocation89_spill] sm:$0xff] %v6856_v14 }
  0x5f   : > { %v1628_v57 = vadd.f32 %v1627_v32, %v11247_v47  ;;  %v11250_v20 = vunpack.c.h.bf16 %v6303_v10  ;;  %v11251_v6 = vunpack.c.h.bf16 %v6336_v29  ;;  %v11252_v62 = vunpack.c.h.bf16 %v6403_v27  ;;  %v6769_v27 = vld [vmem:[%s6216_s14 + $0x848] sm:$0xff]  ;;  %11284 = vst [vmem:[#allocation78_spill] sm:$0xff] %v6799_v0 }
  0x60   : > { %v1836_v25 = vadd.f32 %v1835_v13, %v11248_v63  ;;  %v2459_v8 = vadd.f32 %v2458_v2, %v11249_v39  ;;  %v3081_v31 = vadd.f32 %v1516_v41, %v1500_v60  ;;  %v11253_v45 = vunpack.c.h.bf16 %v6240_v37  ;;  %v5835_v60 = vld [vmem:[%s10777_s1 + $0x140] sm:$0xff]   ;;  %v6789_v29 = vld [vmem:[%s6216_s14 + $0x948] sm:$0xff] }
  0x61   : > { %v2044_v17 = vadd.f32 %v2043_v42, %v11250_v20  ;;  %v2252_v43 = vadd.f32 %v2251_v55, %v11251_v6  ;;  %v2667_v46 = vadd.f32 %v2666_v52, %v11252_v62  ;;  %v11254_v47 = vunpack.c.h.bf16 %v6273_v56  ;;  %5595 = vmatprep.subr.bf16.mxu0 %v5835_v60  ;;  %v6829_v51 = vld [vmem:[%s6216_s14 + $0xb48] sm:$0xff] }
  0x62   : > { %v1629_v32 = vadd.f32 %v1628_v57, %v11253_v45  ;;  %v11255_v63 = vunpack.c.h.bf16 %v6373_v58  ;;  %v2875_v15 = vadd.f32 %v2874_v21, %v1436_v30  ;;  %v11256_v26 = vunpack.c.h.bf16 %v6306_v11  ;;  %v11260_v30 = vld [vmem:[#allocation54_spill] sm:$0xff]  ;;  %v6779_v58 = vld [vmem:[%s6216_s14 + $0x8c8] sm:$0xff]  ;;  %11290 = vst [vmem:[#allocation84_spill] sm:$0xff] %v6829_v51 }
  0x63   : > { %v1837_v13 = vadd.f32 %v1836_v25, %v11254_v47  ;;  %v11257_v39 = vunpack.c.h.bf16 %v6343_v54  ;;  %v11258_v20 = vunpack.c.h.bf16 %v6406_v7  ;;  %v3082_v41 = vadd.f32 %v3081_v31, %v1532_v18  ;;  %v6759_v7 = vld [vmem:[%s6216_s14 + $0x7c8] sm:$0xff]  ;;  %11282 = vst [vmem:[#allocation76_spill] sm:$0xff] %v6779_v58 }
  0x64   : > { %v2460_v2 = vadd.f32 %v2459_v8, %v11255_v63  ;;  %v2045_v42 = vadd.f32 %v2044_v17, %v11256_v26  ;;  %v1631_v57 = vadd.f32 %v1630_v61, %v1629_v32  ;;  %v11259_v6 = vunpack.c.h.bf16 %v6376_v40  ;;  %v5836_v17 = vld [vmem:[%s10777_s1 + $0x1c0] sm:$0xff]   ;;  %v11264_v32 = vld [vmem:[#allocation55_spill] sm:$0xff]  ;;  %v6796_v40 = vld [vmem:[%s6216_s14 + $0x988] sm:$0xff] }
  0x65   : > { %v2253_v55 = vadd.f32 %v2252_v43, %v11257_v39  ;;  %v2668_v52 = vadd.f32 %v2667_v46, %v11258_v20  ;;  %v1839_v25 = vadd.f32 %v1838_v12, %v1837_v13  ;;  %v11261_v21 = vunpack.c.h.bf16 %v11260_v30  ;;  %v11262_v46 = vld [vmem:[#allocation48_spill] sm:$0xff]  ;;  %5617 = vmatprep.subr.bf16.mxu1 %v5836_v17  ;;  %v6749_v30 = vld [vmem:[%s6216_s14 + $0x748] sm:$0xff]  ;;  %11283 = vst [vmem:[#allocation77_spill] sm:$0xff] %v6796_v40 }
  0x66   : > { %v2461_v8 = vadd.f32 %v2460_v2, %v11259_v6  ;;  %v2047_v43 = vadd.f32 %v2046_v19, %v2045_v42  ;;  %v11263_v18 = vunpack.c.h.bf16 %v11262_v46  ;;  %v3083_v47 = vadd.f32 %v3082_v41, %v1548_v53  ;;  %11280 = vst [vmem:[#allocation74_spill] sm:$0xff] %v6749_v30  ;;  %v6786_v46 = vld [vmem:[%s6216_s14 + $0x908] sm:$0xff] }
  0x67   : > { %v2876_v62 = vadd.f32 %v2875_v15, %v11261_v21  ;;  %v2255_v45 = vadd.f32 %v2254_v1, %v2253_v55  ;;  %v1632_v63 = vrot.slane %v1631_v57, 4  ;;  %v1840_v61 = vrot.slane %v1839_v25, 4  ;;  %v6806_v54 = vld [vmem:[%s6216_s14 + $0xa08] sm:$0xff] }
  0x68   : > { %v2669_v31 = vadd.f32 %v2668_v52, %v11263_v18  ;;  %v2463_v12 = vadd.f32 %v2462_v22, %v2461_v8  ;;  %v11265_v13 = vunpack.c.h.bf16 %v11264_v32  ;;  %v2048_v26 = vrot.slane %v2047_v43, 4  ;;  %v6776_v32 = vld [vmem:[%s6216_s14 + $0x888] sm:$0x11]  ;;  %11285 = vst [vmem:[#allocation79_spill] sm:$0xff] %v6806_v54 }
  0x69   : > { %v2256_v15 = vrot.slane %v2255_v45, 4  ;;  %v11266_v20 = vunpack.c.h.bf16 %v6476_v59  ;;  %v1633_v19 = vadd.f32 %v1632_v63, %v1631_v57  ;;  %v1841_v1 = vadd.f32 %v1840_v61, %v1839_v25  ;;  %11281 = vst [vmem:[#allocation75_spill] sm:$0xff] %v6776_v32  ;;  %v6826_v11 = vld [vmem:[%s6216_s14 + $0xb08] sm:$0xff] }
  0x6a   : > { %v2877_v2 = vadd.f32 %v2876_v62, %v11265_v13  ;;  %v2671_v39 = vadd.f32 %v2670_v3, %v2669_v31  ;;  %v2464_v42 = vrot.slane %v2463_v12, 4  ;;  %v2049_v52 = vadd.f32 %v2048_v26, %v2047_v43  ;;  %v11268_v31 = vld [vmem:[#allocation63_spill] sm:$0xff]  ;;  %11289 = vst [vmem:[#allocation83_spill] sm:$0xff] %v6826_v11  ;;  %v6836_v56 = vld [vmem:[%s6216_s14 + $0xb88] sm:$0xff] }
  0x6b   : > { %v3084_v6 = vadd.f32 %v3083_v47, %v11266_v20  ;;  %v2257_v53 = vadd.f32 %v2256_v15, %v2255_v45  ;;  %v11267_v60 = vunpack.c.h.bf16 %v6483_v48  ;;  %v1634_v8 = vrot.slane %v1633_v19, 2  ;;  %v6739_v48 = vld [vmem:[%s6216_s14 + $0x6c8] sm:$0x11]  ;;  %11291 = vst [vmem:[#allocation85_spill] sm:$0xff] %v6836_v56 }
  0x6c   : > { %v2879_v55 = vadd.f32 %v2878_v24, %v2877_v2  ;;  %v2672_v41 = vrot.slane %v2671_v39, 4  ;;  %v1842_v21 = vrot.slane %v1841_v1, 2  ;;  %v2465_v62 = vadd.f32 %v2464_v42, %v2463_v12  ;;  %11278 = vst [vmem:[#allocation72_spill] sm:$0xff] %v6739_v48  ;;  %v6846_v10 = vld [vmem:[%s6216_s14 + $0xc08] sm:$0x11] }
  0x6d   : > { %v3085_v22 = vadd.f32 %v3084_v6, %v11267_v60  ;;  %v2050_v18 = vrot.slane %v2049_v52, 2  ;;  %v2258_v13 = vrot.slane %v2257_v53, 2  ;;  %v11269_v59 = vunpack.c.h.bf16 %v11268_v31  ;;  %v6766_v31 = vld [vmem:[%s6216_s14 + $0x808] sm:$0xff]  ;;  %11293 = vst [vmem:[#allocation87_spill] sm:$0xff] %v6846_v10 }
  0x6e   : > { %v2880_v17 = vrot.slane %v2879_v55, 4  ;;  %v2673_v3 = vadd.f32 %v2672_v41, %v2671_v39  ;;  %v1635_v25 = vadd.f32 %v1634_v8, %v1633_v19  ;;  %v1843_v24 = vadd.f32 %v1842_v21, %v1841_v1 }
  0x6f   : > { %v3086_v57 = vsel %vm1616_vm0, %v11269_v59, 0.0  ;;  %v2466_v43 = vrot.slane %v2465_v62, 2  ;;  %v2051_v47 = vadd.f32 %v2050_v18, %v2049_v52  ;;  %v2259_v63 = vadd.f32 %v2258_v13, %v2257_v53  ;;  %v6611_v18 = vld [vmem:[%s6216_s14 + $0x8] sm:$0xff] }
  0x70   : > { %v2881_v45 = vadd.f32 %v2880_v17, %v2879_v55  ;;  %v2674_v61 = vrot.slane %v2673_v3, 2  ;;  %v3087_v2 = vadd.f32 %v3086_v57, %v3085_v22  ;;  %v1636_v12 = vrot.slane %v1635_v25, 1  ;;  %11270 = vst [vmem:[#allocation64_spill] sm:$0xff] %v6611_v18 }
  0x71   : > { %v1844_v26 = vrot.slane %v1843_v24, 1  ;;  %v2467_v15 = vadd.f32 %v2466_v43, %v2465_v62  ;;  %v2052_v39 = vrot.slane %v2051_v47, 1  ;;  %v2260_v6 = vrot.slane %v2259_v63, 1 }
  0x72   : > { %v2882_v20 = vrot.slane %v2881_v45, 2  ;;  %v2675_v42 = vadd.f32 %v2674_v61, %v2673_v3  ;;  %v3088_v59 = vrot.slane %v3087_v2, 4  ;;  %v1637_v19 = vadd.f32 %v1636_v12, %v1635_v25  ;;  %v6617_v61 = vld [vmem:[%s6216_s14 + $0x88] sm:$0xff] }
  0x73   : > { %v1845_v1 = vadd.f32 %v1844_v26, %v1843_v24  ;;  %v2468_v55 = vrot.slane %v2467_v15, 1  ;;  %v2053_v53 = vadd.f32 %v2052_v39, %v2051_v47  ;;  %v2261_v41 = vadd.f32 %v2260_v6, %v2259_v63  ;;  %v6614_v24 = vld [vmem:[%s6216_s14 + $0x48] sm:$0xff] }
  0x74   : > { %v2883_v52 = vadd.f32 %v2882_v20, %v2881_v45  ;;  %v2676_v60 = vrot.slane %v2675_v42, 1  ;;  %v3089_v22 = vadd.f32 %v3088_v59, %v3087_v2  ;;  %v3277_v62 = vpack.c.bf16 %v1637_v19, %v1637_v19  ;;  %v6620_v20 = vld [vmem:[%s6216_s14 + $0xc8] sm:$0xff] }
  0x75   : > { %v2469_v8 = vadd.f32 %v2468_v55, %v2467_v15  ;;  %v3293_v17 = vpack.c.bf16 %v1845_v1, %v1845_v1  ;;  %v3309_v57 = vpack.c.bf16 %v2053_v53, %v2053_v53  ;;  %v3325_v25 = vpack.c.bf16 %v2261_v41, %v2261_v41  ;;  %v6623_v39 = vld [vmem:[%s6216_s14 + $0x108] sm:$0xff] }
  0x76   : > { %v2884_v21 = vrot.slane %v2883_v52, 1  ;;  %v2677_v13 = vadd.f32 %v2676_v60, %v2675_v42  ;;  %v3090_v3 = vrot.slane %v3089_v22, 2  ;;  %v3796_v47 = vunpack.c.l.b16 %v3277_v62  ;;  %v6627_v19 = vld [vmem:[%s6216_s14 + $0x148] sm:$0xff] }
  0x77   : > { %v3341_v45 = vpack.c.bf16 %v2469_v8, %v2469_v8  ;;  %v3812_v63 = vunpack.c.l.b16 %v3293_v17  ;;  %v3828_v26 = vunpack.c.l.b16 %v3309_v57  ;;  %v3844_v15 = vunpack.c.l.b16 %v3325_v25  ;;  %v6632_v41 = vld [vmem:[%s6216_s14 + $0x188] sm:$0x11] }
  0x78   : > { %v2885_v43 = vadd.f32 %v2884_v21, %v2883_v52  ;;  %v3091_v2 = vadd.f32 %v3090_v3, %v3089_v22  ;;  %v3357_v12 = vpack.c.bf16 %v2677_v13, %v2677_v13  ;;  %11271 = vst [vmem:[#allocation65_spill] sm:$0xff] %v6632_v41  ;;  %v6635_v60 = vld [vmem:[%s6216_s14 + $0x1c8] sm:$0xff]  ;;  %v1374_v5 = vunpack.c.h.bf16 %v6809_v28 }
  0x79   : > { %v3860_v42 = vunpack.c.l.b16 %v3341_v45  ;;  %v3937_v59 = vsel %vm3923_vm1, %v3812_v63, %v3796_v47  ;;  %11272 = vst [vmem:[#allocation66_spill] sm:$0xff] %v6635_v60  ;;  %v6640_v62 = vld [vmem:[%s6216_s14 + $0x208] sm:$0xff]  ;;  %v1390_v37 = vunpack.c.h.bf16 %v6816_v9  ;;  %v1406_v36 = vunpack.c.h.bf16 %v6819_v38 }
  0x7a   : > { %v3373_v6 = vpack.c.bf16 %v2885_v43, %v2885_v43  ;;  %v3092_v55 = vrot.slane %v3091_v2, 1  ;;  %v3876_v52 = vunpack.c.l.b16 %v3357_v12  ;;  %v3938_v53 = vsel %vm3925_vm2, %v3828_v26, %v3937_v59  ;;  %v6646_v25 = vld [vmem:[%s6216_s14 + $0x248] sm:$0xff] }
  0x7b   : > { %v3939_v21 = vsel %vm3927_vm3, %v3844_v15, %v3938_v53  ;;  %v6649_v43 = vld [vmem:[%s6216_s14 + $0x288] sm:$0xff]  ;;  %v1422_v28 = vunpack.c.h.bf16 %v6826_v11  ;;  %v1502_v33 = vunpack.c.h.bf16 %v6849_v50  ;;  %v1518_v38 = vunpack.c.h.bf16 %v6856_v14 }
  0x7c   : > { %v3892_v8 = vunpack.c.l.b16 %v3373_v6  ;;  %v3093_v3 = vadd.f32 %v3092_v55, %v3091_v2  ;;  %v3940_v57 = vsel %vm3929_vm4, %v3860_v42, %v3939_v21  ;;  %v6655_v12 = vld [vmem:[%s6216_s14 + $0x2c8] sm:$0xff]  ;;  %v1534_v44 = vunpack.c.h.bf16 %v6859_v4 }
  0x7d   : > { %v3941_v63 = vsel %vm3931_vm5, %v3876_v52, %v3940_v57  ;;  %v6658_v26 = vld [vmem:[%s6216_s14 + $0x308] sm:$0xff]  ;;  %v1550_v54 = vunpack.c.h.bf16 %v6866_v49  ;;  %v11300_v35 = vunpack.c.h.bf16 %v6611_v18  ;;  %v11301_v4 = vunpack.c.h.bf16 %v6614_v24 }
  0x7e   : > { %v3389_v42 = vpack.c.bf16 %v3093_v3, %v3093_v3  ;;  %v3942_v59 = vsel %vm3933_vm6, %v3892_v8, %v3941_v63  ;;  %v6665_v55 = vld [vmem:[%s6216_s14 + $0x348] sm:$0x11]  ;;  %v11302_v23 = vunpack.c.h.bf16 %v6632_v41  ;;  %v11303_v16 = vunpack.c.h.bf16 %v6635_v60 }
  0x7f   : > { %11273 = vst [vmem:[#allocation67_spill] sm:$0xff] %v6665_v55  ;;  %v6670_v21 = vld [vmem:[%s6216_s14 + $0x388] sm:$0xff]  ;;  %v1651_v56 = vadd.f32 %v11301_v4, %v11300_v35  ;;  %v11305_v50 = vunpack.c.h.bf16 %v6665_v55 }
  0x80   : > { %11274 = vst [vmem:[#allocation68_spill] sm:$0xff] %v6670_v21  ;;  %v3908_v6 = vunpack.c.l.b16 %v3389_v42  ;;  %v6680_v17 = vld [vmem:[%s6216_s14 + $0x3c8] sm:$0xff]  ;;  %v1656_v49 = vsel %vm1616_vm0, %v11302_v23, 0.0  ;;  %v11306_v14 = vunpack.c.h.bf16 %v6670_v21  ;;  %v11313_v21 = vunpack.c.h.bf16 %v6646_v25 }
  0x81   : > { %11275 = vst [vmem:[#allocation69_spill] sm:$0xff] %v6680_v17  ;;  %v6688_v53 = vld [vmem:[%s6216_s14 + $0x408] sm:$0xff]  ;;  %v11307_v18 = vunpack.c.h.bf16 %v6680_v17 }
  0x82   : > { %v3943_v3 = vsel %vm3935_vm7, %v3908_v6, %v3942_v59  ;;  %v6691_v2 = vld [vmem:[%s6216_s14 + $0x448] sm:$0xff]  ;;  %v1864_v59 = vsel %vm1616_vm0, %v11305_v50, 0.0  ;;  %v11312_v50 = vunpack.c.h.bf16 %v6617_v61 }
  0x83   : > { %v4043_v15 = vpack.c.b16 %v3943_v3, %v3943_v3  ;;  %v6697_v52 = vld [vmem:[%s6216_s14 + $0x488] sm:$0xff] }
  0x84   : > { %v6700_v57 = vld [vmem:[%s6216_s14 + $0x4c8] sm:$0xff]  ;;  %v1652_v55 = vadd.f32 %v1651_v56, %v11312_v50  ;;  %v11319_v56 = vunpack.c.h.bf16 %v6779_v58  ;;  %v11320_v50 = vunpack.c.h.bf16 %v6786_v46 }
  0x85   : > { %v6706_v63 = vld [vmem:[%s6216_s14 + $0x508] sm:$0x11]  ;;  %4874 = vmatprep.mubr.bf16.mxu0 %v4043_v15  ;;  %v1438_v15 = vunpack.c.h.bf16 %v6829_v51  ;;  %v1486_v51 = vunpack.c.h.bf16 %v6846_v10 }
  0x86   : > { %v6709_v8 = vld [vmem:[%s6216_s14 + $0x548] sm:$0xff]  ;;  %v11308_v35 = vunpack.c.h.bf16 %v6706_v63 }
  0x87   : > { %11276 = vst [vmem:[#allocation70_spill] sm:$0xff] %v6709_v8  ;;  %v6716_v45 = vld [vmem:[%s6216_s14 + $0x588] sm:$0xff]  ;;  %v11309_v23 = vunpack.c.h.bf16 %v6709_v8  ;;  %v11316_v8 = vunpack.c.h.bf16 %v6776_v32 }
  0x88   : > { %11277 = vst [vmem:[#allocation71_spill] sm:$0xff] %v6716_v45  ;;  %v6719_v6 = vld [vmem:[%s6216_s14 + $0x5c8] sm:$0xff]  ;;  %v2072_v4 = vsel %vm1616_vm0, %v11308_v35, 0.0  ;;  %v11310_v60 = vunpack.c.h.bf16 %v6716_v45 }
  0x89   : > { %v6726_v22 = vld [vmem:[%s6216_s14 + $0x608] sm:$0xff]  ;;  %v2488_v45 = vsel %vm1616_vm0, %v11316_v8, 0.0 }
  0x8a   : > { %v6729_v1 = vld [vmem:[%s6216_s14 + $0x648] sm:$0xff]  ;;  %v2275_v41 = vadd.f32 %v11310_v60, %v11309_v23  ;;  %v11317_v60 = vunpack.c.h.bf16 %v6688_v53 }
  0x8b   : > { %v6736_v13 = vld [vmem:[%s6216_s14 + $0x688] sm:$0xff] }
  0x8c   : > { %v6746_v42 = vld [vmem:[%s6216_s14 + $0x708] sm:$0xff] }
  0x8d   : > { %11279 = vst [vmem:[#allocation73_spill] sm:$0xff] %v6746_v42  ;;  %v6756_v3 = vld [vmem:[%s6216_s14 + $0x788] sm:$0xff] }
  0x8e   : > { %v6869_v9 = vld [vmem:[%s6216_s14 + $0xd48] sm:$0xff]  ;;  %v11323_v8 = vunpack.c.h.bf16 %v6756_v3 }
  0x8f   : > { %11298 = vst [vmem:[#allocation92_spill] sm:$0xff] %v6869_v9  ;;  %v6879_v47 = vld [vmem:[%s6216_s14 + $0xdc8] sm:$0x11]  ;;  %v1566_v10 = vunpack.c.h.bf16 %v6869_v9  ;;  %v11304_v9 = vunpack.c.h.bf16 %v6640_v62 }
  0x90   : > { %11299 = vst [vmem:[#allocation93_spill] sm:$0xff] %v6879_v47  ;;  %v2067_v47 = vadd.f32 %v11307_v18, %v11306_v14  ;;  %v11314_v14 = vunpack.c.h.bf16 %v6746_v42  ;;  %v11315_v18 = vunpack.c.h.bf16 %v6749_v30  ;;  %v11321_v30 = vunpack.c.h.bf16 %v6620_v20 }
  0x91   : > { %v1859_v11 = vadd.f32 %v11304_v9, %v11303_v16  ;;  %v11311_v9 = vunpack.c.h.bf16 %v6739_v48 }
  0x92   : > { %v2483_v35 = vadd.f32 %v11315_v18, %v11314_v14  ;;  %v2068_v23 = vadd.f32 %v2067_v47, %v11317_v60  ;;  %v1653_v14 = vadd.f32 %v1652_v55, %v11321_v30  ;;  %v11322_v18 = vunpack.c.h.bf16 %v6649_v43 }
  0x93   : > { %v2280_v16 = vsel %vm1616_vm0, %v11311_v9, 0.0  ;;  %v1860_v17 = vadd.f32 %v1859_v11, %v11313_v21  ;;  %v11318_v9 = vunpack.c.h.bf16 %v6719_v6  ;;  %v2691_v11 = vadd.f32 %v11320_v50, %v11319_v56 }
  0x94   : > { %v2696_v21 = vsel %vm1616_vm0, %v1374_v5, 0.0  ;;  %v2484_v42 = vadd.f32 %v2483_v35, %v11323_v8  ;;  %v2899_v47 = vadd.f32 %v1406_v36, %v1390_v37  ;;  %v11324_v60 = vunpack.c.h.bf16 %v6691_v2 }
  0x95   : > { %v2276_v48 = vadd.f32 %v2275_v41, %v11318_v9  ;;  %v1861_v32 = vadd.f32 %v1860_v17, %v11322_v18  ;;  %v11325_v9 = vunpack.c.h.bf16 %v6726_v22  ;;  %v11326_v56 = vunpack.c.h.bf16 %v6789_v29 }
  0x96   : > { %v2069_v41 = vadd.f32 %v2068_v23, %v11324_v60  ;;  %v2904_v5 = vsel %vm1616_vm0, %v1486_v51, 0.0  ;;  %v11327_v30 = vunpack.c.h.bf16 %v6623_v39  ;;  %v11328_v17 = vunpack.c.h.bf16 %v6655_v12 }
  0x97   : > { %v2277_v58 = vadd.f32 %v2276_v48, %v11325_v9  ;;  %v2692_v50 = vadd.f32 %v2691_v11, %v11326_v56  ;;  %v11329_v35 = vunpack.c.h.bf16 %v6759_v7  ;;  %v2900_v37 = vadd.f32 %v2899_v47, %v1422_v28 }
  0x98   : > { %v1654_v55 = vadd.f32 %v1653_v14, %v11327_v30  ;;  %v1862_v18 = vadd.f32 %v1861_v32, %v11328_v17  ;;  %v11330_v23 = vunpack.c.h.bf16 %v6697_v52  ;;  %v11331_v48 = vunpack.c.h.bf16 %v6729_v1 }
  0x99   : > { %v2485_v36 = vadd.f32 %v2484_v42, %v11329_v35  ;;  %v11332_v11 = vunpack.c.h.bf16 %v6796_v40  ;;  %v3107_v51 = vadd.f32 %v1518_v38, %v1502_v33  ;;  %v11333_v56 = vunpack.c.h.bf16 %v6627_v19 }
  0x9a   : > { %v2070_v8 = vadd.f32 %v2069_v41, %v11330_v23  ;;  %v2278_v60 = vadd.f32 %v2277_v58, %v11331_v48  ;;  %v11334_v30 = vunpack.c.h.bf16 %v6658_v26  ;;  %v11335_v17 = vunpack.c.h.bf16 %v6766_v31 }
  0x9b   : > { %v2693_v9 = vadd.f32 %v2692_v50, %v11332_v11  ;;  %v1655_v14 = vadd.f32 %v1654_v55, %v11333_v56  ;;  %v2901_v28 = vadd.f32 %v2900_v37, %v1438_v15  ;;  %v11336_v47 = vunpack.c.h.bf16 %v6700_v57  ;;  %v11342_v37 = vld [vmem:[#allocation79_spill] sm:$0xff] }
  0x9c   : > { %v1863_v32 = vadd.f32 %v1862_v18, %v11334_v30  ;;  %v2486_v42 = vadd.f32 %v2485_v36, %v11335_v17  ;;  %v11337_v35 = vunpack.c.h.bf16 %v6736_v13  ;;  %v11338_v23 = vunpack.c.h.bf16 %v6799_v0  ;;  %v11340_v18 = vld [vmem:[#allocation85_spill] sm:$0xff]  ;;  %v11344_v0 = vld [vmem:[#allocation86_spill] sm:$0xff] }
  0x9d   : > { %v2071_v41 = vadd.f32 %v2070_v8, %v11336_v47  ;;  %v3108_v33 = vadd.f32 %v3107_v51, %v1534_v44  ;;  %v1657_v38 = vadd.f32 %v1656_v49, %v1655_v14  ;;  %v11339_v55 = vunpack.c.h.bf16 %v6769_v27 }
  0x9e   : > { %v2279_v58 = vadd.f32 %v2278_v60, %v11337_v35  ;;  %v2694_v50 = vadd.f32 %v2693_v9, %v11338_v23  ;;  %v1865_v48 = vadd.f32 %v1864_v59, %v1863_v32  ;;  %v11341_v56 = vunpack.c.h.bf16 %v11340_v18 }
  0x9f   : > { %v2487_v11 = vadd.f32 %v2486_v42, %v11339_v55  ;;  %v2073_v36 = vadd.f32 %v2072_v4, %v2071_v41  ;;  %v11343_v17 = vunpack.c.h.bf16 %v11342_v37  ;;  %v3109_v47 = vadd.f32 %v3108_v33, %v1550_v54 }
  0xa0   : > { %v2902_v30 = vadd.f32 %v2901_v28, %v11341_v56  ;;  %v2281_v15 = vadd.f32 %v2280_v16, %v2279_v58  ;;  %v1658_v40 = vrot.slane %v1657_v38, 4  ;;  %v1866_v60 = vrot.slane %v1865_v48, 4 }
  0xa1   : > { %v2695_v8 = vadd.f32 %v2694_v50, %v11343_v17  ;;  %v2489_v35 = vadd.f32 %v2488_v45, %v2487_v11  ;;  %v11345_v9 = vunpack.c.h.bf16 %v11344_v0  ;;  %v2074_v49 = vrot.slane %v2073_v36, 4  ;;  %v11347_v17 = vld [vmem:[#allocation93_spill] sm:$0xff] }
  0xa2   : > { %v2282_v59 = vrot.slane %v2281_v15, 4  ;;  %v3110_v14 = vadd.f32 %v3109_v47, %v1566_v10  ;;  %v1659_v32 = vadd.f32 %v1658_v40, %v1657_v38  ;;  %v1867_v42 = vadd.f32 %v1866_v60, %v1865_v48 }
  0xa3   : > { %v2903_v44 = vadd.f32 %v2902_v30, %v11345_v9  ;;  %v2697_v51 = vadd.f32 %v2696_v21, %v2695_v8  ;;  %v2490_v23 = vrot.slane %v2489_v35, 4  ;;  %v2075_v4 = vadd.f32 %v2074_v49, %v2073_v36 }
  0xa4   : > { %v2283_v16 = vadd.f32 %v2282_v59, %v2281_v15  ;;  %v11346_v58 = vunpack.c.h.bf16 %v6876_v34  ;;  %v1660_v50 = vrot.slane %v1659_v32, 2  ;;  %v1868_v33 = vrot.slane %v1867_v42, 2 }
  0xa5   : > { %v2905_v28 = vadd.f32 %v2904_v5, %v2903_v44  ;;  %v2698_v41 = vrot.slane %v2697_v51, 4  ;;  %v2491_v45 = vadd.f32 %v2490_v23, %v2489_v35  ;;  %v2076_v11 = vrot.slane %v2075_v4, 2 }
  0xa6   : > { %v3111_v54 = vadd.f32 %v3110_v14, %v11346_v58  ;;  %v2284_v56 = vrot.slane %v2283_v16, 2  ;;  %v11348_v21 = vunpack.c.h.bf16 %v11347_v17  ;;  %v1661_v10 = vadd.f32 %v1660_v50, %v1659_v32 }
  0xa7   : > { %v2906_v55 = vrot.slane %v2905_v28, 4  ;;  %v2699_v30 = vadd.f32 %v2698_v41, %v2697_v51  ;;  %v1869_v38 = vadd.f32 %v1868_v33, %v1867_v42  ;;  %v2492_v5 = vrot.slane %v2491_v45, 2 }
  0xa8   : > { %v3112_v40 = vsel %vm1616_vm0, %v11348_v21, 0.0  ;;  %v2077_v36 = vadd.f32 %v2076_v11, %v2075_v4  ;;  %v2285_v15 = vadd.f32 %v2284_v56, %v2283_v16  ;;  %v1662_v60 = vrot.slane %v1661_v10, 1 }
  0xa9   : > { %v2907_v48 = vadd.f32 %v2906_v55, %v2905_v28  ;;  %v2700_v8 = vrot.slane %v2699_v30, 2  ;;  %v3113_v47 = vadd.f32 %v3112_v40, %v3111_v54  ;;  %v1870_v9 = vrot.slane %v1869_v38, 1 }
  0xaa   : > { %v2493_v44 = vadd.f32 %v2492_v5, %v2491_v45  ;;  %v2078_v49 = vrot.slane %v2077_v36, 1  ;;  %v2286_v59 = vrot.slane %v2285_v15, 1  ;;  %v1663_v23 = vadd.f32 %v1662_v60, %v1661_v10 }
  0xab   : > { %v2908_v35 = vrot.slane %v2907_v48, 2  ;;  %v2701_v14 = vadd.f32 %v2700_v8, %v2699_v30  ;;  %v3114_v51 = vrot.slane %v3113_v47, 4  ;;  %v1871_v41 = vadd.f32 %v1870_v9, %v1869_v38  ;;  %v11349_v9 = vld [vmem:[#allocation8_spill] sm:$0xff] }
  0xac   : > { %v2494_v58 = vrot.slane %v2493_v44, 1  ;;  %v2079_v32 = vadd.f32 %v2078_v49, %v2077_v36  ;;  %v2287_v42 = vadd.f32 %v2286_v59, %v2285_v15  ;;  %v3279_v33 = vpack.c.bf16 %v1663_v23, %v1663_v23 }
  0xad   : > { %v2909_v21 = vadd.f32 %v2908_v35, %v2907_v48  ;;  %v2702_v50 = vrot.slane %v2701_v14, 1  ;;  %v3115_v28 = vadd.f32 %v3114_v51, %v3113_v47  ;;  %v3295_v54 = vpack.c.bf16 %v1871_v41, %v1871_v41  ;;  %v11351_v35 = vld [vmem:[#allocation9_spill] sm:$0xff]  ;;  %v11353_v41 = vld [vmem:[#allocation14_spill] sm:$0xff] }
  0xae   : > { %v2495_v4 = vadd.f32 %v2494_v58, %v2493_v44  ;;  %v3311_v45 = vpack.c.bf16 %v2079_v32, %v2079_v32  ;;  %v3327_v56 = vpack.c.bf16 %v2287_v42, %v2287_v42  ;;  %v3798_v30 = vunpack.c.l.b16 %v3279_v33 }
  0xaf   : > { %v2910_v16 = vrot.slane %v2909_v21, 1  ;;  %v2703_v55 = vadd.f32 %v2702_v50, %v2701_v14  ;;  %v3116_v11 = vrot.slane %v3115_v28, 2  ;;  %v3814_v8 = vunpack.c.l.b16 %v3295_v54  ;;  %v11355_v50 = vld [vmem:[#allocation10_spill] sm:$0xff]  ;;  %v11359_v54 = vld [vmem:[#allocation16_spill] sm:$0xff] }
  0xb0   : > { %v3343_v5 = vpack.c.bf16 %v2495_v4, %v2495_v4  ;;  %v3830_v60 = vunpack.c.l.b16 %v3311_v45  ;;  %v3846_v48 = vunpack.c.l.b16 %v3327_v56  ;;  %v11350_v44 = vunpack.c.l.bf16 %v11349_v9  ;;  %v11367_v9 = vld [vmem:[#allocation11_spill] sm:$0xff] }
  0xb1   : > { %v2911_v40 = vadd.f32 %v2910_v16, %v2909_v21  ;;  %v3117_v10 = vadd.f32 %v3116_v11, %v3115_v28  ;;  %v3359_v38 = vpack.c.bf16 %v2703_v55, %v2703_v55  ;;  %v3951_v47 = vsel %vm3923_vm1, %v3814_v8, %v3798_v30  ;;  %v11357_v16 = vld [vmem:[#allocation15_spill] sm:$0xff]  ;;  %v11363_v8 = vld [vmem:[#allocation22_spill] sm:$0xff] }
  0xb2   : > { %v3862_v15 = vunpack.c.l.b16 %v3343_v5  ;;  %v11352_v49 = vunpack.c.l.bf16 %v11351_v35  ;;  %v3952_v23 = vsel %vm3925_vm2, %v3830_v60, %v3951_v47  ;;  %v11354_v58 = vunpack.c.l.bf16 %v11353_v41  ;;  %v11365_v60 = vld [vmem:[#allocation23_spill] sm:$0xff] }
  0xb3   : > { %v3375_v36 = vpack.c.bf16 %v2911_v40, %v2911_v40  ;;  %v3118_v14 = vrot.slane %v3117_v10, 1  ;;  %v3878_v51 = vunpack.c.l.b16 %v3359_v38  ;;  %v3953_v42 = vsel %vm3927_vm3, %v3846_v48, %v3952_v23  ;;  %v11361_v40 = vld [vmem:[#allocation21_spill] sm:$0xff] }
  0xb4   : > { %v1611_v59 = vadd.f32 %v11352_v49, %v11350_v44  ;;  %v1617_v21 = vsel %vm1616_vm0, %v11354_v58, 0.0  ;;  %v11356_v28 = vunpack.c.l.bf16 %v11355_v50  ;;  %v11358_v33 = vunpack.c.l.bf16 %v11357_v16  ;;  %v11369_v49 = vld [vmem:[#allocation17_spill] sm:$0xff] }
  0xb5   : > { %v3894_v32 = vunpack.c.l.b16 %v3375_v36  ;;  %v11360_v55 = vunpack.c.l.bf16 %v11359_v54  ;;  %v3119_v45 = vadd.f32 %v3118_v14, %v3117_v10  ;;  %v3954_v56 = vsel %vm3929_vm4, %v3862_v15, %v3953_v42  ;;  %v11371_v10 = vld [vmem:[#allocation28_spill] sm:$0xff]  ;;  %v11375_v16 = vld [vmem:[#allocation29_spill] sm:$0xff]  ;;  %v11377_v54 = vld [vmem:[#allocation30_spill] sm:$0xff] }
  0xb6   : > { %v1612_v4 = vadd.f32 %v1611_v59, %v11356_v28  ;;  %v11362_v5 = vunpack.c.l.bf16 %v11361_v40  ;;  %v11364_v38 = vunpack.c.l.bf16 %v11363_v8  ;;  %v11366_v36 = vunpack.c.l.bf16 %v11365_v60  ;;  %v11373_v42 = vld [vmem:[#allocation24_spill] sm:$0xff] }
  0xb7   : > { %v1820_v11 = vadd.f32 %v11360_v55, %v11358_v33  ;;  %v3955_v47 = vsel %vm3931_vm5, %v3878_v51, %v3954_v56  ;;  %v11368_v44 = vunpack.c.l.bf16 %v11367_v9  ;;  %v11370_v59 = vunpack.c.l.bf16 %v11369_v49  ;;  %v11379_v56 = vld [vmem:[#allocation12_spill] sm:$0xff]  ;;  %v11389_v49 = vld [vmem:[#allocation25_spill] sm:$0xff] }
  0xb8   : > { %v1825_v30 = vsel %vm1616_vm0, %v11362_v5, 0.0  ;;  %v2028_v48 = vadd.f32 %v11366_v36, %v11364_v38  ;;  %v11372_v14 = vunpack.c.l.bf16 %v11371_v10  ;;  %v3391_v41 = vpack.c.bf16 %v3119_v45, %v3119_v45  ;;  %v11381_v5 = vld [vmem:[#allocation18_spill] sm:$0xff]  ;;  %v11383_v38 = vld [vmem:[#allocation35_spill] sm:$0xff]  ;;  %v11385_v36 = vld [vmem:[#allocation36_spill] sm:$0xff] }
  0xb9   : > { %v1613_v35 = vadd.f32 %v1612_v4, %v11368_v44  ;;  %v1821_v23 = vadd.f32 %v1820_v11, %v11370_v59  ;;  %v3956_v58 = vsel %vm3933_vm6, %v3894_v32, %v3955_v47  ;;  %v11374_v50 = vunpack.c.l.bf16 %v11373_v42  ;;  %v11387_v47 = vld [vmem:[#allocation37_spill] sm:$0xff] }
  0xba   : > { %v2033_v15 = vsel %vm1616_vm0, %v11372_v14, 0.0  ;;  %v11376_v33 = vunpack.c.l.bf16 %v11375_v16  ;;  %v11378_v51 = vunpack.c.l.bf16 %v11377_v54  ;;  %v11380_v4 = vunpack.c.l.bf16 %v11379_v56  ;;  %v11391_v14 = vld [vmem:[#allocation31_spill] sm:$0xff] }
  0xbb   : > { %v2029_v28 = vadd.f32 %v2028_v48, %v11374_v50  ;;  %v11382_v11 = vunpack.c.l.bf16 %v11381_v5  ;;  %v11384_v60 = vunpack.c.l.bf16 %v11383_v38  ;;  %v11386_v32 = vunpack.c.l.bf16 %v11385_v36  ;;  %v11397_v56 = vld [vmem:[#allocation19_spill] sm:$0xff] }
  0xbc   : > { %v2236_v55 = vadd.f32 %v11378_v51, %v11376_v33  ;;  %v1614_v40 = vadd.f32 %v1613_v35, %v11380_v4  ;;  %v11388_v9 = vunpack.c.l.bf16 %v11387_v47  ;;  %v3910_v44 = vunpack.c.l.b16 %v3391_v41  ;;  %v11393_v35 = vld [vmem:[#allocation42_spill] sm:$0xff]  ;;  %v11395_v33 = vld [vmem:[#allocation13_spill] sm:$0xff]  ;;  %v11401_v41 = vld [vmem:[#allocation43_spill] sm:$0xff] }
  0xbd   : > { %v1822_v8 = vadd.f32 %v1821_v23, %v11382_v11  ;;  %v2241_v45 = vsel %vm1616_vm0, %v11384_v60, 0.0  ;;  %v11390_v59 = vunpack.c.l.bf16 %v11389_v49  ;;  %v11392_v42 = vunpack.c.l.bf16 %v11391_v14  ;;  %v11399_v11 = vld [vmem:[#allocation38_spill] sm:$0xff]  ;;  %v11407_v14 = vld [vmem:[#allocation32_spill] sm:$0xff] }
  0xbe   : > { %v2444_v48 = vadd.f32 %v11388_v9, %v11386_v32  ;;  %v11394_v16 = vunpack.c.l.bf16 %v11393_v35  ;;  %v11396_v54 = vunpack.c.l.bf16 %v11395_v33  ;;  %v11398_v4 = vunpack.c.l.bf16 %v11397_v56  ;;  %v11403_v32 = vld [vmem:[#allocation44_spill] sm:$0xff]  ;;  %v11405_v9 = vld [vmem:[#allocation26_spill] sm:$0xff] }
  0xbf   : > { %v2030_v10 = vadd.f32 %v2029_v28, %v11390_v59  ;;  %v2237_v50 = vadd.f32 %v2236_v55, %v11392_v42  ;;  %v11400_v38 = vunpack.c.l.bf16 %v11399_v11  ;;  %v11402_v36 = vunpack.c.l.bf16 %v11401_v41  ;;  %v11413_v11 = vld [vmem:[#allocation39_spill] sm:$0xff] }
  0xc0   : > { %v2449_v23 = vsel %vm1616_vm0, %v11394_v16, 0.0  ;;  %v1615_v51 = vadd.f32 %v1614_v40, %v11396_v54  ;;  %v1823_v5 = vadd.f32 %v1822_v8, %v11398_v4  ;;  %v11404_v28 = vunpack.c.l.bf16 %v11403_v32  ;;  %v11409_v40 = vld [vmem:[#allocation49_spill] sm:$0xff] }
  0xc1   : > { %v2445_v60 = vadd.f32 %v2444_v48, %v11400_v38  ;;  %v3957_v55 = vsel %vm3935_vm7, %v3910_v44, %v3956_v58  ;;  %v11406_v49 = vunpack.c.l.bf16 %v11405_v9  ;;  %v11408_v42 = vunpack.c.l.bf16 %v11407_v14  ;;  %v11411_v48 = vld [vmem:[#allocation20_spill] sm:$0xff]  ;;  %v11417_v32 = vld [vmem:[#allocation33_spill] sm:$0xff]  ;;  %v11421_v14 = vld [vmem:[#allocation50_spill] sm:$0xff] }
  0xc2   : > { %v2652_v47 = vadd.f32 %v11404_v28, %v11402_v36  ;;  %v11410_v16 = vunpack.c.l.bf16 %v11409_v40  ;;  %v4045_v33 = vpack.c.b16 %v3957_v55, %v3957_v55  ;;  %v1618_v54 = vadd.f32 %v1617_v21, %v1615_v51  ;;  %v11415_v36 = vld [vmem:[#allocation27_spill] sm:$0xff]  ;;  %v11419_v9 = vld [vmem:[#allocation45_spill] sm:$0xff] }
  0xc3   : > { %v2031_v59 = vadd.f32 %v2030_v10, %v11406_v49  ;;  %v2238_v35 = vadd.f32 %v2237_v50, %v11408_v42  ;;  %v11412_v56 = vunpack.c.l.bf16 %v11411_v48  ;;  %v11414_v38 = vunpack.c.l.bf16 %v11413_v11  ;;  %v11423_v40 = vld [vmem:[#allocation51_spill] sm:$0xff] }
  0xc4   : > { %v2657_v8 = vsel %vm1616_vm0, %v11410_v16, 0.0  ;;  %v11416_v58 = vunpack.c.l.bf16 %v11415_v36  ;;  %v11418_v10 = vunpack.c.l.bf16 %v11417_v32  ;;  %v11420_v50 = vunpack.c.l.bf16 %v11419_v9  ;;  %4914 = vmatprep.mubr.bf16.mxu1 %v4045_v33  ;;  %v11425_v16 = vld [vmem:[#allocation40_spill] sm:$0xff] }
  0xc5   : > { %v1824_v4 = vadd.f32 %v1823_v5, %v11412_v56  ;;  %v2446_v41 = vadd.f32 %v2445_v60, %v11414_v38  ;;  %v11422_v42 = vunpack.c.l.bf16 %v11421_v14  ;;  %v11424_v55 = vunpack.c.l.bf16 %v11423_v40  ;;  %v11427_v56 = vld [vmem:[#allocation56_spill] sm:$0xff] }
  0xc6   : > { %v2032_v44 = vadd.f32 %v2031_v59, %v11416_v58  ;;  %v2239_v28 = vadd.f32 %v2238_v35, %v11418_v10  ;;  %v2653_v49 = vadd.f32 %v2652_v47, %v11420_v50  ;;  %v1619_v51 = vrot.slane %v1618_v54, 4  ;;  %v11429_v35 = vld [vmem:[#allocation34_spill] sm:$0xff]  ;;  %v11433_v9 = vld [vmem:[#allocation52_spill] sm:$0xff] }
  0xc7   : > { %v2860_v21 = vadd.f32 %v11424_v55, %v11422_v42  ;;  %v1826_v5 = vadd.f32 %v1825_v30, %v1824_v4  ;;  %v11426_v48 = vunpack.c.l.bf16 %v11425_v16  ;;  %v11428_v11 = vunpack.c.l.bf16 %v11427_v56  ;;  %v11431_v47 = vld [vmem:[#allocation46_spill] sm:$0xff]  ;;  %v11435_v30 = vld [vmem:[#allocation41_spill] sm:$0xff] }
  0xc8   : > { %v2034_v38 = vadd.f32 %v2033_v15, %v2032_v44  ;;  %v11430_v36 = vunpack.c.l.bf16 %v11429_v35  ;;  %v11432_v32 = vunpack.c.l.bf16 %v11431_v47  ;;  %v11434_v50 = vunpack.c.l.bf16 %v11433_v9  ;;  %v11439_v16 = vld [vmem:[#allocation58_spill] sm:$0xff] }
  0xc9   : > { %v2447_v60 = vadd.f32 %v2446_v41, %v11426_v48  ;;  %v2865_v59 = vsel %vm1616_vm0, %v11428_v11, 0.0  ;;  %v1620_v33 = vadd.f32 %v1619_v51, %v1618_v54  ;;  %v1827_v42 = vrot.slane %v1826_v5, 4  ;;  %v11437_v41 = vld [vmem:[#allocation57_spill] sm:$0xff]  ;;  %v11441_v11 = vld [vmem:[#allocation47_spill] sm:$0xff] }
  0xca   : > { %v2240_v58 = vadd.f32 %v2239_v28, %v11430_v36  ;;  %v2654_v10 = vadd.f32 %v2653_v49, %v11432_v32  ;;  %v2861_v14 = vadd.f32 %v2860_v21, %v11434_v50  ;;  %v11436_v4 = vunpack.c.l.bf16 %v11435_v30  ;;  %v11443_v36 = vld [vmem:[#allocation53_spill] sm:$0xff]  ;;  %v11445_v51 = vld [vmem:[#allocation59_spill] sm:$0xff] }
  0xcb   : > { %v11438_v55 = vunpack.c.l.bf16 %v11437_v41  ;;  %v11440_v48 = vunpack.c.l.bf16 %v11439_v16  ;;  %v2035_v15 = vrot.slane %v2034_v38, 4  ;;  %v11442_v28 = vunpack.c.l.bf16 %v11441_v11 }
  0xcc   : > { %v2448_v40 = vadd.f32 %v2447_v60, %v11436_v4  ;;  %v2242_v44 = vadd.f32 %v2241_v45, %v2240_v58  ;;  %v11444_v49 = vunpack.c.l.bf16 %v11443_v36  ;;  %v1621_v32 = vrot.slane %v1620_v33, 2  ;;  %v11447_v4 = vld [vmem:[#allocation48_spill] sm:$0xff] }
  0xcd   : > { %v3068_v56 = vadd.f32 %v11440_v48, %v11438_v55  ;;  %v2655_v35 = vadd.f32 %v2654_v10, %v11442_v28  ;;  %v1828_v21 = vadd.f32 %v1827_v42, %v1826_v5  ;;  %v11446_v9 = vunpack.c.l.bf16 %v11445_v51  ;;  %v11449_v55 = vld [vmem:[#allocation54_spill] sm:$0xff]  ;;  %v11451_v28 = vld [vmem:[#allocation60_spill] sm:$0xff]  ;;  %v11453_v42 = vld [vmem:[#allocation55_spill] sm:$0xff] }
  0xce   : > { %v2862_v47 = vadd.f32 %v2861_v14, %v11444_v49  ;;  %v2450_v54 = vadd.f32 %v2449_v23, %v2448_v40  ;;  %v2036_v60 = vadd.f32 %v2035_v15, %v2034_v38  ;;  %v2243_v30 = vrot.slane %v2242_v44, 4 }
  0xcf   : > { %v3069_v50 = vadd.f32 %v3068_v56, %v11446_v9  ;;  %v11448_v41 = vunpack.c.l.bf16 %v11447_v4  ;;  %v11450_v48 = vunpack.c.l.bf16 %v11449_v55  ;;  %v1622_v58 = vadd.f32 %v1621_v32, %v1620_v33  ;;  %v11455_v9 = vld [vmem:[#allocation61_spill] sm:$0xff] }
  0xd0   : > { %v1829_v11 = vrot.slane %v1828_v21, 2  ;;  %v2451_v10 = vrot.slane %v2450_v54, 4  ;;  %v11452_v36 = vunpack.c.l.bf16 %v11451_v28  ;;  %v2037_v49 = vrot.slane %v2036_v60, 2 }
  0xd1   : > { %v2656_v16 = vadd.f32 %v2655_v35, %v11448_v41  ;;  %v2863_v45 = vadd.f32 %v2862_v47, %v11450_v48  ;;  %v2244_v5 = vadd.f32 %v2243_v30, %v2242_v44  ;;  %v11454_v40 = vunpack.c.l.bf16 %v11453_v42 }
  0xd2   : > { %v3070_v14 = vadd.f32 %v3069_v50, %v11452_v36  ;;  %v1623_v38 = vrot.slane %v1622_v58, 1  ;;  %v1830_v15 = vadd.f32 %v1829_v11, %v1828_v21  ;;  %v2452_v51 = vadd.f32 %v2451_v10, %v2450_v54  ;;  %v11457_v50 = vld [vmem:[#allocation62_spill] sm:$0xff]  ;;  %v11459_v54 = vld [vmem:[#allocation63_spill] sm:$0xff] }
  0xd3   : > { %v2658_v23 = vadd.f32 %v2657_v8, %v2656_v16  ;;  %v2864_v56 = vadd.f32 %v2863_v45, %v11454_v40  ;;  %v11456_v35 = vunpack.c.l.bf16 %v11455_v9  ;;  %v2038_v41 = vadd.f32 %v2037_v49, %v2036_v60 }
  0xd4   : > { %v2245_v47 = vrot.slane %v2244_v5, 2  ;;  %v1624_v55 = vadd.f32 %v1623_v38, %v1622_v58  ;;  %v1831_v48 = vrot.slane %v1830_v15, 1  ;;  %v2453_v28 = vrot.slane %v2452_v51, 2 }
  0xd5   : > { %v3071_v4 = vadd.f32 %v3070_v14, %v11456_v35  ;;  %v2659_v33 = vrot.slane %v2658_v23, 4  ;;  %v2866_v32 = vadd.f32 %v2865_v59, %v2864_v56  ;;  %v11458_v36 = vunpack.c.l.bf16 %v11457_v50 }
  0xd6   : > { %v2039_v8 = vrot.slane %v2038_v41, 1  ;;  %v2246_v30 = vadd.f32 %v2245_v47, %v2244_v5  ;;  %v1832_v42 = vadd.f32 %v1831_v48, %v1830_v15  ;;  %v2454_v21 = vadd.f32 %v2453_v28, %v2452_v51 }
  0xd7   : > { %v3072_v44 = vadd.f32 %v3071_v4, %v11458_v36  ;;  %v2660_v16 = vadd.f32 %v2659_v33, %v2658_v23  ;;  %v2867_v45 = vrot.slane %v2866_v32, 4  ;;  %v11460_v11 = vunpack.c.l.bf16 %v11459_v54  ;;  %v11461_v33 = vld [vmem:[#allocation64_spill] sm:$0xff] }
  0xd8   : > { %v3276_v60 = vpack.c.bf16 %v1624_v55, %v1624_v55  ;;  %v2040_v14 = vadd.f32 %v2039_v8, %v2038_v41  ;;  %v2247_v49 = vrot.slane %v2246_v30, 1  ;;  %v2455_v40 = vrot.slane %v2454_v21, 1 }
  0xd9   : > { %v3073_v10 = vsel %vm1616_vm0, %v11460_v11, 0.0  ;;  %v2661_v59 = vrot.slane %v2660_v16, 2  ;;  %v2868_v58 = vadd.f32 %v2867_v45, %v2866_v32  ;;  %v3292_v38 = vpack.c.bf16 %v1832_v42, %v1832_v42 }
  0xda   : > { %v3074_v56 = vadd.f32 %v3073_v10, %v3072_v44  ;;  %v3795_v9 = vunpack.c.l.b16 %v3276_v60  ;;  %v2248_v35 = vadd.f32 %v2247_v49, %v2246_v30  ;;  %v3308_v23 = vpack.c.bf16 %v2040_v14, %v2040_v14  ;;  %v11466_v49 = vld [vmem:[#allocation65_spill] sm:$0xff] }
  0xdb   : > { %v2662_v4 = vadd.f32 %v2661_v59, %v2660_v16  ;;  %v2869_v5 = vrot.slane %v2868_v58, 2  ;;  %v2456_v47 = vadd.f32 %v2455_v40, %v2454_v21  ;;  %v3811_v51 = vunpack.c.l.b16 %v3292_v38 }
  0xdc   : > { %v3075_v15 = vrot.slane %v3074_v56, 4  ;;  %v11462_v48 = vunpack.c.l.bf16 %v11461_v33  ;;  %v11463_v28 = vunpack.c.l.bf16 %v6614_v24  ;;  %v3324_v36 = vpack.c.bf16 %v2248_v35, %v2248_v35 }
  0xdd   : > { %v2663_v41 = vrot.slane %v2662_v4, 1  ;;  %v2870_v50 = vadd.f32 %v2869_v5, %v2868_v58  ;;  %v3827_v32 = vunpack.c.l.b16 %v3308_v23  ;;  %v3340_v44 = vpack.c.bf16 %v2456_v47, %v2456_v47 }
  0xde   : > { %v1638_v55 = vadd.f32 %v11463_v28, %v11462_v48  ;;  %v3076_v8 = vadd.f32 %v3075_v15, %v3074_v56  ;;  %v3924_v45 = vsel %vm3923_vm1, %v3811_v51, %v3795_v9  ;;  %v11464_v30 = vunpack.c.l.bf16 %v6617_v61  ;;  %v11468_v61 = vld [vmem:[#allocation66_spill] sm:$0xff]  ;;  %v11472_v15 = vld [vmem:[#allocation67_spill] sm:$0xff] }
  0xdf   : > { %v2664_v42 = vadd.f32 %v2663_v41, %v2662_v4  ;;  %v2871_v21 = vrot.slane %v2870_v50, 1  ;;  %v3843_v54 = vunpack.c.l.b16 %v3324_v36  ;;  %v3926_v11 = vsel %vm3925_vm2, %v3827_v32, %v3924_v45  ;;  %v11477_v32 = vld [vmem:[#allocation69_spill] sm:$0xff] }
  0xe0   : > { %v1639_v16 = vadd.f32 %v1638_v55, %v11464_v30  ;;  %v3077_v10 = vrot.slane %v3076_v8, 2  ;;  %v3859_v60 = vunpack.c.l.b16 %v3340_v44  ;;  %v11465_v24 = vunpack.c.l.bf16 %v6620_v20 }
  0xe1   : > { %v11467_v59 = vunpack.c.l.bf16 %v11466_v49  ;;  %v2872_v40 = vadd.f32 %v2871_v21, %v2870_v50  ;;  %v3356_v56 = vpack.c.bf16 %v2664_v42, %v2664_v42  ;;  %v3928_v38 = vsel %vm3927_vm3, %v3843_v54, %v3926_v11  ;;  %v11475_v50 = vld [vmem:[#allocation68_spill] sm:$0xff]  ;;  %v11481_v42 = vld [vmem:[#allocation70_spill] sm:$0xff]  ;;  %v11483_v54 = vld [vmem:[#allocation71_spill] sm:$0xff] }
  0xe2   : > { %v1640_v14 = vadd.f32 %v1639_v16, %v11465_v24  ;;  %v11469_v9 = vunpack.c.l.bf16 %v11468_v61  ;;  %v11470_v35 = vunpack.c.l.bf16 %v6640_v62  ;;  %v3078_v5 = vadd.f32 %v3077_v10, %v3076_v8 }
  0xe3   : > { %v1643_v58 = vsel %vm1616_vm0, %v11467_v59, 0.0  ;;  %v3930_v23 = vsel %vm3929_vm4, %v3859_v60, %v3928_v38  ;;  %v11471_v47 = vunpack.c.l.bf16 %v6623_v39  ;;  %v11473_v51 = vunpack.c.l.bf16 %v11472_v15  ;;  %v11488_v38 = vld [vmem:[#allocation72_spill] sm:$0xff]  ;;  %v11494_v15 = vld [vmem:[#allocation74_spill] sm:$0xff] }
  0xe4   : > { %v1846_v4 = vadd.f32 %v11470_v35, %v11469_v9  ;;  %v3372_v48 = vpack.c.bf16 %v2872_v40, %v2872_v40  ;;  %v3875_v28 = vunpack.c.l.b16 %v3356_v56  ;;  %v11474_v55 = vunpack.c.l.bf16 %v6646_v25 }
  0xe5   : > { %v1641_v20 = vadd.f32 %v1640_v14, %v11471_v47  ;;  %v1851_v33 = vsel %vm1616_vm0, %v11473_v51, 0.0  ;;  %v11476_v36 = vunpack.c.l.bf16 %v11475_v50  ;;  %v11478_v62 = vunpack.c.l.bf16 %v11477_v32 }
  0xe6   : > { %v1847_v41 = vadd.f32 %v1846_v4, %v11474_v55  ;;  %v3079_v8 = vrot.slane %v3078_v5, 1  ;;  %v11479_v45 = vunpack.c.l.bf16 %v6627_v19  ;;  %v11480_v39 = vunpack.c.l.bf16 %v6706_v63  ;;  %v11497_v55 = vld [vmem:[#allocation75_spill] sm:$0xff] }
  0xe7   : > { %v2054_v44 = vadd.f32 %v11478_v62, %v11476_v36  ;;  %v11482_v21 = vunpack.c.l.bf16 %v11481_v42  ;;  %v11484_v11 = vunpack.c.l.bf16 %v11483_v54  ;;  %v3891_v25 = vunpack.c.l.b16 %v3372_v48 }
  0xe8   : > { %v1642_v30 = vadd.f32 %v1641_v20, %v11479_v45  ;;  %v2059_v16 = vsel %vm1616_vm0, %v11480_v39, 0.0  ;;  %v3932_v60 = vsel %vm3931_vm5, %v3875_v28, %v3930_v23  ;;  %v11485_v24 = vunpack.c.l.bf16 %v6649_v43  ;;  %v11492_v20 = vld [vmem:[#allocation73_spill] sm:$0xff] }
  0xe9   : > { %v2262_v10 = vadd.f32 %v11484_v11, %v11482_v21  ;;  %v11486_v49 = vunpack.c.l.bf16 %v6688_v53  ;;  %v3080_v19 = vadd.f32 %v3079_v8, %v3078_v5  ;;  %v11487_v63 = vunpack.c.l.bf16 %v6719_v6  ;;  %v11502_v8 = vld [vmem:[#allocation76_spill] sm:$0xff] }
  0xea   : > { %v1848_v14 = vadd.f32 %v1847_v41, %v11485_v24  ;;  %v1644_v40 = vadd.f32 %v1643_v58, %v1642_v30  ;;  %v11489_v61 = vunpack.c.l.bf16 %v11488_v38  ;;  %v3934_v35 = vsel %vm3933_vm6, %v3891_v25, %v3932_v60  ;;  %v11506_v11 = vld [vmem:[#allocation80_spill] sm:$0xff] }
  0xeb   : > { %v2055_v59 = vadd.f32 %v2054_v44, %v11486_v49  ;;  %v2263_v56 = vadd.f32 %v2262_v10, %v11487_v63  ;;  %v11490_v4 = vunpack.c.l.bf16 %v6655_v12  ;;  %v11491_v43 = vunpack.c.l.bf16 %v6691_v2 }
  0xec   : > { %v2267_v9 = vsel %vm1616_vm0, %v11489_v61, 0.0  ;;  %v11493_v53 = vunpack.c.l.bf16 %v11492_v20  ;;  %v11495_v5 = vunpack.c.l.bf16 %v11494_v15  ;;  %v3388_v51 = vpack.c.bf16 %v3080_v19, %v3080_v19  ;;  %v11519_v15 = vld [vmem:[#allocation83_spill] sm:$0xff] }
  0xed   : > { %v1849_v23 = vadd.f32 %v1848_v14, %v11490_v4  ;;  %v2056_v47 = vadd.f32 %v2055_v59, %v11491_v43  ;;  %v1645_v6 = vrot.slane %v1644_v40, 4  ;;  %v11496_v48 = vunpack.c.l.bf16 %v6726_v22 }
  0xee   : > { %v2470_v58 = vadd.f32 %v11495_v5, %v11493_v53  ;;  %v11498_v41 = vunpack.c.l.bf16 %v11497_v55  ;;  %v11499_v12 = vunpack.c.l.bf16 %v6658_v26  ;;  %v11500_v2 = vunpack.c.l.bf16 %v6697_v52 }
  0xef   : > { %v2264_v28 = vadd.f32 %v2263_v56, %v11496_v48  ;;  %v11501_v62 = vunpack.c.l.bf16 %v6756_v3  ;;  %v11503_v45 = vunpack.c.l.bf16 %v11502_v8  ;;  %v11504_v30 = vunpack.c.l.bf16 %v6786_v46  ;;  %v11514_v56 = vld [vmem:[#allocation82_spill] sm:$0xff] }
  0xf0   : > { %v2475_v50 = vsel %vm1616_vm0, %v11498_v41, 0.0  ;;  %v1850_v36 = vadd.f32 %v1849_v23, %v11499_v12  ;;  %v2057_v32 = vadd.f32 %v2056_v47, %v11500_v2  ;;  %v3907_v22 = vunpack.c.l.b16 %v3388_v51  ;;  %v11517_v47 = vld [vmem:[#allocation77_spill] sm:$0xff] }
  0xf1   : > { %v2471_v44 = vadd.f32 %v2470_v58, %v11501_v62  ;;  %v2678_v39 = vadd.f32 %v11504_v30, %v11503_v45  ;;  %v1646_v42 = vadd.f32 %v1645_v6, %v1644_v40  ;;  %v11505_v21 = vunpack.c.l.bf16 %v6729_v1  ;;  %v11512_v40 = vld [vmem:[#allocation81_spill] sm:$0xff]  ;;  %v11526_v62 = vld [vmem:[#allocation84_spill] sm:$0xff] }
  0xf2   : > { %v11507_v10 = vunpack.c.l.bf16 %v11506_v11  ;;  %v1852_v25 = vadd.f32 %v1851_v33, %v1850_v36  ;;  %v11508_v52 = vunpack.c.l.bf16 %v6700_v57  ;;  %v11509_v3 = vunpack.c.l.bf16 %v6759_v7  ;;  %v5837_v57 = vld [vmem:[%s10777_s1 + $0x100] sm:$0xff]   ;;  %v5841_v51 = vld [vmem:[%s10777_s1 + $0x108] sm:$0xff]   ;;  %v11524_v36 = vld [vmem:[#allocation78_spill] sm:$0xff] }
  0xf3   : > { %v2265_v54 = vadd.f32 %v2264_v28, %v11505_v21  ;;  %v11510_v14 = vunpack.c.l.bf16 %v6789_v29  ;;  %v3936_v49 = vsel %vm3935_vm7, %v3907_v22, %v3934_v35  ;;  %v1647_v59 = vrot.slane %v1646_v42, 2  ;;  %v11522_v28 = vld [vmem:[#allocation87_spill] sm:$0xff]  ;;  %v11528_v22 = vld [vmem:[#allocation88_spill] sm:$0xff]  ;;  %v5843_v11 = vld [vmem:[%s10777_s1 + $0x150] sm:$0xff]  }
  0xf4   : > { %v2683_v26 = vsel %vm1616_vm0, %v11507_v10, 0.0  ;;  %v2058_v60 = vadd.f32 %v2057_v32, %v11508_v52  ;;  %v2472_v24 = vadd.f32 %v2471_v44, %v11509_v3  ;;  %v11511_v1 = vunpack.c.l.bf16 %v6736_v13  ;;  %v5839_v13 = vld [vmem:[%s10777_s1 + $0x148] sm:$0xff]  }
  0xf5   : > { %v2679_v46 = vadd.f32 %v2678_v39, %v11510_v14  ;;  %v11513_v63 = vunpack.c.l.bf16 %v11512_v40  ;;  %v11515_v38 = vunpack.c.l.bf16 %v11514_v56  ;;  %v4042_v7 = vpack.c.b16 %v3936_v49, %v3936_v49 }
  0xf6   : > { %v2266_v19 = vadd.f32 %v2265_v54, %v11511_v1  ;;  %v1853_v61 = vrot.slane %v1852_v25, 4  ;;  %v2060_v4 = vadd.f32 %v2059_v16, %v2058_v60  ;;  %v11516_v29 = vunpack.c.l.bf16 %v6766_v31 }
  0xf7   : > { %v2886_v33 = vadd.f32 %v11515_v38, %v11513_v63  ;;  %v1648_v35 = vadd.f32 %v1647_v59, %v1646_v42  ;;  %v11518_v20 = vunpack.c.l.bf16 %v11517_v47  ;;  %v11520_v5 = vunpack.c.l.bf16 %v11519_v15  ;;  %4875 = vmatmul.mubr.bf16.vlgmr.msra.gmra.mrb[0].mxu0 %v4042_v7  ;;  %v11534_v59 = vld [vmem:[#allocation90_spill] sm:$0xff]  ;;  %v11541_v15 = vld [vmem:[#allocation92_spill] sm:$0xff] }
  0xf8   : > { %v2473_v23 = vadd.f32 %v2472_v24, %v11516_v29  ;;  %v2268_v43 = vadd.f32 %v2267_v9, %v2266_v19  ;;  %v1854_v16 = vadd.f32 %v1853_v61, %v1852_v25  ;;  %v2061_v31 = vrot.slane %v2060_v4, 4  ;;  %5596 = vmatpush3.bf16.msra.mxu0 %v5837_v57  ;;  %v11538_v61 = vld [vmem:[#allocation91_spill] sm:$0xff] }
  0xf9   : > { %v2680_v53 = vadd.f32 %v2679_v46, %v11518_v20  ;;  %v2887_v58 = vadd.f32 %v2886_v33, %v11520_v5  ;;  %v11521_v6 = vunpack.c.l.bf16 %v6769_v27  ;;  %v11523_v55 = vunpack.c.l.bf16 %v11522_v28  ;;  %v11530_v27 = vld [vmem:[#allocation89_spill] sm:$0xff]  ;;  %5597 = vmatprep.subr.bf16.mxu0 %v5839_v13 }
  0xfa   : > { %v1649_v41 = vrot.slane %v1648_v35, 1  ;;  %v2269_v12 = vrot.slane %v2268_v43, 4  ;;  %v11525_v2 = vunpack.c.l.bf16 %v11524_v36  ;;  %v11527_v44 = vunpack.c.l.bf16 %v11526_v62  ;;  %v7564_v62 = vld [vmem:[%s6216_s14 + $0xc90] sm:$0xff] }
  0xfb   : > { %v2474_v48 = vadd.f32 %v2473_v23, %v11521_v6  ;;  %v2891_v9 = vsel %vm1616_vm0, %v11523_v55, 0.0  ;;  %v1855_v45 = vrot.slane %v1854_v16, 2  ;;  %v2062_v30 = vadd.f32 %v2061_v31, %v2060_v4  ;;  %v5847_v23 = vld [vmem:[%s10777_s1 + $0x158] sm:$0xff]   ;;  %11593 = vst [vmem:[#allocation47_spill] sm:$0xff] %v7564_v62 }
  0xfc   : > { %v2681_v32 = vadd.f32 %v2680_v53, %v11525_v2  ;;  %v2888_v8 = vadd.f32 %v2887_v58, %v11527_v44  ;;  %v11529_v42 = vunpack.c.l.bf16 %v11528_v22  ;;  %v11531_v21 = vunpack.c.l.bf16 %v11530_v27  ;;  %5598 = vmatpush3.bf16.msra.mxu0 %v5841_v51  ;;  %v5851_v51 = vld [vmem:[%s10777_s1 + $0x160] sm:$0xff]  }
  0xfd   : > { %v2476_v39 = vadd.f32 %v2475_v50, %v2474_v48  ;;  %v1650_v10 = vadd.f32 %v1649_v41, %v1648_v35  ;;  %v2270_v25 = vadd.f32 %v2269_v12, %v2268_v43  ;;  %v11532_v52 = vunpack.c.l.bf16 %v11342_v37  ;;  %v5845_v50 = vld [vmem:[%s10777_s1 + $0x110] sm:$0xff]   ;;  %5599 = vmatprep.subr.bf16.mxu0 %v5843_v11  ;;  %v5849_v43 = vld [vmem:[%s10777_s1 + $0x118] sm:$0xff]  }
  0xfe   : > { %v3094_v54 = vadd.f32 %v11531_v21, %v11529_v42  ;;  %v11533_v3 = vunpack.c.l.bf16 %v11340_v18  ;;  %v1856_v14 = vadd.f32 %v1855_v45, %v1854_v16  ;;  %v2063_v46 = vrot.slane %v2062_v30, 2 }
  0xff   : > { %v2682_v60 = vadd.f32 %v2681_v32, %v11532_v52  ;;  %v2477_v49 = vrot.slane %v2476_v39, 4  ;;  %v11535_v1 = vunpack.c.l.bf16 %v11534_v59  ;;  %v2271_v40 = vrot.slane %v2270_v25, 2  ;;  %v5855_v52 = vld [vmem:[%s10777_s1 + $0x168] sm:$0xff]  }
 0x100   : > { %v2889_v24 = vadd.f32 %v2888_v8, %v11533_v3  ;;  %v11536_v56 = vunpack.c.l.bf16 %v11344_v0  ;;  %v11537_v38 = vunpack.c.l.bf16 %v11347_v17  ;;  %v1857_v33 = vrot.slane %v1856_v14, 1  ;;  %5600 = vmatpush3.bf16.msra.mxu0 %v5845_v50 }
 0x101   : > { %v3095_v19 = vadd.f32 %v3094_v54, %v11535_v1  ;;  %v2684_v63 = vadd.f32 %v2683_v26, %v2682_v60  ;;  %v2064_v57 = vadd.f32 %v2063_v46, %v2062_v30  ;;  %v2478_v7 = vadd.f32 %v2477_v49, %v2476_v39  ;;  %v7264_v26 = vld [vmem:[%s6216_s14 + $0x10] sm:$0xff]  ;;  %5601 = vmatprep.subr.bf16.mxu0 %v5847_v23 }
 0x102   : > { %v2890_v37 = vadd.f32 %v2889_v24, %v11536_v56  ;;  %v3099_v18 = vsel %vm1616_vm0, %v11537_v38, 0.0  ;;  %v11539_v4 = vunpack.c.l.bf16 %v11538_v61  ;;  %11540 = vst [vmem:[#allocation85_spill] sm:$0xff] %v7264_v26  ;;  %v2272_v0 = vadd.f32 %v2271_v40, %v2270_v25  ;;  %v7278_v39 = vld [vmem:[%s6216_s14 + $0x50] sm:$0xff]  ;;  %v5857_v38 = vld [vmem:[%s10777_s1 + $0x128] sm:$0xff]  }
 0x103   : > { %v2685_v13 = vrot.slane %v2684_v63, 4  ;;  %v3278_v17 = vpack.c.bf16 %v1650_v10, %v1650_v10  ;;  %v1858_v47 = vadd.f32 %v1857_v33, %v1856_v14  ;;  %v2065_v20 = vrot.slane %v2064_v57, 1  ;;  %11544 = vst [vmem:[#allocation79_spill] sm:$0xff] %v7278_v39  ;;  %v7289_v60 = vld [vmem:[%s6216_s14 + $0x90] sm:$0xff] }
 0x104   : > { %v3096_v29 = vadd.f32 %v3095_v19, %v11539_v4  ;;  %v2892_v35 = vadd.f32 %v2891_v9, %v2890_v37  ;;  %v2479_v53 = vrot.slane %v2478_v7, 2  ;;  %v11542_v5 = vunpack.c.l.bf16 %v11541_v15  ;;  %5602 = vmatpush3.bf16.msra.mxu0 %v5849_v43  ;;  %11545 = vst [vmem:[#allocation86_spill] sm:$0xff] %v7289_v60  ;;  %v7292_v14 = vld [vmem:[%s6216_s14 + $0xd0] sm:$0xff] }
 0x105   : > { %v2273_v16 = vrot.slane %v2272_v0, 1  ;;  %v2686_v31 = vadd.f32 %v2685_v13, %v2684_v63  ;;  %v3797_v48 = vunpack.c.l.b16 %v3278_v17  ;;  %v2066_v28 = vadd.f32 %v2065_v20, %v2064_v57  ;;  %5603 = vmatprep.subr.bf16.mxu0 %v5851_v51  ;;  %11546 = vst [vmem:[#allocation93_spill] sm:$0xff] %v7292_v14  ;;  %v7297_v19 = vld [vmem:[%s6216_s14 + $0x110] sm:$0xff] }
 0x106   : > { %v3097_v58 = vadd.f32 %v3096_v29, %v11542_v5  ;;  %v2893_v6 = vrot.slane %v2892_v35, 4  ;;  %v2480_v55 = vadd.f32 %v2479_v53, %v2478_v7  ;;  %v11543_v9 = vunpack.c.l.bf16 %v6876_v34  ;;  %v5853_v34 = vld [vmem:[%s10777_s1 + $0x120] sm:$0xff]   ;;  %11547 = vst [vmem:[#allocation8_spill] sm:$0xff] %v7297_v19  ;;  %v5859_v61 = vld [vmem:[%s10777_s1 + $0x170] sm:$0xff]  }
 0x107   : > { %v3294_v12 = vpack.c.bf16 %v1858_v47, %v1858_v47  ;;  %v2274_v36 = vadd.f32 %v2273_v16, %v2272_v0  ;;  %v2687_v2 = vrot.slane %v2686_v31, 2  ;;  %v3310_v45 = vpack.c.bf16 %v2066_v28, %v2066_v28  ;;  %v7312_v4 = vld [vmem:[%s6216_s14 + $0x190] sm:$0x11] }
 0x108   : > { %v3098_v41 = vadd.f32 %v3097_v58, %v11543_v9  ;;  %v2894_v32 = vadd.f32 %v2893_v6, %v2892_v35  ;;  %v2481_v44 = vrot.slane %v2480_v55, 1  ;;  %5604 = vmatpush3.bf16.msra.mxu0 %v5853_v34  ;;  %11549 = vst [vmem:[#allocation14_spill] sm:$0xff] %v7312_v4  ;;  %v7317_v35 = vld [vmem:[%s6216_s14 + $0x1d0] sm:$0xff]  ;;  %v5863_v9 = vld [vmem:[%s10777_s1 + $0x178] sm:$0xff]  }
 0x109   : > { %v3813_v30 = vunpack.c.l.b16 %v3294_v12  ;;  %v2688_v22 = vadd.f32 %v2687_v2, %v2686_v31  ;;  %v3326_v27 = vpack.c.bf16 %v2274_v36, %v2274_v36  ;;  %v3829_v10 = vunpack.c.l.b16 %v3310_v45  ;;  %5605 = vmatprep.subr.bf16.mxu0 %v5855_v52  ;;  %11550 = vst [vmem:[#allocation10_spill] sm:$0xff] %v7317_v35  ;;  %v7323_v53 = vld [vmem:[%s6216_s14 + $0x210] sm:$0xff]  ;;  %v5865_v52 = vld [vmem:[%s10777_s1 + $0x138] sm:$0xff]  }
 0x10a   : > { %v3100_v8 = vadd.f32 %v3099_v18, %v3098_v41  ;;  %v2895_v42 = vrot.slane %v2894_v32, 2  ;;  %v2482_v54 = vadd.f32 %v2481_v44, %v2480_v55  ;;  %v7305_v18 = vld [vmem:[%s6216_s14 + $0x150] sm:$0xff]  ;;  %11551 = vst [vmem:[#allocation15_spill] sm:$0xff] %v7323_v53  ;;  %v11601_v2 = vunpack.c.h.bf16 %v7312_v4 }
 0x10b   : > { %v3944_v25 = vsel %vm3923_vm1, %v3813_v30, %v3797_v48  ;;  %v2689_v3 = vrot.slane %v2688_v22, 1  ;;  %v3845_v50 = vunpack.c.l.b16 %v3326_v27  ;;  %11548 = vst [vmem:[#allocation9_spill] sm:$0xff] %v7305_v18  ;;  %v5861_v16 = vld [vmem:[%s10777_s1 + $0x130] sm:$0xff]  }
 0x10c   : > { %v3101_v11 = vrot.slane %v3100_v8, 4  ;;  %v2896_v24 = vadd.f32 %v2895_v42, %v2894_v32  ;;  %v3342_v59 = vpack.c.bf16 %v2482_v54, %v2482_v54  ;;  %v3945_v1 = vsel %vm3925_vm2, %v3829_v10, %v3944_v25  ;;  %5606 = vmatpush3.bf16.msra.mxu0 %v5857_v38  ;;  %v7331_v31 = vld [vmem:[%s6216_s14 + $0x250] sm:$0xff] }
 0x10d   : > { %v2690_v63 = vadd.f32 %v2689_v3, %v2688_v22  ;;  %v3946_v37 = vsel %vm3927_vm3, %v3845_v50, %v3945_v1  ;;  %11552 = vst [vmem:[#allocation16_spill] sm:$0xff] %v7331_v31  ;;  %v7334_v6 = vld [vmem:[%s6216_s14 + $0x290] sm:$0xff]  ;;  %5607 = vmatprep.subr.bf16.mxu0 %v5859_v61 }
 0x10e   : > { %v3102_v49 = vadd.f32 %v3101_v11, %v3100_v8  ;;  %v2897_v56 = vrot.slane %v2896_v24, 1  ;;  %v3861_v7 = vunpack.c.l.b16 %v3342_v59  ;;  %11553 = vst [vmem:[#allocation21_spill] sm:$0xff] %v7334_v6  ;;  %v7342_v41 = vld [vmem:[%s6216_s14 + $0x2d0] sm:$0xff] }
 0x10f   : > { %v3358_v13 = vpack.c.bf16 %v2690_v63, %v2690_v63  ;;  %11554 = vst [vmem:[#allocation22_spill] sm:$0xff] %v7342_v41  ;;  %v7349_v8 = vld [vmem:[%s6216_s14 + $0x310] sm:$0xff] }
 0x110   : > { %v3103_v57 = vrot.slane %v3102_v49, 2  ;;  %v2898_v0 = vadd.f32 %v2897_v56, %v2896_v24  ;;  %v3947_v20 = vsel %vm3929_vm4, %v3861_v7, %v3946_v37  ;;  %11555 = vst [vmem:[#allocation23_spill] sm:$0xff] %v7349_v8  ;;  %v7352_v45 = vld [vmem:[%s6216_s14 + $0x350] sm:$0x11]  ;;  %5608 = vmatpush3.bf16.msra.mxu0 %v5861_v16 }
 0x111   : > { %v3877_v51 = vunpack.c.l.b16 %v3358_v13  ;;  %11556 = vst [vmem:[#allocation11_spill] sm:$0xff] %v7352_v45  ;;  %v7357_v27 = vld [vmem:[%s6216_s14 + $0x390] sm:$0xff]  ;;  %5609 = vmatprep.subr.bf16.mxu0 %v5863_v9  ;;  %v5856_v13 = vld [vmem:[%s10777_s1 + $0x1e8] sm:$0xff]  }
 0x112   : > { %v3104_v47 = vadd.f32 %v3103_v57, %v3102_v49  ;;  %v3374_v58 = vpack.c.bf16 %v2898_v0, %v2898_v0  ;;  %11557 = vst [vmem:[#allocation17_spill] sm:$0xff] %v7357_v27  ;;  %v7360_v34 = vld [vmem:[%s6216_s14 + $0x3d0] sm:$0xff] }
 0x113   : > { %v3948_v44 = vsel %vm3931_vm5, %v3877_v51, %v3947_v20  ;;  %11558 = vst [vmem:[#allocation28_spill] sm:$0xff] %v7360_v34  ;;  %v7370_v3 = vld [vmem:[%s6216_s14 + $0x410] sm:$0xff] }
 0x114   : > { %v3105_v55 = vrot.slane %v3104_v47, 1  ;;  %v3893_v32 = vunpack.c.l.b16 %v3374_v58  ;;  %11559 = vst [vmem:[#allocation24_spill] sm:$0xff] %v7370_v3  ;;  %v7376_v1 = vld [vmem:[%s6216_s14 + $0x450] sm:$0xff]  ;;  %5610 = vmatpush3.bf16.msra.mxu0 %v5865_v52  ;;  %v5838_v52 = vld [vmem:[%s10777_s1 + $0x180] sm:$0xff]  }
 0x115   : > { %11560 = vst [vmem:[#allocation29_spill] sm:$0xff] %v7376_v1  ;;  %v7379_v63 = vld [vmem:[%s6216_s14 + $0x490] sm:$0xff] }
 0x116   : > { %v3106_v42 = vadd.f32 %v3105_v55, %v3104_v47  ;;  %v3949_v25 = vsel %vm3933_vm6, %v3893_v32, %v3948_v44  ;;  %11561 = vst [vmem:[#allocation30_spill] sm:$0xff] %v7379_v63  ;;  %v7385_v57 = vld [vmem:[%s6216_s14 + $0x4d0] sm:$0xff]  ;;  %v5850_v44 = vld [vmem:[%s10777_s1 + $0x198] sm:$0xff]  }
 0x117   : > { %11562 = vst [vmem:[#allocation12_spill] sm:$0xff] %v7385_v57  ;;  %v7388_v7 = vld [vmem:[%s6216_s14 + $0x510] sm:$0x11] }
 0x118   : > { %v3390_v59 = vpack.c.bf16 %v3106_v42, %v3106_v42  ;;  %11563 = vst [vmem:[#allocation18_spill] sm:$0xff] %v7388_v7  ;;  %v7395_v58 = vld [vmem:[%s6216_s14 + $0x550] sm:$0xff] }
 0x119   : > { %11564 = vst [vmem:[#allocation35_spill] sm:$0xff] %v7395_v58  ;;  %v7401_v9 = vld [vmem:[%s6216_s14 + $0x590] sm:$0xff] }
 0x11a   : > { %v3909_v20 = vunpack.c.l.b16 %v3390_v59  ;;  %11565 = vst [vmem:[#allocation36_spill] sm:$0xff] %v7401_v9  ;;  %v7404_v32 = vld [vmem:[%s6216_s14 + $0x5d0] sm:$0xff] }
 0x11b   : > { %11566 = vst [vmem:[#allocation37_spill] sm:$0xff] %v7404_v32  ;;  %v7415_v5 = vld [vmem:[%s6216_s14 + $0x610] sm:$0xff] }
 0x11c   : > { %v3950_v50 = vsel %vm3935_vm7, %v3909_v20, %v3949_v25  ;;  %11567 = vst [vmem:[#allocation25_spill] sm:$0xff] %v7415_v5  ;;  %v7418_v10 = vld [vmem:[%s6216_s14 + $0x650] sm:$0xff]  ;;  %v5840_v25 = vld [vmem:[%s10777_s1 + $0x1c8] sm:$0xff]  }
 0x11d   : > { %11568 = vst [vmem:[#allocation31_spill] sm:$0xff] %v7418_v10  ;;  %v4044_v16 = vpack.c.b16 %v3950_v50, %v3950_v50  ;;  %v7427_v20 = vld [vmem:[%s6216_s14 + $0x690] sm:$0xff] }
 0x11e   : > { %11569 = vst [vmem:[#allocation42_spill] sm:$0xff] %v7427_v20  ;;  %v7430_v54 = vld [vmem:[%s6216_s14 + $0x6d0] sm:$0x11] }
 0x11f   : > { %11570 = vst [vmem:[#allocation13_spill] sm:$0xff] %v7430_v54  ;;  %v7436_v0 = vld [vmem:[%s6216_s14 + $0x710] sm:$0xff]  ;;  %4915 = vmatmul.mubr.bf16.vlgmr.msra.gmra.mrb[0].mxu1 %v4044_v16  ;;  %v5842_v16 = vld [vmem:[%s10777_s1 + $0x188] sm:$0xff]  }
 0x120   : > { %11571 = vst [vmem:[#allocation19_spill] sm:$0xff] %v7436_v0  ;;  %v7439_v59 = vld [vmem:[%s6216_s14 + $0x750] sm:$0xff]  ;;  %5618 = vmatpush3.bf16.msra.mxu1 %v5838_v52 }
 0x121   : > { %11572 = vst [vmem:[#allocation38_spill] sm:$0xff] %v7439_v59  ;;  %v7446_v33 = vld [vmem:[%s6216_s14 + $0x790] sm:$0xff]  ;;  %5619 = vmatprep.subr.bf16.mxu1 %v5840_v25 }
 0x122   : > { %11573 = vst [vmem:[#allocation43_spill] sm:$0xff] %v7446_v33  ;;  %v7449_v47 = vld [vmem:[%s6216_s14 + $0x7d0] sm:$0xff] }
 0x123   : > { %11574 = vst [vmem:[#allocation44_spill] sm:$0xff] %v7449_v47  ;;  %v7459_v30 = vld [vmem:[%s6216_s14 + $0x810] sm:$0xff] }
 0x124   : > { %11575 = vst [vmem:[#allocation26_spill] sm:$0xff] %v7459_v30  ;;  %v7462_v43 = vld [vmem:[%s6216_s14 + $0x850] sm:$0xff]  ;;  %5620 = vmatpush3.bf16.msra.mxu1 %v5842_v16  ;;  %v5848_v16 = vld [vmem:[%s10777_s1 + $0x1d8] sm:$0xff]  }
 0x125   : > { %11576 = vst [vmem:[#allocation32_spill] sm:$0xff] %v7462_v43  ;;  %v5844_v52 = vld [vmem:[%s10777_s1 + $0x1d0] sm:$0xff]  }
 0x126   : > { %v7472_v50 = vld [vmem:[%s6216_s14 + $0x890] sm:$0x11]  ;;  %5621 = vmatprep.subr.bf16.mxu1 %v5844_v52 }
 0x127   : > { %11577 = vst [vmem:[#allocation49_spill] sm:$0xff] %v7472_v50  ;;  %v7475_v56 = vld [vmem:[%s6216_s14 + $0x8d0] sm:$0xff] }
 0x128   : > { %11578 = vst [vmem:[#allocation20_spill] sm:$0xff] %v7475_v56  ;;  %v7482_v15 = vld [vmem:[%s6216_s14 + $0x910] sm:$0xff] }
 0x129   : > { %11579 = vst [vmem:[#allocation39_spill] sm:$0xff] %v7482_v15  ;;  %v7485_v25 = vld [vmem:[%s6216_s14 + $0x950] sm:$0xff] }
 0x12a   : > { %11580 = vst [vmem:[#allocation27_spill] sm:$0xff] %v7485_v25  ;;  %v7492_v17 = vld [vmem:[%s6216_s14 + $0x990] sm:$0xff] }
 0x12b   : > { %11581 = vst [vmem:[#allocation33_spill] sm:$0xff] %v7492_v17  ;;  %v7495_v28 = vld [vmem:[%s6216_s14 + $0x9d0] sm:$0xff] }
 0x12c   : > { %11582 = vst [vmem:[#allocation45_spill] sm:$0xff] %v7495_v28  ;;  %v5846_v24 = vld [vmem:[%s10777_s1 + $0x190] sm:$0xff]  }
 0x12d   : > { %v7505_v49 = vld [vmem:[%s6216_s14 + $0xa10] sm:$0xff]  ;;  %5622 = vmatpush3.bf16.msra.mxu1 %v5846_v24  ;;  %v5852_v24 = vld [vmem:[%s10777_s1 + $0x1e0] sm:$0xff]  }
 0x12e   : > { %11583 = vst [vmem:[#allocation50_spill] sm:$0xff] %v7505_v49  ;;  %v7508_v42 = vld [vmem:[%s6216_s14 + $0xa50] sm:$0x11]  ;;  %5623 = vmatprep.subr.bf16.mxu1 %v5848_v16  ;;  %v5854_v16 = vld [vmem:[%s10777_s1 + $0x1a0] sm:$0xff]  }
 0x12f   : > { %11584 = vst [vmem:[#allocation51_spill] sm:$0xff] %v7508_v42  ;;  %v7518_v46 = vld [vmem:[%s6216_s14 + $0xa90] sm:$0xff] }
 0x130   : > { %11585 = vst [vmem:[#allocation40_spill] sm:$0xff] %v7518_v46  ;;  %v7521_v11 = vld [vmem:[%s6216_s14 + $0xad0] sm:$0xff]  ;;  %v1392_v55 = vunpack.c.h.bf16 %v7518_v46  ;;  %v1520_v46 = vunpack.c.h.bf16 %v7564_v62  ;;  %v11604_v62 = vunpack.c.h.bf16 %v7352_v45 }
 0x131   : > { %11586 = vst [vmem:[#allocation56_spill] sm:$0xff] %v7521_v11  ;;  %v7528_v48 = vld [vmem:[%s6216_s14 + $0xb10] sm:$0xff]  ;;  %v1408_v51 = vunpack.c.h.bf16 %v7521_v11  ;;  %5624 = vmatpush3.bf16.msra.mxu1 %v5850_v44  ;;  %v1682_v44 = vsel %vm1616_vm0, %v11601_v2, 0.0  ;;  %v11607_v2 = vunpack.c.h.bf16 %v7388_v7  ;;  %v11612_v7 = vunpack.c.h.bf16 %v7331_v31  ;;  %v7996_v31 = vld [vmem:[%s6216_s14 + $0xd18] sm:$0xff] }
 0x132   : > { %11587 = vst [vmem:[#allocation34_spill] sm:$0xff] %v7528_v48  ;;  %v7531_v52 = vld [vmem:[%s6216_s14 + $0xb50] sm:$0xff]  ;;  %5625 = vmatprep.subr.bf16.mxu1 %v5852_v24  ;;  %v1890_v21 = vsel %vm1616_vm0, %v11604_v62, 0.0  ;;  %v5858_v24 = vld [vmem:[%s10777_s1 + $0x1a8] sm:$0xff]   ;;  %v11610_v62 = vunpack.c.h.bf16 %v7430_v54  ;;  %11681 = vst [vmem:[#allocation90_spill] sm:$0xff] %v7996_v31 }
 0x133   : > { %11588 = vst [vmem:[#allocation46_spill] sm:$0xff] %v7531_v52  ;;  %v7538_v23 = vld [vmem:[%s6216_s14 + $0xb90] sm:$0xff] }
 0x134   : > { %11589 = vst [vmem:[#allocation52_spill] sm:$0xff] %v7538_v23  ;;  %v7541_v36 = vld [vmem:[%s6216_s14 + $0xbd0] sm:$0xff]  ;;  %v11600_v23 = vunpack.c.h.bf16 %v7278_v39  ;;  %v8006_v39 = vld [vmem:[%s6216_s14 + $0xd98] sm:$0xff] }
 0x135   : > { %11590 = vst [vmem:[#allocation41_spill] sm:$0xff] %v7541_v36  ;;  %v7551_v29 = vld [vmem:[%s6216_s14 + $0xc10] sm:$0x11]  ;;  %5626 = vmatpush3.bf16.msra.mxu1 %v5854_v16  ;;  %v2306_v16 = vsel %vm1616_vm0, %v11610_v62, 0.0 }
 0x136   : > { %11591 = vst [vmem:[#allocation57_spill] sm:$0xff] %v7551_v29  ;;  %v7554_v38 = vld [vmem:[%s6216_s14 + $0xc50] sm:$0xff]  ;;  %v1488_v37 = vunpack.c.h.bf16 %v7551_v29  ;;  %v11603_v29 = vunpack.c.h.bf16 %v7323_v53  ;;  %5627 = vmatprep.subr.bf16.mxu1 %v5856_v13  ;;  %v11616_v13 = vunpack.c.h.bf16 %v7370_v3 }
 0x137   : > { %11592 = vst [vmem:[#allocation58_spill] sm:$0xff] %v7554_v38  ;;  %v7567_v61 = vld [vmem:[%s6216_s14 + $0xcd0] sm:$0xff]  ;;  %v1504_v43 = vunpack.c.h.bf16 %v7554_v38  ;;  %v11602_v38 = vunpack.c.h.bf16 %v7317_v35  ;;  %v2098_v35 = vsel %vm1616_vm0, %v11607_v2, 0.0 }
 0x138   : > { %11594 = vst [vmem:[#allocation53_spill] sm:$0xff] %v7567_v61  ;;  %v7574_v12 = vld [vmem:[%s6216_s14 + $0xd10] sm:$0xff]  ;;  %v1536_v36 = vunpack.c.h.bf16 %v7567_v61  ;;  %v11599_v61 = vunpack.c.h.bf16 %v7264_v26 }
 0x139   : > { %11595 = vst [vmem:[#allocation59_spill] sm:$0xff] %v7574_v12  ;;  %v7577_v40 = vld [vmem:[%s6216_s14 + $0xd50] sm:$0xff]  ;;  %v1885_v11 = vadd.f32 %v11603_v29, %v11602_v38  ;;  %v11608_v29 = vunpack.c.h.bf16 %v7395_v58  ;;  %v11609_v38 = vunpack.c.h.bf16 %v7401_v9  ;;  %v11613_v58 = vunpack.c.h.bf16 %v7436_v0  ;;  %5628 = vmatpush3.bf16.msra.mxu1 %v5858_v24  ;;  %v7979_v0 = vld [vmem:[%s6216_s14 + $0xc58] sm:$0xff] }
 0x13a   : > { %11596 = vst [vmem:[#allocation48_spill] sm:$0xff] %v7577_v40  ;;  %v7584_v49 = vld [vmem:[%s6216_s14 + $0xd90] sm:$0xff]  ;;  %v1677_v28 = vadd.f32 %v11600_v23, %v11599_v61  ;;  %v11605_v23 = vunpack.c.h.bf16 %v7357_v27  ;;  %v11606_v61 = vunpack.c.h.bf16 %v7360_v34  ;;  %v11614_v9 = vunpack.c.h.bf16 %v7439_v59  ;;  %11678 = vst [vmem:[#allocation84_spill] sm:$0xff] %v7979_v0 }
 0x13b   : > { %11597 = vst [vmem:[#allocation54_spill] sm:$0xff] %v7584_v49  ;;  %v7587_v22 = vld [vmem:[%s6216_s14 + $0xdd0] sm:$0x11]  ;;  %v2301_v45 = vadd.f32 %v11609_v38, %v11608_v29  ;;  %v1886_v2 = vadd.f32 %v1885_v11, %v11612_v7  ;;  %v11615_v38 = vunpack.c.h.bf16 %v7472_v50  ;;  %v11617_v34 = vunpack.c.h.bf16 %v7404_v32 }
 0x13c   : > { %11598 = vst [vmem:[#allocation60_spill] sm:$0xff] %v7587_v22  ;;  %v2093_v4 = vadd.f32 %v11606_v61, %v11605_v23  ;;  %v5860_v27 = vld [vmem:[%s10777_s1 + $0x1f0] sm:$0xff]   ;;  %v11611_v23 = vunpack.c.h.bf16 %v7289_v60  ;;  %v2509_v29 = vadd.f32 %v11614_v9, %v11613_v58  ;;  %v11620_v7 = vunpack.c.h.bf16 %v7508_v42 }
 0x13d   : > { %v2514_v62 = vsel %vm1616_vm0, %v11615_v38, 0.0  ;;  %v2302_v53 = vadd.f32 %v2301_v45, %v11617_v34  ;;  %v11621_v58 = vunpack.c.h.bf16 %v7292_v14  ;;  %v11622_v38 = vunpack.c.h.bf16 %v7334_v6  ;;  %v5862_v45 = vld [vmem:[%s10777_s1 + $0x1b0] sm:$0xff]   ;;  %5629 = vmatprep.subr.bf16.mxu1 %v5860_v27 }
 0x13e   : > { %v1678_v61 = vadd.f32 %v1677_v28, %v11611_v23  ;;  %v2094_v54 = vadd.f32 %v2093_v4, %v11616_v13  ;;  %v11618_v28 = vunpack.c.h.bf16 %v7475_v56  ;;  %v11619_v23 = vunpack.c.h.bf16 %v7482_v15  ;;  %5630 = vmatpush3.bf16.msra.mxu1 %v5862_v45  ;;  %v7949_v15 = vld [vmem:[%s6216_s14 + $0xad8] sm:$0xff] }
 0x13f   : > { %v2722_v59 = vsel %vm1616_vm0, %v11620_v7, 0.0  ;;  %v1887_v50 = vadd.f32 %v1886_v2, %v11622_v38  ;;  %v11623_v4 = vunpack.c.h.bf16 %v7446_v33  ;;  %v2925_v32 = vadd.f32 %v1408_v51, %v1392_v55  ;;  %v5864_v51 = vld [vmem:[%s10777_s1 + $0x1f8] sm:$0xff]   ;;  %11672 = vst [vmem:[#allocation81_spill] sm:$0xff] %v7949_v15 }
 0x140   : > { %v2717_v11 = vadd.f32 %v11619_v23, %v11618_v28  ;;  %v1679_v9 = vadd.f32 %v1678_v61, %v11621_v58  ;;  %v11624_v34 = vunpack.c.h.bf16 %v7376_v1  ;;  %v11625_v23 = vunpack.c.h.bf16 %v7415_v5  ;;  %5631 = vmatprep.subr.bf16.mxu1 %v5864_v51  ;;  %v7939_v5 = vld [vmem:[%s6216_s14 + $0xa58] sm:$0x11] }
 0x141   : > { %v2510_v13 = vadd.f32 %v2509_v29, %v11623_v4  ;;  %v11626_v61 = vunpack.c.h.bf16 %v7485_v25  ;;  %v2930_v2 = vsel %vm1616_vm0, %v1488_v37, 0.0  ;;  %v11627_v55 = vunpack.c.h.bf16 %v7297_v19  ;;  %11670 = vst [vmem:[#allocation76_spill] sm:$0xff] %v7939_v5  ;;  %v7959_v33 = vld [vmem:[%s6216_s14 + $0xb58] sm:$0xff] }
 0x142   : > { %v2095_v28 = vadd.f32 %v2094_v54, %v11624_v34  ;;  %v2303_v7 = vadd.f32 %v2302_v53, %v11625_v23  ;;  %v11628_v29 = vunpack.c.h.bf16 %v7342_v41  ;;  %v11629_v54 = vunpack.c.h.bf16 %v7449_v47  ;;  %v7929_v47 = vld [vmem:[%s6216_s14 + $0x9d8] sm:$0xff]  ;;  %11674 = vst [vmem:[#allocation77_spill] sm:$0xff] %v7959_v33 }
 0x143   : > { %v2718_v58 = vadd.f32 %v2717_v11, %v11626_v61  ;;  %v1680_v24 = vadd.f32 %v1679_v9, %v11627_v55  ;;  %v11630_v53 = vunpack.c.h.bf16 %v7528_v48  ;;  %v11631_v11 = vunpack.c.h.bf16 %v7379_v63  ;;  %11668 = vst [vmem:[#allocation74_spill] sm:$0xff] %v7929_v47  ;;  %v7976_v63 = vld [vmem:[%s6216_s14 + $0xc18] sm:$0x11] }
 0x144   : > { %v1888_v38 = vadd.f32 %v1887_v50, %v11628_v29  ;;  %v2511_v4 = vadd.f32 %v2510_v13, %v11629_v54  ;;  %v11632_v27 = vunpack.c.h.bf16 %v7418_v10  ;;  %v11633_v61 = vunpack.c.h.bf16 %v7492_v17  ;;  %v11646_v17 = vld [vmem:[#allocation50_spill] sm:$0xff]  ;;  %v7919_v10 = vld [vmem:[%s6216_s14 + $0x958] sm:$0xff]  ;;  %11677 = vst [vmem:[#allocation78_spill] sm:$0xff] %v7976_v63 }
 0x145   : > { %v2926_v34 = vadd.f32 %v2925_v32, %v11630_v53  ;;  %v2096_v37 = vadd.f32 %v2095_v28, %v11631_v11  ;;  %v3133_v42 = vadd.f32 %v1520_v46, %v1504_v43  ;;  %v11634_v9 = vunpack.c.h.bf16 %v7305_v18  ;;  %v5866_v28 = vld [vmem:[%s10777_s1 + $0x1b8] sm:$0xff]  }
 0x146   : > { %v2304_v23 = vadd.f32 %v2303_v7, %v11632_v27  ;;  %v2719_v25 = vadd.f32 %v2718_v58, %v11633_v61  ;;  %v11635_v50 = vunpack.c.h.bf16 %v7349_v8  ;;  %v11636_v13 = vunpack.c.h.bf16 %v7459_v30  ;;  %5632 = vmatpush3.bf16.msra.mxu1 %v5866_v28  ;;  %v7946_v30 = vld [vmem:[%s6216_s14 + $0xa98] sm:$0xff] }
 0x147   : > { %v1681_v55 = vadd.f32 %v1680_v24, %v11634_v9  ;;  %v11637_v32 = vunpack.c.h.bf16 %v7531_v52  ;;  %v11638_v7 = vunpack.c.h.bf16 %v7385_v57  ;;  %v11639_v43 = vunpack.c.h.bf16 %v7427_v20  ;;  %v11640_v24 = vld [vmem:[#allocation45_spill] sm:$0xff]  ;;  %v11642_v9 = vld [vmem:[#allocation32_spill] sm:$0xff]  ;;  %v7909_v20 = vld [vmem:[%s6216_s14 + $0x8d8] sm:$0xff]  ;;  %11671 = vst [vmem:[#allocation80_spill] sm:$0xff] %v7946_v30 }
 0x148   : > { %v1889_v29 = vadd.f32 %v1888_v38, %v11635_v50  ;;  %v2512_v54 = vadd.f32 %v2511_v4, %v11636_v13  ;;  %v11641_v11 = vunpack.c.h.bf16 %v11640_v24  ;;  %v3134_v27 = vadd.f32 %v3133_v42, %v1536_v36  ;;  %v11644_v50 = vld [vmem:[#allocation52_spill] sm:$0xff]  ;;  %v11649_v42 = vld [vmem:[#allocation41_spill] sm:$0xff]  ;;  %11666 = vst [vmem:[#allocation72_spill] sm:$0xff] %v7909_v20  ;;  %v7956_v57 = vld [vmem:[%s6216_s14 + $0xb18] sm:$0xff] }
 0x149   : > { %v2927_v53 = vadd.f32 %v2926_v34, %v11637_v32  ;;  %v2097_v46 = vadd.f32 %v2096_v37, %v11638_v7  ;;  %v2305_v58 = vadd.f32 %v2304_v23, %v11639_v43  ;;  %v1683_v4 = vadd.f32 %v1682_v44, %v1681_v55  ;;  %11673 = vst [vmem:[#allocation82_spill] sm:$0xff] %v7956_v57  ;;  %v7966_v8 = vld [vmem:[%s6216_s14 + $0xb98] sm:$0xff] }
 0x14a   : > { %v2720_v38 = vadd.f32 %v2719_v25, %v11641_v11  ;;  %v1891_v61 = vadd.f32 %v1890_v21, %v1889_v29  ;;  %v11643_v34 = vunpack.c.h.bf16 %v11642_v9  ;;  %v11645_v13 = vunpack.c.h.bf16 %v11644_v50  ;;  %v7926_v50 = vld [vmem:[%s6216_s14 + $0x998] sm:$0xff]  ;;  %11675 = vst [vmem:[#allocation83_spill] sm:$0xff] %v7966_v8 }
 0x14b   : > { %v2099_v52 = vadd.f32 %v2098_v35, %v2097_v46  ;;  %v2307_v48 = vadd.f32 %v2306_v16, %v2305_v58  ;;  %v11647_v37 = vunpack.c.h.bf16 %v11646_v17  ;;  %v11648_v23 = vunpack.c.h.bf16 %v7574_v12  ;;  %v7889_v12 = vld [vmem:[%s6216_s14 + $0x7d8] sm:$0xff]  ;;  %11667 = vst [vmem:[#allocation73_spill] sm:$0xff] %v7926_v50 }
 0x14c   : > { %v2513_v45 = vadd.f32 %v2512_v54, %v11643_v34  ;;  %v2928_v32 = vadd.f32 %v2927_v53, %v11645_v13  ;;  %v1684_v24 = vrot.slane %v1683_v4, 4  ;;  %v1892_v25 = vrot.slane %v1891_v61, 4  ;;  %v7899_v17 = vld [vmem:[%s6216_s14 + $0x858] sm:$0xff] }
 0x14d   : > { %v2721_v7 = vadd.f32 %v2720_v38, %v11647_v37  ;;  %v3135_v43 = vadd.f32 %v3134_v27, %v11648_v23  ;;  %v11650_v44 = vunpack.c.h.bf16 %v11649_v42  ;;  %v2100_v51 = vrot.slane %v2099_v52, 4  ;;  %v7916_v42 = vld [vmem:[%s6216_s14 + $0x918] sm:$0xff] }
 0x14e   : > { %v2515_v36 = vadd.f32 %v2514_v62, %v2513_v45  ;;  %v2308_v55 = vrot.slane %v2307_v48, 4  ;;  %v11651_v54 = vunpack.c.h.bf16 %v7577_v40  ;;  %v1685_v16 = vadd.f32 %v1684_v24, %v1683_v4  ;;  %v7876_v40 = vld [vmem:[%s6216_s14 + $0x718] sm:$0xff] }
 0x14f   : > { %v2929_v21 = vadd.f32 %v2928_v32, %v11650_v44  ;;  %v2723_v29 = vadd.f32 %v2722_v59, %v2721_v7  ;;  %v1893_v53 = vadd.f32 %v1892_v25, %v1891_v61  ;;  %v2101_v11 = vadd.f32 %v2100_v51, %v2099_v52  ;;  %11663 = vst [vmem:[#allocation69_spill] sm:$0xff] %v7876_v40  ;;  %v7936_v9 = vld [vmem:[%s6216_s14 + $0xa18] sm:$0xff] }
 0x150   : > { %v3136_v35 = vadd.f32 %v3135_v43, %v11651_v54  ;;  %v2516_v46 = vrot.slane %v2515_v36, 4  ;;  %v2309_v38 = vadd.f32 %v2308_v55, %v2307_v48  ;;  %v11652_v34 = vunpack.c.h.bf16 %v7584_v49  ;;  %v7886_v49 = vld [vmem:[%s6216_s14 + $0x798] sm:$0xff]  ;;  %11669 = vst [vmem:[#allocation75_spill] sm:$0xff] %v7936_v9 }
 0x151   : > { %v2931_v58 = vadd.f32 %v2930_v2, %v2929_v21  ;;  %v2724_v27 = vrot.slane %v2723_v29, 4  ;;  %v1686_v45 = vrot.slane %v1685_v16, 2  ;;  %v1894_v13 = vrot.slane %v1893_v53, 2  ;;  %v7969_v18 = vld [vmem:[%s6216_s14 + $0xbd8] sm:$0xff] }
 0x152   : > { %v3137_v62 = vadd.f32 %v3136_v35, %v11652_v34  ;;  %v2517_v32 = vadd.f32 %v2516_v46, %v2515_v36  ;;  %v2102_v37 = vrot.slane %v2101_v11, 2  ;;  %v2310_v23 = vrot.slane %v2309_v38, 2  ;;  %11676 = vst [vmem:[#allocation87_spill] sm:$0xff] %v7969_v18  ;;  %v7986_v56 = vld [vmem:[%s6216_s14 + $0xc98] sm:$0xff] }
 0x153   : > { %v2932_v28 = vrot.slane %v2931_v58, 4  ;;  %v2725_v59 = vadd.f32 %v2724_v27, %v2723_v29  ;;  %v11653_v7 = vunpack.c.h.bf16 %v7587_v22  ;;  %v1687_v4 = vadd.f32 %v1686_v45, %v1685_v16  ;;  %v7866_v22 = vld [vmem:[%s6216_s14 + $0x698] sm:$0xff]  ;;  %11679 = vst [vmem:[#allocation88_spill] sm:$0xff] %v7986_v56 }
 0x154   : > { %v1895_v61 = vadd.f32 %v1894_v13, %v1893_v53  ;;  %v2518_v2 = vrot.slane %v2517_v32, 2  ;;  %v2103_v48 = vadd.f32 %v2102_v37, %v2101_v11  ;;  %v2311_v43 = vadd.f32 %v2310_v23, %v2309_v38  ;;  %v7989_v19 = vld [vmem:[%s6216_s14 + $0xcd8] sm:$0xff] }
 0x155   : > { %v3138_v24 = vsel %vm1616_vm0, %v11653_v7, 0.0  ;;  %v2933_v52 = vadd.f32 %v2932_v28, %v2931_v58  ;;  %v2726_v25 = vrot.slane %v2725_v59, 2  ;;  %v1688_v21 = vrot.slane %v1687_v4, 1  ;;  %11680 = vst [vmem:[#allocation89_spill] sm:$0xff] %v7989_v19 }
 0x156   : > { %v3139_v44 = vadd.f32 %v3138_v24, %v3137_v62  ;;  %v1896_v51 = vrot.slane %v1895_v61, 1  ;;  %v2519_v55 = vadd.f32 %v2518_v2, %v2517_v32  ;;  %v2104_v54 = vrot.slane %v2103_v48, 1  ;;  %v7735_v24 = vld [vmem:[%s6216_s14 + $0x18] sm:$0xff] }
 0x157   : > { %v2934_v36 = vrot.slane %v2933_v52, 2  ;;  %v2312_v35 = vrot.slane %v2311_v43, 1  ;;  %v2727_v46 = vadd.f32 %v2726_v25, %v2725_v59  ;;  %v1689_v27 = vadd.f32 %v1688_v21, %v1687_v4  ;;  %11654 = vst [vmem:[#allocation55_spill] sm:$0xff] %v7735_v24  ;;  %v7738_v21 = vld [vmem:[%s6216_s14 + $0x58] sm:$0xff] }
 0x158   : > { %v3140_v29 = vrot.slane %v3139_v44, 4  ;;  %v1897_v34 = vadd.f32 %v1896_v51, %v1895_v61  ;;  %v2520_v7 = vrot.slane %v2519_v55, 1  ;;  %v2105_v53 = vadd.f32 %v2104_v54, %v2103_v48  ;;  %v7742_v54 = vld [vmem:[%s6216_s14 + $0x98] sm:$0xff] }
 0x159   : > { %v2935_v16 = vadd.f32 %v2934_v36, %v2933_v52  ;;  %v2313_v45 = vadd.f32 %v2312_v35, %v2311_v43  ;;  %v2728_v58 = vrot.slane %v2727_v46, 1  ;;  %v3281_v62 = vpack.c.bf16 %v1689_v27, %v1689_v27 }
 0x15a   : > { %v3141_v11 = vadd.f32 %v3140_v29, %v3139_v44  ;;  %v2521_v38 = vadd.f32 %v2520_v7, %v2519_v55  ;;  %v3297_v28 = vpack.c.bf16 %v1897_v34, %v1897_v34  ;;  %v3313_v23 = vpack.c.bf16 %v2105_v53, %v2105_v53  ;;  %v7747_v34 = vld [vmem:[%s6216_s14 + $0xd8] sm:$0xff] }
 0x15b   : > { %v2936_v13 = vrot.slane %v2935_v16, 1  ;;  %v2729_v32 = vadd.f32 %v2728_v58, %v2727_v46  ;;  %v3329_v59 = vpack.c.bf16 %v2313_v45, %v2313_v45  ;;  %v3800_v2 = vunpack.c.l.b16 %v3281_v62  ;;  %v7750_v7 = vld [vmem:[%s6216_s14 + $0x118] sm:$0xff] }
 0x15c   : > { %v3142_v37 = vrot.slane %v3141_v11, 2  ;;  %v3345_v61 = vpack.c.bf16 %v2521_v38, %v2521_v38  ;;  %v3816_v52 = vunpack.c.l.b16 %v3297_v28  ;;  %v3832_v25 = vunpack.c.l.b16 %v3313_v23  ;;  %v7755_v58 = vld [vmem:[%s6216_s14 + $0x158] sm:$0xff] }
 0x15d   : > { %v2937_v4 = vadd.f32 %v2936_v13, %v2935_v16  ;;  %v3361_v43 = vpack.c.bf16 %v2729_v32, %v2729_v32  ;;  %v3848_v44 = vunpack.c.l.b16 %v3329_v59  ;;  %v7761_v28 = vld [vmem:[%s6216_s14 + $0x198] sm:$0x11]  ;;  %v1378_v1 = vunpack.c.h.bf16 %v7939_v5 }
 0x15e   : > { %v3143_v48 = vadd.f32 %v3142_v37, %v3141_v11  ;;  %v3864_v55 = vunpack.c.l.b16 %v3345_v61  ;;  %v3965_v36 = vsel %vm3923_vm1, %v3816_v52, %v3800_v2  ;;  %11655 = vst [vmem:[#allocation61_spill] sm:$0xff] %v7761_v28  ;;  %v7764_v32 = vld [vmem:[%s6216_s14 + $0x1d8] sm:$0xff]  ;;  %v5867_v52 = vld [vmem:[%s10777_s1 + $0x240] sm:$0xff]   ;;  %v1394_v41 = vunpack.c.h.bf16 %v7946_v30 }
 0x15f   : > { %v3377_v51 = vpack.c.bf16 %v2937_v4, %v2937_v4  ;;  %v3880_v29 = vunpack.c.l.b16 %v3361_v43  ;;  %v3966_v27 = vsel %vm3925_vm2, %v3832_v25, %v3965_v36  ;;  %11656 = vst [vmem:[#allocation62_spill] sm:$0xff] %v7764_v32  ;;  %v7770_v4 = vld [vmem:[%s6216_s14 + $0x218] sm:$0xff]  ;;  %v5868_v2 = vld [vmem:[%s10777_s1 + $0x2c0] sm:$0xff]   ;;  %5639 = vmatprep.subr.bf16.mxu0 %v5867_v52  ;;  %v1410_v6 = vunpack.c.h.bf16 %v7949_v15 }
 0x160   : > { %v3144_v46 = vrot.slane %v3143_v48, 1  ;;  %v3967_v45 = vsel %vm3927_vm3, %v3848_v44, %v3966_v27  ;;  %v7777_v25 = vld [vmem:[%s6216_s14 + $0x258] sm:$0xff]  ;;  %5661 = vmatprep.subr.bf16.mxu1 %v5868_v2  ;;  %v1426_v5 = vunpack.c.h.bf16 %v7956_v57  ;;  %v1506_v26 = vunpack.c.h.bf16 %v7979_v0 }
 0x161   : > { %v3896_v53 = vunpack.c.l.b16 %v3377_v51  ;;  %v3968_v62 = vsel %vm3929_vm4, %v3864_v55, %v3967_v45  ;;  %v7780_v44 = vld [vmem:[%s6216_s14 + $0x298] sm:$0xff]  ;;  %v1522_v15 = vunpack.c.h.bf16 %v7986_v56  ;;  %v1538_v60 = vunpack.c.h.bf16 %v7989_v19 }
 0x162   : > { %v3145_v13 = vadd.f32 %v3144_v46, %v3143_v48  ;;  %v3969_v59 = vsel %vm3931_vm5, %v3880_v29, %v3968_v62  ;;  %v7785_v36 = vld [vmem:[%s6216_s14 + $0x2d8] sm:$0xff]  ;;  %v1554_v9 = vunpack.c.h.bf16 %v7996_v31  ;;  %v11684_v14 = vunpack.c.h.bf16 %v7735_v24 }
 0x163   : > { %v3970_v43 = vsel %vm3933_vm6, %v3896_v53, %v3969_v59  ;;  %v7788_v46 = vld [vmem:[%s6216_s14 + $0x318] sm:$0xff]  ;;  %v11685_v19 = vunpack.c.h.bf16 %v7738_v21  ;;  %v11686_v18 = vunpack.c.h.bf16 %v7761_v28  ;;  %v11687_v3 = vunpack.c.h.bf16 %v7764_v32 }
 0x164   : > { %v3393_v48 = vpack.c.bf16 %v3145_v13, %v3145_v13  ;;  %v7795_v62 = vld [vmem:[%s6216_s14 + $0x358] sm:$0x11] }
 0x165   : > { %11657 = vst [vmem:[#allocation63_spill] sm:$0xff] %v7795_v62  ;;  %v7801_v61 = vld [vmem:[%s6216_s14 + $0x398] sm:$0xff]  ;;  %v1703_v8 = vadd.f32 %v11685_v19, %v11684_v14  ;;  %v1708_v31 = vsel %vm1616_vm0, %v11686_v18, 0.0  ;;  %v11689_v0 = vunpack.c.h.bf16 %v7795_v62 }
 0x166   : > { %v3912_v13 = vunpack.c.l.b16 %v3393_v48  ;;  %11658 = vst [vmem:[#allocation64_spill] sm:$0xff] %v7801_v61  ;;  %v7804_v37 = vld [vmem:[%s6216_s14 + $0x3d8] sm:$0xff]  ;;  %v11690_v56 = vunpack.c.h.bf16 %v7801_v61  ;;  %v11697_v61 = vunpack.c.h.bf16 %v7777_v25 }
 0x167   : > { %11659 = vst [vmem:[#allocation65_spill] sm:$0xff] %v7804_v37  ;;  %v7812_v55 = vld [vmem:[%s6216_s14 + $0x418] sm:$0xff]  ;;  %v1916_v2 = vsel %vm1616_vm0, %v11689_v0, 0.0  ;;  %v11691_v24 = vunpack.c.h.bf16 %v7804_v37  ;;  %v11696_v0 = vunpack.c.h.bf16 %v7742_v54 }
 0x168   : > { %v3971_v35 = vsel %vm3935_vm7, %v3912_v13, %v3970_v43  ;;  %v7815_v29 = vld [vmem:[%s6216_s14 + $0x458] sm:$0xff] }
 0x169   : > { %v7818_v51 = vld [vmem:[%s6216_s14 + $0x498] sm:$0xff]  ;;  %v4047_v45 = vpack.c.b16 %v3971_v35, %v3971_v35  ;;  %v1704_v62 = vadd.f32 %v1703_v8, %v11696_v0  ;;  %v11703_v8 = vunpack.c.h.bf16 %v7909_v20  ;;  %v11704_v0 = vunpack.c.h.bf16 %v7916_v42 }
 0x16a   : > { %v7824_v23 = vld [vmem:[%s6216_s14 + $0x4d8] sm:$0xff] }
 0x16b   : > { %v7836_v11 = vld [vmem:[%s6216_s14 + $0x518] sm:$0x11]  ;;  %4954 = vmatprep.mubr.bf16.mxu0 %v4047_v45  ;;  %v1442_v45 = vunpack.c.h.bf16 %v7959_v33  ;;  %v1490_v33 = vunpack.c.h.bf16 %v7976_v63 }
 0x16c   : > { %v7839_v35 = vld [vmem:[%s6216_s14 + $0x558] sm:$0xff]  ;;  %v11692_v14 = vunpack.c.h.bf16 %v7836_v11 }
 0x16d   : > { %11660 = vst [vmem:[#allocation66_spill] sm:$0xff] %v7839_v35  ;;  %v7846_v59 = vld [vmem:[%s6216_s14 + $0x598] sm:$0xff]  ;;  %v11693_v18 = vunpack.c.h.bf16 %v7839_v35 }
 0x16e   : > { %11661 = vst [vmem:[#allocation67_spill] sm:$0xff] %v7846_v59  ;;  %v7849_v53 = vld [vmem:[%s6216_s14 + $0x5d8] sm:$0xff]  ;;  %v2124_v19 = vsel %vm1616_vm0, %v11692_v14, 0.0  ;;  %v11694_v32 = vunpack.c.h.bf16 %v7846_v59 }
 0x16f   : > { %v7856_v27 = vld [vmem:[%s6216_s14 + $0x618] sm:$0xff] }
 0x170   : > { %v7859_v13 = vld [vmem:[%s6216_s14 + $0x658] sm:$0xff]  ;;  %v2327_v28 = vadd.f32 %v11694_v32, %v11693_v18  ;;  %v11701_v32 = vunpack.c.h.bf16 %v7812_v55 }
 0x171   : > { %v7869_v48 = vld [vmem:[%s6216_s14 + $0x6d8] sm:$0x11] }
 0x172   : > { %11662 = vst [vmem:[#allocation68_spill] sm:$0xff] %v7869_v48  ;;  %v7879_v38 = vld [vmem:[%s6216_s14 + $0x758] sm:$0xff] }
 0x173   : > { %11664 = vst [vmem:[#allocation70_spill] sm:$0xff] %v7879_v38  ;;  %v7896_v16 = vld [vmem:[%s6216_s14 + $0x818] sm:$0xff] }
 0x174   : > { %v7906_v43 = vld [vmem:[%s6216_s14 + $0x898] sm:$0x11] }
 0x175   : > { %11665 = vst [vmem:[#allocation71_spill] sm:$0xff] %v7906_v43  ;;  %v7999_v30 = vld [vmem:[%s6216_s14 + $0xd58] sm:$0xff]  ;;  %v11700_v35 = vunpack.c.h.bf16 %v7906_v43 }
 0x176   : > { %11682 = vst [vmem:[#allocation91_spill] sm:$0xff] %v7999_v30  ;;  %v8009_v52 = vld [vmem:[%s6216_s14 + $0xdd8] sm:$0x11]  ;;  %v1570_v63 = vunpack.c.h.bf16 %v7999_v30  ;;  %v11688_v30 = vunpack.c.h.bf16 %v7770_v4 }
 0x177   : > { %11683 = vst [vmem:[#allocation92_spill] sm:$0xff] %v8009_v52  ;;  %v2119_v52 = vadd.f32 %v11691_v24, %v11690_v56  ;;  %v11698_v56 = vunpack.c.h.bf16 %v7876_v40  ;;  %v11699_v24 = vunpack.c.h.bf16 %v7879_v38  ;;  %v2540_v59 = vsel %vm1616_vm0, %v11700_v35, 0.0 }
 0x178   : > { %v1911_v57 = vadd.f32 %v11688_v30, %v11687_v3  ;;  %v11695_v30 = vunpack.c.h.bf16 %v7869_v48  ;;  %v11705_v38 = vunpack.c.h.bf16 %v7747_v34  ;;  %v11707_v35 = vunpack.c.h.bf16 %v7886_v49 }
 0x179   : > { %v2535_v14 = vadd.f32 %v11699_v24, %v11698_v56  ;;  %v2120_v18 = vadd.f32 %v2119_v52, %v11701_v32  ;;  %v11706_v24 = vunpack.c.h.bf16 %v7780_v44  ;;  %v2951_v52 = vadd.f32 %v1410_v6, %v1394_v41 }
 0x17a   : > { %v2332_v3 = vsel %vm1616_vm0, %v11695_v30, 0.0  ;;  %v1912_v37 = vadd.f32 %v1911_v57, %v11697_v61  ;;  %v11702_v30 = vunpack.c.h.bf16 %v7849_v53  ;;  %v2743_v57 = vadd.f32 %v11704_v0, %v11703_v8 }
 0x17b   : > { %v2748_v61 = vsel %vm1616_vm0, %v1378_v1, 0.0  ;;  %v1705_v56 = vadd.f32 %v1704_v62, %v11705_v38  ;;  %v2536_v40 = vadd.f32 %v2535_v14, %v11707_v35  ;;  %v11708_v32 = vunpack.c.h.bf16 %v7815_v29 }
 0x17c   : > { %v2328_v48 = vadd.f32 %v2327_v28, %v11702_v30  ;;  %v1913_v43 = vadd.f32 %v1912_v37, %v11706_v24  ;;  %v11709_v30 = vunpack.c.h.bf16 %v7856_v27  ;;  %v11710_v8 = vunpack.c.h.bf16 %v7919_v10 }
 0x17d   : > { %v2121_v28 = vadd.f32 %v2120_v18, %v11708_v32  ;;  %v2956_v1 = vsel %vm1616_vm0, %v1490_v33, 0.0  ;;  %v11711_v38 = vunpack.c.h.bf16 %v7750_v7  ;;  %v11712_v37 = vunpack.c.h.bf16 %v7785_v36 }
 0x17e   : > { %v2329_v20 = vadd.f32 %v2328_v48, %v11709_v30  ;;  %v2744_v0 = vadd.f32 %v2743_v57, %v11710_v8  ;;  %v11713_v14 = vunpack.c.h.bf16 %v7889_v12  ;;  %v2952_v41 = vadd.f32 %v2951_v52, %v1426_v5 }
 0x17f   : > { %v1706_v62 = vadd.f32 %v1705_v56, %v11711_v38  ;;  %v1914_v24 = vadd.f32 %v1913_v43, %v11712_v37  ;;  %v11714_v18 = vunpack.c.h.bf16 %v7818_v51  ;;  %v11715_v48 = vunpack.c.h.bf16 %v7859_v13 }
 0x180   : > { %v2537_v6 = vadd.f32 %v2536_v40, %v11713_v14  ;;  %v11716_v57 = vunpack.c.h.bf16 %v7926_v50  ;;  %v3159_v33 = vadd.f32 %v1522_v15, %v1506_v26  ;;  %v11717_v8 = vunpack.c.h.bf16 %v7755_v58 }
 0x181   : > { %v2122_v35 = vadd.f32 %v2121_v28, %v11714_v18  ;;  %v2330_v32 = vadd.f32 %v2329_v20, %v11715_v48  ;;  %v11718_v38 = vunpack.c.h.bf16 %v7788_v46  ;;  %v11719_v37 = vunpack.c.h.bf16 %v7896_v16 }
 0x182   : > { %v2745_v30 = vadd.f32 %v2744_v0, %v11716_v57  ;;  %v1707_v56 = vadd.f32 %v1706_v62, %v11717_v8  ;;  %v2953_v5 = vadd.f32 %v2952_v41, %v1442_v45  ;;  %v11720_v52 = vunpack.c.h.bf16 %v7824_v23  ;;  %v11726_v41 = vld [vmem:[#allocation75_spill] sm:$0xff] }
 0x183   : > { %v1915_v43 = vadd.f32 %v1914_v24, %v11718_v38  ;;  %v2538_v40 = vadd.f32 %v2537_v6, %v11719_v37  ;;  %v11721_v14 = vunpack.c.h.bf16 %v7866_v22  ;;  %v11722_v18 = vunpack.c.h.bf16 %v7929_v47  ;;  %v11724_v24 = vld [vmem:[#allocation83_spill] sm:$0xff] }
 0x184   : > { %v2123_v28 = vadd.f32 %v2122_v35, %v11720_v52  ;;  %v3160_v26 = vadd.f32 %v3159_v33, %v1538_v60  ;;  %v1709_v15 = vadd.f32 %v1708_v31, %v1707_v56  ;;  %v11723_v62 = vunpack.c.h.bf16 %v7899_v17  ;;  %v11728_v47 = vld [vmem:[#allocation87_spill] sm:$0xff] }
 0x185   : > { %v2331_v20 = vadd.f32 %v2330_v32, %v11721_v14  ;;  %v2746_v0 = vadd.f32 %v2745_v30, %v11722_v18  ;;  %v1917_v48 = vadd.f32 %v1916_v2, %v1915_v43  ;;  %v11725_v8 = vunpack.c.h.bf16 %v11724_v24 }
 0x186   : > { %v2539_v57 = vadd.f32 %v2538_v40, %v11723_v62  ;;  %v2125_v6 = vadd.f32 %v2124_v19, %v2123_v28  ;;  %v11727_v37 = vunpack.c.h.bf16 %v11726_v41  ;;  %v3161_v52 = vadd.f32 %v3160_v26, %v1554_v9 }
 0x187   : > { %v2954_v38 = vadd.f32 %v2953_v5, %v11725_v8  ;;  %v2333_v45 = vadd.f32 %v2332_v3, %v2331_v20  ;;  %v1710_v50 = vrot.slane %v1709_v15, 4  ;;  %v1918_v32 = vrot.slane %v1917_v48, 4 }
 0x188   : > { %v2747_v35 = vadd.f32 %v2746_v0, %v11727_v37  ;;  %v2541_v14 = vadd.f32 %v2540_v59, %v2539_v57  ;;  %v11729_v30 = vunpack.c.h.bf16 %v11728_v47  ;;  %v2126_v31 = vrot.slane %v2125_v6, 4  ;;  %v11731_v37 = vld [vmem:[#allocation92_spill] sm:$0xff] }
 0x189   : > { %v2334_v2 = vrot.slane %v2333_v45, 4  ;;  %v3162_v56 = vadd.f32 %v3161_v52, %v1570_v63  ;;  %v1711_v43 = vadd.f32 %v1710_v50, %v1709_v15  ;;  %v1919_v40 = vadd.f32 %v1918_v32, %v1917_v48 }
 0x18a   : > { %v2955_v60 = vadd.f32 %v2954_v38, %v11729_v30  ;;  %v2749_v33 = vadd.f32 %v2748_v61, %v2747_v35  ;;  %v2542_v18 = vrot.slane %v2541_v14, 4  ;;  %v2127_v19 = vadd.f32 %v2126_v31, %v2125_v6 }
 0x18b   : > { %v2335_v3 = vadd.f32 %v2334_v2, %v2333_v45  ;;  %v11730_v20 = vunpack.c.h.bf16 %v8006_v39  ;;  %v1712_v0 = vrot.slane %v1711_v43, 2  ;;  %v1920_v26 = vrot.slane %v1919_v40, 2 }
 0x18c   : > { %v2957_v5 = vadd.f32 %v2956_v1, %v2955_v60  ;;  %v2750_v28 = vrot.slane %v2749_v33, 4  ;;  %v2543_v59 = vadd.f32 %v2542_v18, %v2541_v14  ;;  %v2128_v57 = vrot.slane %v2127_v19, 2 }
 0x18d   : > { %v3163_v9 = vadd.f32 %v3162_v56, %v11730_v20  ;;  %v2336_v8 = vrot.slane %v2335_v3, 2  ;;  %v11732_v61 = vunpack.c.h.bf16 %v11731_v37  ;;  %v1713_v50 = vadd.f32 %v1712_v0, %v1711_v43 }
 0x18e   : > { %v2958_v62 = vrot.slane %v2957_v5, 4  ;;  %v2751_v38 = vadd.f32 %v2750_v28, %v2749_v33  ;;  %v1921_v15 = vadd.f32 %v1920_v26, %v1919_v40  ;;  %v2544_v1 = vrot.slane %v2543_v59, 2 }
 0x18f   : > { %v3164_v63 = vsel %vm1616_vm0, %v11732_v61, 0.0  ;;  %v2129_v6 = vadd.f32 %v2128_v57, %v2127_v19  ;;  %v2337_v45 = vadd.f32 %v2336_v8, %v2335_v3  ;;  %v1714_v32 = vrot.slane %v1713_v50, 1 }
 0x190   : > { %v2959_v48 = vadd.f32 %v2958_v62, %v2957_v5  ;;  %v2752_v35 = vrot.slane %v2751_v38, 2  ;;  %v3165_v52 = vadd.f32 %v3164_v63, %v3163_v9  ;;  %v1922_v30 = vrot.slane %v1921_v15, 1 }
 0x191   : > { %v2545_v60 = vadd.f32 %v2544_v1, %v2543_v59  ;;  %v2130_v31 = vrot.slane %v2129_v6, 1  ;;  %v2338_v2 = vrot.slane %v2337_v45, 1  ;;  %v1715_v18 = vadd.f32 %v1714_v32, %v1713_v50 }
 0x192   : > { %v2960_v14 = vrot.slane %v2959_v48, 2  ;;  %v2753_v56 = vadd.f32 %v2752_v35, %v2751_v38  ;;  %v3166_v33 = vrot.slane %v3165_v52, 4  ;;  %v1923_v28 = vadd.f32 %v1922_v30, %v1921_v15  ;;  %v11733_v30 = vld [vmem:[#allocation85_spill] sm:$0xff] }
 0x193   : > { %v2546_v20 = vrot.slane %v2545_v60, 1  ;;  %v2131_v43 = vadd.f32 %v2130_v31, %v2129_v6  ;;  %v2339_v40 = vadd.f32 %v2338_v2, %v2337_v45  ;;  %v3283_v26 = vpack.c.bf16 %v1715_v18, %v1715_v18 }
 0x194   : > { %v2961_v61 = vadd.f32 %v2960_v14, %v2959_v48  ;;  %v2754_v0 = vrot.slane %v2753_v56, 1  ;;  %v3167_v5 = vadd.f32 %v3166_v33, %v3165_v52  ;;  %v3299_v9 = vpack.c.bf16 %v1923_v28, %v1923_v28  ;;  %v11735_v14 = vld [vmem:[#allocation79_spill] sm:$0xff]  ;;  %v11737_v28 = vld [vmem:[#allocation14_spill] sm:$0xff] }
 0x195   : > { %v2547_v19 = vadd.f32 %v2546_v20, %v2545_v60  ;;  %v3315_v59 = vpack.c.bf16 %v2131_v43, %v2131_v43  ;;  %v3331_v8 = vpack.c.bf16 %v2339_v40, %v2339_v40  ;;  %v3802_v38 = vunpack.c.l.b16 %v3283_v26 }
 0x196   : > { %v2962_v3 = vrot.slane %v2961_v61, 1  ;;  %v2755_v62 = vadd.f32 %v2754_v0, %v2753_v56  ;;  %v3168_v57 = vrot.slane %v3167_v5, 2  ;;  %v3818_v35 = vunpack.c.l.b16 %v3299_v9  ;;  %v11739_v0 = vld [vmem:[#allocation86_spill] sm:$0xff]  ;;  %v11743_v9 = vld [vmem:[#allocation15_spill] sm:$0xff] }
 0x197   : > { %v3347_v1 = vpack.c.bf16 %v2547_v19, %v2547_v19  ;;  %v3834_v32 = vunpack.c.l.b16 %v3315_v59  ;;  %v3850_v48 = vunpack.c.l.b16 %v3331_v8  ;;  %v11734_v60 = vunpack.c.l.bf16 %v11733_v30  ;;  %v11751_v30 = vld [vmem:[#allocation93_spill] sm:$0xff] }
 0x198   : > { %v2963_v63 = vadd.f32 %v2962_v3, %v2961_v61  ;;  %v3169_v50 = vadd.f32 %v3168_v57, %v3167_v5  ;;  %v3363_v15 = vpack.c.bf16 %v2755_v62, %v2755_v62  ;;  %v3979_v52 = vsel %vm3923_vm1, %v3818_v35, %v3802_v38  ;;  %v11741_v3 = vld [vmem:[#allocation10_spill] sm:$0xff]  ;;  %v11747_v35 = vld [vmem:[#allocation17_spill] sm:$0xff] }
 0x199   : > { %v3866_v45 = vunpack.c.l.b16 %v3347_v1  ;;  %v11736_v31 = vunpack.c.l.bf16 %v11735_v14  ;;  %v3980_v18 = vsel %vm3925_vm2, %v3834_v32, %v3979_v52  ;;  %v11738_v20 = vunpack.c.l.bf16 %v11737_v28  ;;  %v11749_v32 = vld [vmem:[#allocation28_spill] sm:$0xff] }
 0x19a   : > { %v3379_v6 = vpack.c.bf16 %v2963_v63, %v2963_v63  ;;  %v3170_v56 = vrot.slane %v3169_v50, 1  ;;  %v3882_v33 = vunpack.c.l.b16 %v3363_v15  ;;  %v3981_v40 = vsel %vm3927_vm3, %v3850_v48, %v3980_v18  ;;  %v11745_v63 = vld [vmem:[#allocation11_spill] sm:$0xff] }
 0x19b   : > { %v1664_v2 = vadd.f32 %v11736_v31, %v11734_v60  ;;  %v1669_v61 = vsel %vm1616_vm0, %v11738_v20, 0.0  ;;  %v11740_v5 = vunpack.c.l.bf16 %v11739_v0  ;;  %v11742_v26 = vunpack.c.l.bf16 %v11741_v3  ;;  %v11753_v31 = vld [vmem:[#allocation16_spill] sm:$0xff]  ;;  %v11759_v3 = vld [vmem:[#allocation35_spill] sm:$0xff] }
 0x19c   : > { %v3898_v43 = vunpack.c.l.b16 %v3379_v6  ;;  %v11744_v62 = vunpack.c.l.bf16 %v11743_v9  ;;  %v3171_v59 = vadd.f32 %v3170_v56, %v3169_v50  ;;  %v3982_v8 = vsel %vm3929_vm4, %v3866_v45, %v3981_v40  ;;  %v11755_v50 = vld [vmem:[#allocation18_spill] sm:$0xff]  ;;  %v11757_v40 = vld [vmem:[#allocation24_spill] sm:$0xff] }
 0x19d   : > { %v1665_v19 = vadd.f32 %v1664_v2, %v11740_v5  ;;  %v11746_v1 = vunpack.c.l.bf16 %v11745_v63  ;;  %v11748_v15 = vunpack.c.l.bf16 %v11747_v35  ;;  %v11750_v6 = vunpack.c.l.bf16 %v11749_v32  ;;  %v11761_v9 = vld [vmem:[#allocation36_spill] sm:$0xff] }
 0x19e   : > { %v1872_v57 = vadd.f32 %v11744_v62, %v11742_v26  ;;  %v3983_v52 = vsel %vm3931_vm5, %v3882_v33, %v3982_v8  ;;  %v11752_v60 = vunpack.c.l.bf16 %v11751_v30  ;;  %v11754_v2 = vunpack.c.l.bf16 %v11753_v31  ;;  %v11763_v8 = vld [vmem:[#allocation8_spill] sm:$0xff]  ;;  %v11773_v31 = vld [vmem:[#allocation29_spill] sm:$0xff] }
 0x19f   : > { %v1877_v38 = vsel %vm1616_vm0, %v11746_v1, 0.0  ;;  %v2080_v48 = vadd.f32 %v11750_v6, %v11748_v15  ;;  %v11756_v56 = vunpack.c.l.bf16 %v11755_v50  ;;  %v3395_v28 = vpack.c.bf16 %v3171_v59, %v3171_v59  ;;  %v11765_v1 = vld [vmem:[#allocation21_spill] sm:$0xff]  ;;  %v11769_v6 = vld [vmem:[#allocation19_spill] sm:$0xff] }
 0x1a0   : > { %v1666_v14 = vadd.f32 %v1665_v19, %v11752_v60  ;;  %v1873_v18 = vadd.f32 %v1872_v57, %v11754_v2  ;;  %v3984_v20 = vsel %vm3933_vm6, %v3898_v43, %v3983_v52  ;;  %v11758_v0 = vunpack.c.l.bf16 %v11757_v40  ;;  %v11767_v15 = vld [vmem:[#allocation13_spill] sm:$0xff]  ;;  %v11771_v52 = vld [vmem:[#allocation38_spill] sm:$0xff] }
 0x1a1   : > { %v2085_v45 = vsel %vm1616_vm0, %v11756_v56, 0.0  ;;  %v11760_v26 = vunpack.c.l.bf16 %v11759_v3  ;;  %v11762_v33 = vunpack.c.l.bf16 %v11761_v9  ;;  %v11764_v19 = vunpack.c.l.bf16 %v11763_v8  ;;  %v11775_v56 = vld [vmem:[#allocation37_spill] sm:$0xff]  ;;  %v11781_v8 = vld [vmem:[#allocation22_spill] sm:$0xff] }
 0x1a2   : > { %v2081_v5 = vadd.f32 %v2080_v48, %v11758_v0  ;;  %v11766_v57 = vunpack.c.l.bf16 %v11765_v1  ;;  %v11768_v32 = vunpack.c.l.bf16 %v11767_v15  ;;  %v11770_v43 = vunpack.c.l.bf16 %v11769_v6 }
 0x1a3   : > { %v2288_v62 = vadd.f32 %v11762_v33, %v11760_v26  ;;  %v1667_v63 = vadd.f32 %v1666_v14, %v11764_v19  ;;  %v11772_v30 = vunpack.c.l.bf16 %v11771_v52  ;;  %v3914_v60 = vunpack.c.l.b16 %v3395_v28  ;;  %v11777_v14 = vld [vmem:[#allocation49_spill] sm:$0xff]  ;;  %v11785_v28 = vld [vmem:[#allocation20_spill] sm:$0xff] }
 0x1a4   : > { %v1874_v35 = vadd.f32 %v1873_v18, %v11766_v57  ;;  %v2293_v59 = vsel %vm1616_vm0, %v11768_v32, 0.0  ;;  %v11774_v2 = vunpack.c.l.bf16 %v11773_v31  ;;  %v11776_v40 = vunpack.c.l.bf16 %v11775_v56  ;;  %v11779_v26 = vld [vmem:[#allocation9_spill] sm:$0xff]  ;;  %v11783_v57 = vld [vmem:[#allocation43_spill] sm:$0xff] }
 0x1a5   : > { %v2496_v48 = vadd.f32 %v11772_v30, %v11770_v43  ;;  %v11778_v3 = vunpack.c.l.bf16 %v11777_v14  ;;  %v11780_v9 = vunpack.c.l.bf16 %v11779_v26  ;;  %v11782_v19 = vunpack.c.l.bf16 %v11781_v8  ;;  %v11787_v43 = vld [vmem:[#allocation39_spill] sm:$0xff]  ;;  %v11789_v30 = vld [vmem:[#allocation30_spill] sm:$0xff]  ;;  %v11791_v56 = vld [vmem:[#allocation25_spill] sm:$0xff] }
 0x1a6   : > { %v2082_v50 = vadd.f32 %v2081_v5, %v11774_v2  ;;  %v2289_v0 = vadd.f32 %v2288_v62, %v11776_v40  ;;  %v11784_v15 = vunpack.c.l.bf16 %v11783_v57  ;;  %v11786_v6 = vunpack.c.l.bf16 %v11785_v28  ;;  %v11797_v57 = vld [vmem:[#allocation44_spill] sm:$0xff] }
 0x1a7   : > { %v2501_v18 = vsel %vm1616_vm0, %v11778_v3, 0.0  ;;  %v1668_v33 = vadd.f32 %v1667_v63, %v11780_v9  ;;  %v1875_v1 = vadd.f32 %v1874_v35, %v11782_v19  ;;  %v11788_v5 = vunpack.c.l.bf16 %v11787_v43  ;;  %v11793_v63 = vld [vmem:[#allocation51_spill] sm:$0xff] }
 0x1a8   : > { %v2497_v32 = vadd.f32 %v2496_v48, %v11784_v15  ;;  %v3985_v62 = vsel %vm3935_vm7, %v3914_v60, %v3984_v20  ;;  %v11790_v31 = vunpack.c.l.bf16 %v11789_v30  ;;  %v11792_v40 = vunpack.c.l.bf16 %v11791_v56  ;;  %v11795_v48 = vld [vmem:[#allocation23_spill] sm:$0xff]  ;;  %v11805_v56 = vld [vmem:[#allocation40_spill] sm:$0xff] }
 0x1a9   : > { %v2704_v52 = vadd.f32 %v11788_v5, %v11786_v6  ;;  %v11794_v3 = vunpack.c.l.bf16 %v11793_v63  ;;  %v4049_v26 = vpack.c.b16 %v3985_v62, %v3985_v62  ;;  %v1670_v9 = vadd.f32 %v1669_v61, %v1668_v33  ;;  %v11799_v6 = vld [vmem:[#allocation12_spill] sm:$0xff]  ;;  %v11801_v43 = vld [vmem:[#allocation31_spill] sm:$0xff] }
 0x1aa   : > { %v2083_v2 = vadd.f32 %v2082_v50, %v11790_v31  ;;  %v2290_v14 = vadd.f32 %v2289_v0, %v11792_v40  ;;  %v11796_v8 = vunpack.c.l.bf16 %v11795_v48  ;;  %v11798_v15 = vunpack.c.l.bf16 %v11797_v57  ;;  %v11803_v30 = vld [vmem:[#allocation27_spill] sm:$0xff]  ;;  %v11807_v63 = vld [vmem:[#allocation56_spill] sm:$0xff] }
 0x1ab   : > { %v2709_v35 = vsel %vm1616_vm0, %v11794_v3, 0.0  ;;  %v11800_v20 = vunpack.c.l.bf16 %v11799_v6  ;;  %v11802_v50 = vunpack.c.l.bf16 %v11801_v43  ;;  %v11804_v0 = vunpack.c.l.bf16 %v11803_v30  ;;  %4994 = vmatprep.mubr.bf16.mxu1 %v4049_v26  ;;  %v11809_v3 = vld [vmem:[#allocation26_spill] sm:$0xff] }
 0x1ac   : > { %v1876_v19 = vadd.f32 %v1875_v1, %v11796_v8  ;;  %v2498_v28 = vadd.f32 %v2497_v32, %v11798_v15  ;;  %v11806_v40 = vunpack.c.l.bf16 %v11805_v56  ;;  %v11808_v62 = vunpack.c.l.bf16 %v11807_v63  ;;  %v11811_v8 = vld [vmem:[#allocation57_spill] sm:$0xff]  ;;  %v11817_v30 = vld [vmem:[#allocation34_spill] sm:$0xff] }
 0x1ad   : > { %v2084_v60 = vadd.f32 %v2083_v2, %v11800_v20  ;;  %v2291_v5 = vadd.f32 %v2290_v14, %v11802_v50  ;;  %v2705_v31 = vadd.f32 %v2704_v52, %v11804_v0  ;;  %v1671_v33 = vrot.slane %v1670_v9, 4  ;;  %v11813_v14 = vld [vmem:[#allocation42_spill] sm:$0xff]  ;;  %v11815_v52 = vld [vmem:[#allocation33_spill] sm:$0xff] }
 0x1ae   : > { %v2912_v61 = vadd.f32 %v11808_v62, %v11806_v40  ;;  %v1878_v1 = vadd.f32 %v1877_v38, %v1876_v19  ;;  %v11810_v48 = vunpack.c.l.bf16 %v11809_v3  ;;  %v11812_v57 = vunpack.c.l.bf16 %v11811_v8  ;;  %v11819_v38 = vld [vmem:[#allocation32_spill] sm:$0xff]  ;;  %v11823_v3 = vld [vmem:[#allocation47_spill] sm:$0xff] }
 0x1af   : > { %v2086_v15 = vadd.f32 %v2085_v45, %v2084_v60  ;;  %v11814_v6 = vunpack.c.l.bf16 %v11813_v14  ;;  %v11816_v43 = vunpack.c.l.bf16 %v11815_v52  ;;  %v11818_v0 = vunpack.c.l.bf16 %v11817_v30 }
 0x1b0   : > { %v2499_v32 = vadd.f32 %v2498_v28, %v11810_v48  ;;  %v2917_v2 = vsel %vm1616_vm0, %v11812_v57, 0.0  ;;  %v1672_v26 = vadd.f32 %v1671_v33, %v1670_v9  ;;  %v1879_v40 = vrot.slane %v1878_v1, 4  ;;  %v11821_v28 = vld [vmem:[#allocation58_spill] sm:$0xff]  ;;  %v11825_v57 = vld [vmem:[#allocation45_spill] sm:$0xff] }
 0x1b1   : > { %v2292_v20 = vadd.f32 %v2291_v5, %v11814_v6  ;;  %v2706_v50 = vadd.f32 %v2705_v31, %v11816_v43  ;;  %v2913_v56 = vadd.f32 %v2912_v61, %v11818_v0  ;;  %v11820_v19 = vunpack.c.l.bf16 %v11819_v38  ;;  %v11827_v6 = vld [vmem:[#allocation46_spill] sm:$0xff]  ;;  %v11829_v33 = vld [vmem:[#allocation53_spill] sm:$0xff] }
 0x1b2   : > { %v11822_v62 = vunpack.c.l.bf16 %v11821_v28  ;;  %v11824_v48 = vunpack.c.l.bf16 %v11823_v3  ;;  %v2087_v45 = vrot.slane %v2086_v15, 4  ;;  %v11826_v5 = vunpack.c.l.bf16 %v11825_v57 }
 0x1b3   : > { %v2500_v63 = vadd.f32 %v2499_v32, %v11820_v19  ;;  %v2294_v60 = vadd.f32 %v2293_v59, %v2292_v20  ;;  %v11828_v31 = vunpack.c.l.bf16 %v11827_v6  ;;  %v1673_v43 = vrot.slane %v1672_v26, 2  ;;  %v11831_v19 = vld [vmem:[#allocation50_spill] sm:$0xff] }
 0x1b4   : > { %v3120_v8 = vadd.f32 %v11824_v48, %v11822_v62  ;;  %v2707_v14 = vadd.f32 %v2706_v50, %v11826_v5  ;;  %v1880_v61 = vadd.f32 %v1879_v40, %v1878_v1  ;;  %v11830_v30 = vunpack.c.l.bf16 %v11829_v33  ;;  %v11833_v62 = vld [vmem:[#allocation52_spill] sm:$0xff]  ;;  %v11835_v5 = vld [vmem:[#allocation59_spill] sm:$0xff]  ;;  %v11837_v40 = vld [vmem:[#allocation41_spill] sm:$0xff] }
 0x1b5   : > { %v2914_v52 = vadd.f32 %v2913_v56, %v11828_v31  ;;  %v2502_v9 = vadd.f32 %v2501_v18, %v2500_v63  ;;  %v2088_v32 = vadd.f32 %v2087_v45, %v2086_v15  ;;  %v2295_v38 = vrot.slane %v2294_v60, 4 }
 0x1b6   : > { %v3121_v0 = vadd.f32 %v3120_v8, %v11830_v30  ;;  %v11832_v28 = vunpack.c.l.bf16 %v11831_v19  ;;  %v11834_v48 = vunpack.c.l.bf16 %v11833_v62  ;;  %v1674_v20 = vadd.f32 %v1673_v43, %v1672_v26  ;;  %v11839_v30 = vld [vmem:[#allocation48_spill] sm:$0xff] }
 0x1b7   : > { %v1881_v57 = vrot.slane %v1880_v61, 2  ;;  %v2503_v50 = vrot.slane %v2502_v9, 4  ;;  %v11836_v6 = vunpack.c.l.bf16 %v11835_v5  ;;  %v2089_v31 = vrot.slane %v2088_v32, 2 }
 0x1b8   : > { %v2708_v3 = vadd.f32 %v2707_v14, %v11832_v28  ;;  %v2915_v59 = vadd.f32 %v2914_v52, %v11834_v48  ;;  %v2296_v1 = vadd.f32 %v2295_v38, %v2294_v60  ;;  %v11838_v63 = vunpack.c.l.bf16 %v11837_v40 }
 0x1b9   : > { %v3122_v56 = vadd.f32 %v3121_v0, %v11836_v6  ;;  %v1675_v15 = vrot.slane %v1674_v20, 1  ;;  %v1882_v45 = vadd.f32 %v1881_v57, %v1880_v61  ;;  %v2504_v33 = vadd.f32 %v2503_v50, %v2502_v9  ;;  %v11841_v0 = vld [vmem:[#allocation54_spill] sm:$0xff]  ;;  %v11843_v9 = vld [vmem:[#allocation60_spill] sm:$0xff] }
 0x1ba   : > { %v2710_v18 = vadd.f32 %v2709_v35, %v2708_v3  ;;  %v2916_v8 = vadd.f32 %v2915_v59, %v11838_v63  ;;  %v11840_v14 = vunpack.c.l.bf16 %v11839_v30  ;;  %v2090_v28 = vadd.f32 %v2089_v31, %v2088_v32 }
 0x1bb   : > { %v2297_v52 = vrot.slane %v2296_v1, 2  ;;  %v1676_v62 = vadd.f32 %v1675_v15, %v1674_v20  ;;  %v1883_v48 = vrot.slane %v1882_v45, 1  ;;  %v2505_v5 = vrot.slane %v2504_v33, 2 }
 0x1bc   : > { %v3123_v19 = vadd.f32 %v3122_v56, %v11840_v14  ;;  %v2711_v26 = vrot.slane %v2710_v18, 4  ;;  %v2918_v43 = vadd.f32 %v2917_v2, %v2916_v8  ;;  %v11842_v6 = vunpack.c.l.bf16 %v11841_v0 }
 0x1bd   : > { %v2091_v35 = vrot.slane %v2090_v28, 1  ;;  %v2298_v38 = vadd.f32 %v2297_v52, %v2296_v1  ;;  %v1884_v40 = vadd.f32 %v1883_v48, %v1882_v45  ;;  %v2506_v61 = vadd.f32 %v2505_v5, %v2504_v33 }
 0x1be   : > { %v3124_v60 = vadd.f32 %v3123_v19, %v11842_v6  ;;  %v2712_v3 = vadd.f32 %v2711_v26, %v2710_v18  ;;  %v2919_v59 = vrot.slane %v2918_v43, 4  ;;  %v11844_v57 = vunpack.c.l.bf16 %v11843_v9  ;;  %v11845_v26 = vld [vmem:[#allocation55_spill] sm:$0xff] }
 0x1bf   : > { %v3280_v32 = vpack.c.bf16 %v1676_v62, %v1676_v62  ;;  %v2092_v56 = vadd.f32 %v2091_v35, %v2090_v28  ;;  %v2299_v31 = vrot.slane %v2298_v38, 1  ;;  %v2507_v63 = vrot.slane %v2506_v61, 1 }
 0x1c0   : > { %v3125_v50 = vsel %vm1616_vm0, %v11844_v57, 0.0  ;;  %v2713_v2 = vrot.slane %v2712_v3, 2  ;;  %v2920_v20 = vadd.f32 %v2919_v59, %v2918_v43  ;;  %v3296_v15 = vpack.c.bf16 %v1884_v40, %v1884_v40 }
 0x1c1   : > { %v3126_v8 = vadd.f32 %v3125_v50, %v3124_v60  ;;  %v3799_v30 = vunpack.c.l.b16 %v3280_v32  ;;  %v2300_v14 = vadd.f32 %v2299_v31, %v2298_v38  ;;  %v3312_v18 = vpack.c.bf16 %v2092_v56, %v2092_v56  ;;  %v11850_v31 = vld [vmem:[#allocation61_spill] sm:$0xff] }
 0x1c2   : > { %v2714_v19 = vadd.f32 %v2713_v2, %v2712_v3  ;;  %v2921_v1 = vrot.slane %v2920_v20, 2  ;;  %v2508_v52 = vadd.f32 %v2507_v63, %v2506_v61  ;;  %v3815_v33 = vunpack.c.l.b16 %v3296_v15 }
 0x1c3   : > { %v3127_v45 = vrot.slane %v3126_v8, 4  ;;  %v11846_v48 = vunpack.c.l.bf16 %v11845_v26  ;;  %v11847_v5 = vunpack.c.l.bf16 %v7738_v21  ;;  %v3328_v6 = vpack.c.bf16 %v2300_v14, %v2300_v14 }
 0x1c4   : > { %v2715_v28 = vrot.slane %v2714_v19, 1  ;;  %v2922_v0 = vadd.f32 %v2921_v1, %v2920_v20  ;;  %v3831_v43 = vunpack.c.l.b16 %v3312_v18  ;;  %v3344_v60 = vpack.c.bf16 %v2508_v52, %v2508_v52 }
 0x1c5   : > { %v1690_v62 = vadd.f32 %v11847_v5, %v11846_v48  ;;  %v3128_v35 = vadd.f32 %v3127_v45, %v3126_v8  ;;  %v3958_v59 = vsel %vm3923_vm1, %v3815_v33, %v3799_v30  ;;  %v11848_v38 = vunpack.c.l.bf16 %v7742_v54  ;;  %v11852_v54 = vld [vmem:[#allocation62_spill] sm:$0xff]  ;;  %v11856_v45 = vld [vmem:[#allocation63_spill] sm:$0xff] }
 0x1c6   : > { %v2716_v40 = vadd.f32 %v2715_v28, %v2714_v19  ;;  %v2923_v61 = vrot.slane %v2922_v0, 1  ;;  %v3847_v9 = vunpack.c.l.b16 %v3328_v6  ;;  %v3959_v57 = vsel %vm3925_vm2, %v3831_v43, %v3958_v59  ;;  %v11861_v43 = vld [vmem:[#allocation65_spill] sm:$0xff] }
 0x1c7   : > { %v1691_v3 = vadd.f32 %v1690_v62, %v11848_v38  ;;  %v3129_v50 = vrot.slane %v3128_v35, 2  ;;  %v3863_v32 = vunpack.c.l.b16 %v3344_v60  ;;  %v11849_v21 = vunpack.c.l.bf16 %v7747_v34 }
 0x1c8   : > { %v11851_v2 = vunpack.c.l.bf16 %v11850_v31  ;;  %v2924_v63 = vadd.f32 %v2923_v61, %v2922_v0  ;;  %v3360_v8 = vpack.c.bf16 %v2716_v40, %v2716_v40  ;;  %v3960_v15 = vsel %vm3927_vm3, %v3847_v9, %v3959_v57  ;;  %v11859_v0 = vld [vmem:[#allocation64_spill] sm:$0xff]  ;;  %v11865_v40 = vld [vmem:[#allocation66_spill] sm:$0xff]  ;;  %v11867_v9 = vld [vmem:[#allocation67_spill] sm:$0xff] }
 0x1c9   : > { %v1692_v56 = vadd.f32 %v1691_v3, %v11849_v21  ;;  %v11853_v30 = vunpack.c.l.bf16 %v11852_v54  ;;  %v11854_v14 = vunpack.c.l.bf16 %v7770_v4  ;;  %v3130_v1 = vadd.f32 %v3129_v50, %v3128_v35 }
 0x1ca   : > { %v1695_v20 = vsel %vm1616_vm0, %v11851_v2, 0.0  ;;  %v3961_v18 = vsel %vm3929_vm4, %v3863_v32, %v3960_v15  ;;  %v11855_v52 = vunpack.c.l.bf16 %v7750_v7  ;;  %v11857_v33 = vunpack.c.l.bf16 %v11856_v45  ;;  %v11872_v15 = vld [vmem:[#allocation68_spill] sm:$0xff]  ;;  %v11878_v45 = vld [vmem:[#allocation70_spill] sm:$0xff] }
 0x1cb   : > { %v1898_v19 = vadd.f32 %v11854_v14, %v11853_v30  ;;  %v3376_v48 = vpack.c.bf16 %v2924_v63, %v2924_v63  ;;  %v3879_v5 = vunpack.c.l.b16 %v3360_v8  ;;  %v11858_v62 = vunpack.c.l.bf16 %v7777_v25 }
 0x1cc   : > { %v1693_v34 = vadd.f32 %v1692_v56, %v11855_v52  ;;  %v1903_v26 = vsel %vm1616_vm0, %v11857_v33, 0.0  ;;  %v11860_v6 = vunpack.c.l.bf16 %v11859_v0  ;;  %v11862_v4 = vunpack.c.l.bf16 %v11861_v43 }
 0x1cd   : > { %v1899_v28 = vadd.f32 %v1898_v19, %v11858_v62  ;;  %v3131_v35 = vrot.slane %v3130_v1, 1  ;;  %v11863_v59 = vunpack.c.l.bf16 %v7755_v58  ;;  %v11864_v7 = vunpack.c.l.bf16 %v7836_v11  ;;  %v11881_v62 = vld [vmem:[#allocation71_spill] sm:$0xff] }
 0x1ce   : > { %v2106_v60 = vadd.f32 %v11862_v4, %v11860_v6  ;;  %v11866_v61 = vunpack.c.l.bf16 %v11865_v40  ;;  %v11868_v57 = vunpack.c.l.bf16 %v11867_v9  ;;  %v3895_v25 = vunpack.c.l.b16 %v3376_v48 }
 0x1cf   : > { %v1694_v38 = vadd.f32 %v1693_v34, %v11863_v59  ;;  %v2111_v3 = vsel %vm1616_vm0, %v11864_v7, 0.0  ;;  %v3962_v32 = vsel %vm3931_vm5, %v3879_v5, %v3961_v18  ;;  %v11869_v21 = vunpack.c.l.bf16 %v7780_v44  ;;  %v11876_v34 = vld [vmem:[#allocation69_spill] sm:$0xff] }
 0x1d0   : > { %v2314_v50 = vadd.f32 %v11868_v57, %v11866_v61  ;;  %v11870_v31 = vunpack.c.l.bf16 %v7812_v55  ;;  %v3132_v58 = vadd.f32 %v3131_v35, %v3130_v1  ;;  %v11871_v11 = vunpack.c.l.bf16 %v7849_v53  ;;  %v11886_v35 = vld [vmem:[#allocation72_spill] sm:$0xff] }
 0x1d1   : > { %v1900_v56 = vadd.f32 %v1899_v28, %v11869_v21  ;;  %v1696_v63 = vadd.f32 %v1695_v20, %v1694_v38  ;;  %v11873_v54 = vunpack.c.l.bf16 %v11872_v15  ;;  %v3963_v14 = vsel %vm3933_vm6, %v3895_v25, %v3962_v32  ;;  %v11890_v57 = vld [vmem:[#allocation76_spill] sm:$0xff] }
 0x1d2   : > { %v2107_v2 = vadd.f32 %v2106_v60, %v11870_v31  ;;  %v2315_v8 = vadd.f32 %v2314_v50, %v11871_v11  ;;  %v11874_v19 = vunpack.c.l.bf16 %v7785_v36  ;;  %v11875_v44 = vunpack.c.l.bf16 %v7815_v29 }
 0x1d3   : > { %v2319_v30 = vsel %vm1616_vm0, %v11873_v54, 0.0  ;;  %v11877_v55 = vunpack.c.l.bf16 %v11876_v34  ;;  %v11879_v1 = vunpack.c.l.bf16 %v11878_v45  ;;  %v3392_v33 = vpack.c.bf16 %v3132_v58, %v3132_v58  ;;  %v11903_v45 = vld [vmem:[#allocation82_spill] sm:$0xff] }
 0x1d4   : > { %v1901_v18 = vadd.f32 %v1900_v56, %v11874_v19  ;;  %v2108_v52 = vadd.f32 %v2107_v2, %v11875_v44  ;;  %v1697_v53 = vrot.slane %v1696_v63, 4  ;;  %v11880_v48 = vunpack.c.l.bf16 %v7856_v27 }
 0x1d5   : > { %v2522_v20 = vadd.f32 %v11879_v1, %v11877_v55  ;;  %v11882_v28 = vunpack.c.l.bf16 %v11881_v62  ;;  %v11883_v36 = vunpack.c.l.bf16 %v7788_v46  ;;  %v11884_v29 = vunpack.c.l.bf16 %v7818_v51 }
 0x1d6   : > { %v2316_v5 = vadd.f32 %v2315_v8, %v11880_v48  ;;  %v11885_v4 = vunpack.c.l.bf16 %v7886_v49  ;;  %v11887_v59 = vunpack.c.l.bf16 %v11886_v35  ;;  %v11888_v38 = vunpack.c.l.bf16 %v7916_v42  ;;  %v11898_v8 = vld [vmem:[#allocation81_spill] sm:$0xff] }
 0x1d7   : > { %v2527_v0 = vsel %vm1616_vm0, %v11882_v28, 0.0  ;;  %v1902_v6 = vadd.f32 %v1901_v18, %v11883_v36  ;;  %v2109_v43 = vadd.f32 %v2108_v52, %v11884_v29  ;;  %v3911_v27 = vunpack.c.l.b16 %v3392_v33  ;;  %v11901_v52 = vld [vmem:[#allocation73_spill] sm:$0xff] }
 0x1d8   : > { %v2523_v60 = vadd.f32 %v2522_v20, %v11885_v4  ;;  %v2730_v7 = vadd.f32 %v11888_v38, %v11887_v59  ;;  %v1698_v40 = vadd.f32 %v1697_v53, %v1696_v63  ;;  %v11889_v61 = vunpack.c.l.bf16 %v7859_v13  ;;  %v11896_v63 = vld [vmem:[#allocation80_spill] sm:$0xff]  ;;  %v5873_v35 = vld [vmem:[%s10777_s1 + $0x208] sm:$0xff]  }
 0x1d9   : > { %v11891_v50 = vunpack.c.l.bf16 %v11890_v57  ;;  %v1904_v25 = vadd.f32 %v1903_v26, %v1902_v6  ;;  %v11892_v51 = vunpack.c.l.bf16 %v7824_v23  ;;  %v11893_v49 = vunpack.c.l.bf16 %v7889_v12  ;;  %v5869_v23 = vld [vmem:[%s10777_s1 + $0x200] sm:$0xff]   ;;  %v11908_v6 = vld [vmem:[#allocation74_spill] sm:$0xff] }
 0x1da   : > { %v2317_v9 = vadd.f32 %v2316_v5, %v11889_v61  ;;  %v11894_v56 = vunpack.c.l.bf16 %v7919_v10  ;;  %v3964_v31 = vsel %vm3935_vm7, %v3911_v27, %v3963_v14  ;;  %v1699_v2 = vrot.slane %v1698_v40, 2  ;;  %v5875_v57 = vld [vmem:[%s10777_s1 + $0x250] sm:$0xff]  }
 0x1db   : > { %v2735_v46 = vsel %vm1616_vm0, %v11891_v50, 0.0  ;;  %v2110_v32 = vadd.f32 %v2109_v43, %v11892_v51  ;;  %v2524_v21 = vadd.f32 %v2523_v60, %v11893_v49  ;;  %v11895_v13 = vunpack.c.l.bf16 %v7866_v22  ;;  %v5871_v22 = vld [vmem:[%s10777_s1 + $0x248] sm:$0xff]  }
 0x1dc   : > { %v2731_v42 = vadd.f32 %v2730_v7, %v11894_v56  ;;  %v11897_v11 = vunpack.c.l.bf16 %v11896_v63  ;;  %v11899_v15 = vunpack.c.l.bf16 %v11898_v8  ;;  %v4046_v12 = vpack.c.b16 %v3964_v31, %v3964_v31  ;;  %v11910_v43 = vld [vmem:[#allocation77_spill] sm:$0xff]  ;;  %v11912_v7 = vld [vmem:[#allocation84_spill] sm:$0xff] }
 0x1dd   : > { %v2318_v58 = vadd.f32 %v2317_v9, %v11895_v13  ;;  %v1905_v54 = vrot.slane %v1904_v25, 4  ;;  %v2112_v19 = vadd.f32 %v2111_v3, %v2110_v32  ;;  %v11900_v10 = vunpack.c.l.bf16 %v7896_v16  ;;  %v11906_v16 = vld [vmem:[#allocation78_spill] sm:$0xff]  ;;  %v11918_v31 = vld [vmem:[#allocation89_spill] sm:$0xff] }
 0x1de   : > { %v2938_v26 = vadd.f32 %v11899_v15, %v11897_v11  ;;  %v1700_v14 = vadd.f32 %v1699_v2, %v1698_v40  ;;  %v11902_v34 = vunpack.c.l.bf16 %v11901_v52  ;;  %v11904_v1 = vunpack.c.l.bf16 %v11903_v45  ;;  %4955 = vmatmul.mubr.bf16.vlgmr.msra.gmra.mrb[4].mxu0 %v4046_v12  ;;  %v11914_v40 = vld [vmem:[#allocation88_spill] sm:$0xff] }
 0x1df   : > { %v2525_v18 = vadd.f32 %v2524_v21, %v11900_v10  ;;  %v2320_v44 = vadd.f32 %v2319_v30, %v2318_v58  ;;  %v1906_v33 = vadd.f32 %v1905_v54, %v1904_v25  ;;  %v2113_v53 = vrot.slane %v2112_v19, 4  ;;  %5640 = vmatpush3.bf16.msra.mxu0 %v5869_v23  ;;  %v11922_v54 = vld [vmem:[#allocation90_spill] sm:$0xff] }
 0x1e0   : > { %v2732_v55 = vadd.f32 %v2731_v42, %v11902_v34  ;;  %v2939_v20 = vadd.f32 %v2938_v26, %v11904_v1  ;;  %v11905_v3 = vunpack.c.l.bf16 %v7899_v17  ;;  %v11907_v5 = vunpack.c.l.bf16 %v11906_v16  ;;  %5641 = vmatprep.subr.bf16.mxu0 %v5871_v22  ;;  %v11924_v34 = vld [vmem:[#allocation91_spill] sm:$0xff]  ;;  %v8396_v1 = vld [vmem:[%s6216_s14 + $0x20] sm:$0xff] }
 0x1e1   : > { %v1701_v28 = vrot.slane %v1700_v14, 1  ;;  %v2321_v36 = vrot.slane %v2320_v44, 4  ;;  %v11909_v30 = vunpack.c.l.bf16 %v11908_v6  ;;  %v11911_v4 = vunpack.c.l.bf16 %v11910_v43  ;;  %11926 = vst [vmem:[#allocation83_spill] sm:$0xff] %v8396_v1  ;;  %v5883_v6 = vld [vmem:[%s10777_s1 + $0x260] sm:$0xff]  }
 0x1e2   : > { %v2526_v48 = vadd.f32 %v2525_v18, %v11905_v3  ;;  %v2943_v62 = vsel %vm1616_vm0, %v11907_v5, 0.0  ;;  %v1907_v59 = vrot.slane %v1906_v33, 2  ;;  %v2114_v17 = vadd.f32 %v2113_v53, %v2112_v19 }
 0x1e3   : > { %v2733_v29 = vadd.f32 %v2732_v55, %v11909_v30  ;;  %v2940_v60 = vadd.f32 %v2939_v20, %v11911_v4  ;;  %v11913_v27 = vunpack.c.l.bf16 %v11912_v7  ;;  %v11915_v61 = vunpack.c.l.bf16 %v11914_v40  ;;  %5642 = vmatpush3.bf16.msra.mxu0 %v5873_v35  ;;  %v5885_v40 = vld [vmem:[%s10777_s1 + $0x220] sm:$0xff]  }
 0x1e4   : > { %v2528_v38 = vadd.f32 %v2527_v0, %v2526_v48  ;;  %v1702_v50 = vadd.f32 %v1701_v28, %v1700_v14  ;;  %v2322_v25 = vadd.f32 %v2321_v36, %v2320_v44  ;;  %v11916_v51 = vunpack.c.l.bf16 %v11726_v41  ;;  %5643 = vmatprep.subr.bf16.mxu0 %v5875_v57  ;;  %v5881_v48 = vld [vmem:[%s10777_s1 + $0x218] sm:$0xff]   ;;  %v8694_v4 = vld [vmem:[%s6216_s14 + $0xca0] sm:$0xff] }
 0x1e5   : > { %v3146_v9 = vadd.f32 %v11915_v61, %v11913_v27  ;;  %v11917_v49 = vunpack.c.l.bf16 %v11724_v24  ;;  %v1908_v56 = vadd.f32 %v1907_v59, %v1906_v33  ;;  %v2115_v0 = vrot.slane %v2114_v17, 2  ;;  %v5877_v24 = vld [vmem:[%s10777_s1 + $0x210] sm:$0xff]   ;;  %11977 = vst [vmem:[#allocation45_spill] sm:$0xff] %v8694_v4 }
 0x1e6   : > { %v2734_v32 = vadd.f32 %v2733_v29, %v11916_v51  ;;  %v2529_v42 = vrot.slane %v2528_v38, 4  ;;  %v11919_v2 = vunpack.c.l.bf16 %v11918_v31  ;;  %v2323_v58 = vrot.slane %v2322_v25, 2  ;;  %v5887_v51 = vld [vmem:[%s10777_s1 + $0x268] sm:$0xff]  }
 0x1e7   : > { %v2941_v21 = vadd.f32 %v2940_v60, %v11917_v49  ;;  %v11920_v11 = vunpack.c.l.bf16 %v11728_v47  ;;  %v11921_v15 = vunpack.c.l.bf16 %v11731_v37  ;;  %v1909_v41 = vrot.slane %v1908_v56, 1  ;;  %v5879_v47 = vld [vmem:[%s10777_s1 + $0x258] sm:$0xff]   ;;  %5644 = vmatpush3.bf16.msra.mxu0 %v5877_v24  ;;  %v8435_v24 = vld [vmem:[%s6216_s14 + $0x160] sm:$0xff] }
 0x1e8   : > { %v3147_v13 = vadd.f32 %v3146_v9, %v11919_v2  ;;  %v2736_v63 = vadd.f32 %v2735_v46, %v2734_v32  ;;  %v2116_v23 = vadd.f32 %v2115_v0, %v2114_v17  ;;  %v2530_v12 = vadd.f32 %v2529_v42, %v2528_v38  ;;  %5645 = vmatprep.subr.bf16.mxu0 %v5879_v47  ;;  %v8408_v38 = vld [vmem:[%s6216_s14 + $0x60] sm:$0xff] }
 0x1e9   : > { %v2942_v8 = vadd.f32 %v2941_v21, %v11920_v11  ;;  %v3151_v26 = vsel %vm1616_vm0, %v11921_v15, 0.0  ;;  %v11923_v19 = vunpack.c.l.bf16 %v11922_v54  ;;  %v2324_v37 = vadd.f32 %v2323_v58, %v2322_v25  ;;  %11928 = vst [vmem:[#allocation75_spill] sm:$0xff] %v8408_v38  ;;  %v8419_v32 = vld [vmem:[%s6216_s14 + $0xa0] sm:$0xff]  ;;  %11932 = vst [vmem:[#allocation79_spill] sm:$0xff] %v8435_v24  ;;  %v5891_v54 = vld [vmem:[%s10777_s1 + $0x270] sm:$0xff]  }
 0x1ea   : > { %v2737_v46 = vrot.slane %v2736_v63, 4  ;;  %v3282_v22 = vpack.c.bf16 %v1702_v50, %v1702_v50  ;;  %v1910_v14 = vadd.f32 %v1909_v41, %v1908_v56  ;;  %v2117_v44 = vrot.slane %v2116_v23, 1  ;;  %11929 = vst [vmem:[#allocation87_spill] sm:$0xff] %v8419_v32  ;;  %v8422_v0 = vld [vmem:[%s6216_s14 + $0xe0] sm:$0xff] }
 0x1eb   : > { %v3148_v10 = vadd.f32 %v3147_v13, %v11923_v19  ;;  %v2944_v18 = vadd.f32 %v2943_v62, %v2942_v8  ;;  %v2531_v52 = vrot.slane %v2530_v12, 2  ;;  %v11925_v55 = vunpack.c.l.bf16 %v11924_v34  ;;  %5646 = vmatpush3.bf16.msra.mxu0 %v5881_v48  ;;  %11930 = vst [vmem:[#allocation92_spill] sm:$0xff] %v8422_v0  ;;  %v8427_v58 = vld [vmem:[%s6216_s14 + $0x120] sm:$0xff] }
 0x1ec   : > { %v2325_v20 = vrot.slane %v2324_v37, 1  ;;  %v2738_v33 = vadd.f32 %v2737_v46, %v2736_v63  ;;  %v3801_v3 = vunpack.c.l.b16 %v3282_v22  ;;  %v2118_v16 = vadd.f32 %v2117_v44, %v2116_v23  ;;  %5647 = vmatprep.subr.bf16.mxu0 %v5883_v6  ;;  %11931 = vst [vmem:[#allocation85_spill] sm:$0xff] %v8427_v58  ;;  %v8442_v19 = vld [vmem:[%s6216_s14 + $0x1a0] sm:$0x11] }
 0x1ed   : > { %v3149_v45 = vadd.f32 %v3148_v10, %v11925_v55  ;;  %v2945_v53 = vrot.slane %v2944_v18, 4  ;;  %v2532_v5 = vadd.f32 %v2531_v52, %v2530_v12  ;;  %v11927_v62 = vunpack.c.l.bf16 %v8006_v39  ;;  %11933 = vst [vmem:[#allocation14_spill] sm:$0xff] %v8442_v19  ;;  %v8453_v34 = vld [vmem:[%s6216_s14 + $0x220] sm:$0xff] }
 0x1ee   : > { %v3298_v36 = vpack.c.bf16 %v1910_v14, %v1910_v14  ;;  %v2326_v30 = vadd.f32 %v2325_v20, %v2324_v37  ;;  %v2739_v29 = vrot.slane %v2738_v33, 2  ;;  %v3314_v59 = vpack.c.bf16 %v2118_v16, %v2118_v16  ;;  %11935 = vst [vmem:[#allocation10_spill] sm:$0xff] %v8453_v34  ;;  %v8464_v48 = vld [vmem:[%s6216_s14 + $0x2a0] sm:$0xff] }
 0x1ef   : > { %v3150_v28 = vadd.f32 %v3149_v45, %v11927_v62  ;;  %v2946_v43 = vadd.f32 %v2945_v53, %v2944_v18  ;;  %v2533_v60 = vrot.slane %v2532_v5, 1  ;;  %5648 = vmatpush3.bf16.msra.mxu0 %v5885_v40  ;;  %v8447_v18 = vld [vmem:[%s6216_s14 + $0x1e0] sm:$0xff]  ;;  %v5893_v53 = vld [vmem:[%s10777_s1 + $0x230] sm:$0xff]   ;;  %11937 = vst [vmem:[#allocation11_spill] sm:$0xff] %v8464_v48 }
 0x1f0   : > { %v3817_v17 = vunpack.c.l.b16 %v3298_v36  ;;  %v2740_v39 = vadd.f32 %v2739_v29, %v2738_v33  ;;  %v3330_v27 = vpack.c.bf16 %v2326_v30, %v2326_v30  ;;  %v3833_v50 = vunpack.c.l.b16 %v3314_v59  ;;  %5649 = vmatprep.subr.bf16.mxu0 %v5887_v51  ;;  %11934 = vst [vmem:[#allocation86_spill] sm:$0xff] %v8447_v18  ;;  %v8472_v36 = vld [vmem:[%s6216_s14 + $0x2e0] sm:$0xff]  ;;  %v5897_v51 = vld [vmem:[%s10777_s1 + $0x238] sm:$0xff]  }
 0x1f1   : > { %v3152_v35 = vadd.f32 %v3151_v26, %v3150_v28  ;;  %v2947_v7 = vrot.slane %v2946_v43, 2  ;;  %v2534_v9 = vadd.f32 %v2533_v60, %v2532_v5  ;;  %v5889_v26 = vld [vmem:[%s10777_s1 + $0x228] sm:$0xff]   ;;  %v5895_v28 = vld [vmem:[%s10777_s1 + $0x278] sm:$0xff]   ;;  %11938 = vst [vmem:[#allocation17_spill] sm:$0xff] %v8472_v36  ;;  %v8482_v59 = vld [vmem:[%s6216_s14 + $0x360] sm:$0x11]  ;;  %v11985_v29 = vunpack.c.h.bf16 %v8442_v19 }
 0x1f2   : > { %v3972_v25 = vsel %vm3923_vm1, %v3817_v17, %v3801_v3  ;;  %v2741_v49 = vrot.slane %v2740_v39, 1  ;;  %v3849_v56 = vunpack.c.l.b16 %v3330_v27  ;;  %v8461_v3 = vld [vmem:[%s6216_s14 + $0x260] sm:$0xff]  ;;  %11940 = vst [vmem:[#allocation93_spill] sm:$0xff] %v8482_v59 }
 0x1f3   : > { %v3153_v57 = vrot.slane %v3152_v35, 4  ;;  %v2948_v21 = vadd.f32 %v2947_v7, %v2946_v43  ;;  %v3346_v2 = vpack.c.bf16 %v2534_v9, %v2534_v9  ;;  %v3973_v13 = vsel %vm3925_vm2, %v3833_v50, %v3972_v25  ;;  %5650 = vmatpush3.bf16.msra.mxu0 %v5889_v26  ;;  %11936 = vst [vmem:[#allocation15_spill] sm:$0xff] %v8461_v3  ;;  %v8487_v27 = vld [vmem:[%s6216_s14 + $0x3a0] sm:$0xff] }
 0x1f4   : > { %v2742_v11 = vadd.f32 %v2741_v49, %v2740_v39  ;;  %v3974_v15 = vsel %vm3927_vm3, %v3849_v56, %v3973_v13  ;;  %5651 = vmatprep.subr.bf16.mxu0 %v5891_v54  ;;  %11941 = vst [vmem:[#allocation16_spill] sm:$0xff] %v8487_v27  ;;  %v8490_v40 = vld [vmem:[%s6216_s14 + $0x3e0] sm:$0xff] }
 0x1f5   : > { %v3154_v31 = vadd.f32 %v3153_v57, %v3152_v35  ;;  %v2949_v8 = vrot.slane %v2948_v21, 1  ;;  %v3865_v12 = vunpack.c.l.b16 %v3346_v2  ;;  %v8479_v35 = vld [vmem:[%s6216_s14 + $0x320] sm:$0xff]  ;;  %11942 = vst [vmem:[#allocation18_spill] sm:$0xff] %v8490_v40 }
 0x1f6   : > { %v3362_v46 = vpack.c.bf16 %v2742_v11, %v2742_v11  ;;  %11939 = vst [vmem:[#allocation28_spill] sm:$0xff] %v8479_v35  ;;  %v8500_v49 = vld [vmem:[%s6216_s14 + $0x420] sm:$0xff] }
 0x1f7   : > { %v3155_v23 = vrot.slane %v3154_v31, 2  ;;  %v2950_v37 = vadd.f32 %v2949_v8, %v2948_v21  ;;  %v3975_v52 = vsel %vm3929_vm4, %v3865_v12, %v3974_v15  ;;  %5652 = vmatpush3.bf16.msra.mxu0 %v5893_v53  ;;  %11943 = vst [vmem:[#allocation24_spill] sm:$0xff] %v8500_v49  ;;  %v8506_v13 = vld [vmem:[%s6216_s14 + $0x460] sm:$0xff]  ;;  %v5878_v21 = vld [vmem:[%s10777_s1 + $0x290] sm:$0xff]  }
 0x1f8   : > { %v3881_v33 = vunpack.c.l.b16 %v3362_v46  ;;  %5653 = vmatprep.subr.bf16.mxu0 %v5895_v28  ;;  %11944 = vst [vmem:[#allocation35_spill] sm:$0xff] %v8506_v13  ;;  %v8509_v11 = vld [vmem:[%s6216_s14 + $0x4a0] sm:$0xff]  ;;  %v5888_v46 = vld [vmem:[%s10777_s1 + $0x2e8] sm:$0xff]  }
 0x1f9   : > { %v3156_v44 = vadd.f32 %v3155_v23, %v3154_v31  ;;  %v3378_v20 = vpack.c.bf16 %v2950_v37, %v2950_v37  ;;  %11945 = vst [vmem:[#allocation36_spill] sm:$0xff] %v8509_v11  ;;  %v8515_v23 = vld [vmem:[%s6216_s14 + $0x4e0] sm:$0xff] }
 0x1fa   : > { %v3976_v60 = vsel %vm3931_vm5, %v3881_v33, %v3975_v52  ;;  %11946 = vst [vmem:[#allocation8_spill] sm:$0xff] %v8515_v23  ;;  %v8518_v12 = vld [vmem:[%s6216_s14 + $0x520] sm:$0x11] }
 0x1fb   : > { %v3157_v62 = vrot.slane %v3156_v44, 1  ;;  %v3897_v43 = vunpack.c.l.b16 %v3378_v20  ;;  %11947 = vst [vmem:[#allocation21_spill] sm:$0xff] %v8518_v12  ;;  %v8525_v20 = vld [vmem:[%s6216_s14 + $0x560] sm:$0xff]  ;;  %5654 = vmatpush3.bf16.msra.mxu0 %v5897_v51 }
 0x1fc   : > { %11948 = vst [vmem:[#allocation13_spill] sm:$0xff] %v8525_v20  ;;  %v8531_v28 = vld [vmem:[%s6216_s14 + $0x5a0] sm:$0xff] }
 0x1fd   : > { %v3158_v7 = vadd.f32 %v3157_v62, %v3156_v44  ;;  %v3977_v25 = vsel %vm3933_vm6, %v3897_v43, %v3976_v60  ;;  %11949 = vst [vmem:[#allocation19_spill] sm:$0xff] %v8531_v28  ;;  %v8534_v43 = vld [vmem:[%s6216_s14 + $0x5e0] sm:$0xff]  ;;  %v5882_v60 = vld [vmem:[%s10777_s1 + $0x298] sm:$0xff]  }
 0x1fe   : > { %11950 = vst [vmem:[#allocation38_spill] sm:$0xff] %v8534_v43  ;;  %v5870_v51 = vld [vmem:[%s10777_s1 + $0x280] sm:$0xff]  }
 0x1ff   : > { %v3394_v2 = vpack.c.bf16 %v3158_v7, %v3158_v7  ;;  %v8545_v45 = vld [vmem:[%s6216_s14 + $0x620] sm:$0xff] }
 0x200   : > { %11951 = vst [vmem:[#allocation29_spill] sm:$0xff] %v8545_v45  ;;  %v8548_v50 = vld [vmem:[%s6216_s14 + $0x660] sm:$0xff] }
 0x201   : > { %v3913_v52 = vunpack.c.l.b16 %v3394_v2  ;;  %11952 = vst [vmem:[#allocation37_spill] sm:$0xff] %v8548_v50  ;;  %v8560_v9 = vld [vmem:[%s6216_s14 + $0x6e0] sm:$0x11] }
 0x202   : > { %11954 = vst [vmem:[#allocation9_spill] sm:$0xff] %v8560_v9  ;;  %v8566_v37 = vld [vmem:[%s6216_s14 + $0x720] sm:$0xff] }
 0x203   : > { %v3978_v56 = vsel %vm3935_vm7, %v3913_v52, %v3977_v25  ;;  %v5872_v25 = vld [vmem:[%s10777_s1 + $0x2c8] sm:$0xff]   ;;  %v8557_v52 = vld [vmem:[%s6216_s14 + $0x6a0] sm:$0xff]  ;;  %11955 = vst [vmem:[#allocation22_spill] sm:$0xff] %v8566_v37 }
 0x204   : > { %v4048_v53 = vpack.c.b16 %v3978_v56, %v3978_v56  ;;  %11953 = vst [vmem:[#allocation49_spill] sm:$0xff] %v8557_v52  ;;  %v8569_v2 = vld [vmem:[%s6216_s14 + $0x760] sm:$0xff] }
 0x205   : > { %11956 = vst [vmem:[#allocation43_spill] sm:$0xff] %v8569_v2  ;;  %v8576_v41 = vld [vmem:[%s6216_s14 + $0x7a0] sm:$0xff] }
 0x206   : > { %4995 = vmatmul.mubr.bf16.vlgmr.msra.gmra.mrb[4].mxu1 %v4048_v53  ;;  %11957 = vst [vmem:[#allocation20_spill] sm:$0xff] %v8576_v41  ;;  %v8579_v44 = vld [vmem:[%s6216_s14 + $0x7e0] sm:$0xff]  ;;  %v5874_v53 = vld [vmem:[%s10777_s1 + $0x288] sm:$0xff]  }
 0x207   : > { %11958 = vst [vmem:[#allocation39_spill] sm:$0xff] %v8579_v44  ;;  %5662 = vmatpush3.bf16.msra.mxu1 %v5870_v51  ;;  %v8589_v17 = vld [vmem:[%s6216_s14 + $0x820] sm:$0xff]  ;;  %v5876_v51 = vld [vmem:[%s10777_s1 + $0x2d0] sm:$0xff]  }
 0x208   : > { %11959 = vst [vmem:[#allocation30_spill] sm:$0xff] %v8589_v17  ;;  %v8592_v14 = vld [vmem:[%s6216_s14 + $0x860] sm:$0xff]  ;;  %5663 = vmatprep.subr.bf16.mxu1 %v5872_v25 }
 0x209   : > { %11960 = vst [vmem:[#allocation25_spill] sm:$0xff] %v8592_v14  ;;  %v8602_v56 = vld [vmem:[%s6216_s14 + $0x8a0] sm:$0x11] }
 0x20a   : > { %11961 = vst [vmem:[#allocation51_spill] sm:$0xff] %v8602_v56  ;;  %v8605_v8 = vld [vmem:[%s6216_s14 + $0x8e0] sm:$0xff] }
 0x20b   : > { %11962 = vst [vmem:[#allocation23_spill] sm:$0xff] %v8605_v8  ;;  %v8612_v55 = vld [vmem:[%s6216_s14 + $0x920] sm:$0xff]  ;;  %5664 = vmatpush3.bf16.msra.mxu1 %v5874_v53  ;;  %v5880_v53 = vld [vmem:[%s10777_s1 + $0x2d8] sm:$0xff]  }
 0x20c   : > { %11963 = vst [vmem:[#allocation44_spill] sm:$0xff] %v8612_v55  ;;  %v8615_v25 = vld [vmem:[%s6216_s14 + $0x960] sm:$0xff]  ;;  %5665 = vmatprep.subr.bf16.mxu1 %v5876_v51 }
 0x20d   : > { %11964 = vst [vmem:[#allocation12_spill] sm:$0xff] %v8615_v25  ;;  %v8622_v22 = vld [vmem:[%s6216_s14 + $0x9a0] sm:$0xff] }
 0x20e   : > { %11965 = vst [vmem:[#allocation31_spill] sm:$0xff] %v8622_v22  ;;  %v8625_v5 = vld [vmem:[%s6216_s14 + $0x9e0] sm:$0xff] }
 0x20f   : > { %11966 = vst [vmem:[#allocation27_spill] sm:$0xff] %v8625_v5  ;;  %v8635_v31 = vld [vmem:[%s6216_s14 + $0xa20] sm:$0xff]  ;;  %5666 = vmatpush3.bf16.msra.mxu1 %v5878_v21 }
 0x210   : > { %11967 = vst [vmem:[#allocation40_spill] sm:$0xff] %v8635_v31  ;;  %v8638_v7 = vld [vmem:[%s6216_s14 + $0xa60] sm:$0x11]  ;;  %5667 = vmatprep.subr.bf16.mxu1 %v5880_v53 }
 0x211   : > { %11968 = vst [vmem:[#allocation56_spill] sm:$0xff] %v8638_v7  ;;  %v8648_v42 = vld [vmem:[%s6216_s14 + $0xaa0] sm:$0xff] }
 0x212   : > { %11969 = vst [vmem:[#allocation26_spill] sm:$0xff] %v8648_v42  ;;  %v8651_v57 = vld [vmem:[%s6216_s14 + $0xae0] sm:$0xff]  ;;  %v1396_v62 = vunpack.c.h.bf16 %v8648_v42  ;;  %v1524_v42 = vunpack.c.h.bf16 %v8694_v4  ;;  %v11988_v4 = vunpack.c.h.bf16 %v8482_v59 }
 0x213   : > { %11970 = vst [vmem:[#allocation57_spill] sm:$0xff] %v8651_v57  ;;  %v8658_v16 = vld [vmem:[%s6216_s14 + $0xb20] sm:$0xff]  ;;  %v1412_v33 = vunpack.c.h.bf16 %v8651_v57  ;;  %5668 = vmatpush3.bf16.msra.mxu1 %v5882_v60  ;;  %v1734_v60 = vsel %vm1616_vm0, %v11985_v29, 0.0  ;;  %v11991_v29 = vunpack.c.h.bf16 %v8518_v12  ;;  %v11996_v12 = vunpack.c.h.bf16 %v8461_v3  ;;  %v9126_v3 = vld [vmem:[%s6216_s14 + $0xd28] sm:$0xff] }
 0x214   : > { %11971 = vst [vmem:[#allocation42_spill] sm:$0xff] %v8658_v16  ;;  %v8661_v51 = vld [vmem:[%s6216_s14 + $0xb60] sm:$0xff]  ;;  %v1942_v61 = vsel %vm1616_vm0, %v11988_v4, 0.0  ;;  %v11994_v4 = vunpack.c.h.bf16 %v8560_v9  ;;  %12065 = vst [vmem:[#allocation89_spill] sm:$0xff] %v9126_v3 }
 0x215   : > { %11972 = vst [vmem:[#allocation33_spill] sm:$0xff] %v8661_v51  ;;  %v8668_v47 = vld [vmem:[%s6216_s14 + $0xba0] sm:$0xff] }
 0x216   : > { %11973 = vst [vmem:[#allocation34_spill] sm:$0xff] %v8668_v47  ;;  %v8671_v30 = vld [vmem:[%s6216_s14 + $0xbe0] sm:$0xff]  ;;  %v11984_v47 = vunpack.c.h.bf16 %v8408_v38  ;;  %v9136_v38 = vld [vmem:[%s6216_s14 + $0xda8] sm:$0xff] }
 0x217   : > { %11974 = vst [vmem:[#allocation32_spill] sm:$0xff] %v8671_v30  ;;  %v8681_v10 = vld [vmem:[%s6216_s14 + $0xc20] sm:$0x11] }
 0x218   : > { %11975 = vst [vmem:[#allocation58_spill] sm:$0xff] %v8681_v10  ;;  %v8684_v26 = vld [vmem:[%s6216_s14 + $0xc60] sm:$0xff]  ;;  %v1492_v15 = vunpack.c.h.bf16 %v8681_v10  ;;  %v11987_v10 = vunpack.c.h.bf16 %v8453_v34 }
 0x219   : > { %11976 = vst [vmem:[#allocation47_spill] sm:$0xff] %v8684_v26  ;;  %v5884_v21 = vld [vmem:[%s10777_s1 + $0x2e0] sm:$0xff]   ;;  %v1508_v14 = vunpack.c.h.bf16 %v8684_v26  ;;  %v11986_v26 = vunpack.c.h.bf16 %v8447_v18  ;;  %v2150_v18 = vsel %vm1616_vm0, %v11991_v29, 0.0 }
 0x21a   : > { %v8697_v54 = vld [vmem:[%s6216_s14 + $0xce0] sm:$0xff]  ;;  %5669 = vmatprep.subr.bf16.mxu1 %v5884_v21  ;;  %v5890_v21 = vld [vmem:[%s10777_s1 + $0x2a8] sm:$0xff]  }
 0x21b   : > { %11978 = vst [vmem:[#allocation46_spill] sm:$0xff] %v8697_v54  ;;  %v8704_v6 = vld [vmem:[%s6216_s14 + $0xd20] sm:$0xff]  ;;  %v1540_v30 = vunpack.c.h.bf16 %v8697_v54  ;;  %v11983_v54 = vunpack.c.h.bf16 %v8396_v1  ;;  %v1937_v57 = vadd.f32 %v11987_v10, %v11986_v26  ;;  %v11992_v10 = vunpack.c.h.bf16 %v8525_v20 }
 0x21c   : > { %11979 = vst [vmem:[#allocation53_spill] sm:$0xff] %v8704_v6  ;;  %v8707_v63 = vld [vmem:[%s6216_s14 + $0xd60] sm:$0xff]  ;;  %v11993_v26 = vunpack.c.h.bf16 %v8531_v28  ;;  %v11997_v20 = vunpack.c.h.bf16 %v8566_v37  ;;  %v11998_v28 = vunpack.c.h.bf16 %v8569_v2  ;;  %v9109_v37 = vld [vmem:[%s6216_s14 + $0xc68] sm:$0xff] }
 0x21d   : > { %11980 = vst [vmem:[#allocation50_spill] sm:$0xff] %v8707_v63  ;;  %v8714_v31 = vld [vmem:[%s6216_s14 + $0xda0] sm:$0xff]  ;;  %v1729_v5 = vadd.f32 %v11984_v47, %v11983_v54  ;;  %v11989_v47 = vunpack.c.h.bf16 %v8487_v27  ;;  %v11990_v54 = vunpack.c.h.bf16 %v8490_v40  ;;  %v5892_v27 = vld [vmem:[%s10777_s1 + $0x2f0] sm:$0xff]   ;;  %v1938_v29 = vadd.f32 %v1937_v57, %v11996_v12  ;;  %12062 = vst [vmem:[#allocation77_spill] sm:$0xff] %v9109_v37 }
 0x21e   : > { %11981 = vst [vmem:[#allocation52_spill] sm:$0xff] %v8714_v31  ;;  %v8717_v39 = vld [vmem:[%s6216_s14 + $0xde0] sm:$0x11]  ;;  %v2353_v59 = vadd.f32 %v11993_v26, %v11992_v10  ;;  %v2561_v10 = vadd.f32 %v11998_v28, %v11997_v20  ;;  %v11999_v26 = vunpack.c.h.bf16 %v8602_v56  ;;  %v12001_v40 = vunpack.c.h.bf16 %v8534_v43 }
 0x21f   : > { %11982 = vst [vmem:[#allocation59_spill] sm:$0xff] %v8717_v39  ;;  %v5886_v53 = vld [vmem:[%s10777_s1 + $0x2a0] sm:$0xff]   ;;  %v2145_v19 = vadd.f32 %v11990_v54, %v11989_v47  ;;  %v11995_v47 = vunpack.c.h.bf16 %v8419_v32  ;;  %v12004_v12 = vunpack.c.h.bf16 %v8638_v7  ;;  %v12005_v20 = vunpack.c.h.bf16 %v8422_v0 }
 0x220   : > { %5670 = vmatpush3.bf16.msra.mxu1 %v5886_v53  ;;  %v2358_v53 = vsel %vm1616_vm0, %v11994_v4, 0.0  ;;  %v2566_v4 = vsel %vm1616_vm0, %v11999_v26, 0.0  ;;  %v2354_v34 = vadd.f32 %v2353_v59, %v12001_v40  ;;  %v12006_v26 = vunpack.c.h.bf16 %v8464_v48  ;;  %v5894_v59 = vld [vmem:[%s10777_s1 + $0x2b0] sm:$0xff]  }
 0x221   : > { %5671 = vmatprep.subr.bf16.mxu1 %v5888_v46  ;;  %v1730_v54 = vadd.f32 %v1729_v5, %v11995_v47  ;;  %v12000_v46 = vunpack.c.h.bf16 %v8500_v49  ;;  %v12002_v5 = vunpack.c.h.bf16 %v8605_v8  ;;  %v12003_v47 = vunpack.c.h.bf16 %v8612_v55  ;;  %v9079_v55 = vld [vmem:[%s6216_s14 + $0xae8] sm:$0xff] }
 0x222   : > { %v2774_v2 = vsel %vm1616_vm0, %v12004_v12, 0.0  ;;  %v1939_v56 = vadd.f32 %v1938_v29, %v12006_v26  ;;  %v2977_v43 = vadd.f32 %v1412_v33, %v1396_v62  ;;  %v12008_v40 = vunpack.c.h.bf16 %v8506_v13  ;;  %v5896_v33 = vld [vmem:[%s10777_s1 + $0x2f8] sm:$0xff]   ;;  %12056 = vst [vmem:[#allocation80_spill] sm:$0xff] %v9079_v55  ;;  %v9116_v8 = vld [vmem:[%s6216_s14 + $0xca8] sm:$0xff] }
 0x223   : > { %v2146_v9 = vadd.f32 %v2145_v19, %v12000_v46  ;;  %v2769_v57 = vadd.f32 %v12003_v47, %v12002_v5  ;;  %v1731_v28 = vadd.f32 %v1730_v54, %v12005_v20  ;;  %v12007_v19 = vunpack.c.h.bf16 %v8576_v41  ;;  %v9089_v41 = vld [vmem:[%s6216_s14 + $0xb68] sm:$0xff]  ;;  %12063 = vst [vmem:[#allocation84_spill] sm:$0xff] %v9116_v8 }
 0x224   : > { %5672 = vmatpush3.bf16.msra.mxu1 %v5890_v21  ;;  %v12009_v47 = vunpack.c.h.bf16 %v8545_v45  ;;  %v12010_v54 = vunpack.c.h.bf16 %v8615_v25  ;;  %v2982_v29 = vsel %vm1616_vm0, %v1492_v15, 0.0  ;;  %v12011_v62 = vunpack.c.h.bf16 %v8427_v58  ;;  %v9069_v45 = vld [vmem:[%s6216_s14 + $0xa68] sm:$0x11]  ;;  %12058 = vst [vmem:[#allocation73_spill] sm:$0xff] %v9089_v41 }
 0x225   : > { %v2562_v46 = vadd.f32 %v2561_v10, %v12007_v19  ;;  %v2147_v5 = vadd.f32 %v2146_v9, %v12008_v40  ;;  %5673 = vmatprep.subr.bf16.mxu1 %v5892_v27  ;;  %v12012_v10 = vunpack.c.h.bf16 %v8472_v36  ;;  %v12013_v9 = vunpack.c.h.bf16 %v8579_v44  ;;  %v9059_v44 = vld [vmem:[%s6216_s14 + $0x9e8] sm:$0xff]  ;;  %12054 = vst [vmem:[#allocation72_spill] sm:$0xff] %v9069_v45 }
 0x226   : > { %v2355_v12 = vadd.f32 %v2354_v34, %v12009_v47  ;;  %v2770_v20 = vadd.f32 %v2769_v57, %v12010_v54  ;;  %v1732_v21 = vadd.f32 %v1731_v28, %v12011_v62  ;;  %v12014_v34 = vunpack.c.h.bf16 %v8658_v16  ;;  %12052 = vst [vmem:[#allocation70_spill] sm:$0xff] %v9059_v44  ;;  %v9119_v58 = vld [vmem:[%s6216_s14 + $0xce8] sm:$0xff] }
 0x227   : > { %v1940_v26 = vadd.f32 %v1939_v56, %v12012_v10  ;;  %v2563_v19 = vadd.f32 %v2562_v46, %v12013_v9  ;;  %v12015_v57 = vunpack.c.h.bf16 %v8509_v11  ;;  %v12016_v27 = vunpack.c.h.bf16 %v8548_v50  ;;  %v9049_v50 = vld [vmem:[%s6216_s14 + $0x968] sm:$0xff]  ;;  %12064 = vst [vmem:[#allocation88_spill] sm:$0xff] %v9119_v58 }
 0x228   : > { %v2978_v40 = vadd.f32 %v2977_v43, %v12014_v34  ;;  %v12017_v54 = vunpack.c.h.bf16 %v8622_v22  ;;  %v3185_v7 = vadd.f32 %v1524_v42, %v1508_v14  ;;  %v12018_v28 = vunpack.c.h.bf16 %v8435_v24  ;;  %5674 = vmatpush3.bf16.msra.mxu1 %v5894_v59  ;;  %v12030_v22 = vld [vmem:[#allocation40_spill] sm:$0xff]  ;;  %v9099_v24 = vld [vmem:[%s6216_s14 + $0xbe8] sm:$0xff] }
 0x229   : > { %v2148_v15 = vadd.f32 %v2147_v5, %v12015_v57  ;;  %v2356_v47 = vadd.f32 %v2355_v12, %v12016_v27  ;;  %v12019_v56 = vunpack.c.h.bf16 %v8479_v35  ;;  %v12020_v46 = vunpack.c.h.bf16 %v8589_v17  ;;  %v5898_v5 = vld [vmem:[%s10777_s1 + $0x2b8] sm:$0xff]   ;;  %5675 = vmatprep.subr.bf16.mxu1 %v5896_v33  ;;  %v9076_v17 = vld [vmem:[%s6216_s14 + $0xaa8] sm:$0xff]  ;;  %12060 = vst [vmem:[#allocation78_spill] sm:$0xff] %v9099_v24 }
 0x22a   : > { %v2771_v25 = vadd.f32 %v2770_v20, %v12017_v54  ;;  %v1733_v62 = vadd.f32 %v1732_v21, %v12018_v28  ;;  %v12021_v43 = vunpack.c.h.bf16 %v8661_v51  ;;  %v12022_v12 = vunpack.c.h.bf16 %v8515_v23  ;;  %v12024_v21 = vld [vmem:[#allocation27_spill] sm:$0xff]  ;;  %v12026_v28 = vld [vmem:[#allocation25_spill] sm:$0xff]  ;;  %12055 = vst [vmem:[#allocation76_spill] sm:$0xff] %v9076_v17 }
 0x22b   : > { %v1941_v10 = vadd.f32 %v1940_v26, %v12019_v56  ;;  %v2564_v9 = vadd.f32 %v2563_v19, %v12020_v46  ;;  %v12023_v14 = vunpack.c.h.bf16 %v8557_v52  ;;  %v12025_v57 = vunpack.c.h.bf16 %v12024_v21  ;;  %v12028_v56 = vld [vmem:[#allocation34_spill] sm:$0xff]  ;;  %v9039_v52 = vld [vmem:[%s6216_s14 + $0x8e8] sm:$0xff] }
 0x22c   : > { %v2979_v34 = vadd.f32 %v2978_v40, %v12021_v43  ;;  %v2149_v42 = vadd.f32 %v2148_v15, %v12022_v12  ;;  %v3186_v27 = vadd.f32 %v3185_v7, %v1540_v30  ;;  %v1735_v19 = vadd.f32 %v1734_v60, %v1733_v62  ;;  %v12033_v7 = vld [vmem:[#allocation32_spill] sm:$0xff]  ;;  %5676 = vmatpush3.bf16.msra.mxu1 %v5898_v5  ;;  %v9086_v23 = vld [vmem:[%s6216_s14 + $0xb28] sm:$0xff] }
 0x22d   : > { %v2357_v20 = vadd.f32 %v2356_v47, %v12023_v14  ;;  %v2772_v26 = vadd.f32 %v2771_v25, %v12025_v57  ;;  %v1943_v54 = vadd.f32 %v1942_v61, %v1941_v10  ;;  %v12027_v40 = vunpack.c.h.bf16 %v12026_v28  ;;  %12050 = vst [vmem:[#allocation68_spill] sm:$0xff] %v9039_v52  ;;  %v9066_v28 = vld [vmem:[%s6216_s14 + $0xa28] sm:$0xff]  ;;  %12057 = vst [vmem:[#allocation81_spill] sm:$0xff] %v9086_v23 }
 0x22e   : > { %v12029_v46 = vunpack.c.h.bf16 %v12028_v56  ;;  %v2151_v51 = vadd.f32 %v2150_v18, %v2149_v42  ;;  %v12031_v15 = vunpack.c.h.bf16 %v12030_v22  ;;  %v12032_v47 = vunpack.c.h.bf16 %v8704_v6  ;;  %v9019_v6 = vld [vmem:[%s6216_s14 + $0x7e8] sm:$0xff]  ;;  %12053 = vst [vmem:[#allocation71_spill] sm:$0xff] %v9066_v28 }
 0x22f   : > { %v2565_v59 = vadd.f32 %v2564_v9, %v12027_v40  ;;  %v2359_v16 = vadd.f32 %v2358_v53, %v2357_v20  ;;  %v1736_v21 = vrot.slane %v1735_v19, 4  ;;  %v1944_v25 = vrot.slane %v1943_v54, 4  ;;  %v9029_v22 = vld [vmem:[%s6216_s14 + $0x868] sm:$0xff] }
 0x230   : > { %v2980_v43 = vadd.f32 %v2979_v34, %v12029_v46  ;;  %v2773_v12 = vadd.f32 %v2772_v26, %v12031_v15  ;;  %v3187_v14 = vadd.f32 %v3186_v27, %v12032_v47  ;;  %v12034_v60 = vunpack.c.h.bf16 %v12033_v7  ;;  %v9046_v7 = vld [vmem:[%s6216_s14 + $0x928] sm:$0xff] }
 0x231   : > { %v2567_v30 = vadd.f32 %v2566_v4, %v2565_v59  ;;  %v2152_v33 = vrot.slane %v2151_v51, 4  ;;  %v2360_v62 = vrot.slane %v2359_v16, 4  ;;  %v12035_v9 = vunpack.c.h.bf16 %v8707_v63  ;;  %v9006_v63 = vld [vmem:[%s6216_s14 + $0x728] sm:$0xff] }
 0x232   : > { %v2981_v61 = vadd.f32 %v2980_v43, %v12034_v60  ;;  %v2775_v10 = vadd.f32 %v2774_v2, %v2773_v12  ;;  %v1737_v53 = vadd.f32 %v1736_v21, %v1735_v19  ;;  %v1945_v34 = vadd.f32 %v1944_v25, %v1943_v54  ;;  %12047 = vst [vmem:[#allocation65_spill] sm:$0xff] %v9006_v63  ;;  %v9056_v56 = vld [vmem:[%s6216_s14 + $0x9a8] sm:$0xff] }
 0x233   : > { %v3188_v18 = vadd.f32 %v3187_v14, %v12035_v9  ;;  %v2568_v42 = vrot.slane %v2567_v30, 4  ;;  %v2153_v57 = vadd.f32 %v2152_v33, %v2151_v51  ;;  %v2361_v26 = vadd.f32 %v2360_v62, %v2359_v16  ;;  %12051 = vst [vmem:[#allocation69_spill] sm:$0xff] %v9056_v56  ;;  %v9096_v35 = vld [vmem:[%s6216_s14 + $0xba8] sm:$0xff] }
 0x234   : > { %v2983_v20 = vadd.f32 %v2982_v29, %v2981_v61  ;;  %v2776_v27 = vrot.slane %v2775_v10, 4  ;;  %v12036_v40 = vunpack.c.h.bf16 %v8714_v31  ;;  %v1738_v59 = vrot.slane %v1737_v53, 2  ;;  %v9016_v31 = vld [vmem:[%s6216_s14 + $0x7a8] sm:$0xff]  ;;  %12059 = vst [vmem:[#allocation82_spill] sm:$0xff] %v9096_v35 }
 0x235   : > { %v1946_v46 = vrot.slane %v1945_v34, 2  ;;  %v2569_v43 = vadd.f32 %v2568_v42, %v2567_v30  ;;  %v2154_v15 = vrot.slane %v2153_v57, 2  ;;  %v2362_v47 = vrot.slane %v2361_v26, 2  ;;  %v9106_v11 = vld [vmem:[%s6216_s14 + $0xc28] sm:$0x11] }
 0x236   : > { %v3189_v4 = vadd.f32 %v3188_v18, %v12036_v40  ;;  %v2984_v5 = vrot.slane %v2983_v20, 4  ;;  %v2777_v2 = vadd.f32 %v2776_v27, %v2775_v10  ;;  %v12037_v12 = vunpack.c.h.bf16 %v8717_v39  ;;  %v8996_v39 = vld [vmem:[%s6216_s14 + $0x6a8] sm:$0xff]  ;;  %12061 = vst [vmem:[#allocation74_spill] sm:$0xff] %v9106_v11 }
 0x237   : > { %v1739_v19 = vadd.f32 %v1738_v59, %v1737_v53  ;;  %v1947_v54 = vadd.f32 %v1946_v46, %v1945_v34  ;;  %v2570_v29 = vrot.slane %v2569_v43, 2  ;;  %v2155_v16 = vadd.f32 %v2154_v15, %v2153_v57 }
 0x238   : > { %v3190_v21 = vsel %vm1616_vm0, %v12037_v12, 0.0  ;;  %v2985_v51 = vadd.f32 %v2984_v5, %v2983_v20  ;;  %v2363_v14 = vadd.f32 %v2362_v47, %v2361_v26  ;;  %v2778_v25 = vrot.slane %v2777_v2, 2 }
 0x239   : > { %v3191_v60 = vadd.f32 %v3190_v21, %v3189_v4  ;;  %v1740_v61 = vrot.slane %v1739_v19, 1  ;;  %v1948_v33 = vrot.slane %v1947_v54, 1  ;;  %v2571_v62 = vadd.f32 %v2570_v29, %v2569_v43  ;;  %v8865_v21 = vld [vmem:[%s6216_s14 + $0x28] sm:$0xff] }
 0x23a   : > { %v2986_v30 = vrot.slane %v2985_v51, 2  ;;  %v2156_v9 = vrot.slane %v2155_v16, 1  ;;  %v2364_v18 = vrot.slane %v2363_v14, 1  ;;  %v2779_v42 = vadd.f32 %v2778_v25, %v2777_v2  ;;  %12038 = vst [vmem:[#allocation41_spill] sm:$0xff] %v8865_v21 }
 0x23b   : > { %v3192_v10 = vrot.slane %v3191_v60, 4  ;;  %v1741_v27 = vadd.f32 %v1740_v61, %v1739_v19  ;;  %v1949_v40 = vadd.f32 %v1948_v33, %v1947_v54  ;;  %v2572_v12 = vrot.slane %v2571_v62, 1  ;;  %v8868_v61 = vld [vmem:[%s6216_s14 + $0x68] sm:$0xff] }
 0x23c   : > { %v2987_v53 = vadd.f32 %v2986_v30, %v2985_v51  ;;  %v2157_v34 = vadd.f32 %v2156_v9, %v2155_v16  ;;  %v2365_v59 = vadd.f32 %v2364_v18, %v2363_v14  ;;  %v2780_v20 = vrot.slane %v2779_v42, 1  ;;  %v8872_v9 = vld [vmem:[%s6216_s14 + $0xa8] sm:$0xff] }
 0x23d   : > { %v3193_v57 = vadd.f32 %v3192_v10, %v3191_v60  ;;  %v2573_v26 = vadd.f32 %v2572_v12, %v2571_v62  ;;  %v3285_v4 = vpack.c.bf16 %v1741_v27, %v1741_v27  ;;  %v3301_v5 = vpack.c.bf16 %v1949_v40, %v1949_v40  ;;  %v8877_v40 = vld [vmem:[%s6216_s14 + $0xe8] sm:$0xff] }
 0x23e   : > { %v2988_v46 = vrot.slane %v2987_v53, 1  ;;  %v2781_v43 = vadd.f32 %v2780_v20, %v2779_v42  ;;  %v3317_v47 = vpack.c.bf16 %v2157_v34, %v2157_v34  ;;  %v3333_v2 = vpack.c.bf16 %v2365_v59, %v2365_v59  ;;  %v8880_v12 = vld [vmem:[%s6216_s14 + $0x128] sm:$0xff] }
 0x23f   : > { %v3194_v15 = vrot.slane %v3193_v57, 2  ;;  %v3349_v54 = vpack.c.bf16 %v2573_v26, %v2573_v26  ;;  %v3804_v29 = vunpack.c.l.b16 %v3285_v4  ;;  %v3820_v51 = vunpack.c.l.b16 %v3301_v5  ;;  %v8885_v20 = vld [vmem:[%s6216_s14 + $0x168] sm:$0xff] }
 0x240   : > { %v2989_v19 = vadd.f32 %v2988_v46, %v2987_v53  ;;  %v3365_v14 = vpack.c.bf16 %v2781_v43, %v2781_v43  ;;  %v3836_v25 = vunpack.c.l.b16 %v3317_v47  ;;  %v3852_v60 = vunpack.c.l.b16 %v3333_v2  ;;  %v8891_v5 = vld [vmem:[%s6216_s14 + $0x1a8] sm:$0x11] }
 0x241   : > { %v3195_v16 = vadd.f32 %v3194_v15, %v3193_v57  ;;  %v3868_v62 = vunpack.c.l.b16 %v3349_v54  ;;  %v3993_v30 = vsel %vm3923_vm1, %v3820_v51, %v3804_v29  ;;  %12039 = vst [vmem:[#allocation48_spill] sm:$0xff] %v8891_v5  ;;  %v8894_v43 = vld [vmem:[%s6216_s14 + $0x1e8] sm:$0xff]  ;;  %v5899_v51 = vld [vmem:[%s10777_s1 + $0x340] sm:$0xff]   ;;  %v1382_v13 = vunpack.c.h.bf16 %v9069_v45 }
 0x242   : > { %v3381_v33 = vpack.c.bf16 %v2989_v19, %v2989_v19  ;;  %v3884_v10 = vunpack.c.l.b16 %v3365_v14  ;;  %v3994_v27 = vsel %vm3925_vm2, %v3836_v25, %v3993_v30  ;;  %12040 = vst [vmem:[#allocation54_spill] sm:$0xff] %v8894_v43  ;;  %v8900_v19 = vld [vmem:[%s6216_s14 + $0x228] sm:$0xff]  ;;  %v5900_v29 = vld [vmem:[%s10777_s1 + $0x3c0] sm:$0xff]   ;;  %5683 = vmatprep.subr.bf16.mxu0 %v5899_v51  ;;  %v1398_v36 = vunpack.c.h.bf16 %v9076_v17 }
 0x243   : > { %v3196_v42 = vrot.slane %v3195_v16, 1  ;;  %v3995_v59 = vsel %vm3927_vm3, %v3852_v60, %v3994_v27  ;;  %v8907_v25 = vld [vmem:[%s6216_s14 + $0x268] sm:$0xff]  ;;  %5705 = vmatprep.subr.bf16.mxu1 %v5900_v29  ;;  %v1414_v48 = vunpack.c.h.bf16 %v9079_v55  ;;  %v1430_v45 = vunpack.c.h.bf16 %v9086_v23 }
 0x244   : > { %v3900_v34 = vunpack.c.l.b16 %v3381_v33  ;;  %v3996_v4 = vsel %vm3929_vm4, %v3868_v62, %v3995_v59  ;;  %v8910_v60 = vld [vmem:[%s6216_s14 + $0x2a8] sm:$0xff]  ;;  %v1510_v1 = vunpack.c.h.bf16 %v9109_v37  ;;  %v1526_v55 = vunpack.c.h.bf16 %v9116_v8 }
 0x245   : > { %v3197_v46 = vadd.f32 %v3196_v42, %v3195_v16  ;;  %v3997_v2 = vsel %vm3931_vm5, %v3884_v10, %v3996_v4  ;;  %v8915_v30 = vld [vmem:[%s6216_s14 + $0x2e8] sm:$0xff]  ;;  %v1542_v32 = vunpack.c.h.bf16 %v9119_v58  ;;  %v1558_v28 = vunpack.c.h.bf16 %v9126_v3 }
 0x246   : > { %v3998_v14 = vsel %vm3933_vm6, %v3900_v34, %v3997_v2  ;;  %v8918_v42 = vld [vmem:[%s6216_s14 + $0x328] sm:$0xff]  ;;  %v12068_v0 = vunpack.c.h.bf16 %v8865_v21  ;;  %v12069_v58 = vunpack.c.h.bf16 %v8868_v61  ;;  %v12070_v24 = vunpack.c.h.bf16 %v8891_v5 }
 0x247   : > { %v3397_v16 = vpack.c.bf16 %v3197_v46, %v3197_v46  ;;  %v8925_v4 = vld [vmem:[%s6216_s14 + $0x368] sm:$0x11]  ;;  %v12071_v49 = vunpack.c.h.bf16 %v8894_v43 }
 0x248   : > { %12041 = vst [vmem:[#allocation60_spill] sm:$0xff] %v8925_v4  ;;  %v8931_v54 = vld [vmem:[%s6216_s14 + $0x3a8] sm:$0xff]  ;;  %v1755_v35 = vadd.f32 %v12069_v58, %v12068_v0  ;;  %v1760_v3 = vsel %vm1616_vm0, %v12070_v24, 0.0  ;;  %v12073_v37 = vunpack.c.h.bf16 %v8925_v4 }
 0x249   : > { %v3916_v46 = vunpack.c.l.b16 %v3397_v16  ;;  %12042 = vst [vmem:[#allocation55_spill] sm:$0xff] %v8931_v54  ;;  %v8934_v15 = vld [vmem:[%s6216_s14 + $0x3e8] sm:$0xff]  ;;  %v12074_v8 = vunpack.c.h.bf16 %v8931_v54  ;;  %v12081_v54 = vunpack.c.h.bf16 %v8907_v25 }
 0x24a   : > { %12043 = vst [vmem:[#allocation61_spill] sm:$0xff] %v8934_v15  ;;  %v8942_v62 = vld [vmem:[%s6216_s14 + $0x428] sm:$0xff]  ;;  %v1968_v29 = vsel %vm1616_vm0, %v12073_v37, 0.0  ;;  %v12075_v21 = vunpack.c.h.bf16 %v8934_v15  ;;  %v12080_v37 = vunpack.c.h.bf16 %v8872_v9 }
 0x24b   : > { %v3999_v18 = vsel %vm3935_vm7, %v3916_v46, %v3998_v14  ;;  %v8945_v10 = vld [vmem:[%s6216_s14 + $0x468] sm:$0xff] }
 0x24c   : > { %v8948_v33 = vld [vmem:[%s6216_s14 + $0x4a8] sm:$0xff]  ;;  %v4051_v59 = vpack.c.b16 %v3999_v18, %v3999_v18  ;;  %v1756_v4 = vadd.f32 %v1755_v35, %v12080_v37  ;;  %v12087_v35 = vunpack.c.h.bf16 %v9039_v52  ;;  %v12088_v37 = vunpack.c.h.bf16 %v9046_v7 }
 0x24d   : > { %v8954_v47 = vld [vmem:[%s6216_s14 + $0x4e8] sm:$0xff] }
 0x24e   : > { %v8966_v57 = vld [vmem:[%s6216_s14 + $0x528] sm:$0x11]  ;;  %5034 = vmatprep.mubr.bf16.mxu0 %v4051_v59  ;;  %v1446_v59 = vunpack.c.h.bf16 %v9089_v41  ;;  %v1494_v41 = vunpack.c.h.bf16 %v9106_v11 }
 0x24f   : > { %v8969_v18 = vld [vmem:[%s6216_s14 + $0x568] sm:$0xff]  ;;  %v12076_v0 = vunpack.c.h.bf16 %v8966_v57 }
 0x250   : > { %12044 = vst [vmem:[#allocation62_spill] sm:$0xff] %v8969_v18  ;;  %v8976_v2 = vld [vmem:[%s6216_s14 + $0x5a8] sm:$0xff]  ;;  %v12077_v24 = vunpack.c.h.bf16 %v8969_v18 }
 0x251   : > { %12045 = vst [vmem:[#allocation63_spill] sm:$0xff] %v8976_v2  ;;  %v8979_v34 = vld [vmem:[%s6216_s14 + $0x5e8] sm:$0xff]  ;;  %v2176_v58 = vsel %vm1616_vm0, %v12076_v0, 0.0  ;;  %v12078_v43 = vunpack.c.h.bf16 %v8976_v2 }
 0x252   : > { %v8986_v27 = vld [vmem:[%s6216_s14 + $0x628] sm:$0xff] }
 0x253   : > { %v8989_v46 = vld [vmem:[%s6216_s14 + $0x668] sm:$0xff]  ;;  %v2379_v5 = vadd.f32 %v12078_v43, %v12077_v24  ;;  %v12085_v43 = vunpack.c.h.bf16 %v8942_v62 }
 0x254   : > { %v8999_v16 = vld [vmem:[%s6216_s14 + $0x6e8] sm:$0x11] }
 0x255   : > { %12046 = vst [vmem:[#allocation64_spill] sm:$0xff] %v8999_v16  ;;  %v9009_v26 = vld [vmem:[%s6216_s14 + $0x768] sm:$0xff] }
 0x256   : > { %12048 = vst [vmem:[#allocation66_spill] sm:$0xff] %v9009_v26  ;;  %v9026_v53 = vld [vmem:[%s6216_s14 + $0x828] sm:$0xff] }
 0x257   : > { %v9036_v14 = vld [vmem:[%s6216_s14 + $0x8a8] sm:$0x11] }
 0x258   : > { %12049 = vst [vmem:[#allocation67_spill] sm:$0xff] %v9036_v14  ;;  %v9129_v17 = vld [vmem:[%s6216_s14 + $0xd68] sm:$0xff]  ;;  %v12084_v18 = vunpack.c.h.bf16 %v9036_v14 }
 0x259   : > { %12066 = vst [vmem:[#allocation90_spill] sm:$0xff] %v9129_v17  ;;  %v9139_v51 = vld [vmem:[%s6216_s14 + $0xde8] sm:$0x11]  ;;  %v1574_v11 = vunpack.c.h.bf16 %v9129_v17  ;;  %v12072_v17 = vunpack.c.h.bf16 %v8900_v19 }
 0x25a   : > { %12067 = vst [vmem:[#allocation91_spill] sm:$0xff] %v9139_v51  ;;  %v2171_v51 = vadd.f32 %v12075_v21, %v12074_v8  ;;  %v12082_v8 = vunpack.c.h.bf16 %v9006_v63  ;;  %v12083_v21 = vunpack.c.h.bf16 %v9009_v26  ;;  %v2592_v2 = vsel %vm1616_vm0, %v12084_v18, 0.0 }
 0x25b   : > { %v1963_v23 = vadd.f32 %v12072_v17, %v12071_v49  ;;  %v12079_v17 = vunpack.c.h.bf16 %v8999_v16  ;;  %v12089_v26 = vunpack.c.h.bf16 %v8877_v40  ;;  %v12091_v18 = vunpack.c.h.bf16 %v9016_v31 }
 0x25c   : > { %v2587_v0 = vadd.f32 %v12083_v21, %v12082_v8  ;;  %v2172_v24 = vadd.f32 %v2171_v51, %v12085_v43  ;;  %v12090_v21 = vunpack.c.h.bf16 %v8910_v60  ;;  %v3003_v51 = vadd.f32 %v1414_v48, %v1398_v36 }
 0x25d   : > { %v2384_v49 = vsel %vm1616_vm0, %v12079_v17, 0.0  ;;  %v1964_v15 = vadd.f32 %v1963_v23, %v12081_v54  ;;  %v12086_v17 = vunpack.c.h.bf16 %v8979_v34  ;;  %v2795_v23 = vadd.f32 %v12088_v37, %v12087_v35 }
 0x25e   : > { %v2800_v54 = vsel %vm1616_vm0, %v1382_v13, 0.0  ;;  %v1757_v8 = vadd.f32 %v1756_v4, %v12089_v26  ;;  %v2588_v63 = vadd.f32 %v2587_v0, %v12091_v18  ;;  %v12092_v43 = vunpack.c.h.bf16 %v8945_v10 }
 0x25f   : > { %v2380_v16 = vadd.f32 %v2379_v5, %v12086_v17  ;;  %v1965_v14 = vadd.f32 %v1964_v15, %v12090_v21  ;;  %v12093_v17 = vunpack.c.h.bf16 %v8986_v27  ;;  %v12094_v35 = vunpack.c.h.bf16 %v9049_v50 }
 0x260   : > { %v2173_v5 = vadd.f32 %v2172_v24, %v12092_v43  ;;  %v3008_v13 = vsel %vm1616_vm0, %v1494_v41, 0.0  ;;  %v12095_v26 = vunpack.c.h.bf16 %v8880_v12  ;;  %v12096_v15 = vunpack.c.h.bf16 %v8915_v30 }
 0x261   : > { %v2381_v52 = vadd.f32 %v2380_v16, %v12093_v17  ;;  %v2796_v37 = vadd.f32 %v2795_v23, %v12094_v35  ;;  %v12097_v0 = vunpack.c.h.bf16 %v9019_v6  ;;  %v3004_v36 = vadd.f32 %v3003_v51, %v1430_v45 }
 0x262   : > { %v1758_v4 = vadd.f32 %v1757_v8, %v12095_v26  ;;  %v1966_v21 = vadd.f32 %v1965_v14, %v12096_v15  ;;  %v12098_v24 = vunpack.c.h.bf16 %v8948_v33  ;;  %v12099_v16 = vunpack.c.h.bf16 %v8989_v46 }
 0x263   : > { %v2589_v48 = vadd.f32 %v2588_v63, %v12097_v0  ;;  %v12100_v23 = vunpack.c.h.bf16 %v9056_v56  ;;  %v3211_v41 = vadd.f32 %v1526_v55, %v1510_v1  ;;  %v12101_v35 = vunpack.c.h.bf16 %v8885_v20 }
 0x264   : > { %v2174_v18 = vadd.f32 %v2173_v5, %v12098_v24  ;;  %v2382_v43 = vadd.f32 %v2381_v52, %v12099_v16  ;;  %v12102_v26 = vunpack.c.h.bf16 %v8918_v42  ;;  %v12103_v15 = vunpack.c.h.bf16 %v9026_v53 }
 0x265   : > { %v2797_v17 = vadd.f32 %v2796_v37, %v12100_v23  ;;  %v1759_v8 = vadd.f32 %v1758_v4, %v12101_v35  ;;  %v3005_v45 = vadd.f32 %v3004_v36, %v1446_v59  ;;  %v12104_v51 = vunpack.c.h.bf16 %v8954_v47  ;;  %v12110_v36 = vld [vmem:[#allocation71_spill] sm:$0xff] }
 0x266   : > { %v1967_v14 = vadd.f32 %v1966_v21, %v12102_v26  ;;  %v2590_v63 = vadd.f32 %v2589_v48, %v12103_v15  ;;  %v12105_v0 = vunpack.c.h.bf16 %v8996_v39  ;;  %v12106_v24 = vunpack.c.h.bf16 %v9059_v44  ;;  %v12108_v21 = vld [vmem:[#allocation82_spill] sm:$0xff] }
 0x267   : > { %v2175_v5 = vadd.f32 %v2174_v18, %v12104_v51  ;;  %v3212_v1 = vadd.f32 %v3211_v41, %v1542_v32  ;;  %v1761_v55 = vadd.f32 %v1760_v3, %v1759_v8  ;;  %v12107_v4 = vunpack.c.h.bf16 %v9029_v22  ;;  %v12112_v44 = vld [vmem:[#allocation78_spill] sm:$0xff] }
 0x268   : > { %v2383_v52 = vadd.f32 %v2382_v43, %v12105_v0  ;;  %v2798_v37 = vadd.f32 %v2797_v17, %v12106_v24  ;;  %v1969_v16 = vadd.f32 %v1968_v29, %v1967_v14  ;;  %v12109_v35 = vunpack.c.h.bf16 %v12108_v21 }
 0x269   : > { %v2591_v23 = vadd.f32 %v2590_v63, %v12107_v4  ;;  %v2177_v48 = vadd.f32 %v2176_v58, %v2175_v5  ;;  %v12111_v15 = vunpack.c.h.bf16 %v12110_v36  ;;  %v3213_v51 = vadd.f32 %v3212_v1, %v1558_v28 }
 0x26a   : > { %v3006_v26 = vadd.f32 %v3005_v45, %v12109_v35  ;;  %v2385_v59 = vadd.f32 %v2384_v49, %v2383_v52  ;;  %v1762_v56 = vrot.slane %v1761_v55, 4  ;;  %v1970_v43 = vrot.slane %v1969_v16, 4 }
 0x26b   : > { %v2799_v18 = vadd.f32 %v2798_v37, %v12111_v15  ;;  %v2593_v0 = vadd.f32 %v2592_v2, %v2591_v23  ;;  %v12113_v17 = vunpack.c.h.bf16 %v12112_v44  ;;  %v2178_v3 = vrot.slane %v2177_v48, 4  ;;  %v12115_v15 = vld [vmem:[#allocation91_spill] sm:$0xff] }
 0x26c   : > { %v2386_v29 = vrot.slane %v2385_v59, 4  ;;  %v3214_v8 = vadd.f32 %v3213_v51, %v1574_v11  ;;  %v1763_v14 = vadd.f32 %v1762_v56, %v1761_v55  ;;  %v1971_v63 = vadd.f32 %v1970_v43, %v1969_v16 }
 0x26d   : > { %v3007_v32 = vadd.f32 %v3006_v26, %v12113_v17  ;;  %v2801_v41 = vadd.f32 %v2800_v54, %v2799_v18  ;;  %v2594_v24 = vrot.slane %v2593_v0, 4  ;;  %v2179_v58 = vadd.f32 %v2178_v3, %v2177_v48 }
 0x26e   : > { %v2387_v49 = vadd.f32 %v2386_v29, %v2385_v59  ;;  %v12114_v52 = vunpack.c.h.bf16 %v9136_v38  ;;  %v1764_v37 = vrot.slane %v1763_v14, 2  ;;  %v1972_v1 = vrot.slane %v1971_v63, 2 }
 0x26f   : > { %v3009_v45 = vadd.f32 %v3008_v13, %v3007_v32  ;;  %v2802_v5 = vrot.slane %v2801_v41, 4  ;;  %v2595_v2 = vadd.f32 %v2594_v24, %v2593_v0  ;;  %v2180_v23 = vrot.slane %v2179_v58, 2 }
 0x270   : > { %v3215_v28 = vadd.f32 %v3214_v8, %v12114_v52  ;;  %v2388_v35 = vrot.slane %v2387_v49, 2  ;;  %v12116_v54 = vunpack.c.h.bf16 %v12115_v15  ;;  %v1765_v56 = vadd.f32 %v1764_v37, %v1763_v14 }
 0x271   : > { %v3010_v4 = vrot.slane %v3009_v45, 4  ;;  %v2803_v26 = vadd.f32 %v2802_v5, %v2801_v41  ;;  %v1973_v55 = vadd.f32 %v1972_v1, %v1971_v63  ;;  %v2596_v13 = vrot.slane %v2595_v2, 2 }
 0x272   : > { %v3216_v11 = vsel %vm1616_vm0, %v12116_v54, 0.0  ;;  %v2181_v48 = vadd.f32 %v2180_v23, %v2179_v58  ;;  %v2389_v59 = vadd.f32 %v2388_v35, %v2387_v49  ;;  %v1766_v43 = vrot.slane %v1765_v56, 1 }
 0x273   : > { %v3011_v16 = vadd.f32 %v3010_v4, %v3009_v45  ;;  %v2804_v18 = vrot.slane %v2803_v26, 2  ;;  %v3217_v51 = vadd.f32 %v3216_v11, %v3215_v28  ;;  %v1974_v17 = vrot.slane %v1973_v55, 1 }
 0x274   : > { %v2597_v32 = vadd.f32 %v2596_v13, %v2595_v2  ;;  %v2182_v3 = vrot.slane %v2181_v48, 1  ;;  %v2390_v29 = vrot.slane %v2389_v59, 1  ;;  %v1767_v24 = vadd.f32 %v1766_v43, %v1765_v56 }
 0x275   : > { %v3012_v0 = vrot.slane %v3011_v16, 2  ;;  %v2805_v8 = vadd.f32 %v2804_v18, %v2803_v26  ;;  %v3218_v41 = vrot.slane %v3217_v51, 4  ;;  %v1975_v5 = vadd.f32 %v1974_v17, %v1973_v55  ;;  %v12117_v17 = vld [vmem:[#allocation83_spill] sm:$0xff] }
 0x276   : > { %v2598_v52 = vrot.slane %v2597_v32, 1  ;;  %v2183_v14 = vadd.f32 %v2182_v3, %v2181_v48  ;;  %v2391_v63 = vadd.f32 %v2390_v29, %v2389_v59  ;;  %v3287_v1 = vpack.c.bf16 %v1767_v24, %v1767_v24 }
 0x277   : > { %v3013_v54 = vadd.f32 %v3012_v0, %v3011_v16  ;;  %v2806_v37 = vrot.slane %v2805_v8, 1  ;;  %v3219_v45 = vadd.f32 %v3218_v41, %v3217_v51  ;;  %v3303_v28 = vpack.c.bf16 %v1975_v5, %v1975_v5  ;;  %v12119_v0 = vld [vmem:[#allocation75_spill] sm:$0xff]  ;;  %v12121_v5 = vld [vmem:[#allocation14_spill] sm:$0xff] }
 0x278   : > { %v2599_v58 = vadd.f32 %v2598_v52, %v2597_v32  ;;  %v3319_v2 = vpack.c.bf16 %v2183_v14, %v2183_v14  ;;  %v3335_v35 = vpack.c.bf16 %v2391_v63, %v2391_v63  ;;  %v3806_v26 = vunpack.c.l.b16 %v3287_v1 }
 0x279   : > { %v3014_v49 = vrot.slane %v3013_v54, 1  ;;  %v2807_v4 = vadd.f32 %v2806_v37, %v2805_v8  ;;  %v3220_v23 = vrot.slane %v3219_v45, 2  ;;  %v3822_v18 = vunpack.c.l.b16 %v3303_v28  ;;  %v12123_v37 = vld [vmem:[#allocation87_spill] sm:$0xff]  ;;  %v12127_v28 = vld [vmem:[#allocation10_spill] sm:$0xff] }
 0x27a   : > { %v3351_v13 = vpack.c.bf16 %v2599_v58, %v2599_v58  ;;  %v3838_v43 = vunpack.c.l.b16 %v3319_v2  ;;  %v3854_v16 = vunpack.c.l.b16 %v3335_v35  ;;  %v12118_v32 = vunpack.c.l.bf16 %v12117_v17  ;;  %v12135_v17 = vld [vmem:[#allocation92_spill] sm:$0xff] }
 0x27b   : > { %v3015_v11 = vadd.f32 %v3014_v49, %v3013_v54  ;;  %v3221_v56 = vadd.f32 %v3220_v23, %v3219_v45  ;;  %v3367_v55 = vpack.c.bf16 %v2807_v4, %v2807_v4  ;;  %v4007_v51 = vsel %vm3923_vm1, %v3822_v18, %v3806_v26  ;;  %v12125_v49 = vld [vmem:[#allocation86_spill] sm:$0xff]  ;;  %v12131_v18 = vld [vmem:[#allocation16_spill] sm:$0xff] }
 0x27c   : > { %v3870_v59 = vunpack.c.l.b16 %v3351_v13  ;;  %v12120_v3 = vunpack.c.l.bf16 %v12119_v0  ;;  %v4008_v24 = vsel %vm3925_vm2, %v3838_v43, %v4007_v51  ;;  %v12122_v52 = vunpack.c.l.bf16 %v12121_v5  ;;  %v12133_v43 = vld [vmem:[#allocation18_spill] sm:$0xff] }
 0x27d   : > { %v3383_v48 = vpack.c.bf16 %v3015_v11, %v3015_v11  ;;  %v3222_v8 = vrot.slane %v3221_v56, 1  ;;  %v3886_v41 = vunpack.c.l.b16 %v3367_v55  ;;  %v4009_v63 = vsel %vm3927_vm3, %v3854_v16, %v4008_v24  ;;  %v12129_v11 = vld [vmem:[#allocation93_spill] sm:$0xff] }
 0x27e   : > { %v1716_v29 = vadd.f32 %v12120_v3, %v12118_v32  ;;  %v1721_v54 = vsel %vm1616_vm0, %v12122_v52, 0.0  ;;  %v12124_v45 = vunpack.c.l.bf16 %v12123_v37  ;;  %v12126_v1 = vunpack.c.l.bf16 %v12125_v49  ;;  %v12137_v3 = vld [vmem:[#allocation15_spill] sm:$0xff]  ;;  %v12143_v49 = vld [vmem:[#allocation13_spill] sm:$0xff] }
 0x27f   : > { %v3902_v14 = vunpack.c.l.b16 %v3383_v48  ;;  %v12128_v4 = vunpack.c.l.bf16 %v12127_v28  ;;  %v3223_v2 = vadd.f32 %v3222_v8, %v3221_v56  ;;  %v4010_v35 = vsel %vm3929_vm4, %v3870_v59, %v4009_v63  ;;  %v12139_v56 = vld [vmem:[#allocation21_spill] sm:$0xff]  ;;  %v12141_v63 = vld [vmem:[#allocation24_spill] sm:$0xff]  ;;  %v12145_v28 = vld [vmem:[#allocation19_spill] sm:$0xff] }
 0x280   : > { %v1717_v58 = vadd.f32 %v1716_v29, %v12124_v45  ;;  %v12130_v13 = vunpack.c.l.bf16 %v12129_v11  ;;  %v12132_v55 = vunpack.c.l.bf16 %v12131_v18  ;;  %v12134_v48 = vunpack.c.l.bf16 %v12133_v43 }
 0x281   : > { %v1924_v23 = vadd.f32 %v12128_v4, %v12126_v1  ;;  %v4011_v51 = vsel %vm3931_vm5, %v3886_v41, %v4010_v35  ;;  %v12136_v32 = vunpack.c.l.bf16 %v12135_v17  ;;  %v12138_v29 = vunpack.c.l.bf16 %v12137_v3  ;;  %v12147_v35 = vld [vmem:[#allocation85_spill] sm:$0xff]  ;;  %v12157_v3 = vld [vmem:[#allocation35_spill] sm:$0xff] }
 0x282   : > { %v1929_v26 = vsel %vm1616_vm0, %v12130_v13, 0.0  ;;  %v2132_v16 = vadd.f32 %v12134_v48, %v12132_v55  ;;  %v12140_v8 = vunpack.c.l.bf16 %v12139_v56  ;;  %v3399_v5 = vpack.c.bf16 %v3223_v2, %v3223_v2  ;;  %v12149_v13 = vld [vmem:[#allocation11_spill] sm:$0xff]  ;;  %v12151_v55 = vld [vmem:[#allocation9_spill] sm:$0xff]  ;;  %v12153_v48 = vld [vmem:[#allocation22_spill] sm:$0xff] }
 0x283   : > { %v1718_v0 = vadd.f32 %v1717_v58, %v12136_v32  ;;  %v1925_v24 = vadd.f32 %v1924_v23, %v12138_v29  ;;  %v4012_v52 = vsel %vm3933_vm6, %v3902_v14, %v4011_v51  ;;  %v12142_v37 = vunpack.c.l.bf16 %v12141_v63  ;;  %v12155_v51 = vld [vmem:[#allocation43_spill] sm:$0xff] }
 0x284   : > { %v2137_v59 = vsel %vm1616_vm0, %v12140_v8, 0.0  ;;  %v12144_v1 = vunpack.c.l.bf16 %v12143_v49  ;;  %v12146_v41 = vunpack.c.l.bf16 %v12145_v28  ;;  %v12148_v58 = vunpack.c.l.bf16 %v12147_v35  ;;  %v12159_v8 = vld [vmem:[#allocation38_spill] sm:$0xff]  ;;  %v12165_v35 = vld [vmem:[#allocation17_spill] sm:$0xff] }
 0x285   : > { %v2133_v45 = vadd.f32 %v2132_v16, %v12142_v37  ;;  %v12150_v23 = vunpack.c.l.bf16 %v12149_v13  ;;  %v12152_v43 = vunpack.c.l.bf16 %v12151_v55  ;;  %v12154_v14 = vunpack.c.l.bf16 %v12153_v48 }
 0x286   : > { %v2340_v4 = vadd.f32 %v12146_v41, %v12144_v1  ;;  %v1719_v11 = vadd.f32 %v1718_v0, %v12148_v58  ;;  %v12156_v17 = vunpack.c.l.bf16 %v12155_v51  ;;  %v3918_v32 = vunpack.c.l.b16 %v3399_v5  ;;  %v12161_v0 = vld [vmem:[#allocation51_spill] sm:$0xff] }
 0x287   : > { %v1926_v18 = vadd.f32 %v1925_v24, %v12150_v23  ;;  %v2345_v2 = vsel %vm1616_vm0, %v12152_v43, 0.0  ;;  %v12158_v29 = vunpack.c.l.bf16 %v12157_v3  ;;  %v12160_v63 = vunpack.c.l.bf16 %v12159_v8  ;;  %v12163_v1 = vld [vmem:[#allocation79_spill] sm:$0xff]  ;;  %v12167_v23 = vld [vmem:[#allocation20_spill] sm:$0xff]  ;;  %v12175_v8 = vld [vmem:[#allocation29_spill] sm:$0xff] }
 0x288   : > { %v2548_v16 = vadd.f32 %v12156_v17, %v12154_v14  ;;  %v12162_v49 = vunpack.c.l.bf16 %v12161_v0  ;;  %v12164_v28 = vunpack.c.l.bf16 %v12163_v1  ;;  %v12166_v58 = vunpack.c.l.bf16 %v12165_v35  ;;  %v12169_v5 = vld [vmem:[#allocation23_spill] sm:$0xff]  ;;  %v12171_v14 = vld [vmem:[#allocation44_spill] sm:$0xff] }
 0x289   : > { %v2134_v56 = vadd.f32 %v2133_v45, %v12158_v29  ;;  %v2341_v37 = vadd.f32 %v2340_v4, %v12160_v63  ;;  %v12168_v55 = vunpack.c.l.bf16 %v12167_v23  ;;  %v12170_v48 = vunpack.c.l.bf16 %v12169_v5  ;;  %v12173_v17 = vld [vmem:[#allocation36_spill] sm:$0xff]  ;;  %v12181_v23 = vld [vmem:[#allocation39_spill] sm:$0xff] }
 0x28a   : > { %v2553_v24 = vsel %vm1616_vm0, %v12162_v49, 0.0  ;;  %v1720_v41 = vadd.f32 %v1719_v11, %v12164_v28  ;;  %v1927_v13 = vadd.f32 %v1926_v18, %v12166_v58  ;;  %v12172_v45 = vunpack.c.l.bf16 %v12171_v14  ;;  %v12177_v11 = vld [vmem:[#allocation56_spill] sm:$0xff]  ;;  %v12185_v14 = vld [vmem:[#allocation37_spill] sm:$0xff] }
 0x28b   : > { %v2549_v43 = vadd.f32 %v2548_v16, %v12168_v55  ;;  %v4013_v4 = vsel %vm3935_vm7, %v3918_v32, %v4012_v52  ;;  %v12174_v3 = vunpack.c.l.bf16 %v12173_v17  ;;  %v12176_v63 = vunpack.c.l.bf16 %v12175_v8  ;;  %v12179_v16 = vld [vmem:[#allocation28_spill] sm:$0xff]  ;;  %v12189_v8 = vld [vmem:[#allocation26_spill] sm:$0xff] }
 0x28c   : > { %v2756_v51 = vadd.f32 %v12172_v45, %v12170_v48  ;;  %v12178_v49 = vunpack.c.l.bf16 %v12177_v11  ;;  %v4053_v1 = vpack.c.b16 %v4013_v4, %v4013_v4  ;;  %v1722_v28 = vadd.f32 %v1721_v54, %v1720_v41  ;;  %v12183_v48 = vld [vmem:[#allocation8_spill] sm:$0xff]  ;;  %v12191_v11 = vld [vmem:[#allocation57_spill] sm:$0xff] }
 0x28d   : > { %v2135_v29 = vadd.f32 %v2134_v56, %v12174_v3  ;;  %v2342_v0 = vadd.f32 %v2341_v37, %v12176_v63  ;;  %v12180_v35 = vunpack.c.l.bf16 %v12179_v16  ;;  %v12182_v55 = vunpack.c.l.bf16 %v12181_v23  ;;  %v12187_v17 = vld [vmem:[#allocation12_spill] sm:$0xff] }
 0x28e   : > { %v2761_v18 = vsel %vm1616_vm0, %v12178_v49, 0.0  ;;  %v12184_v52 = vunpack.c.l.bf16 %v12183_v48  ;;  %v12186_v56 = vunpack.c.l.bf16 %v12185_v14  ;;  %v12188_v37 = vunpack.c.l.bf16 %v12187_v17  ;;  %5074 = vmatprep.mubr.bf16.mxu1 %v4053_v1  ;;  %v12193_v49 = vld [vmem:[#allocation30_spill] sm:$0xff] }
 0x28f   : > { %v1928_v58 = vadd.f32 %v1927_v13, %v12180_v35  ;;  %v2550_v5 = vadd.f32 %v2549_v43, %v12182_v55  ;;  %v12190_v63 = vunpack.c.l.bf16 %v12189_v8  ;;  %v12192_v4 = vunpack.c.l.bf16 %v12191_v11  ;;  %v12195_v35 = vld [vmem:[#allocation58_spill] sm:$0xff] }
 0x290   : > { %v2136_v32 = vadd.f32 %v2135_v29, %v12184_v52  ;;  %v2343_v45 = vadd.f32 %v2342_v0, %v12186_v56  ;;  %v2757_v3 = vadd.f32 %v2756_v51, %v12188_v37  ;;  %v1723_v41 = vrot.slane %v1722_v28, 4  ;;  %v12197_v0 = vld [vmem:[#allocation49_spill] sm:$0xff]  ;;  %v12199_v51 = vld [vmem:[#allocation31_spill] sm:$0xff]  ;;  %v12201_v17 = vld [vmem:[#allocation42_spill] sm:$0xff] }
 0x291   : > { %v2964_v54 = vadd.f32 %v12192_v4, %v12190_v63  ;;  %v1930_v13 = vadd.f32 %v1929_v26, %v1928_v58  ;;  %v12194_v16 = vunpack.c.l.bf16 %v12193_v49  ;;  %v12196_v23 = vunpack.c.l.bf16 %v12195_v35  ;;  %v12203_v26 = vld [vmem:[#allocation25_spill] sm:$0xff] }
 0x292   : > { %v2138_v55 = vadd.f32 %v2137_v59, %v2136_v32  ;;  %v12198_v48 = vunpack.c.l.bf16 %v12197_v0  ;;  %v12200_v14 = vunpack.c.l.bf16 %v12199_v51  ;;  %v12202_v37 = vunpack.c.l.bf16 %v12201_v17  ;;  %v12207_v49 = vld [vmem:[#allocation45_spill] sm:$0xff] }
 0x293   : > { %v2551_v43 = vadd.f32 %v2550_v5, %v12194_v16  ;;  %v2969_v29 = vsel %vm1616_vm0, %v12196_v23, 0.0  ;;  %v1724_v1 = vadd.f32 %v1723_v41, %v1722_v28  ;;  %v1931_v63 = vrot.slane %v1930_v13, 4  ;;  %v12205_v5 = vld [vmem:[#allocation47_spill] sm:$0xff]  ;;  %v12213_v41 = vld [vmem:[#allocation46_spill] sm:$0xff] }
 0x294   : > { %v2344_v52 = vadd.f32 %v2343_v45, %v12198_v48  ;;  %v2758_v56 = vadd.f32 %v2757_v3, %v12200_v14  ;;  %v2965_v8 = vadd.f32 %v2964_v54, %v12202_v37  ;;  %v12204_v58 = vunpack.c.l.bf16 %v12203_v26  ;;  %v12209_v23 = vld [vmem:[#allocation27_spill] sm:$0xff]  ;;  %v12211_v48 = vld [vmem:[#allocation33_spill] sm:$0xff] }
 0x295   : > { %v12206_v4 = vunpack.c.l.bf16 %v12205_v5  ;;  %v12208_v16 = vunpack.c.l.bf16 %v12207_v49  ;;  %v2139_v59 = vrot.slane %v2138_v55, 4  ;;  %v12210_v45 = vunpack.c.l.bf16 %v12209_v23 }
 0x296   : > { %v2552_v11 = vadd.f32 %v2551_v43, %v12204_v58  ;;  %v2346_v32 = vadd.f32 %v2345_v2, %v2344_v52  ;;  %v12212_v3 = vunpack.c.l.bf16 %v12211_v48  ;;  %v1725_v14 = vrot.slane %v1724_v1, 2  ;;  %v12215_v58 = vld [vmem:[#allocation40_spill] sm:$0xff] }
 0x297   : > { %v3172_v35 = vadd.f32 %v12208_v16, %v12206_v4  ;;  %v2759_v0 = vadd.f32 %v2758_v56, %v12210_v45  ;;  %v1932_v54 = vadd.f32 %v1931_v63, %v1930_v13  ;;  %v12214_v17 = vunpack.c.l.bf16 %v12213_v41  ;;  %v12217_v4 = vld [vmem:[#allocation34_spill] sm:$0xff]  ;;  %v12219_v45 = vld [vmem:[#allocation53_spill] sm:$0xff]  ;;  %v12221_v63 = vld [vmem:[#allocation32_spill] sm:$0xff] }
 0x298   : > { %v2966_v51 = vadd.f32 %v2965_v8, %v12212_v3  ;;  %v2554_v28 = vadd.f32 %v2553_v24, %v2552_v11  ;;  %v2140_v43 = vadd.f32 %v2139_v59, %v2138_v55  ;;  %v2347_v26 = vrot.slane %v2346_v32, 4 }
 0x299   : > { %v3173_v37 = vadd.f32 %v3172_v35, %v12214_v17  ;;  %v12216_v5 = vunpack.c.l.bf16 %v12215_v58  ;;  %v12218_v16 = vunpack.c.l.bf16 %v12217_v4  ;;  %v1726_v52 = vadd.f32 %v1725_v14, %v1724_v1  ;;  %v12223_v17 = vld [vmem:[#allocation50_spill] sm:$0xff] }
 0x29a   : > { %v1933_v23 = vrot.slane %v1932_v54, 2  ;;  %v2555_v56 = vrot.slane %v2554_v28, 4  ;;  %v12220_v48 = vunpack.c.l.bf16 %v12219_v45  ;;  %v2141_v3 = vrot.slane %v2140_v43, 2 }
 0x29b   : > { %v2760_v49 = vadd.f32 %v2759_v0, %v12216_v5  ;;  %v2967_v2 = vadd.f32 %v2966_v51, %v12218_v16  ;;  %v2348_v13 = vadd.f32 %v2347_v26, %v2346_v32  ;;  %v12222_v11 = vunpack.c.l.bf16 %v12221_v63 }
 0x29c   : > { %v3174_v8 = vadd.f32 %v3173_v37, %v12220_v48  ;;  %v1727_v55 = vrot.slane %v1726_v52, 1  ;;  %v1934_v59 = vadd.f32 %v1933_v23, %v1932_v54  ;;  %v2556_v41 = vadd.f32 %v2555_v56, %v2554_v28  ;;  %v12225_v37 = vld [vmem:[#allocation52_spill] sm:$0xff]  ;;  %v12227_v28 = vld [vmem:[#allocation59_spill] sm:$0xff] }
 0x29d   : > { %v2762_v24 = vadd.f32 %v2761_v18, %v2760_v49  ;;  %v2968_v35 = vadd.f32 %v2967_v2, %v12222_v11  ;;  %v12224_v0 = vunpack.c.l.bf16 %v12223_v17  ;;  %v2142_v5 = vadd.f32 %v2141_v3, %v2140_v43 }
 0x29e   : > { %v2349_v51 = vrot.slane %v2348_v13, 2  ;;  %v1728_v4 = vadd.f32 %v1727_v55, %v1726_v52  ;;  %v1935_v16 = vrot.slane %v1934_v59, 1  ;;  %v2557_v45 = vrot.slane %v2556_v41, 2 }
 0x29f   : > { %v3175_v58 = vadd.f32 %v3174_v8, %v12224_v0  ;;  %v2763_v1 = vrot.slane %v2762_v24, 4  ;;  %v2970_v14 = vadd.f32 %v2969_v29, %v2968_v35  ;;  %v12226_v48 = vunpack.c.l.bf16 %v12225_v37 }
 0x2a0   : > { %v2143_v18 = vrot.slane %v2142_v5, 1  ;;  %v2350_v26 = vadd.f32 %v2349_v51, %v2348_v13  ;;  %v1936_v63 = vadd.f32 %v1935_v16, %v1934_v59  ;;  %v2558_v54 = vadd.f32 %v2557_v45, %v2556_v41 }
 0x2a1   : > { %v3176_v32 = vadd.f32 %v3175_v58, %v12226_v48  ;;  %v2764_v49 = vadd.f32 %v2763_v1, %v2762_v24  ;;  %v2971_v2 = vrot.slane %v2970_v14, 4  ;;  %v12228_v23 = vunpack.c.l.bf16 %v12227_v28  ;;  %v12229_v1 = vld [vmem:[#allocation41_spill] sm:$0xff] }
 0x2a2   : > { %v3284_v43 = vpack.c.bf16 %v1728_v4, %v1728_v4  ;;  %v2144_v8 = vadd.f32 %v2143_v18, %v2142_v5  ;;  %v2351_v3 = vrot.slane %v2350_v26, 1  ;;  %v2559_v11 = vrot.slane %v2558_v54, 1 }
 0x2a3   : > { %v3177_v56 = vsel %vm1616_vm0, %v12228_v23, 0.0  ;;  %v2765_v29 = vrot.slane %v2764_v49, 2  ;;  %v2972_v52 = vadd.f32 %v2971_v2, %v2970_v14  ;;  %v3300_v55 = vpack.c.bf16 %v1936_v63, %v1936_v63 }
 0x2a4   : > { %v3178_v35 = vadd.f32 %v3177_v56, %v3176_v32  ;;  %v3803_v17 = vunpack.c.l.b16 %v3284_v43  ;;  %v2352_v0 = vadd.f32 %v2351_v3, %v2350_v26  ;;  %v3316_v24 = vpack.c.bf16 %v2144_v8, %v2144_v8  ;;  %v12234_v3 = vld [vmem:[#allocation48_spill] sm:$0xff] }
 0x2a5   : > { %v2766_v58 = vadd.f32 %v2765_v29, %v2764_v49  ;;  %v2973_v13 = vrot.slane %v2972_v52, 2  ;;  %v2560_v51 = vadd.f32 %v2559_v11, %v2558_v54  ;;  %v3819_v41 = vunpack.c.l.b16 %v3300_v55 }
 0x2a6   : > { %v3179_v59 = vrot.slane %v3178_v35, 4  ;;  %v12230_v16 = vunpack.c.l.bf16 %v12229_v1  ;;  %v12231_v45 = vunpack.c.l.bf16 %v8868_v61  ;;  %v3332_v48 = vpack.c.bf16 %v2352_v0, %v2352_v0 }
 0x2a7   : > { %v2767_v5 = vrot.slane %v2766_v58, 1  ;;  %v2974_v37 = vadd.f32 %v2973_v13, %v2972_v52  ;;  %v3835_v14 = vunpack.c.l.b16 %v3316_v24  ;;  %v3348_v32 = vpack.c.bf16 %v2560_v51, %v2560_v51 }
 0x2a8   : > { %v1742_v4 = vadd.f32 %v12231_v45, %v12230_v16  ;;  %v3180_v18 = vadd.f32 %v3179_v59, %v3178_v35  ;;  %v3986_v2 = vsel %vm3923_vm1, %v3819_v41, %v3803_v17  ;;  %v12232_v26 = vunpack.c.l.bf16 %v8872_v9  ;;  %v12236_v9 = vld [vmem:[#allocation54_spill] sm:$0xff]  ;;  %v12240_v59 = vld [vmem:[#allocation60_spill] sm:$0xff] }
 0x2a9   : > { %v2768_v63 = vadd.f32 %v2767_v5, %v2766_v58  ;;  %v2975_v54 = vrot.slane %v2974_v37, 1  ;;  %v3851_v28 = vunpack.c.l.b16 %v3332_v48  ;;  %v3987_v23 = vsel %vm3925_vm2, %v3835_v14, %v3986_v2  ;;  %v12245_v14 = vld [vmem:[#allocation61_spill] sm:$0xff] }
 0x2aa   : > { %v1743_v49 = vadd.f32 %v1742_v4, %v12232_v26  ;;  %v3181_v56 = vrot.slane %v3180_v18, 2  ;;  %v3867_v43 = vunpack.c.l.b16 %v3348_v32  ;;  %v12233_v61 = vunpack.c.l.bf16 %v8877_v40 }
 0x2ab   : > { %v12235_v29 = vunpack.c.l.bf16 %v12234_v3  ;;  %v2976_v11 = vadd.f32 %v2975_v54, %v2974_v37  ;;  %v3364_v35 = vpack.c.bf16 %v2768_v63, %v2768_v63  ;;  %v3988_v55 = vsel %vm3927_vm3, %v3851_v28, %v3987_v23  ;;  %v12243_v37 = vld [vmem:[#allocation55_spill] sm:$0xff]  ;;  %v12249_v63 = vld [vmem:[#allocation62_spill] sm:$0xff] }
 0x2ac   : > { %v1744_v8 = vadd.f32 %v1743_v49, %v12233_v61  ;;  %v12237_v17 = vunpack.c.l.bf16 %v12236_v9  ;;  %v12238_v0 = vunpack.c.l.bf16 %v8900_v19  ;;  %v3182_v13 = vadd.f32 %v3181_v56, %v3180_v18  ;;  %v12251_v28 = vld [vmem:[#allocation63_spill] sm:$0xff] }
 0x2ad   : > { %v1747_v52 = vsel %vm1616_vm0, %v12235_v29, 0.0  ;;  %v3989_v24 = vsel %vm3929_vm4, %v3867_v43, %v3988_v55  ;;  %v12239_v51 = vunpack.c.l.bf16 %v8880_v12  ;;  %v12241_v41 = vunpack.c.l.bf16 %v12240_v59  ;;  %v12256_v55 = vld [vmem:[#allocation64_spill] sm:$0xff]  ;;  %v12262_v59 = vld [vmem:[#allocation66_spill] sm:$0xff] }
 0x2ae   : > { %v1950_v58 = vadd.f32 %v12238_v0, %v12237_v17  ;;  %v3380_v16 = vpack.c.bf16 %v2976_v11, %v2976_v11  ;;  %v3883_v45 = vunpack.c.l.b16 %v3364_v35  ;;  %v12242_v4 = vunpack.c.l.bf16 %v8907_v25 }
 0x2af   : > { %v1745_v40 = vadd.f32 %v1744_v8, %v12239_v51  ;;  %v1955_v1 = vsel %vm1616_vm0, %v12241_v41, 0.0  ;;  %v12244_v48 = vunpack.c.l.bf16 %v12243_v37  ;;  %v12246_v19 = vunpack.c.l.bf16 %v12245_v14 }
 0x2b0   : > { %v1951_v5 = vadd.f32 %v1950_v58, %v12242_v4  ;;  %v3183_v18 = vrot.slane %v3182_v13, 1  ;;  %v12247_v2 = vunpack.c.l.bf16 %v8885_v20  ;;  %v12248_v12 = vunpack.c.l.bf16 %v8966_v57  ;;  %v12265_v4 = vld [vmem:[#allocation67_spill] sm:$0xff] }
 0x2b1   : > { %v2158_v32 = vadd.f32 %v12246_v19, %v12244_v48  ;;  %v12250_v54 = vunpack.c.l.bf16 %v12249_v63  ;;  %v12252_v23 = vunpack.c.l.bf16 %v12251_v28  ;;  %v3899_v25 = vunpack.c.l.b16 %v3380_v16 }
 0x2b2   : > { %v1746_v26 = vadd.f32 %v1745_v40, %v12247_v2  ;;  %v2163_v49 = vsel %vm1616_vm0, %v12248_v12, 0.0  ;;  %v3990_v43 = vsel %vm3931_vm5, %v3883_v45, %v3989_v24  ;;  %v12253_v61 = vunpack.c.l.bf16 %v8910_v60  ;;  %v12260_v40 = vld [vmem:[#allocation65_spill] sm:$0xff] }
 0x2b3   : > { %v2366_v56 = vadd.f32 %v12252_v23, %v12250_v54  ;;  %v12254_v3 = vunpack.c.l.bf16 %v8942_v62  ;;  %v3184_v20 = vadd.f32 %v3183_v18, %v3182_v13  ;;  %v12255_v57 = vunpack.c.l.bf16 %v8979_v34  ;;  %v12270_v18 = vld [vmem:[#allocation68_spill] sm:$0xff] }
 0x2b4   : > { %v1952_v8 = vadd.f32 %v1951_v5, %v12253_v61  ;;  %v1748_v11 = vadd.f32 %v1747_v52, %v1746_v26  ;;  %v12257_v9 = vunpack.c.l.bf16 %v12256_v55  ;;  %v3991_v0 = vsel %vm3933_vm6, %v3899_v25, %v3990_v43  ;;  %v12274_v23 = vld [vmem:[#allocation72_spill] sm:$0xff] }
 0x2b5   : > { %v2159_v29 = vadd.f32 %v2158_v32, %v12254_v3  ;;  %v2367_v35 = vadd.f32 %v2366_v56, %v12255_v57  ;;  %v12258_v58 = vunpack.c.l.bf16 %v8915_v30  ;;  %v12259_v60 = vunpack.c.l.bf16 %v8945_v10 }
 0x2b6   : > { %v2371_v17 = vsel %vm1616_vm0, %v12257_v9, 0.0  ;;  %v12261_v62 = vunpack.c.l.bf16 %v12260_v40  ;;  %v12263_v13 = vunpack.c.l.bf16 %v12262_v59  ;;  %v3396_v41 = vpack.c.bf16 %v3184_v20, %v3184_v20  ;;  %v12287_v59 = vld [vmem:[#allocation81_spill] sm:$0xff] }
 0x2b7   : > { %v1953_v24 = vadd.f32 %v1952_v8, %v12258_v58  ;;  %v2160_v51 = vadd.f32 %v2159_v29, %v12259_v60  ;;  %v1749_v34 = vrot.slane %v1748_v11, 4  ;;  %v12264_v16 = vunpack.c.l.bf16 %v8986_v27 }
 0x2b8   : > { %v2574_v52 = vadd.f32 %v12263_v13, %v12261_v62  ;;  %v12266_v5 = vunpack.c.l.bf16 %v12265_v4  ;;  %v12267_v30 = vunpack.c.l.bf16 %v8918_v42  ;;  %v12268_v10 = vunpack.c.l.bf16 %v8948_v33 }
 0x2b9   : > { %v2368_v45 = vadd.f32 %v2367_v35, %v12264_v16  ;;  %v12269_v19 = vunpack.c.l.bf16 %v9016_v31  ;;  %v12271_v2 = vunpack.c.l.bf16 %v12270_v18  ;;  %v12272_v26 = vunpack.c.l.bf16 %v9046_v7  ;;  %v12282_v35 = vld [vmem:[#allocation80_spill] sm:$0xff]  ;;  %v5905_v18 = vld [vmem:[%s10777_s1 + $0x308] sm:$0xff]  }
 0x2ba   : > { %v2579_v37 = vsel %vm1616_vm0, %v12266_v5, 0.0  ;;  %v1954_v48 = vadd.f32 %v1953_v24, %v12267_v30  ;;  %v2161_v14 = vadd.f32 %v2160_v51, %v12268_v10  ;;  %v3915_v27 = vunpack.c.l.b16 %v3396_v41  ;;  %v12285_v51 = vld [vmem:[#allocation69_spill] sm:$0xff] }
 0x2bb   : > { %v2575_v32 = vadd.f32 %v2574_v52, %v12269_v19  ;;  %v2782_v12 = vadd.f32 %v12272_v26, %v12271_v2  ;;  %v1750_v63 = vadd.f32 %v1749_v34, %v1748_v11  ;;  %v12273_v54 = vunpack.c.l.bf16 %v8989_v46  ;;  %v12280_v11 = vld [vmem:[#allocation76_spill] sm:$0xff] }
 0x2bc   : > { %v12275_v56 = vunpack.c.l.bf16 %v12274_v23  ;;  %v1956_v25 = vadd.f32 %v1955_v1, %v1954_v48  ;;  %v12276_v33 = vunpack.c.l.bf16 %v8954_v47  ;;  %v12277_v31 = vunpack.c.l.bf16 %v9019_v6  ;;  %v5901_v47 = vld [vmem:[%s10777_s1 + $0x300] sm:$0xff]   ;;  %v12292_v48 = vld [vmem:[#allocation70_spill] sm:$0xff] }
 0x2bd   : > { %v2369_v28 = vadd.f32 %v2368_v45, %v12273_v54  ;;  %v12278_v8 = vunpack.c.l.bf16 %v9049_v50  ;;  %v3992_v3 = vsel %vm3935_vm7, %v3915_v27, %v3991_v0  ;;  %v1751_v29 = vrot.slane %v1750_v63, 2  ;;  %v5907_v23 = vld [vmem:[%s10777_s1 + $0x350] sm:$0xff]  }
 0x2be   : > { %v2787_v42 = vsel %vm1616_vm0, %v12275_v56, 0.0  ;;  %v2162_v43 = vadd.f32 %v2161_v14, %v12276_v33  ;;  %v2576_v61 = vadd.f32 %v2575_v32, %v12277_v31  ;;  %v12279_v46 = vunpack.c.l.bf16 %v8996_v39  ;;  %v5903_v39 = vld [vmem:[%s10777_s1 + $0x348] sm:$0xff]  }
 0x2bf   : > { %v2783_v7 = vadd.f32 %v2782_v12, %v12278_v8  ;;  %v12281_v57 = vunpack.c.l.bf16 %v12280_v11  ;;  %v12283_v55 = vunpack.c.l.bf16 %v12282_v35  ;;  %v4050_v6 = vpack.c.b16 %v3992_v3, %v3992_v3  ;;  %v12294_v14 = vld [vmem:[#allocation73_spill] sm:$0xff]  ;;  %v12302_v3 = vld [vmem:[#allocation88_spill] sm:$0xff] }
 0x2c0   : > { %v2370_v20 = vadd.f32 %v2369_v28, %v12279_v46  ;;  %v1957_v9 = vrot.slane %v1956_v25, 4  ;;  %v2164_v58 = vadd.f32 %v2163_v49, %v2162_v43  ;;  %v12284_v50 = vunpack.c.l.bf16 %v9026_v53  ;;  %v12290_v53 = vld [vmem:[#allocation74_spill] sm:$0xff]  ;;  %v12296_v12 = vld [vmem:[#allocation77_spill] sm:$0xff] }
 0x2c1   : > { %v2990_v1 = vadd.f32 %v12283_v55, %v12281_v57  ;;  %v1752_v0 = vadd.f32 %v1751_v29, %v1750_v63  ;;  %v12286_v40 = vunpack.c.l.bf16 %v12285_v51  ;;  %v12288_v13 = vunpack.c.l.bf16 %v12287_v59  ;;  %5035 = vmatmul.mubr.bf16.vlgmr.msra.gmra.mrb[8].mxu0 %v4050_v6  ;;  %v12298_v63 = vld [vmem:[#allocation84_spill] sm:$0xff] }
 0x2c2   : > { %v2577_v24 = vadd.f32 %v2576_v61, %v12284_v50  ;;  %v2372_v60 = vadd.f32 %v2371_v17, %v2370_v20  ;;  %v1958_v41 = vadd.f32 %v1957_v9, %v1956_v25  ;;  %v2165_v34 = vrot.slane %v2164_v58, 4  ;;  %5684 = vmatpush3.bf16.msra.mxu0 %v5901_v47  ;;  %v12306_v9 = vld [vmem:[#allocation89_spill] sm:$0xff] }
 0x2c3   : > { %v2784_v62 = vadd.f32 %v2783_v7, %v12286_v40  ;;  %v2991_v52 = vadd.f32 %v2990_v1, %v12288_v13  ;;  %v12289_v49 = vunpack.c.l.bf16 %v9029_v22  ;;  %v12291_v45 = vunpack.c.l.bf16 %v12290_v53  ;;  %5685 = vmatprep.subr.bf16.mxu0 %v5903_v39  ;;  %v12308_v40 = vld [vmem:[#allocation90_spill] sm:$0xff] }
 0x2c4   : > { %v1753_v5 = vrot.slane %v1752_v0, 1  ;;  %v2373_v30 = vrot.slane %v2372_v60, 4  ;;  %v12293_v17 = vunpack.c.l.bf16 %v12292_v48  ;;  %v12295_v19 = vunpack.c.l.bf16 %v12294_v14  ;;  %v9526_v13 = vld [vmem:[%s6216_s14 + $0x30] sm:$0xff]  ;;  %v5915_v48 = vld [vmem:[%s10777_s1 + $0x360] sm:$0xff]  }
 0x2c5   : > { %v2578_v16 = vadd.f32 %v2577_v24, %v12289_v49  ;;  %v2995_v4 = vsel %vm1616_vm0, %v12291_v45, 0.0  ;;  %v1959_v2 = vrot.slane %v1958_v41, 2  ;;  %v2166_v22 = vadd.f32 %v2165_v34, %v2164_v58  ;;  %12310 = vst [vmem:[#allocation82_spill] sm:$0xff] %v9526_v13 }
 0x2c6   : > { %v2785_v10 = vadd.f32 %v2784_v62, %v12293_v17  ;;  %v2992_v32 = vadd.f32 %v2991_v52, %v12295_v19  ;;  %v12297_v27 = vunpack.c.l.bf16 %v12296_v12  ;;  %v12299_v54 = vunpack.c.l.bf16 %v12298_v63  ;;  %5686 = vmatpush3.bf16.msra.mxu0 %v5905_v18  ;;  %v5917_v63 = vld [vmem:[%s10777_s1 + $0x320] sm:$0xff]   ;;  %v9824_v19 = vld [vmem:[%s6216_s14 + $0xcb0] sm:$0xff] }
 0x2c7   : > { %v2580_v26 = vadd.f32 %v2579_v37, %v2578_v16  ;;  %v1754_v56 = vadd.f32 %v1753_v5, %v1752_v0  ;;  %v2374_v25 = vadd.f32 %v2373_v30, %v2372_v60  ;;  %v12300_v33 = vunpack.c.l.bf16 %v12110_v36  ;;  %5687 = vmatprep.subr.bf16.mxu0 %v5907_v23  ;;  %v5913_v16 = vld [vmem:[%s10777_s1 + $0x318] sm:$0xff]   ;;  %12361 = vst [vmem:[#allocation27_spill] sm:$0xff] %v9824_v19 }
 0x2c8   : > { %v3198_v28 = vadd.f32 %v12299_v54, %v12297_v27  ;;  %v12301_v31 = vunpack.c.l.bf16 %v12108_v21  ;;  %v1960_v8 = vadd.f32 %v1959_v2, %v1958_v41  ;;  %v2167_v37 = vrot.slane %v2166_v22, 2  ;;  %v5909_v21 = vld [vmem:[%s10777_s1 + $0x310] sm:$0xff]  }
 0x2c9   : > { %v2786_v43 = vadd.f32 %v2785_v10, %v12300_v33  ;;  %v2581_v7 = vrot.slane %v2580_v26, 4  ;;  %v12303_v29 = vunpack.c.l.bf16 %v12302_v3  ;;  %v2375_v20 = vrot.slane %v2374_v25, 2  ;;  %v5919_v33 = vld [vmem:[%s10777_s1 + $0x368] sm:$0xff]  }
 0x2ca   : > { %v2993_v61 = vadd.f32 %v2992_v32, %v12301_v31  ;;  %v12304_v57 = vunpack.c.l.bf16 %v12112_v44  ;;  %v12305_v55 = vunpack.c.l.bf16 %v12115_v15  ;;  %v1961_v36 = vrot.slane %v1960_v8, 1  ;;  %v5911_v44 = vld [vmem:[%s10777_s1 + $0x358] sm:$0xff]   ;;  %5688 = vmatpush3.bf16.msra.mxu0 %v5909_v21  ;;  %v9565_v21 = vld [vmem:[%s6216_s14 + $0x170] sm:$0xff] }
 0x2cb   : > { %v3199_v46 = vadd.f32 %v3198_v28, %v12303_v29  ;;  %v2788_v11 = vadd.f32 %v2787_v42, %v2786_v43  ;;  %v2168_v47 = vadd.f32 %v2167_v37, %v2166_v22  ;;  %v2582_v6 = vadd.f32 %v2581_v7, %v2580_v26  ;;  %5689 = vmatprep.subr.bf16.mxu0 %v5911_v44  ;;  %v9538_v26 = vld [vmem:[%s6216_s14 + $0x70] sm:$0xff] }
 0x2cc   : > { %v2994_v35 = vadd.f32 %v2993_v61, %v12304_v57  ;;  %v3203_v1 = vsel %vm1616_vm0, %v12305_v55, 0.0  ;;  %v12307_v58 = vunpack.c.l.bf16 %v12306_v9  ;;  %v2376_v15 = vadd.f32 %v2375_v20, %v2374_v25  ;;  %12312 = vst [vmem:[#allocation71_spill] sm:$0xff] %v9538_v26  ;;  %v9549_v43 = vld [vmem:[%s6216_s14 + $0xb0] sm:$0xff]  ;;  %12316 = vst [vmem:[#allocation75_spill] sm:$0xff] %v9565_v21 }
 0x2cd   : > { %v2789_v42 = vrot.slane %v2788_v11, 4  ;;  %v3286_v39 = vpack.c.bf16 %v1754_v56, %v1754_v56  ;;  %v1962_v0 = vadd.f32 %v1961_v36, %v1960_v8  ;;  %v2169_v60 = vrot.slane %v2168_v47, 1  ;;  %12313 = vst [vmem:[#allocation78_spill] sm:$0xff] %v9549_v43  ;;  %v9552_v37 = vld [vmem:[%s6216_s14 + $0xf0] sm:$0xff] }
 0x2ce   : > { %v3200_v50 = vadd.f32 %v3199_v46, %v12307_v58  ;;  %v2996_v24 = vadd.f32 %v2995_v4, %v2994_v35  ;;  %v2583_v51 = vrot.slane %v2582_v6, 2  ;;  %v12309_v62 = vunpack.c.l.bf16 %v12308_v40  ;;  %5690 = vmatpush3.bf16.msra.mxu0 %v5913_v16  ;;  %12314 = vst [vmem:[#allocation91_spill] sm:$0xff] %v9552_v37  ;;  %v9557_v20 = vld [vmem:[%s6216_s14 + $0x130] sm:$0xff] }
 0x2cf   : > { %v2377_v52 = vrot.slane %v2376_v15, 1  ;;  %v2790_v41 = vadd.f32 %v2789_v42, %v2788_v11  ;;  %v3805_v49 = vunpack.c.l.b16 %v3286_v39  ;;  %v2170_v53 = vadd.f32 %v2169_v60, %v2168_v47  ;;  %5691 = vmatprep.subr.bf16.mxu0 %v5915_v48  ;;  %12315 = vst [vmem:[#allocation83_spill] sm:$0xff] %v9557_v20  ;;  %v5923_v9 = vld [vmem:[%s10777_s1 + $0x370] sm:$0xff]  }
 0x2d0   : > { %v3201_v59 = vadd.f32 %v3200_v50, %v12309_v62  ;;  %v2997_v34 = vrot.slane %v2996_v24, 4  ;;  %v2584_v45 = vadd.f32 %v2583_v51, %v2582_v6  ;;  %v12311_v4 = vunpack.c.l.bf16 %v9136_v38  ;;  %v9572_v58 = vld [vmem:[%s6216_s14 + $0x1b0] sm:$0x11] }
 0x2d1   : > { %v3302_v30 = vpack.c.bf16 %v1962_v0, %v1962_v0  ;;  %v2378_v17 = vadd.f32 %v2377_v52, %v2376_v15  ;;  %v2791_v10 = vrot.slane %v2790_v41, 2  ;;  %v3318_v2 = vpack.c.bf16 %v2170_v53, %v2170_v53  ;;  %12317 = vst [vmem:[#allocation14_spill] sm:$0xff] %v9572_v58  ;;  %v9583_v40 = vld [vmem:[%s6216_s14 + $0x230] sm:$0xff] }
 0x2d2   : > { %v3202_v5 = vadd.f32 %v3201_v59, %v12311_v4  ;;  %v2998_v14 = vadd.f32 %v2997_v34, %v2996_v24  ;;  %v2585_v32 = vrot.slane %v2584_v45, 1  ;;  %5692 = vmatpush3.bf16.msra.mxu0 %v5917_v63  ;;  %v9577_v24 = vld [vmem:[%s6216_s14 + $0x1f0] sm:$0xff]  ;;  %12319 = vst [vmem:[#allocation86_spill] sm:$0xff] %v9583_v40 }
 0x2d3   : > { %v3821_v22 = vunpack.c.l.b16 %v3302_v30  ;;  %v2792_v38 = vadd.f32 %v2791_v10, %v2790_v41  ;;  %v3334_v27 = vpack.c.bf16 %v2378_v17, %v2378_v17  ;;  %v3837_v56 = vunpack.c.l.b16 %v3318_v2  ;;  %5693 = vmatprep.subr.bf16.mxu0 %v5919_v33  ;;  %12318 = vst [vmem:[#allocation87_spill] sm:$0xff] %v9577_v24  ;;  %v5925_v34 = vld [vmem:[%s10777_s1 + $0x330] sm:$0xff]   ;;  %v5929_v33 = vld [vmem:[%s10777_s1 + $0x338] sm:$0xff]  }
 0x2d4   : > { %v3204_v18 = vadd.f32 %v3203_v1, %v3202_v5  ;;  %v2999_v12 = vrot.slane %v2998_v14, 2  ;;  %v2586_v28 = vadd.f32 %v2585_v32, %v2584_v45  ;;  %v5921_v1 = vld [vmem:[%s10777_s1 + $0x328] sm:$0xff]   ;;  %v9594_v16 = vld [vmem:[%s6216_s14 + $0x2b0] sm:$0xff]  ;;  %v5927_v5 = vld [vmem:[%s10777_s1 + $0x378] sm:$0xff]   ;;  %v12369_v10 = vunpack.c.h.bf16 %v9572_v58 }
 0x2d5   : > { %v4000_v25 = vsel %vm3923_vm1, %v3821_v22, %v3805_v49  ;;  %v2793_v31 = vrot.slane %v2792_v38, 1  ;;  %v3853_v8 = vunpack.c.l.b16 %v3334_v27  ;;  %v9591_v49 = vld [vmem:[%s6216_s14 + $0x270] sm:$0xff]  ;;  %12321 = vst [vmem:[#allocation93_spill] sm:$0xff] %v9594_v16 }
 0x2d6   : > { %v3205_v23 = vrot.slane %v3204_v18, 4  ;;  %v3000_v61 = vadd.f32 %v2999_v12, %v2998_v14  ;;  %v3350_v29 = vpack.c.bf16 %v2586_v28, %v2586_v28  ;;  %v4001_v46 = vsel %vm3925_vm2, %v3837_v56, %v4000_v25  ;;  %5694 = vmatpush3.bf16.msra.mxu0 %v5921_v1  ;;  %12320 = vst [vmem:[#allocation10_spill] sm:$0xff] %v9591_v49  ;;  %v9602_v30 = vld [vmem:[%s6216_s14 + $0x2f0] sm:$0xff] }
 0x2d7   : > { %v2794_v57 = vadd.f32 %v2793_v31, %v2792_v38  ;;  %v4002_v55 = vsel %vm3927_vm3, %v3853_v8, %v4001_v46  ;;  %5695 = vmatprep.subr.bf16.mxu0 %v5923_v9  ;;  %12322 = vst [vmem:[#allocation16_spill] sm:$0xff] %v9602_v30  ;;  %v9612_v2 = vld [vmem:[%s6216_s14 + $0x370] sm:$0x11] }
 0x2d8   : > { %v3206_v3 = vadd.f32 %v3205_v23, %v3204_v18  ;;  %v3001_v35 = vrot.slane %v3000_v61, 1  ;;  %v3869_v6 = vunpack.c.l.b16 %v3350_v29  ;;  %v9609_v18 = vld [vmem:[%s6216_s14 + $0x330] sm:$0xff]  ;;  %12324 = vst [vmem:[#allocation92_spill] sm:$0xff] %v9612_v2 }
 0x2d9   : > { %v3366_v42 = vpack.c.bf16 %v2794_v57, %v2794_v57  ;;  %12323 = vst [vmem:[#allocation18_spill] sm:$0xff] %v9609_v18  ;;  %v9617_v27 = vld [vmem:[%s6216_s14 + $0x3b0] sm:$0xff] }
 0x2da   : > { %v3207_v47 = vrot.slane %v3206_v3, 2  ;;  %v3002_v15 = vadd.f32 %v3001_v35, %v3000_v61  ;;  %v4003_v51 = vsel %vm3929_vm4, %v3869_v6, %v4002_v55  ;;  %12325 = vst [vmem:[#allocation15_spill] sm:$0xff] %v9617_v27  ;;  %v9620_v63 = vld [vmem:[%s6216_s14 + $0x3f0] sm:$0xff]  ;;  %5696 = vmatpush3.bf16.msra.mxu0 %v5925_v34 }
 0x2db   : > { %v3885_v41 = vunpack.c.l.b16 %v3366_v42  ;;  %12326 = vst [vmem:[#allocation21_spill] sm:$0xff] %v9620_v63  ;;  %v9630_v31 = vld [vmem:[%s6216_s14 + $0x430] sm:$0xff]  ;;  %5697 = vmatprep.subr.bf16.mxu0 %v5927_v5  ;;  %v5920_v42 = vld [vmem:[%s10777_s1 + $0x3e8] sm:$0xff]  }
 0x2dc   : > { %v3208_v60 = vadd.f32 %v3207_v47, %v3206_v3  ;;  %v3382_v52 = vpack.c.bf16 %v3002_v15, %v3002_v15  ;;  %12327 = vst [vmem:[#allocation24_spill] sm:$0xff] %v9630_v31  ;;  %v9636_v46 = vld [vmem:[%s6216_s14 + $0x470] sm:$0xff] }
 0x2dd   : > { %v4004_v32 = vsel %vm3931_vm5, %v3885_v41, %v4003_v51  ;;  %12328 = vst [vmem:[#allocation13_spill] sm:$0xff] %v9636_v46  ;;  %v9639_v57 = vld [vmem:[%s6216_s14 + $0x4b0] sm:$0xff] }
 0x2de   : > { %v3209_v4 = vrot.slane %v3208_v60, 1  ;;  %v3901_v14 = vunpack.c.l.b16 %v3382_v52  ;;  %12329 = vst [vmem:[#allocation19_spill] sm:$0xff] %v9639_v57  ;;  %v9645_v47 = vld [vmem:[%s6216_s14 + $0x4f0] sm:$0xff]  ;;  %5698 = vmatpush3.bf16.msra.mxu0 %v5929_v33  ;;  %v5902_v33 = vld [vmem:[%s10777_s1 + $0x380] sm:$0xff]  }
 0x2df   : > { %12330 = vst [vmem:[#allocation85_spill] sm:$0xff] %v9645_v47  ;;  %v9648_v6 = vld [vmem:[%s6216_s14 + $0x530] sm:$0x11] }
 0x2e0   : > { %v3210_v12 = vadd.f32 %v3209_v4, %v3208_v60  ;;  %v4005_v25 = vsel %vm3933_vm6, %v3901_v14, %v4004_v32  ;;  %12331 = vst [vmem:[#allocation11_spill] sm:$0xff] %v9648_v6  ;;  %v9655_v52 = vld [vmem:[%s6216_s14 + $0x570] sm:$0xff]  ;;  %v5914_v32 = vld [vmem:[%s10777_s1 + $0x398] sm:$0xff]  }
 0x2e1   : > { %12332 = vst [vmem:[#allocation9_spill] sm:$0xff] %v9655_v52  ;;  %v9661_v5 = vld [vmem:[%s6216_s14 + $0x5b0] sm:$0xff] }
 0x2e2   : > { %v3398_v29 = vpack.c.bf16 %v3210_v12, %v3210_v12  ;;  %12333 = vst [vmem:[#allocation22_spill] sm:$0xff] %v9661_v5  ;;  %v9664_v14 = vld [vmem:[%s6216_s14 + $0x5f0] sm:$0xff] }
 0x2e3   : > { %12334 = vst [vmem:[#allocation43_spill] sm:$0xff] %v9664_v14  ;;  %v9675_v59 = vld [vmem:[%s6216_s14 + $0x630] sm:$0xff] }
 0x2e4   : > { %v3917_v51 = vunpack.c.l.b16 %v3398_v29  ;;  %12335 = vst [vmem:[#allocation35_spill] sm:$0xff] %v9675_v59  ;;  %v9678_v56 = vld [vmem:[%s6216_s14 + $0x670] sm:$0xff] }
 0x2e5   : > { %12336 = vst [vmem:[#allocation38_spill] sm:$0xff] %v9678_v56  ;;  %v9690_v28 = vld [vmem:[%s6216_s14 + $0x6f0] sm:$0x11] }
 0x2e6   : > { %v4006_v8 = vsel %vm3935_vm7, %v3917_v51, %v4005_v25  ;;  %v5904_v25 = vld [vmem:[%s10777_s1 + $0x3c8] sm:$0xff]   ;;  %v9687_v51 = vld [vmem:[%s6216_s14 + $0x6b0] sm:$0xff]  ;;  %12338 = vst [vmem:[#allocation79_spill] sm:$0xff] %v9690_v28 }
 0x2e7   : > { %v4052_v34 = vpack.c.b16 %v4006_v8, %v4006_v8  ;;  %12337 = vst [vmem:[#allocation51_spill] sm:$0xff] %v9687_v51  ;;  %v9696_v15 = vld [vmem:[%s6216_s14 + $0x730] sm:$0xff] }
 0x2e8   : > { %12339 = vst [vmem:[#allocation17_spill] sm:$0xff] %v9696_v15  ;;  %v9699_v29 = vld [vmem:[%s6216_s14 + $0x770] sm:$0xff] }
 0x2e9   : > { %12340 = vst [vmem:[#allocation20_spill] sm:$0xff] %v9699_v29  ;;  %5075 = vmatmul.mubr.bf16.vlgmr.msra.gmra.mrb[8].mxu1 %v4052_v34  ;;  %v9706_v36 = vld [vmem:[%s6216_s14 + $0x7b0] sm:$0xff]  ;;  %v5906_v34 = vld [vmem:[%s10777_s1 + $0x388] sm:$0xff]  }
 0x2ea   : > { %12341 = vst [vmem:[#allocation23_spill] sm:$0xff] %v9706_v36  ;;  %v9709_v60 = vld [vmem:[%s6216_s14 + $0x7f0] sm:$0xff]  ;;  %5706 = vmatpush3.bf16.msra.mxu1 %v5902_v33 }
 0x2eb   : > { %12342 = vst [vmem:[#allocation44_spill] sm:$0xff] %v9709_v60  ;;  %v9719_v22 = vld [vmem:[%s6216_s14 + $0x830] sm:$0xff]  ;;  %5707 = vmatprep.subr.bf16.mxu1 %v5904_v25 }
 0x2ec   : > { %12343 = vst [vmem:[#allocation36_spill] sm:$0xff] %v9719_v22  ;;  %v9722_v0 = vld [vmem:[%s6216_s14 + $0x870] sm:$0xff] }
 0x2ed   : > { %12344 = vst [vmem:[#allocation29_spill] sm:$0xff] %v9722_v0  ;;  %v5908_v33 = vld [vmem:[%s10777_s1 + $0x3d0] sm:$0xff]  }
 0x2ee   : > { %v9732_v8 = vld [vmem:[%s6216_s14 + $0x8b0] sm:$0x11]  ;;  %5708 = vmatpush3.bf16.msra.mxu1 %v5906_v34  ;;  %v5912_v34 = vld [vmem:[%s10777_s1 + $0x3d8] sm:$0xff]  }
 0x2ef   : > { %12345 = vst [vmem:[#allocation56_spill] sm:$0xff] %v9732_v8  ;;  %v9735_v35 = vld [vmem:[%s6216_s14 + $0x8f0] sm:$0xff]  ;;  %5709 = vmatprep.subr.bf16.mxu1 %v5908_v33 }
 0x2f0   : > { %12346 = vst [vmem:[#allocation28_spill] sm:$0xff] %v9735_v35  ;;  %v9742_v62 = vld [vmem:[%s6216_s14 + $0x930] sm:$0xff] }
 0x2f1   : > { %12347 = vst [vmem:[#allocation39_spill] sm:$0xff] %v9742_v62  ;;  %v9745_v25 = vld [vmem:[%s6216_s14 + $0x970] sm:$0xff] }
 0x2f2   : > { %12348 = vst [vmem:[#allocation8_spill] sm:$0xff] %v9745_v25  ;;  %v9752_v39 = vld [vmem:[%s6216_s14 + $0x9b0] sm:$0xff] }
 0x2f3   : > { %12349 = vst [vmem:[#allocation37_spill] sm:$0xff] %v9752_v39  ;;  %v9755_v45 = vld [vmem:[%s6216_s14 + $0x9f0] sm:$0xff] }
 0x2f4   : > { %12350 = vst [vmem:[#allocation12_spill] sm:$0xff] %v9755_v45  ;;  %v5910_v61 = vld [vmem:[%s10777_s1 + $0x390] sm:$0xff]  }
 0x2f5   : > { %v9765_v3 = vld [vmem:[%s6216_s14 + $0xa30] sm:$0xff]  ;;  %5710 = vmatpush3.bf16.msra.mxu1 %v5910_v61  ;;  %v5916_v61 = vld [vmem:[%s10777_s1 + $0x3e0] sm:$0xff]  }
 0x2f6   : > { %12351 = vst [vmem:[#allocation26_spill] sm:$0xff] %v9765_v3  ;;  %v9768_v12 = vld [vmem:[%s6216_s14 + $0xa70] sm:$0x11]  ;;  %5711 = vmatprep.subr.bf16.mxu1 %v5912_v34  ;;  %v5918_v34 = vld [vmem:[%s10777_s1 + $0x3a0] sm:$0xff]  }
 0x2f7   : > { %12352 = vst [vmem:[#allocation57_spill] sm:$0xff] %v9768_v12  ;;  %v9778_v7 = vld [vmem:[%s6216_s14 + $0xab0] sm:$0xff] }
 0x2f8   : > { %12353 = vst [vmem:[#allocation30_spill] sm:$0xff] %v9778_v7  ;;  %v9781_v23 = vld [vmem:[%s6216_s14 + $0xaf0] sm:$0xff]  ;;  %v1400_v4 = vunpack.c.h.bf16 %v9778_v7  ;;  %v1528_v7 = vunpack.c.h.bf16 %v9824_v19  ;;  %v12372_v19 = vunpack.c.h.bf16 %v9612_v2 }
 0x2f9   : > { %12354 = vst [vmem:[#allocation58_spill] sm:$0xff] %v9781_v23  ;;  %v9788_v53 = vld [vmem:[%s6216_s14 + $0xb30] sm:$0xff]  ;;  %v1416_v41 = vunpack.c.h.bf16 %v9781_v23  ;;  %5712 = vmatpush3.bf16.msra.mxu1 %v5914_v32  ;;  %v1786_v32 = vsel %vm1616_vm0, %v12369_v10, 0.0  ;;  %v12375_v10 = vunpack.c.h.bf16 %v9648_v6  ;;  %v12380_v6 = vunpack.c.h.bf16 %v9591_v49  ;;  %v10266_v49 = vld [vmem:[%s6216_s14 + $0xd38] sm:$0xff] }
 0x2fa   : > { %12355 = vst [vmem:[#allocation49_spill] sm:$0xff] %v9788_v53  ;;  %v9791_v33 = vld [vmem:[%s6216_s14 + $0xb70] sm:$0xff]  ;;  %5713 = vmatprep.subr.bf16.mxu1 %v5916_v61  ;;  %v1994_v54 = vsel %vm1616_vm0, %v12372_v19, 0.0  ;;  %v5922_v61 = vld [vmem:[%s10777_s1 + $0x3a8] sm:$0xff]   ;;  %v12378_v19 = vunpack.c.h.bf16 %v9690_v28  ;;  %12457 = vst [vmem:[#allocation99_spill] sm:$0xff] %v10266_v49 }
 0x2fb   : > { %12356 = vst [vmem:[#allocation31_spill] sm:$0xff] %v9791_v33  ;;  %v9798_v44 = vld [vmem:[%s6216_s14 + $0xbb0] sm:$0xff] }
 0x2fc   : > { %12357 = vst [vmem:[#allocation42_spill] sm:$0xff] %v9798_v44  ;;  %v9801_v17 = vld [vmem:[%s6216_s14 + $0xbf0] sm:$0xff]  ;;  %v12368_v44 = vunpack.c.h.bf16 %v9538_v26  ;;  %v10276_v26 = vld [vmem:[%s6216_s14 + $0xdb8] sm:$0xff] }
 0x2fd   : > { %12358 = vst [vmem:[#allocation25_spill] sm:$0xff] %v9801_v17  ;;  %v9811_v50 = vld [vmem:[%s6216_s14 + $0xc30] sm:$0x11]  ;;  %5714 = vmatpush3.bf16.msra.mxu1 %v5918_v34  ;;  %v2410_v34 = vsel %vm1616_vm0, %v12378_v19, 0.0 }
 0x2fe   : > { %12359 = vst [vmem:[#allocation47_spill] sm:$0xff] %v9811_v50  ;;  %v9814_v1 = vld [vmem:[%s6216_s14 + $0xc70] sm:$0xff]  ;;  %v1496_v55 = vunpack.c.h.bf16 %v9811_v50  ;;  %v12371_v50 = vunpack.c.h.bf16 %v9583_v40  ;;  %5715 = vmatprep.subr.bf16.mxu1 %v5920_v42  ;;  %v12384_v42 = vunpack.c.h.bf16 %v9630_v31 }
 0x2ff   : > { %12360 = vst [vmem:[#allocation45_spill] sm:$0xff] %v9814_v1  ;;  %v9827_v9 = vld [vmem:[%s6216_s14 + $0xcf0] sm:$0xff]  ;;  %v1512_v0 = vunpack.c.h.bf16 %v9814_v1  ;;  %v12370_v1 = vunpack.c.h.bf16 %v9577_v24  ;;  %v2202_v24 = vsel %vm1616_vm0, %v12375_v10, 0.0 }
 0x300   : > { %12362 = vst [vmem:[#allocation33_spill] sm:$0xff] %v9827_v9  ;;  %v9834_v48 = vld [vmem:[%s6216_s14 + $0xd30] sm:$0xff]  ;;  %v1544_v17 = vunpack.c.h.bf16 %v9827_v9  ;;  %v12367_v9 = vunpack.c.h.bf16 %v9526_v13 }
 0x301   : > { %12363 = vst [vmem:[#allocation46_spill] sm:$0xff] %v9834_v48  ;;  %v9837_v11 = vld [vmem:[%s6216_s14 + $0xd70] sm:$0xff]  ;;  %v1989_v23 = vadd.f32 %v12371_v50, %v12370_v1  ;;  %v12376_v50 = vunpack.c.h.bf16 %v9655_v52  ;;  %v12377_v1 = vunpack.c.h.bf16 %v9661_v5  ;;  %v12381_v52 = vunpack.c.h.bf16 %v9696_v15  ;;  %5716 = vmatpush3.bf16.msra.mxu1 %v5922_v61  ;;  %v10249_v15 = vld [vmem:[%s6216_s14 + $0xc78] sm:$0xff] }
 0x302   : > { %12364 = vst [vmem:[#allocation40_spill] sm:$0xff] %v9837_v11  ;;  %v9844_v3 = vld [vmem:[%s6216_s14 + $0xdb0] sm:$0xff]  ;;  %v1781_v45 = vadd.f32 %v12368_v44, %v12367_v9  ;;  %v12373_v44 = vunpack.c.h.bf16 %v9617_v27  ;;  %v12374_v9 = vunpack.c.h.bf16 %v9620_v63  ;;  %v12382_v5 = vunpack.c.h.bf16 %v9699_v29  ;;  %12454 = vst [vmem:[#allocation96_spill] sm:$0xff] %v10249_v15 }
 0x303   : > { %12365 = vst [vmem:[#allocation34_spill] sm:$0xff] %v9844_v3  ;;  %v9847_v38 = vld [vmem:[%s6216_s14 + $0xdf0] sm:$0x11]  ;;  %v2405_v2 = vadd.f32 %v12377_v1, %v12376_v50  ;;  %v1990_v10 = vadd.f32 %v1989_v23, %v12380_v6  ;;  %v12383_v1 = vunpack.c.h.bf16 %v9732_v8  ;;  %v12385_v63 = vunpack.c.h.bf16 %v9664_v14 }
 0x304   : > { %12366 = vst [vmem:[#allocation53_spill] sm:$0xff] %v9847_v38  ;;  %v2197_v58 = vadd.f32 %v12374_v9, %v12373_v44  ;;  %v5924_v27 = vld [vmem:[%s10777_s1 + $0x3f0] sm:$0xff]   ;;  %v12379_v44 = vunpack.c.h.bf16 %v9549_v43  ;;  %v2613_v50 = vadd.f32 %v12382_v5, %v12381_v52  ;;  %v12388_v6 = vunpack.c.h.bf16 %v9768_v12 }
 0x305   : > { %v2618_v19 = vsel %vm1616_vm0, %v12383_v1, 0.0  ;;  %v2406_v40 = vadd.f32 %v2405_v2, %v12385_v63  ;;  %v12389_v52 = vunpack.c.h.bf16 %v9552_v37  ;;  %v12390_v1 = vunpack.c.h.bf16 %v9594_v16  ;;  %v5926_v2 = vld [vmem:[%s10777_s1 + $0x3b0] sm:$0xff]   ;;  %5717 = vmatprep.subr.bf16.mxu1 %v5924_v27 }
 0x306   : > { %v1782_v9 = vadd.f32 %v1781_v45, %v12379_v44  ;;  %v2198_v28 = vadd.f32 %v2197_v58, %v12384_v42  ;;  %v12386_v45 = vunpack.c.h.bf16 %v9735_v35  ;;  %v12387_v44 = vunpack.c.h.bf16 %v9742_v62  ;;  %5718 = vmatpush3.bf16.msra.mxu1 %v5926_v2  ;;  %v10219_v62 = vld [vmem:[%s6216_s14 + $0xaf8] sm:$0xff] }
 0x307   : > { %v2826_v29 = vsel %vm1616_vm0, %v12388_v6, 0.0  ;;  %v1991_v8 = vadd.f32 %v1990_v10, %v12390_v1  ;;  %v12391_v58 = vunpack.c.h.bf16 %v9706_v36  ;;  %v3029_v14 = vadd.f32 %v1416_v41, %v1400_v4  ;;  %v5928_v41 = vld [vmem:[%s10777_s1 + $0x3f8] sm:$0xff]   ;;  %12448 = vst [vmem:[#allocation84_spill] sm:$0xff] %v10219_v62 }
 0x308   : > { %v2821_v23 = vadd.f32 %v12387_v44, %v12386_v45  ;;  %v1783_v5 = vadd.f32 %v1782_v9, %v12389_v52  ;;  %v12392_v63 = vunpack.c.h.bf16 %v9636_v46  ;;  %v12393_v44 = vunpack.c.h.bf16 %v9675_v59  ;;  %5719 = vmatprep.subr.bf16.mxu1 %v5928_v41  ;;  %v10216_v59 = vld [vmem:[%s6216_s14 + $0xab8] sm:$0xff] }
 0x309   : > { %v2614_v42 = vadd.f32 %v2613_v50, %v12391_v58  ;;  %v12394_v9 = vunpack.c.h.bf16 %v9745_v25  ;;  %v3034_v10 = vsel %vm1616_vm0, %v1496_v55, 0.0  ;;  %v12395_v4 = vunpack.c.h.bf16 %v9557_v20  ;;  %12447 = vst [vmem:[#allocation77_spill] sm:$0xff] %v10216_v59  ;;  %v10229_v36 = vld [vmem:[%s6216_s14 + $0xb78] sm:$0xff] }
 0x30a   : > { %v2199_v45 = vadd.f32 %v2198_v28, %v12392_v63  ;;  %v2407_v6 = vadd.f32 %v2406_v40, %v12393_v44  ;;  %v12396_v50 = vunpack.c.h.bf16 %v9602_v30  ;;  %v12397_v28 = vunpack.c.h.bf16 %v9709_v60  ;;  %v10206_v60 = vld [vmem:[%s6216_s14 + $0xa38] sm:$0xff]  ;;  %12450 = vst [vmem:[#allocation89_spill] sm:$0xff] %v10229_v36 }
 0x30b   : > { %v2822_v52 = vadd.f32 %v2821_v23, %v12394_v9  ;;  %v1784_v61 = vadd.f32 %v1783_v5, %v12395_v4  ;;  %v12398_v40 = vunpack.c.h.bf16 %v9788_v53  ;;  %v12399_v23 = vunpack.c.h.bf16 %v9639_v57  ;;  %12445 = vst [vmem:[#allocation70_spill] sm:$0xff] %v10206_v60  ;;  %v10246_v57 = vld [vmem:[%s6216_s14 + $0xc38] sm:$0x11] }
 0x30c   : > { %v1992_v1 = vadd.f32 %v1991_v8, %v12396_v50  ;;  %v2615_v58 = vadd.f32 %v2614_v42, %v12397_v28  ;;  %v12400_v27 = vunpack.c.h.bf16 %v9678_v56  ;;  %v12401_v9 = vunpack.c.h.bf16 %v9752_v39  ;;  %v12414_v39 = vld [vmem:[#allocation26_spill] sm:$0xff]  ;;  %12453 = vst [vmem:[#allocation95_spill] sm:$0xff] %v10246_v57  ;;  %v10256_v35 = vld [vmem:[%s6216_s14 + $0xcb8] sm:$0xff] }
 0x30d   : > { %v3030_v63 = vadd.f32 %v3029_v14, %v12398_v40  ;;  %v2200_v55 = vadd.f32 %v2199_v45, %v12399_v23  ;;  %v3237_v12 = vadd.f32 %v1528_v7, %v1512_v0  ;;  %v12402_v5 = vunpack.c.h.bf16 %v9565_v21  ;;  %v5930_v45 = vld [vmem:[%s10777_s1 + $0x3b8] sm:$0xff]   ;;  %12455 = vst [vmem:[#allocation97_spill] sm:$0xff] %v10256_v35 }
 0x30e   : > { %v2408_v44 = vadd.f32 %v2407_v6, %v12400_v27  ;;  %v2823_v25 = vadd.f32 %v2822_v52, %v12401_v9  ;;  %v12403_v8 = vunpack.c.h.bf16 %v9609_v18  ;;  %v12404_v42 = vunpack.c.h.bf16 %v9719_v22  ;;  %5720 = vmatpush3.bf16.msra.mxu1 %v5930_v45  ;;  %v10236_v22 = vld [vmem:[%s6216_s14 + $0xbb8] sm:$0xff] }
 0x30f   : > { %v1785_v4 = vadd.f32 %v1784_v61, %v12402_v5  ;;  %v12405_v14 = vunpack.c.h.bf16 %v9791_v33  ;;  %v12406_v6 = vunpack.c.h.bf16 %v9645_v47  ;;  %v12407_v0 = vunpack.c.h.bf16 %v9687_v51  ;;  %v12408_v61 = vld [vmem:[#allocation12_spill] sm:$0xff]  ;;  %v12410_v5 = vld [vmem:[#allocation29_spill] sm:$0xff]  ;;  %12451 = vst [vmem:[#allocation90_spill] sm:$0xff] %v10236_v22  ;;  %v10239_v21 = vld [vmem:[%s6216_s14 + $0xbf8] sm:$0xff] }
 0x310   : > { %v1993_v50 = vadd.f32 %v1992_v1, %v12403_v8  ;;  %v2616_v28 = vadd.f32 %v2615_v58, %v12404_v42  ;;  %v12409_v23 = vunpack.c.h.bf16 %v12408_v61  ;;  %v3238_v27 = vadd.f32 %v3237_v12, %v1544_v17  ;;  %v12412_v8 = vld [vmem:[#allocation42_spill] sm:$0xff]  ;;  %v12417_v12 = vld [vmem:[#allocation25_spill] sm:$0xff]  ;;  %12452 = vst [vmem:[#allocation94_spill] sm:$0xff] %v10239_v21  ;;  %v10259_v20 = vld [vmem:[%s6216_s14 + $0xcf8] sm:$0xff] }
 0x311   : > { %v3031_v40 = vadd.f32 %v3030_v63, %v12405_v14  ;;  %v2201_v7 = vadd.f32 %v2200_v55, %v12406_v6  ;;  %v2409_v52 = vadd.f32 %v2408_v44, %v12407_v0  ;;  %v1787_v58 = vadd.f32 %v1786_v32, %v1785_v4  ;;  %12456 = vst [vmem:[#allocation98_spill] sm:$0xff] %v10259_v20  ;;  %v10279_v18 = vld [vmem:[%s6216_s14 + $0xdf8] sm:$0x11] }
 0x312   : > { %v2824_v1 = vadd.f32 %v2823_v25, %v12409_v23  ;;  %v1995_v9 = vadd.f32 %v1994_v54, %v1993_v50  ;;  %v12411_v63 = vunpack.c.h.bf16 %v12410_v5  ;;  %v12413_v42 = vunpack.c.h.bf16 %v12412_v8  ;;  %12459 = vst [vmem:[#allocation101_spill] sm:$0xff] %v10279_v18 }
 0x313   : > { %v2203_v33 = vadd.f32 %v2202_v24, %v2201_v7  ;;  %v2411_v53 = vadd.f32 %v2410_v34, %v2409_v52  ;;  %v12415_v55 = vunpack.c.h.bf16 %v12414_v39  ;;  %v12416_v44 = vunpack.c.h.bf16 %v9834_v48  ;;  %v10148_v39 = vld [vmem:[%s6216_s14 + $0x7b8] sm:$0xff] }
 0x314   : > { %v2617_v2 = vadd.f32 %v2616_v28, %v12411_v63  ;;  %v3032_v14 = vadd.f32 %v3031_v40, %v12413_v42  ;;  %v1788_v61 = vrot.slane %v1787_v58, 4  ;;  %v1996_v25 = vrot.slane %v1995_v9, 4 }
 0x315   : > { %v2825_v6 = vadd.f32 %v2824_v1, %v12415_v55  ;;  %v3239_v0 = vadd.f32 %v3238_v27, %v12416_v44  ;;  %v12418_v32 = vunpack.c.h.bf16 %v12417_v12  ;;  %v2204_v41 = vrot.slane %v2203_v33, 4  ;;  %v10138_v12 = vld [vmem:[%s6216_s14 + $0x738] sm:$0xff] }
 0x316   : > { %v2619_v17 = vadd.f32 %v2618_v19, %v2617_v2  ;;  %v2412_v4 = vrot.slane %v2411_v53, 4  ;;  %v12419_v28 = vunpack.c.h.bf16 %v9837_v11  ;;  %v1789_v34 = vadd.f32 %v1788_v61, %v1787_v58  ;;  %12435 = vst [vmem:[#allocation65_spill] sm:$0xff] %v10138_v12 }
 0x317   : > { %v3033_v54 = vadd.f32 %v3032_v14, %v12418_v32  ;;  %v2827_v50 = vadd.f32 %v2826_v29, %v2825_v6  ;;  %v1997_v40 = vadd.f32 %v1996_v25, %v1995_v9  ;;  %v2205_v23 = vadd.f32 %v2204_v41, %v2203_v33 }
 0x318   : > { %v3240_v24 = vadd.f32 %v3239_v0, %v12419_v28  ;;  %v2620_v7 = vrot.slane %v2619_v17, 4  ;;  %v2413_v1 = vadd.f32 %v2412_v4, %v2411_v53  ;;  %v12420_v63 = vunpack.c.h.bf16 %v9844_v3 }
 0x319   : > { %v3035_v52 = vadd.f32 %v3034_v10, %v3033_v54  ;;  %v2828_v27 = vrot.slane %v2827_v50, 4  ;;  %v1790_v2 = vrot.slane %v1789_v34, 2  ;;  %v1998_v42 = vrot.slane %v1997_v40, 2 }
 0x31a   : > { %v3241_v19 = vadd.f32 %v3240_v24, %v12420_v63  ;;  %v2621_v14 = vadd.f32 %v2620_v7, %v2619_v17  ;;  %v2206_v55 = vrot.slane %v2205_v23, 2  ;;  %v2414_v44 = vrot.slane %v2413_v1, 2 }
 0x31b   : > { %v3036_v45 = vrot.slane %v3035_v52, 4  ;;  %v2829_v29 = vadd.f32 %v2828_v27, %v2827_v50  ;;  %v12421_v6 = vunpack.c.h.bf16 %v9847_v38  ;;  %v1791_v58 = vadd.f32 %v1790_v2, %v1789_v34 }
 0x31c   : > { %v1999_v9 = vadd.f32 %v1998_v42, %v1997_v40  ;;  %v2622_v10 = vrot.slane %v2621_v14, 2  ;;  %v2207_v53 = vadd.f32 %v2206_v55, %v2205_v23  ;;  %v2415_v0 = vadd.f32 %v2414_v44, %v2413_v1 }
 0x31d   : > { %v3242_v61 = vsel %vm1616_vm0, %v12421_v6, 0.0  ;;  %v3037_v33 = vadd.f32 %v3036_v45, %v3035_v52  ;;  %v2830_v25 = vrot.slane %v2829_v29, 2  ;;  %v1792_v54 = vrot.slane %v1791_v58, 1 }
 0x31e   : > { %v3243_v32 = vadd.f32 %v3242_v61, %v3241_v19  ;;  %v2000_v41 = vrot.slane %v1999_v9, 1  ;;  %v2623_v4 = vadd.f32 %v2622_v10, %v2621_v14  ;;  %v2208_v28 = vrot.slane %v2207_v53, 1  ;;  %v9995_v61 = vld [vmem:[%s6216_s14 + $0x38] sm:$0xff] }
 0x31f   : > { %v3038_v17 = vrot.slane %v3037_v33, 2  ;;  %v2416_v24 = vrot.slane %v2415_v0, 1  ;;  %v2831_v7 = vadd.f32 %v2830_v25, %v2829_v29  ;;  %v1793_v27 = vadd.f32 %v1792_v54, %v1791_v58  ;;  %12422 = vst [vmem:[#allocation32_spill] sm:$0xff] %v9995_v61  ;;  %v9998_v54 = vld [vmem:[%s6216_s14 + $0x78] sm:$0xff] }
 0x320   : > { %v3244_v50 = vrot.slane %v3243_v32, 4  ;;  %v2001_v63 = vadd.f32 %v2000_v41, %v1999_v9  ;;  %v2624_v6 = vrot.slane %v2623_v4, 1  ;;  %v2209_v40 = vadd.f32 %v2208_v28, %v2207_v53  ;;  %v10002_v28 = vld [vmem:[%s6216_s14 + $0xb8] sm:$0xff] }
 0x321   : > { %v3039_v34 = vadd.f32 %v3038_v17, %v3037_v33  ;;  %v2417_v2 = vadd.f32 %v2416_v24, %v2415_v0  ;;  %v2832_v52 = vrot.slane %v2831_v7, 1  ;;  %v3289_v19 = vpack.c.bf16 %v1793_v27, %v1793_v27 }
 0x322   : > { %v3245_v23 = vadd.f32 %v3244_v50, %v3243_v32  ;;  %v2625_v1 = vadd.f32 %v2624_v6, %v2623_v4  ;;  %v3305_v45 = vpack.c.bf16 %v2001_v63, %v2001_v63  ;;  %v3321_v44 = vpack.c.bf16 %v2209_v40, %v2209_v40  ;;  %v10007_v63 = vld [vmem:[%s6216_s14 + $0xf8] sm:$0xff] }
 0x323   : > { %v3040_v42 = vrot.slane %v3039_v34, 1  ;;  %v2833_v14 = vadd.f32 %v2832_v52, %v2831_v7  ;;  %v3337_v29 = vpack.c.bf16 %v2417_v2, %v2417_v2  ;;  %v3808_v10 = vunpack.c.l.b16 %v3289_v19  ;;  %v10010_v6 = vld [vmem:[%s6216_s14 + $0x138] sm:$0xff] }
 0x324   : > { %v3246_v55 = vrot.slane %v3245_v23, 2  ;;  %v3353_v9 = vpack.c.bf16 %v2625_v1, %v2625_v1  ;;  %v3824_v33 = vunpack.c.l.b16 %v3305_v45  ;;  %v3840_v25 = vunpack.c.l.b16 %v3321_v44  ;;  %v10015_v52 = vld [vmem:[%s6216_s14 + $0x178] sm:$0xff] }
 0x325   : > { %v3041_v58 = vadd.f32 %v3040_v42, %v3039_v34  ;;  %v3369_v0 = vpack.c.bf16 %v2833_v14, %v2833_v14  ;;  %v3856_v32 = vunpack.c.l.b16 %v3337_v29  ;;  %v10021_v45 = vld [vmem:[%s6216_s14 + $0x1b8] sm:$0x11]  ;;  %v1402_v30 = vunpack.c.h.bf16 %v10216_v59 }
 0x326   : > { %v3247_v53 = vadd.f32 %v3246_v55, %v3245_v23  ;;  %v3872_v4 = vunpack.c.l.b16 %v3353_v9  ;;  %v4021_v17 = vsel %vm3923_vm1, %v3824_v33, %v3808_v10  ;;  %12423 = vst [vmem:[#allocation50_spill] sm:$0xff] %v10021_v45  ;;  %v10024_v14 = vld [vmem:[%s6216_s14 + $0x1f8] sm:$0xff]  ;;  %v1418_v16 = vunpack.c.h.bf16 %v10219_v62 }
 0x327   : > { %v3385_v41 = vpack.c.bf16 %v3041_v58, %v3041_v58  ;;  %v3888_v50 = vunpack.c.l.b16 %v3369_v0  ;;  %v4022_v27 = vsel %vm3925_vm2, %v3840_v25, %v4021_v17  ;;  %12424 = vst [vmem:[#allocation52_spill] sm:$0xff] %v10024_v14  ;;  %v10030_v58 = vld [vmem:[%s6216_s14 + $0x238] sm:$0xff]  ;;  %v1450_v47 = vunpack.c.h.bf16 %v10229_v36 }
 0x328   : > { %v3248_v7 = vrot.slane %v3247_v53, 1  ;;  %v4023_v2 = vsel %vm3927_vm3, %v3856_v32, %v4022_v27  ;;  %v10037_v25 = vld [vmem:[%s6216_s14 + $0x278] sm:$0xff]  ;;  %v10111_v27 = vpop.f32.mrb[0].mxu1  ;;  %v1498_v36 = vunpack.c.h.bf16 %v10246_v57  ;;  %v1514_v13 = vunpack.c.h.bf16 %v10249_v15 }
 0x329   : > { %v3904_v40 = vunpack.c.l.b16 %v3385_v41  ;;  %v4024_v19 = vsel %vm3929_vm4, %v3872_v4, %v4023_v2  ;;  %v10040_v32 = vld [vmem:[%s6216_s14 + $0x2b8] sm:$0xff]  ;;  %12431 = vst [vmem:[#allocation61_spill] sm:$0xff] %v10111_v27  ;;  %v10125_v10 = vpop.f32.mrb[1].mxu1  ;;  %v1530_v62 = vunpack.c.h.bf16 %v10256_v35  ;;  %v1546_v43 = vunpack.c.h.bf16 %v10259_v20 }
 0x32a   : > { %v3249_v42 = vadd.f32 %v3248_v7, %v3247_v53  ;;  %v4025_v29 = vsel %vm3931_vm5, %v3888_v50, %v4024_v19  ;;  %v10045_v17 = vld [vmem:[%s6216_s14 + $0x2f8] sm:$0xff]  ;;  %12433 = vst [vmem:[#allocation63_spill] sm:$0xff] %v10125_v10  ;;  %v5592_v1 = vpop.f32.mrb[2].mxu1  ;;  %v1562_v60 = vunpack.c.h.bf16 %v10266_v49  ;;  %v12460_v37 = vunpack.c.h.bf16 %v9995_v61 }
 0x32b   : > { %v4026_v0 = vsel %vm3933_vm6, %v3904_v40, %v4025_v29  ;;  %v10048_v7 = vld [vmem:[%s6216_s14 + $0x338] sm:$0xff]  ;;  %v12461_v20 = vunpack.c.h.bf16 %v9998_v54  ;;  %v12462_v21 = vunpack.c.h.bf16 %v10021_v45  ;;  %v12463_v31 = vunpack.c.h.bf16 %v10024_v14 }
 0x32c   : > { %v3401_v53 = vpack.c.bf16 %v3249_v42, %v3249_v42  ;;  %v10055_v19 = vld [vmem:[%s6216_s14 + $0x378] sm:$0x11] }
 0x32d   : > { %12425 = vst [vmem:[#allocation59_spill] sm:$0xff] %v10055_v19  ;;  %v10061_v9 = vld [vmem:[%s6216_s14 + $0x3b8] sm:$0xff]  ;;  %v1807_v22 = vadd.f32 %v12461_v20, %v12460_v37  ;;  %v1812_v49 = vsel %vm1616_vm0, %v12462_v21, 0.0  ;;  %v12465_v15 = vunpack.c.h.bf16 %v10055_v19 }
 0x32e   : > { %v3920_v42 = vunpack.c.l.b16 %v3401_v53  ;;  %12426 = vst [vmem:[#allocation41_spill] sm:$0xff] %v10061_v9  ;;  %v10064_v55 = vld [vmem:[%s6216_s14 + $0x3f8] sm:$0xff]  ;;  %v12466_v35 = vunpack.c.h.bf16 %v10061_v9  ;;  %v12473_v9 = vunpack.c.h.bf16 %v10037_v25 }
 0x32f   : > { %12427 = vst [vmem:[#allocation48_spill] sm:$0xff] %v10064_v55  ;;  %v10072_v4 = vld [vmem:[%s6216_s14 + $0x438] sm:$0xff]  ;;  %v12467_v61 = vunpack.c.h.bf16 %v10064_v55 }
 0x330   : > { %v4027_v24 = vsel %vm3935_vm7, %v3920_v42, %v4026_v0  ;;  %v10075_v50 = vld [vmem:[%s6216_s14 + $0x478] sm:$0xff]  ;;  %v5593_v42 = vpop.f32.mrb[3].mxu1 }
 0x331   : > { %v4055_v2 = vpack.c.b16 %v4027_v24, %v4027_v24  ;;  %v10081_v44 = vld [vmem:[%s6216_s14 + $0x4b8] sm:$0xff]  ;;  %v10109_v24 = vpop.f32.mrb[0].mxu0  ;;  %v10159_v3 = vpop.f32.mrb[4].mxu1  ;;  %v2223_v18 = vadd.f32 %v12467_v61, %v12466_v35  ;;  %v12474_v35 = vunpack.c.h.bf16 %v10138_v12 }
 0x332   : > { %v10084_v53 = vld [vmem:[%s6216_s14 + $0x4f8] sm:$0xff]  ;;  %12430 = vst [vmem:[#allocation55_spill] sm:$0xff] %v10109_v24  ;;  %v10123_v38 = vpop.f32.mrb[1].mxu0  ;;  %12438 = vst [vmem:[#allocation68_spill] sm:$0xff] %v10159_v3  ;;  %v10173_v48 = vpop.f32.mrb[5].mxu1 }
 0x333   : > { %v10090_v33 = vld [vmem:[%s6216_s14 + $0x538] sm:$0x11]  ;;  %5114 = vmatprep.mubr.bf16.mxu0 %v4055_v2  ;;  %12432 = vst [vmem:[#allocation62_spill] sm:$0xff] %v10123_v38  ;;  %v5570_v11 = vpop.f32.mrb[2].mxu0  ;;  %12440 = vst [vmem:[#allocation76_spill] sm:$0xff] %v10173_v48  ;;  %v5636_v38 = vpop.f32.mrb[6].mxu1 }
 0x334   : > { %v10093_v41 = vld [vmem:[%s6216_s14 + $0x578] sm:$0xff]  ;;  %v5571_v8 = vpop.f32.mrb[3].mxu0  ;;  %v5637_v40 = vpop.f32.mrb[7].mxu1  ;;  %v12468_v37 = vunpack.c.h.bf16 %v10090_v33 }
 0x335   : > { %12428 = vst [vmem:[#allocation54_spill] sm:$0xff] %v10093_v41  ;;  %v10100_v23 = vld [vmem:[%s6216_s14 + $0x5b8] sm:$0xff]  ;;  %v10157_v5 = vpop.f32.mrb[4].mxu0  ;;  %v2020_v40 = vsel %vm1616_vm0, %v12465_v15, 0.0  ;;  %v12469_v21 = vunpack.c.h.bf16 %v10093_v41  ;;  %v12472_v15 = vunpack.c.h.bf16 %v10002_v28 }
 0x336   : > { %12429 = vst [vmem:[#allocation60_spill] sm:$0xff] %v10100_v23  ;;  %v10103_v0 = vld [vmem:[%s6216_s14 + $0x5f8] sm:$0xff]  ;;  %12437 = vst [vmem:[#allocation67_spill] sm:$0xff] %v10157_v5  ;;  %v10171_v51 = vpop.f32.mrb[5].mxu0  ;;  %v2228_v20 = vsel %vm1616_vm0, %v12468_v37, 0.0  ;;  %v12470_v14 = vunpack.c.h.bf16 %v10100_v23 }
 0x337   : > { %v10114_v29 = vld [vmem:[%s6216_s14 + $0x638] sm:$0xff]  ;;  %12439 = vst [vmem:[#allocation72_spill] sm:$0xff] %v10171_v51  ;;  %v5614_v56 = vpop.f32.mrb[6].mxu0  ;;  %v1808_v19 = vadd.f32 %v1807_v22, %v12472_v15 }
 0x338   : > { %v10117_v2 = vld [vmem:[%s6216_s14 + $0x678] sm:$0xff]  ;;  %v5615_v1 = vpop.f32.mrb[7].mxu0  ;;  %v2431_v45 = vadd.f32 %v12470_v14, %v12469_v21  ;;  %v12477_v14 = vunpack.c.h.bf16 %v10072_v4 }
 0x339   : > { %v10128_v24 = vld [vmem:[%s6216_s14 + $0x6b8] sm:$0xff] }
 0x33a   : > { %v10131_v27 = vld [vmem:[%s6216_s14 + $0x6f8] sm:$0x11]  ;;  %v2224_v21 = vadd.f32 %v2223_v18, %v12477_v14  ;;  %v3055_v18 = vadd.f32 %v1418_v16, %v1402_v30  ;;  %v12484_v14 = vunpack.c.h.bf16 %v10075_v50 }
 0x33b   : > { %12434 = vst [vmem:[#allocation64_spill] sm:$0xff] %v10131_v27  ;;  %v10141_v10 = vld [vmem:[%s6216_s14 + $0x778] sm:$0xff] }
 0x33c   : > { %12436 = vst [vmem:[#allocation66_spill] sm:$0xff] %v10141_v10  ;;  %v10151_v11 = vld [vmem:[%s6216_s14 + $0x7f8] sm:$0xff]  ;;  %v12475_v61 = vunpack.c.h.bf16 %v10141_v10  ;;  %v12481_v10 = vunpack.c.h.bf16 %v10007_v63 }
 0x33d   : > { %v10162_v8 = vld [vmem:[%s6216_s14 + $0x838] sm:$0xff] }
 0x33e   : > { %v10165_v42 = vld [vmem:[%s6216_s14 + $0x878] sm:$0xff]  ;;  %v2639_v37 = vadd.f32 %v12475_v61, %v12474_v35  ;;  %v1809_v35 = vadd.f32 %v1808_v19, %v12481_v10  ;;  %v12482_v61 = vunpack.c.h.bf16 %v10040_v32  ;;  %v12487_v10 = vunpack.c.h.bf16 %v10010_v6 }
 0x33f   : > { %v10176_v5 = vld [vmem:[%s6216_s14 + $0x8b8] sm:$0x11] }
 0x340   : > { %12441 = vst [vmem:[#allocation80_spill] sm:$0xff] %v10176_v5  ;;  %v10179_v3 = vld [vmem:[%s6216_s14 + $0x8f8] sm:$0xff]  ;;  %v12476_v41 = vunpack.c.h.bf16 %v10176_v5  ;;  %v1810_v19 = vadd.f32 %v1809_v35, %v12487_v10  ;;  %v12494_v10 = vunpack.c.h.bf16 %v10048_v7 }
 0x341   : > { %12442 = vst [vmem:[#allocation69_spill] sm:$0xff] %v10179_v3  ;;  %v10186_v51 = vld [vmem:[%s6216_s14 + $0x938] sm:$0xff]  ;;  %v12479_v22 = vunpack.c.h.bf16 %v10179_v3 }
 0x342   : > { %v10189_v48 = vld [vmem:[%s6216_s14 + $0x978] sm:$0xff]  ;;  %v2644_v23 = vsel %vm1616_vm0, %v12476_v41, 0.0  ;;  %v12480_v15 = vunpack.c.h.bf16 %v10186_v51  ;;  %v12483_v41 = vunpack.c.h.bf16 %v10148_v39 }
 0x343   : > { %v10196_v56 = vld [vmem:[%s6216_s14 + $0x9b8] sm:$0xff] }
 0x344   : > { %12443 = vst [vmem:[#allocation81_spill] sm:$0xff] %v10196_v56  ;;  %v10199_v38 = vld [vmem:[%s6216_s14 + $0x9f8] sm:$0xff]  ;;  %v2640_v12 = vadd.f32 %v2639_v37, %v12483_v41  ;;  %v12489_v37 = vunpack.c.h.bf16 %v10151_v11 }
 0x345   : > { %12444 = vst [vmem:[#allocation74_spill] sm:$0xff] %v10199_v38  ;;  %v10209_v34 = vld [vmem:[%s6216_s14 + $0xa78] sm:$0x11] }
 0x346   : > { %12446 = vst [vmem:[#allocation73_spill] sm:$0xff] %v10209_v34  ;;  %v10226_v1 = vld [vmem:[%s6216_s14 + $0xb38] sm:$0xff]  ;;  %v1386_v46 = vunpack.c.h.bf16 %v10209_v34  ;;  %v2641_v16 = vadd.f32 %v2640_v12, %v12489_v37  ;;  %v12497_v37 = vunpack.c.h.bf16 %v10128_v24 }
 0x347   : > { %12449 = vst [vmem:[#allocation88_spill] sm:$0xff] %v10226_v1  ;;  %v1434_v34 = vunpack.c.h.bf16 %v10226_v1  ;;  %v10269_v59 = vld [vmem:[%s6216_s14 + $0xd78] sm:$0xff]  ;;  %s5945_s14 = scalar_lea.vmem %s5944_s13, 256 }
 0x348   : > { %12458 = vst [vmem:[#allocation100_spill] sm:$0xff] %v10269_v59  ;;  %v1578_v57 = vunpack.c.h.bf16 %v10269_v59  ;;  %v12464_v59 = vunpack.c.h.bf16 %v10030_v58  ;;  %p5947_p1 = scmp.lt.s32.totalorder %s5945_s14, %s5939_s12 }
 0x349   : > { %v3056_v30 = vadd.f32 %v3055_v18, %v1434_v34  ;;  %v12496_v18 = vunpack.c.h.bf16 %v10084_v53 }
 0x34a   : > { %v2015_v1 = vadd.f32 %v12464_v59, %v12463_v31  ;;  %v12471_v59 = vunpack.c.h.bf16 %v10131_v27  ;;  %p5948_p2 = por %p5947_p1, %p5946_p0 }
 0x34b   : > { %v3057_v34 = vadd.f32 %v3056_v30, %v1450_v47  ;;  %v12502_v30 = vld [vmem:[#allocation70_spill] sm:$0xff] }
 0x34c   : > { %v2436_v31 = vsel %vm1616_vm0, %v12471_v59, 0.0  ;;  %v2016_v55 = vadd.f32 %v2015_v1, %v12473_v9  ;;  %v12478_v59 = vunpack.c.h.bf16 %v10103_v0  ;;  %v2847_v9 = vadd.f32 %v12480_v15, %v12479_v22  ;;  %p5949_p3 = pnand %p5948_p2, %p5942_p13 }
 0x34d   : > { %v2852_v1 = vsel %vm1616_vm0, %v1386_v46, 0.0  ;;  %v12486_v22 = vunpack.c.h.bf16 %v10189_v48  ;;  %v3060_v46 = vsel %vm1616_vm0, %v1498_v36, 0.0  ;;  %v3263_v36 = vadd.f32 %v1530_v62, %v1514_v13 }
 0x34e   : > { %v2432_v27 = vadd.f32 %v2431_v45, %v12478_v59  ;;  %v2017_v5 = vadd.f32 %v2016_v55, %v12482_v61  ;;  %v2225_v45 = vadd.f32 %v2224_v21, %v12484_v14  ;;  %v12485_v59 = vunpack.c.h.bf16 %v10114_v29 }
 0x34f   : > { %v2848_v15 = vadd.f32 %v2847_v9, %v12486_v22  ;;  %v12488_v55 = vunpack.c.h.bf16 %v10045_v17  ;;  %v12490_v21 = vunpack.c.h.bf16 %v10081_v44  ;;  %v12492_v9 = vunpack.c.h.bf16 %v10196_v56 }
 0x350   : > { %v2433_v3 = vadd.f32 %v2432_v27, %v12485_v59  ;;  %v12491_v27 = vunpack.c.h.bf16 %v10117_v2  ;;  %v12493_v22 = vunpack.c.h.bf16 %v10015_v52  ;;  %v3264_v13 = vadd.f32 %v3263_v36, %v1546_v43 }
 0x351   : > { %v2018_v61 = vadd.f32 %v2017_v5, %v12488_v55  ;;  %v2226_v41 = vadd.f32 %v2225_v45, %v12490_v21  ;;  %v2849_v59 = vadd.f32 %v2848_v15, %v12492_v9  ;;  %v12495_v55 = vunpack.c.h.bf16 %v10162_v8 }
 0x352   : > { %v2434_v14 = vadd.f32 %v2433_v3, %v12491_v27  ;;  %v1811_v35 = vadd.f32 %v1810_v19, %v12493_v22  ;;  %v12498_v21 = vunpack.c.h.bf16 %v10199_v38  ;;  %v12499_v19 = vunpack.c.h.bf16 %v10165_v42  ;;  %v12504_v38 = vld [vmem:[#allocation94_spill] sm:$0xff] }
 0x353   : > { %v2019_v5 = vadd.f32 %v2018_v61, %v12494_v10  ;;  %v2642_v12 = vadd.f32 %v2641_v16, %v12495_v55  ;;  %v2227_v45 = vadd.f32 %v2226_v41, %v12496_v18  ;;  %v12500_v61 = vld [vmem:[#allocation90_spill] sm:$0xff]  ;;  %v12503_v55 = vunpack.c.h.bf16 %v12502_v30 }
 0x354   : > { %v2435_v3 = vadd.f32 %v2434_v14, %v12497_v37  ;;  %v2850_v15 = vadd.f32 %v2849_v59, %v12498_v21  ;;  %v1813_v62 = vadd.f32 %v1812_v49, %v1811_v35  ;;  %v12501_v22 = vunpack.c.h.bf16 %v12500_v61 }
 0x355   : > { %v2021_v27 = vadd.f32 %v2020_v40, %v2019_v5  ;;  %v2643_v9 = vadd.f32 %v2642_v12, %v12499_v19  ;;  %v2229_v16 = vadd.f32 %v2228_v20, %v2227_v45  ;;  %v3265_v18 = vadd.f32 %v3264_v13, %v1562_v60 }
 0x356   : > { %v3058_v10 = vadd.f32 %v3057_v34, %v12501_v22  ;;  %v2437_v47 = vadd.f32 %v2436_v31, %v2435_v3  ;;  %v2851_v41 = vadd.f32 %v2850_v15, %v12503_v55  ;;  %v1814_v56 = vrot.slane %v1813_v62, 4  ;;  %v12507_v55 = vld [vmem:[#allocation101_spill] sm:$0xff] }
 0x357   : > { %v2022_v14 = vrot.slane %v2021_v27, 4  ;;  %v2645_v37 = vadd.f32 %v2644_v23, %v2643_v9  ;;  %v12505_v59 = vunpack.c.h.bf16 %v12504_v38  ;;  %v2230_v49 = vrot.slane %v2229_v16, 4 }
 0x358   : > { %v2438_v40 = vrot.slane %v2437_v47, 4  ;;  %v2853_v36 = vadd.f32 %v2852_v1, %v2851_v41  ;;  %v3266_v35 = vadd.f32 %v3265_v18, %v1578_v57  ;;  %v1815_v5 = vadd.f32 %v1814_v56, %v1813_v62 }
 0x359   : > { %v3059_v43 = vadd.f32 %v3058_v10, %v12505_v59  ;;  %v2023_v12 = vadd.f32 %v2022_v14, %v2021_v27  ;;  %v2646_v21 = vrot.slane %v2645_v37, 4  ;;  %v2231_v20 = vadd.f32 %v2230_v49, %v2229_v16 }
 0x35a   : > { %v2439_v31 = vadd.f32 %v2438_v40, %v2437_v47  ;;  %v2854_v45 = vrot.slane %v2853_v36, 4  ;;  %v12506_v3 = vunpack.c.h.bf16 %v10276_v26  ;;  %v1816_v15 = vrot.slane %v1815_v5, 2 }
 0x35b   : > { %v3061_v34 = vadd.f32 %v3060_v46, %v3059_v43  ;;  %v2024_v13 = vrot.slane %v2023_v12, 2  ;;  %v2647_v23 = vadd.f32 %v2646_v21, %v2645_v37  ;;  %v2232_v9 = vrot.slane %v2231_v20, 2 }
 0x35c   : > { %v3267_v60 = vadd.f32 %v3266_v35, %v12506_v3  ;;  %v2440_v22 = vrot.slane %v2439_v31, 2  ;;  %v2855_v10 = vadd.f32 %v2854_v45, %v2853_v36  ;;  %v12508_v1 = vunpack.c.h.bf16 %v12507_v55 }
 0x35d   : > { %v3062_v19 = vrot.slane %v3061_v34, 4  ;;  %v1817_v56 = vadd.f32 %v1816_v15, %v1815_v5  ;;  %v2025_v62 = vadd.f32 %v2024_v13, %v2023_v12  ;;  %v2648_v46 = vrot.slane %v2647_v23, 2 }
 0x35e   : > { %v3268_v57 = vsel %vm1616_vm0, %v12508_v1, 0.0  ;;  %v2233_v16 = vadd.f32 %v2232_v9, %v2231_v20  ;;  %v2441_v47 = vadd.f32 %v2440_v22, %v2439_v31  ;;  %v2856_v41 = vrot.slane %v2855_v10, 2 }
 0x35f   : > { %v3063_v27 = vadd.f32 %v3062_v19, %v3061_v34  ;;  %v3269_v18 = vadd.f32 %v3268_v57, %v3267_v60  ;;  %v1818_v14 = vrot.slane %v1817_v56, 1  ;;  %v2026_v59 = vrot.slane %v2025_v62, 1 }
 0x360   : > { %v2649_v43 = vadd.f32 %v2648_v46, %v2647_v23  ;;  %v2234_v49 = vrot.slane %v2233_v16, 1  ;;  %v2442_v40 = vrot.slane %v2441_v47, 1  ;;  %v2857_v35 = vadd.f32 %v2856_v41, %v2855_v10 }
 0x361   : > { %v3064_v37 = vrot.slane %v3063_v27, 2  ;;  %v3270_v36 = vrot.slane %v3269_v18, 4  ;;  %v1819_v21 = vadd.f32 %v1818_v14, %v1817_v56  ;;  %v2027_v45 = vadd.f32 %v2026_v59, %v2025_v62  ;;  %v12509_v59 = vld [vmem:[#allocation82_spill] sm:$0xff] }
 0x362   : > { %v2650_v3 = vrot.slane %v2649_v43, 1  ;;  %v2235_v5 = vadd.f32 %v2234_v49, %v2233_v16  ;;  %v2443_v12 = vadd.f32 %v2442_v40, %v2441_v47  ;;  %v2858_v15 = vrot.slane %v2857_v35, 1 }
 0x363   : > { %v3065_v1 = vadd.f32 %v3064_v37, %v3063_v27  ;;  %v3271_v34 = vadd.f32 %v3270_v36, %v3269_v18  ;;  %v3291_v13 = vpack.c.bf16 %v1819_v21, %v1819_v21  ;;  %v3307_v60 = vpack.c.bf16 %v2027_v45, %v2027_v45  ;;  %v12511_v37 = vld [vmem:[#allocation71_spill] sm:$0xff]  ;;  %v12513_v45 = vld [vmem:[#allocation14_spill] sm:$0xff] }
 0x364   : > { %v2651_v20 = vadd.f32 %v2650_v3, %v2649_v43  ;;  %v2859_v19 = vadd.f32 %v2858_v15, %v2857_v35  ;;  %v3323_v23 = vpack.c.bf16 %v2235_v5, %v2235_v5  ;;  %v3339_v22 = vpack.c.bf16 %v2443_v12, %v2443_v12  ;;  %v12515_v15 = vld [vmem:[#allocation78_spill] sm:$0xff] }
 0x365   : > { %v3066_v31 = vrot.slane %v3065_v1, 1  ;;  %v3272_v9 = vrot.slane %v3271_v34, 2  ;;  %v3810_v10 = vunpack.c.l.b16 %v3291_v13  ;;  %v3826_v41 = vunpack.c.l.b16 %v3307_v60  ;;  %v12519_v60 = vld [vmem:[#allocation86_spill] sm:$0xff] }
 0x366   : > { %v3355_v46 = vpack.c.bf16 %v2651_v20, %v2651_v20  ;;  %v3371_v62 = vpack.c.bf16 %v2859_v19, %v2859_v19  ;;  %v3842_v14 = vunpack.c.l.b16 %v3323_v23  ;;  %v3858_v27 = vunpack.c.l.b16 %v3339_v22 }
 0x367   : > { %v3067_v57 = vadd.f32 %v3066_v31, %v3065_v1  ;;  %v3273_v56 = vadd.f32 %v3272_v9, %v3271_v34  ;;  %v4035_v18 = vsel %vm3923_vm1, %v3826_v41, %v3810_v10  ;;  %v12510_v43 = vunpack.c.l.bf16 %v12509_v59  ;;  %v12517_v31 = vld [vmem:[#allocation87_spill] sm:$0xff] }
 0x368   : > { %v3874_v47 = vunpack.c.l.b16 %v3355_v46  ;;  %v12512_v49 = vunpack.c.l.bf16 %v12511_v37  ;;  %v3890_v36 = vunpack.c.l.b16 %v3371_v62  ;;  %v4036_v21 = vsel %vm3925_vm2, %v3842_v14, %v4035_v18  ;;  %v12523_v41 = vld [vmem:[#allocation15_spill] sm:$0xff]  ;;  %v12525_v14 = vld [vmem:[#allocation21_spill] sm:$0xff] }
 0x369   : > { %v3387_v16 = vpack.c.bf16 %v3067_v57, %v3067_v57  ;;  %v3274_v35 = vrot.slane %v3273_v56, 1  ;;  %v12514_v3 = vunpack.c.l.bf16 %v12513_v45  ;;  %v4037_v12 = vsel %vm3927_vm3, %v3858_v27, %v4036_v21  ;;  %v12521_v57 = vld [vmem:[#allocation92_spill] sm:$0xff]  ;;  %v12527_v59 = vld [vmem:[#allocation91_spill] sm:$0xff] }
 0x36a   : > { %v1768_v40 = vadd.f32 %v12512_v49, %v12510_v43  ;;  %v12516_v34 = vunpack.c.l.bf16 %v12515_v15  ;;  %v12518_v13 = vunpack.c.l.bf16 %v12517_v31  ;;  %v12520_v19 = vunpack.c.l.bf16 %v12519_v60  ;;  %v12529_v49 = vld [vmem:[#allocation10_spill] sm:$0xff]  ;;  %v12535_v31 = vld [vmem:[#allocation9_spill] sm:$0xff] }
 0x36b   : > { %v1773_v1 = vsel %vm1616_vm0, %v12514_v3, 0.0  ;;  %v3906_v5 = vunpack.c.l.b16 %v3387_v16  ;;  %v3275_v23 = vadd.f32 %v3274_v35, %v3273_v56  ;;  %v4038_v22 = vsel %vm3929_vm4, %v3874_v47, %v4037_v12  ;;  %v12531_v56 = vld [vmem:[#allocation11_spill] sm:$0xff]  ;;  %v12533_v12 = vld [vmem:[#allocation24_spill] sm:$0xff]  ;;  %v12537_v60 = vld [vmem:[#allocation22_spill] sm:$0xff] }
 0x36c   : > { %v1769_v20 = vadd.f32 %v1768_v40, %v12516_v34  ;;  %v1976_v9 = vadd.f32 %v12520_v19, %v12518_v13  ;;  %v12522_v46 = vunpack.c.l.bf16 %v12521_v57  ;;  %v12524_v62 = vunpack.c.l.bf16 %v12523_v41 }
 0x36d   : > { %v12526_v16 = vunpack.c.l.bf16 %v12525_v14  ;;  %v4039_v18 = vsel %vm3931_vm5, %v3890_v36, %v4038_v22  ;;  %v12528_v43 = vunpack.c.l.bf16 %v12527_v59  ;;  %v12530_v40 = vunpack.c.l.bf16 %v12529_v49  ;;  %v12539_v22 = vld [vmem:[#allocation83_spill] sm:$0xff]  ;;  %v12549_v49 = vld [vmem:[#allocation13_spill] sm:$0xff] }
 0x36e   : > { %v1981_v10 = vsel %vm1616_vm0, %v12522_v46, 0.0  ;;  %v12532_v35 = vunpack.c.l.bf16 %v12531_v56  ;;  %v3403_v45 = vpack.c.bf16 %v3275_v23, %v3275_v23  ;;  %v4040_v3 = vsel %vm3933_vm6, %v3906_v5, %v4039_v18  ;;  %v12541_v46 = vld [vmem:[#allocation93_spill] sm:$0xff]  ;;  %v12547_v18 = vld [vmem:[#allocation20_spill] sm:$0xff] }
 0x36f   : > { %v2184_v27 = vadd.f32 %v12526_v16, %v12524_v62  ;;  %v1770_v37 = vadd.f32 %v1769_v20, %v12528_v43  ;;  %v1977_v21 = vadd.f32 %v1976_v9, %v12530_v40  ;;  %v12534_v15 = vunpack.c.l.bf16 %v12533_v12  ;;  %v12543_v62 = vld [vmem:[#allocation79_spill] sm:$0xff]  ;;  %v12545_v16 = vld [vmem:[#allocation17_spill] sm:$0xff] }
 0x370   : > { %v2189_v47 = vsel %vm1616_vm0, %v12532_v35, 0.0  ;;  %v12536_v13 = vunpack.c.l.bf16 %v12535_v31  ;;  %v12538_v36 = vunpack.c.l.bf16 %v12537_v60  ;;  %v12540_v20 = vunpack.c.l.bf16 %v12539_v22  ;;  %v12551_v35 = vld [vmem:[#allocation43_spill] sm:$0xff]  ;;  %v12557_v22 = vld [vmem:[#allocation16_spill] sm:$0xff] }
 0x371   : > { %v2185_v34 = vadd.f32 %v2184_v27, %v12534_v15  ;;  %v12542_v9 = vunpack.c.l.bf16 %v12541_v46  ;;  %v12544_v14 = vunpack.c.l.bf16 %v12543_v62  ;;  %v12546_v5 = vunpack.c.l.bf16 %v12545_v16 }
 0x372   : > { %v2392_v19 = vadd.f32 %v12538_v36, %v12536_v13  ;;  %v1771_v57 = vadd.f32 %v1770_v37, %v12540_v20  ;;  %v12548_v59 = vunpack.c.l.bf16 %v12547_v18  ;;  %v3922_v43 = vunpack.c.l.b16 %v3403_v45  ;;  %v12553_v37 = vld [vmem:[#allocation56_spill] sm:$0xff]  ;;  %v12555_v13 = vld [vmem:[#allocation75_spill] sm:$0xff] }
 0x373   : > { %v1978_v41 = vadd.f32 %v1977_v21, %v12542_v9  ;;  %v2397_v23 = vsel %vm1616_vm0, %v12544_v14, 0.0  ;;  %v12550_v40 = vunpack.c.l.bf16 %v12549_v49  ;;  %v12552_v12 = vunpack.c.l.bf16 %v12551_v35  ;;  %v12559_v9 = vld [vmem:[#allocation23_spill] sm:$0xff]  ;;  %v12561_v45 = vld [vmem:[#allocation28_spill] sm:$0xff] }
 0x374   : > { %v2600_v27 = vadd.f32 %v12548_v59, %v12546_v5  ;;  %v12554_v31 = vunpack.c.l.bf16 %v12553_v37  ;;  %v12556_v60 = vunpack.c.l.bf16 %v12555_v13  ;;  %v12558_v20 = vunpack.c.l.bf16 %v12557_v22  ;;  %v12563_v5 = vld [vmem:[#allocation39_spill] sm:$0xff] }
 0x375   : > { %v2186_v56 = vadd.f32 %v2185_v34, %v12550_v40  ;;  %v2393_v15 = vadd.f32 %v2392_v19, %v12552_v12  ;;  %v12560_v62 = vunpack.c.l.bf16 %v12559_v9  ;;  %v12562_v16 = vunpack.c.l.bf16 %v12561_v45  ;;  %v12565_v59 = vld [vmem:[#allocation19_spill] sm:$0xff]  ;;  %v12573_v9 = vld [vmem:[#allocation44_spill] sm:$0xff] }
 0x376   : > { %v2605_v21 = vsel %vm1616_vm0, %v12554_v31, 0.0  ;;  %v1772_v36 = vadd.f32 %v1771_v57, %v12556_v60  ;;  %v1979_v46 = vadd.f32 %v1978_v41, %v12558_v20  ;;  %v12564_v34 = vunpack.c.l.bf16 %v12563_v5  ;;  %v12567_v35 = vld [vmem:[#allocation35_spill] sm:$0xff]  ;;  %v12569_v57 = vld [vmem:[#allocation57_spill] sm:$0xff]  ;;  %v12577_v5 = vld [vmem:[#allocation38_spill] sm:$0xff] }
 0x377   : > { %v2601_v14 = vadd.f32 %v2600_v27, %v12560_v62  ;;  %v4041_v19 = vsel %vm3935_vm7, %v3922_v43, %v4040_v3  ;;  %v12566_v49 = vunpack.c.l.bf16 %v12565_v59  ;;  %v12568_v12 = vunpack.c.l.bf16 %v12567_v35  ;;  %v12571_v27 = vld [vmem:[#allocation18_spill] sm:$0xff]  ;;  %v12579_v59 = vld [vmem:[#allocation8_spill] sm:$0xff] }
 0x378   : > { %v2808_v18 = vadd.f32 %v12564_v34, %v12562_v16  ;;  %v12570_v31 = vunpack.c.l.bf16 %v12569_v57  ;;  %v4057_v13 = vpack.c.b16 %v4041_v19, %v4041_v19  ;;  %v1774_v60 = vadd.f32 %v1773_v1, %v1772_v36  ;;  %v12575_v16 = vld [vmem:[#allocation85_spill] sm:$0xff]  ;;  %v12581_v35 = vld [vmem:[#allocation30_spill] sm:$0xff] }
 0x379   : > { %v2187_v40 = vadd.f32 %v2186_v56, %v12566_v49  ;;  %v2394_v37 = vadd.f32 %v2393_v15, %v12568_v12  ;;  %v12572_v22 = vunpack.c.l.bf16 %v12571_v27  ;;  %v12574_v62 = vunpack.c.l.bf16 %v12573_v9  ;;  %v12583_v57 = vld [vmem:[#allocation58_spill] sm:$0xff] }
 0x37a   : > { %v2813_v41 = vsel %vm1616_vm0, %v12570_v31, 0.0  ;;  %v12576_v3 = vunpack.c.l.bf16 %v12575_v16  ;;  %v12578_v56 = vunpack.c.l.bf16 %v12577_v5  ;;  %v12580_v15 = vunpack.c.l.bf16 %v12579_v59  ;;  %5154 = vmatprep.mubr.bf16.mxu1 %v4057_v13  ;;  %v12585_v31 = vld [vmem:[#allocation36_spill] sm:$0xff]  ;;  %v12593_v59 = vld [vmem:[#allocation49_spill] sm:$0xff] }
 0x37b   : > { %v1980_v20 = vadd.f32 %v1979_v46, %v12572_v22  ;;  %v2602_v45 = vadd.f32 %v2601_v14, %v12574_v62  ;;  %v12582_v12 = vunpack.c.l.bf16 %v12581_v35  ;;  %v12584_v19 = vunpack.c.l.bf16 %v12583_v57  ;;  %v12587_v22 = vld [vmem:[#allocation47_spill] sm:$0xff] }
 0x37c   : > { %v2188_v43 = vadd.f32 %v2187_v40, %v12576_v3  ;;  %v2395_v34 = vadd.f32 %v2394_v37, %v12578_v56  ;;  %v2809_v49 = vadd.f32 %v2808_v18, %v12580_v15  ;;  %v1775_v36 = vrot.slane %v1774_v60, 4  ;;  %v12589_v37 = vld [vmem:[#allocation51_spill] sm:$0xff]  ;;  %v12591_v18 = vld [vmem:[#allocation37_spill] sm:$0xff] }
 0x37d   : > { %v3016_v1 = vadd.f32 %v12584_v19, %v12582_v12  ;;  %v1982_v46 = vadd.f32 %v1981_v10, %v1980_v20  ;;  %v12586_v27 = vunpack.c.l.bf16 %v12585_v31  ;;  %v12588_v9 = vunpack.c.l.bf16 %v12587_v22  ;;  %v12595_v10 = vld [vmem:[#allocation29_spill] sm:$0xff]  ;;  %v12599_v31 = vld [vmem:[#allocation27_spill] sm:$0xff] }
 0x37e   : > { %v2190_v62 = vadd.f32 %v2189_v47, %v2188_v43  ;;  %v12590_v16 = vunpack.c.l.bf16 %v12589_v37  ;;  %v12592_v5 = vunpack.c.l.bf16 %v12591_v18  ;;  %v12594_v15 = vunpack.c.l.bf16 %v12593_v59 }
 0x37f   : > { %v2603_v14 = vadd.f32 %v2602_v45, %v12586_v27  ;;  %v3021_v40 = vsel %vm1616_vm0, %v12588_v9, 0.0  ;;  %v1776_v13 = vadd.f32 %v1775_v36, %v1774_v60  ;;  %v1983_v12 = vrot.slane %v1982_v46, 4  ;;  %v12597_v45 = vld [vmem:[#allocation45_spill] sm:$0xff]  ;;  %v12601_v9 = vld [vmem:[#allocation12_spill] sm:$0xff] }
 0x380   : > { %v2396_v3 = vadd.f32 %v2395_v34, %v12590_v16  ;;  %v2810_v56 = vadd.f32 %v2809_v49, %v12592_v5  ;;  %v3017_v35 = vadd.f32 %v3016_v1, %v12594_v15  ;;  %v12596_v20 = vunpack.c.l.bf16 %v12595_v10  ;;  %v12603_v16 = vld [vmem:[#allocation31_spill] sm:$0xff]  ;;  %v12605_v36 = vld [vmem:[#allocation33_spill] sm:$0xff] }
 0x381   : > { %v12598_v19 = vunpack.c.l.bf16 %v12597_v45  ;;  %v12600_v27 = vunpack.c.l.bf16 %v12599_v31  ;;  %v2191_v47 = vrot.slane %v2190_v62, 4  ;;  %v12602_v34 = vunpack.c.l.bf16 %v12601_v9 }
 0x382   : > { %v2604_v57 = vadd.f32 %v2603_v14, %v12596_v20  ;;  %v2398_v43 = vadd.f32 %v2397_v23, %v2396_v3  ;;  %v12604_v49 = vunpack.c.l.bf16 %v12603_v16  ;;  %v1777_v5 = vrot.slane %v1776_v13, 2  ;;  %v12607_v20 = vld [vmem:[#allocation26_spill] sm:$0xff] }
 0x383   : > { %v3224_v22 = vadd.f32 %v12600_v27, %v12598_v19  ;;  %v2811_v37 = vadd.f32 %v2810_v56, %v12602_v34  ;;  %v1984_v1 = vadd.f32 %v1983_v12, %v1982_v46  ;;  %v12606_v59 = vunpack.c.l.bf16 %v12605_v36  ;;  %v12609_v19 = vld [vmem:[#allocation42_spill] sm:$0xff]  ;;  %v12613_v12 = vld [vmem:[#allocation25_spill] sm:$0xff] }
 0x384   : > { %v3018_v18 = vadd.f32 %v3017_v35, %v12604_v49  ;;  %v2606_v60 = vadd.f32 %v2605_v21, %v2604_v57  ;;  %v2192_v14 = vadd.f32 %v2191_v47, %v2190_v62  ;;  %v2399_v10 = vrot.slane %v2398_v43, 4  ;;  %v12611_v34 = vld [vmem:[#allocation46_spill] sm:$0xff] }
 0x385   : > { %v3225_v15 = vadd.f32 %v3224_v22, %v12606_v59  ;;  %v12608_v45 = vunpack.c.l.bf16 %v12607_v20  ;;  %v12610_v27 = vunpack.c.l.bf16 %v12609_v19  ;;  %v1778_v3 = vadd.f32 %v1777_v5, %v1776_v13  ;;  %v12615_v59 = vld [vmem:[#allocation40_spill] sm:$0xff] }
 0x386   : > { %v1985_v9 = vrot.slane %v1984_v1, 2  ;;  %v2607_v56 = vrot.slane %v2606_v60, 4  ;;  %v12612_v16 = vunpack.c.l.bf16 %v12611_v34  ;;  %v2193_v49 = vrot.slane %v2192_v14, 2 }
 0x387   : > { %v2812_v31 = vadd.f32 %v2811_v37, %v12608_v45  ;;  %v3019_v23 = vadd.f32 %v3018_v18, %v12610_v27  ;;  %v2400_v46 = vadd.f32 %v2399_v10, %v2398_v43  ;;  %v12614_v57 = vunpack.c.l.bf16 %v12613_v12 }
 0x388   : > { %v3226_v35 = vadd.f32 %v3225_v15, %v12612_v16  ;;  %v1779_v62 = vrot.slane %v1778_v3, 1  ;;  %v1986_v47 = vadd.f32 %v1985_v9, %v1984_v1  ;;  %v2608_v36 = vadd.f32 %v2607_v56, %v2606_v60  ;;  %v12617_v15 = vld [vmem:[#allocation34_spill] sm:$0xff]  ;;  %v12619_v60 = vld [vmem:[#allocation53_spill] sm:$0xff] }
 0x389   : > { %v2814_v21 = vadd.f32 %v2813_v41, %v2812_v31  ;;  %v3020_v22 = vadd.f32 %v3019_v23, %v12614_v57  ;;  %v12616_v37 = vunpack.c.l.bf16 %v12615_v59  ;;  %v2194_v45 = vadd.f32 %v2193_v49, %v2192_v14 }
 0x38a   : > { %v2401_v18 = vrot.slane %v2400_v46, 2  ;;  %v1780_v19 = vadd.f32 %v1779_v62, %v1778_v3  ;;  %v1987_v27 = vrot.slane %v1986_v47, 1  ;;  %v2609_v34 = vrot.slane %v2608_v36, 2 }
 0x38b   : > { %v3227_v20 = vadd.f32 %v3226_v35, %v12616_v37  ;;  %v2815_v13 = vrot.slane %v2814_v21, 4  ;;  %v3022_v5 = vadd.f32 %v3021_v40, %v3020_v22  ;;  %v12618_v16 = vunpack.c.l.bf16 %v12617_v15 }
 0x38c   : > { %v2195_v41 = vrot.slane %v2194_v45, 1  ;;  %v2402_v10 = vadd.f32 %v2401_v18, %v2400_v46  ;;  %v1988_v12 = vadd.f32 %v1987_v27, %v1986_v47  ;;  %v2610_v1 = vadd.f32 %v2609_v34, %v2608_v36 }
 0x38d   : > { %v3228_v43 = vadd.f32 %v3227_v20, %v12618_v16  ;;  %v2816_v31 = vadd.f32 %v2815_v13, %v2814_v21  ;;  %v3023_v23 = vrot.slane %v3022_v5, 4  ;;  %v12620_v9 = vunpack.c.l.bf16 %v12619_v60  ;;  %v12621_v13 = vld [vmem:[#allocation32_spill] sm:$0xff] }
 0x38e   : > { %v3288_v14 = vpack.c.bf16 %v1780_v19, %v1780_v19  ;;  %v2196_v35 = vadd.f32 %v2195_v41, %v2194_v45  ;;  %v2403_v49 = vrot.slane %v2402_v10, 1  ;;  %v2611_v57 = vrot.slane %v2610_v1, 1 }
 0x38f   : > { %v3229_v56 = vsel %vm1616_vm0, %v12620_v9, 0.0  ;;  %v2817_v40 = vrot.slane %v2816_v31, 2  ;;  %v3024_v3 = vadd.f32 %v3023_v23, %v3022_v5  ;;  %v3304_v62 = vpack.c.bf16 %v1988_v12, %v1988_v12 }
 0x390   : > { %v3230_v22 = vadd.f32 %v3229_v56, %v3228_v43  ;;  %v3807_v59 = vunpack.c.l.b16 %v3288_v14  ;;  %v2404_v37 = vadd.f32 %v2403_v49, %v2402_v10  ;;  %v3320_v21 = vpack.c.bf16 %v2196_v35, %v2196_v35  ;;  %v12626_v49 = vld [vmem:[#allocation50_spill] sm:$0xff] }
 0x391   : > { %v2818_v20 = vadd.f32 %v2817_v40, %v2816_v31  ;;  %v3025_v46 = vrot.slane %v3024_v3, 2  ;;  %v2612_v18 = vadd.f32 %v2611_v57, %v2610_v1  ;;  %v3823_v36 = vunpack.c.l.b16 %v3304_v62 }
 0x392   : > { %v3231_v47 = vrot.slane %v3230_v22, 4  ;;  %v12622_v27 = vunpack.c.l.bf16 %v12621_v13  ;;  %v12623_v34 = vunpack.c.l.bf16 %v9998_v54  ;;  %v3336_v16 = vpack.c.bf16 %v2404_v37, %v2404_v37 }
 0x393   : > { %v2819_v45 = vrot.slane %v2818_v20, 1  ;;  %v3026_v15 = vadd.f32 %v3025_v46, %v3024_v3  ;;  %v3839_v5 = vunpack.c.l.b16 %v3320_v21  ;;  %v3352_v43 = vpack.c.bf16 %v2612_v18, %v2612_v18 }
 0x394   : > { %v1794_v19 = vadd.f32 %v12623_v34, %v12622_v27  ;;  %v3232_v41 = vadd.f32 %v3231_v47, %v3230_v22  ;;  %v4014_v23 = vsel %vm3923_vm1, %v3823_v36, %v3807_v59  ;;  %v12624_v10 = vunpack.c.l.bf16 %v10002_v28  ;;  %v12628_v28 = vld [vmem:[#allocation52_spill] sm:$0xff]  ;;  %v12632_v47 = vld [vmem:[#allocation59_spill] sm:$0xff] }
 0x395   : > { %v2820_v12 = vadd.f32 %v2819_v45, %v2818_v20  ;;  %v3027_v1 = vrot.slane %v3026_v15, 1  ;;  %v3855_v60 = vunpack.c.l.b16 %v3336_v16  ;;  %v4015_v9 = vsel %vm3925_vm2, %v3839_v5, %v4014_v23  ;;  %v12637_v5 = vld [vmem:[#allocation48_spill] sm:$0xff] }
 0x396   : > { %v1795_v31 = vadd.f32 %v1794_v19, %v12624_v10  ;;  %v3233_v56 = vrot.slane %v3232_v41, 2  ;;  %v3871_v14 = vunpack.c.l.b16 %v3352_v43  ;;  %v12625_v54 = vunpack.c.l.bf16 %v10007_v63 }
 0x397   : > { %v12627_v40 = vunpack.c.l.bf16 %v12626_v49  ;;  %v3028_v57 = vadd.f32 %v3027_v1, %v3026_v15  ;;  %v3368_v22 = vpack.c.bf16 %v2820_v12, %v2820_v12  ;;  %v4016_v62 = vsel %vm3927_vm3, %v3855_v60, %v4015_v9  ;;  %v12635_v15 = vld [vmem:[#allocation41_spill] sm:$0xff]  ;;  %v12641_v12 = vld [vmem:[#allocation54_spill] sm:$0xff]  ;;  %v12643_v60 = vld [vmem:[#allocation60_spill] sm:$0xff] }
 0x398   : > { %v1796_v35 = vadd.f32 %v1795_v31, %v12625_v54  ;;  %v12629_v59 = vunpack.c.l.bf16 %v12628_v28  ;;  %v12630_v37 = vunpack.c.l.bf16 %v10030_v58  ;;  %v3234_v46 = vadd.f32 %v3233_v56, %v3232_v41 }
 0x399   : > { %v1799_v3 = vsel %vm1616_vm0, %v12627_v40, 0.0  ;;  %v4017_v21 = vsel %vm3929_vm4, %v3871_v14, %v4016_v62  ;;  %v12631_v18 = vunpack.c.l.bf16 %v10010_v6  ;;  %v12633_v36 = vunpack.c.l.bf16 %v12632_v47  ;;  %v12648_v62 = vld [vmem:[#allocation64_spill] sm:$0xff]  ;;  %v12654_v47 = vld [vmem:[#allocation66_spill] sm:$0xff] }
 0x39a   : > { %v2002_v20 = vadd.f32 %v12630_v37, %v12629_v59  ;;  %v3384_v27 = vpack.c.bf16 %v3028_v57, %v3028_v57  ;;  %v3887_v34 = vunpack.c.l.b16 %v3368_v22  ;;  %v12634_v19 = vunpack.c.l.bf16 %v10037_v25 }
 0x39b   : > { %v1797_v63 = vadd.f32 %v1796_v35, %v12631_v18  ;;  %v2007_v13 = vsel %vm1616_vm0, %v12633_v36, 0.0  ;;  %v12636_v16 = vunpack.c.l.bf16 %v12635_v15  ;;  %v12638_v58 = vunpack.c.l.bf16 %v12637_v5 }
 0x39c   : > { %v2003_v45 = vadd.f32 %v2002_v20, %v12634_v19  ;;  %v3235_v41 = vrot.slane %v3234_v46, 1  ;;  %v12639_v23 = vunpack.c.l.bf16 %v10015_v52  ;;  %v12640_v6 = vunpack.c.l.bf16 %v10090_v33  ;;  %v12657_v19 = vld [vmem:[#allocation80_spill] sm:$0xff] }
 0x39d   : > { %v2210_v43 = vadd.f32 %v12638_v58, %v12636_v16  ;;  %v12642_v1 = vunpack.c.l.bf16 %v12641_v12  ;;  %v12644_v9 = vunpack.c.l.bf16 %v12643_v60  ;;  %v3903_v25 = vunpack.c.l.b16 %v3384_v27 }
 0x39e   : > { %v1798_v10 = vadd.f32 %v1797_v63, %v12639_v23  ;;  %v2215_v31 = vsel %vm1616_vm0, %v12640_v6, 0.0  ;;  %v4018_v14 = vsel %vm3931_vm5, %v3887_v34, %v4017_v21  ;;  %v12645_v54 = vunpack.c.l.bf16 %v10040_v32  ;;  %v12652_v63 = vld [vmem:[#allocation65_spill] sm:$0xff] }
 0x39f   : > { %v2418_v56 = vadd.f32 %v12644_v9, %v12642_v1  ;;  %v12646_v49 = vunpack.c.l.bf16 %v10072_v4  ;;  %v3236_v52 = vadd.f32 %v3235_v41, %v3234_v46  ;;  %v12647_v33 = vunpack.c.l.bf16 %v10103_v0  ;;  %v12662_v41 = vld [vmem:[#allocation69_spill] sm:$0xff] }
 0x3a0   : > { %v2004_v35 = vadd.f32 %v2003_v45, %v12645_v54  ;;  %v1800_v57 = vadd.f32 %v1799_v3, %v1798_v10  ;;  %v12649_v28 = vunpack.c.l.bf16 %v12648_v62  ;;  %v4019_v37 = vsel %vm3933_vm6, %v3903_v25, %v4018_v14  ;;  %v12666_v9 = vld [vmem:[#allocation73_spill] sm:$0xff] }
 0x3a1   : > { %v2211_v40 = vadd.f32 %v2210_v43, %v12646_v49  ;;  %v2419_v22 = vadd.f32 %v2418_v56, %v12647_v33  ;;  %v12650_v20 = vunpack.c.l.bf16 %v10045_v17  ;;  %v12651_v32 = vunpack.c.l.bf16 %v10075_v50 }
 0x3a2   : > { %v2423_v59 = vsel %vm1616_vm0, %v12649_v28, 0.0  ;;  %v12653_v4 = vunpack.c.l.bf16 %v12652_v63  ;;  %v12655_v46 = vunpack.c.l.bf16 %v12654_v47  ;;  %v3400_v36 = vpack.c.bf16 %v3236_v52, %v3236_v52 }
 0x3a3   : > { %v2005_v21 = vadd.f32 %v2004_v35, %v12650_v20  ;;  %v2212_v18 = vadd.f32 %v2211_v40, %v12651_v32  ;;  %v1801_v0 = vrot.slane %v1800_v57, 4  ;;  %v12656_v27 = vunpack.c.l.bf16 %v10114_v29 }
 0x3a4   : > { %v2626_v3 = vadd.f32 %v12655_v46, %v12653_v4  ;;  %v12658_v45 = vunpack.c.l.bf16 %v12657_v19  ;;  %v12659_v17 = vunpack.c.l.bf16 %v10048_v7  ;;  %v12660_v50 = vunpack.c.l.bf16 %v10081_v44  ;;  %v12679_v4 = vld [vmem:[#allocation88_spill] sm:$0xff] }
 0x3a5   : > { %v2420_v34 = vadd.f32 %v2419_v22, %v12656_v27  ;;  %v12661_v58 = vunpack.c.l.bf16 %v10148_v39  ;;  %v12663_v23 = vunpack.c.l.bf16 %v12662_v41  ;;  %v12664_v10 = vunpack.c.l.bf16 %v10186_v51  ;;  %v12674_v22 = vld [vmem:[#allocation84_spill] sm:$0xff]  ;;  %v12682_v27 = vld [vmem:[#allocation95_spill] sm:$0xff] }
 0x3a6   : > { %v2631_v15 = vsel %vm1616_vm0, %v12658_v45, 0.0  ;;  %v2006_v16 = vadd.f32 %v2005_v21, %v12659_v17  ;;  %v2213_v5 = vadd.f32 %v2212_v18, %v12660_v50  ;;  %v3919_v29 = vunpack.c.l.b16 %v3400_v36  ;;  %v12677_v18 = vld [vmem:[#allocation81_spill] sm:$0xff]  ;;  %v12684_v45 = vld [vmem:[#allocation74_spill] sm:$0xff] }
 0x3a7   : > { %v2627_v43 = vadd.f32 %v2626_v3, %v12661_v58  ;;  %v2834_v6 = vadd.f32 %v12664_v10, %v12663_v23  ;;  %v1802_v12 = vadd.f32 %v1801_v0, %v1800_v57  ;;  %v12665_v1 = vunpack.c.l.bf16 %v10117_v2  ;;  %v12672_v57 = vld [vmem:[#allocation77_spill] sm:$0xff]  ;;  %v12688_v23 = vld [vmem:[#allocation96_spill] sm:$0xff] }
 0x3a8   : > { %v12667_v56 = vunpack.c.l.bf16 %v12666_v9  ;;  %v2008_v25 = vadd.f32 %v2007_v13, %v2006_v16  ;;  %v12668_v44 = vunpack.c.l.bf16 %v10084_v53  ;;  %v12669_v39 = vunpack.c.l.bf16 %v10151_v11  ;;  %v12686_v16 = vld [vmem:[#allocation89_spill] sm:$0xff] }
 0x3a9   : > { %v2421_v60 = vadd.f32 %v2420_v34, %v12665_v1  ;;  %v12670_v35 = vunpack.c.l.bf16 %v10189_v48  ;;  %v4020_v49 = vsel %vm3935_vm7, %v3919_v29, %v4019_v37  ;;  %v1803_v40 = vrot.slane %v1802_v12, 2 }
 0x3aa   : > { %v2839_v7 = vsel %vm1616_vm0, %v12667_v56, 0.0  ;;  %v2214_v14 = vadd.f32 %v2213_v5, %v12668_v44  ;;  %v2628_v54 = vadd.f32 %v2627_v43, %v12669_v39  ;;  %v12671_v2 = vunpack.c.l.bf16 %v10128_v24 }
 0x3ab   : > { %v2835_v51 = vadd.f32 %v2834_v6, %v12670_v35  ;;  %v12673_v33 = vunpack.c.l.bf16 %v12672_v57  ;;  %v12675_v62 = vunpack.c.l.bf16 %v12674_v22  ;;  %v4054_v28 = vpack.c.b16 %v4020_v49, %v4020_v49  ;;  %v12690_v6 = vld [vmem:[#allocation97_spill] sm:$0xff] }
 0x3ac   : > { %v2422_v52 = vadd.f32 %v2421_v60, %v12671_v2  ;;  %v2009_v53 = vrot.slane %v2008_v25, 4  ;;  %v2216_v20 = vadd.f32 %v2215_v31, %v2214_v14  ;;  %v12676_v11 = vunpack.c.l.bf16 %v10162_v8 }
 0x3ad   : > { %v3042_v13 = vadd.f32 %v12675_v62, %v12673_v33  ;;  %v1804_v32 = vadd.f32 %v1803_v40, %v1802_v12  ;;  %v12678_v63 = vunpack.c.l.bf16 %v12677_v18  ;;  %v12680_v47 = vunpack.c.l.bf16 %v12679_v4  ;;  %5115 = vmatmul.mubr.bf16.vlgmr.msra.gmra.mrb[12].mxu0 %v4054_v28 }
 0x3ae   : > { %v2629_v21 = vadd.f32 %v2628_v54, %v12676_v11  ;;  %v2424_v48 = vadd.f32 %v2423_v59, %v2422_v52  ;;  %v2010_v46 = vadd.f32 %v2009_v53, %v2008_v25  ;;  %v2217_v3 = vrot.slane %v2216_v20, 4  ;;  %v12694_v54 = vld [vmem:[#allocation98_spill] sm:$0xff] }
 0x3af   : > { %v2836_v37 = vadd.f32 %v2835_v51, %v12678_v63  ;;  %v3043_v24 = vadd.f32 %v3042_v13, %v12680_v47  ;;  %v12681_v36 = vunpack.c.l.bf16 %v10165_v42  ;;  %v12683_v34 = vunpack.c.l.bf16 %v12682_v27 }
 0x3b0   : > { %v1805_v8 = vrot.slane %v1804_v32, 1  ;;  %v2425_v19 = vrot.slane %v2424_v48, 4  ;;  %v12685_v59 = vunpack.c.l.bf16 %v12684_v45  ;;  %v12687_v50 = vunpack.c.l.bf16 %v12686_v16 }
 0x3b1   : > { %v2630_v0 = vadd.f32 %v2629_v21, %v12681_v36  ;;  %v3047_v31 = vsel %vm1616_vm0, %v12683_v34, 0.0  ;;  %v2011_v58 = vrot.slane %v2010_v46, 2  ;;  %v2218_v43 = vadd.f32 %v2217_v3, %v2216_v20 }
 0x3b2   : > { %v2837_v17 = vadd.f32 %v2836_v37, %v12685_v59  ;;  %v3044_v5 = vadd.f32 %v3043_v24, %v12687_v50  ;;  %v12689_v10 = vunpack.c.l.bf16 %v12688_v23  ;;  %v12691_v42 = vunpack.c.l.bf16 %v12690_v6 }
 0x3b3   : > { %v2632_v41 = vadd.f32 %v2631_v15, %v2630_v0  ;;  %v1806_v12 = vadd.f32 %v1805_v8, %v1804_v32  ;;  %v2426_v1 = vadd.f32 %v2425_v19, %v2424_v48  ;;  %v12692_v60 = vunpack.c.l.bf16 %v12502_v30  ;;  %v12700_v48 = vld [vmem:[#allocation100_spill] sm:$0xff]  ;;  %v12703_v8 = vld [vmem:[#allocation55_spill] sm:$0xff]  ;;  %v12704_v19 = vld [vmem:[#allocation62_spill] sm:$0xff] }
 0x3b4   : > { %v3250_v29 = vadd.f32 %v12691_v42, %v12689_v10  ;;  %v12693_v56 = vunpack.c.l.bf16 %v12500_v61  ;;  %v2012_v44 = vadd.f32 %v2011_v58, %v2010_v46  ;;  %v2219_v14 = vrot.slane %v2218_v43, 2  ;;  %v12698_v61 = vld [vmem:[#allocation99_spill] sm:$0xff]  ;;  %v5407_v0 = vld [vmem:[%s10778_s2] ss:$0 sm:$0xff] }
 0x3b5   : > { %v2838_v9 = vadd.f32 %v2837_v17, %v12692_v60  ;;  %v2633_v39 = vrot.slane %v2632_v41, 4  ;;  %v12695_v35 = vunpack.c.l.bf16 %v12694_v54  ;;  %v2427_v15 = vrot.slane %v2426_v1, 2  ;;  %v12706_v60 = vld [vmem:[#allocation63_spill] sm:$0xff] }
 0x3b6   : > { %v3045_v25 = vadd.f32 %v3044_v5, %v12693_v56  ;;  %v12696_v40 = vunpack.c.l.bf16 %v12504_v38  ;;  %v12697_v52 = vunpack.c.l.bf16 %v12507_v55  ;;  %v2013_v30 = vrot.slane %v2012_v44, 1 }
 0x3b7   : > { %v3251_v51 = vadd.f32 %v3250_v29, %v12695_v35  ;;  %v2840_v49 = vadd.f32 %v2839_v7, %v2838_v9  ;;  %v2220_v33 = vadd.f32 %v2219_v14, %v2218_v43  ;;  %v2634_v22 = vadd.f32 %v2633_v39, %v2632_v41  ;;  %v12707_v14 = vld [vmem:[#allocation67_spill] sm:$0xff]  ;;  %v12708_v39 = vld [vmem:[#allocation72_spill] sm:$0xff] }
 0x3b8   : > { %v3046_v2 = vadd.f32 %v3045_v25, %v12696_v40  ;;  %v3255_v57 = vsel %vm1616_vm0, %v12697_v52, 0.0  ;;  %v12699_v62 = vunpack.c.l.bf16 %v12698_v61  ;;  %v2428_v28 = vadd.f32 %v2427_v15, %v2426_v1  ;;  %v12705_v1 = vld [vmem:[#allocation61_spill] sm:$0xff]  ;;  %v5931_v35 = vld [vmem:[%s10779_s3] sm:$0xff]  }
 0x3b9   : > { %v2841_v53 = vrot.slane %v2840_v49, 4  ;;  %v3290_v11 = vpack.c.bf16 %v1806_v12, %v1806_v12  ;;  %v2014_v21 = vadd.f32 %v2013_v30, %v2012_v44  ;;  %v2221_v32 = vrot.slane %v2220_v33, 1  ;;  %v12710_v30 = vld [vmem:[#allocation76_spill] sm:$0xff] }
 0x3ba   : > { %v3252_v13 = vadd.f32 %v3251_v51, %v12699_v62  ;;  %v3048_v20 = vadd.f32 %v3047_v31, %v3046_v2  ;;  %v2635_v7 = vrot.slane %v2634_v22, 2  ;;  %v12701_v38 = vunpack.c.l.bf16 %v12700_v48 }
 0x3bb   : > { %v2429_v63 = vrot.slane %v2428_v28, 1  ;;  %v2842_v55 = vadd.f32 %v2841_v53, %v2840_v49  ;;  %v3809_v4 = vunpack.c.l.b16 %v3290_v11  ;;  %v2222_v47 = vadd.f32 %v2221_v32, %v2220_v33 }
 0x3bc   : > { %v3253_v18 = vadd.f32 %v3252_v13, %v12701_v38  ;;  %v3049_v37 = vrot.slane %v3048_v20, 4  ;;  %v2636_v24 = vadd.f32 %v2635_v7, %v2634_v22  ;;  %v12702_v46 = vunpack.c.l.bf16 %v10276_v26 }
 0x3bd   : > { %v3306_v36 = vpack.c.bf16 %v2014_v21, %v2014_v21  ;;  %v2430_v27 = vadd.f32 %v2429_v63, %v2428_v28  ;;  %v2843_v34 = vrot.slane %v2842_v55, 2  ;;  %v5569_v45 = vadd.f32 %v12704_v19, %v12703_v8  ;;  %v5933_v63 = vld [vmem:[%s10779_s3 + $0x10] sm:$0xff]   ;;  %v5935_v8 = vld [vmem:[%s10779_s3 + $0x20] sm:$0xff]   ;;  %v5936_v19 = vld [vmem:[%s10779_s3 + $0x28] sm:$0xff]  }
 0x3be   : > { %v3254_v3 = vadd.f32 %v3253_v18, %v12702_v46  ;;  %v3050_v31 = vadd.f32 %v3049_v37, %v3048_v20  ;;  %v2637_v59 = vrot.slane %v2636_v24, 1  ;;  %v3322_v16 = vpack.c.bf16 %v2222_v47, %v2222_v47  ;;  %v5932_v20 = vld [vmem:[%s10779_s3 + $0x8] sm:$0xff]   ;;  %v5934_v46 = vld [vmem:[%s10779_s3 + $0x18] sm:$0xff]  }
 0x3bf   : > { %v3825_v50 = vunpack.c.l.b16 %v3306_v36  ;;  %v2844_v5 = vadd.f32 %v2843_v34, %v2842_v55  ;;  %v3338_v43 = vpack.c.bf16 %v2430_v27, %v2430_v27  ;;  %v4877_v26 = vadd.f32 %v5569_v45, %v5407_v0  ;;  %v5677_v45 = vpop.f32.mrb[8].mxu1 }
 0x3c0   : > { %v3256_v17 = vadd.f32 %v3255_v57, %v3254_v3  ;;  %v3051_v58 = vrot.slane %v3050_v31, 2  ;;  %v2638_v41 = vadd.f32 %v2637_v59, %v2636_v24  ;;  %v3841_v10 = vunpack.c.l.b16 %v3322_v16  ;;  %v12709_v57 = vld [vmem:[#allocation68_spill] sm:$0xff]  ;;  %v5678_v59 = vpop.f32.mrb[9].mxu1 }
 0x3c1   : > { %v4028_v6 = vsel %vm3923_vm1, %v3825_v50, %v3809_v4  ;;  %v2845_v42 = vrot.slane %v2844_v5, 1  ;;  %v3857_v12 = vunpack.c.l.b16 %v3338_v43  ;;  %v5591_v9 = vadd.f32 %v12706_v60, %v12705_v1  ;;  %v5655_v4 = vpop.f32.mrb[8].mxu0  ;;  %v5680_v16 = vpop.f32.mrb[10].mxu1  ;;  %v5938_v43 = vld [vmem:[%s10779_s3 + $0x38] sm:$0xff]  }
 0x3c2   : > { %v3257_v23 = vrot.slane %v3256_v17, 4  ;;  %v3052_v29 = vadd.f32 %v3051_v58, %v3050_v31  ;;  %v3354_v25 = vpack.c.bf16 %v2638_v41, %v2638_v41  ;;  %v4029_v44 = vsel %vm3925_vm2, %v3841_v10, %v4028_v6  ;;  %v5656_v24 = vpop.f32.mrb[9].mxu0  ;;  %v5681_v50 = vpop.f32.mrb[11].mxu1  ;;  %v5937_v58 = vld [vmem:[%s10779_s3 + $0x30] sm:$0xff]  }
 0x3c3   : > { %v5613_v54 = vadd.f32 %v12708_v39, %v12707_v14  ;;  %v2846_v51 = vadd.f32 %v2845_v42, %v2844_v5  ;;  %v4030_v49 = vsel %vm3927_vm3, %v3857_v12, %v4029_v44  ;;  %v4917_v40 = vadd.f32 %v5591_v9, %v4877_v26  ;;  %v5658_v36 = vpop.f32.mrb[10].mxu0 }
 0x3c4   : > { %v3258_v56 = vadd.f32 %v3257_v23, %v3256_v17  ;;  %v3053_v15 = vrot.slane %v3052_v29, 1  ;;  %v3873_v52 = vunpack.c.l.b16 %v3354_v25  ;;  %v5635_v33 = vadd.f32 %v12710_v30, %v12709_v57  ;;  %v5659_v27 = vpop.f32.mrb[11].mxu0 }
 0x3c5   : > { %v3370_v61 = vpack.c.bf16 %v2846_v51, %v2846_v51  ;;  %v4957_v62 = vadd.f32 %v5613_v54, %v4917_v40  ;;  %v6035_v13 = vmov 0.0   ;;  %v5657_v3 = vadd.f32 %v5656_v24, %v5655_v4 }
 0x3c6   : > { %v3259_v2 = vrot.slane %v3258_v56, 2  ;;  %v3054_v22 = vadd.f32 %v3053_v15, %v3052_v29  ;;  %5736 = vmatprep.subr.bf16.mxu0 %v6035_v13  ;;  %v4031_v53 = vsel %vm3929_vm4, %v3873_v52, %v4030_v49  ;;  %v5679_v17 = vadd.f32 %v5678_v59, %v5677_v45  ;;  %5752 = vmatprep.mubr.msk.bf16.mxu0 %vm6036_vm8, %v6035_v13 }
 0x3c7   : > { %5737 = vmatpush3.bf16.msra.mxu0 %v5931_v35  ;;  %v3889_v21 = vunpack.c.l.b16 %v3370_v61  ;;  %v4997_v32 = vadd.f32 %v5635_v33, %v4957_v62 }
 0x3c8   : > { %v3260_v28 = vadd.f32 %v3259_v2, %v3258_v56  ;;  %v3386_v11 = vpack.c.bf16 %v3054_v22, %v3054_v22  ;;  %5738 = vmatprep.subr.bf16.mxu0 %v6035_v13 }
 0x3c9   : > { %v4032_v38 = vsel %vm3931_vm5, %v3889_v21, %v4031_v53  ;;  %v5037_v31 = vadd.f32 %v5657_v3, %v4997_v32 }
 0x3ca   : > { %v3261_v7 = vrot.slane %v3260_v28, 1  ;;  %v3905_v48 = vunpack.c.l.b16 %v3386_v11 }
 0x3cb   : > { %5739 = vmatpush3.bf16.msra.mxu0 %v5932_v20  ;;  %v5077_v5 = vadd.f32 %v5679_v17, %v5037_v31 }
 0x3cc   : > { %v3262_v18 = vadd.f32 %v3261_v7, %v3260_v28  ;;  %v4033_v55 = vsel %vm3933_vm6, %v3905_v48, %v4032_v38  ;;  %5740 = vmatprep.subr.bf16.mxu0 %v6035_v13 }
 0x3ce   : > { %v3402_v37 = vpack.c.bf16 %v3262_v18, %v3262_v18 }
 0x3cf   : > { %5741 = vmatpush3.bf16.msra.mxu0 %v5933_v63 }
 0x3d0   : > { %v3921_v47 = vunpack.c.l.b16 %v3402_v37  ;;  %5742 = vmatprep.subr.bf16.mxu0 %v6035_v13 }
 0x3d2   : > { %v4034_v0 = vsel %vm3935_vm7, %v3921_v47, %v4033_v55 }
 0x3d3   : > { %v4056_v34 = vpack.c.b16 %v4034_v0, %v4034_v0  ;;  %5743 = vmatpush3.bf16.msra.mxu0 %v5934_v46 }
 0x3d4   : > { %5744 = vmatprep.subr.bf16.mxu0 %v6035_v13 }
 0x3d5   : > { %5155 = vmatmul.mubr.bf16.vlgmr.msra.gmra.mrb[12].mxu1 %v4056_v34 }
 0x3d7   : > { %5745 = vmatpush3.bf16.msra.mxu0 %v5935_v8 }
 0x3d8   : > { %5746 = vmatprep.subr.bf16.mxu0 %v6035_v13 }
 0x3db   : > { %5747 = vmatpush3.bf16.msra.mxu0 %v5936_v19 }
 0x3dc   : > { %5748 = vmatprep.subr.bf16.mxu0 %v6035_v13 }
 0x3df   : > { %5749 = vmatpush3.bf16.msra.mxu0 %v5937_v58 }
 0x3e0   : > { %5750 = vmatprep.subr.bf16.mxu0 %v6035_v13 }
 0x3e3   : > { %5751 = vmatpush3.bf16.msra.mxu0 %v5938_v43 }
 0x480   : > { %v5699_v26 = vpop.f32.mrb[12].mxu0 }
 0x481   : > { %v5700_v41 = vpop.f32.mrb[13].mxu0 }
 0x482   : > { %v5701_v23 = vadd.f32 %v5700_v41, %v5699_v26  ;;  %v5702_v10 = vpop.f32.mrb[14].mxu0 }
 0x483   : > { %v5703_v6 = vpop.f32.mrb[15].mxu0 }
 0x484   : > { %v5117_v42 = vadd.f32 %v5701_v23, %v5077_v5 }
 0x4a8   : > { %v5721_v29 = vpop.f32.mrb[12].mxu1 }
 0x4a9   : > { %v5722_v12 = vpop.f32.mrb[13].mxu1 }
 0x4aa   : > { %v5723_v1 = vadd.f32 %v5722_v12, %v5721_v29  ;;  %v5724_v60 = vpop.f32.mrb[14].mxu1 }
 0x4ab   : > { %v5725_v9 = vpop.f32.mrb[15].mxu1 }
 0x4ac   : > { %v5157_v56 = vadd.f32 %v5723_v1, %v5117_v42 }
 0x4ae   : > { %v5163_v25 = vpack.c.bf16 %v5157_v56, %v5157_v56  ;;  %5162 = vst [vmem:[%s251_s18] sm:$0xff] %v5157_v56 }
 0x4b0   : > { %5753 = vmatmul.mubr.bf16.vlgmr.msra.gmra.mrb[16].mxu0 %v5163_v25 }
 0x4b1   : > { %5952 = shalt.err (!%p5949_p3)
}
 0x4b2   : > { %s5953_s15 = scalar_lea.hbm %s10703_s29, 128  ;;  %s5957_s26 = scalar_lea.hbm %s10781_s5, 256 }
 0x4b3   : > { %p5954_p4 = scmp.ne.s32.totalorder %s10703_s29, %s5953_s15  ;;  %p5958_p9 = scmp.lt.u32.totalorder %s10703_s29, %s10781_s5 }
 0x4b4   : > { %p5959_p10 = scmp.lt.u32.totalorder %s5957_s26, %s5953_s15  ;;  %p5961_p12 = scmp.lt.u32.totalorder %s5953_s15, %s10703_s29 }
 0x4b5   : > { %p5955_p7 = pnand %p5954_p4, %p6112_p5 }
 0x4b6   : > { %p5960_p11 = por %p5959_p10, %p5958_p9 }
 0x4b7   : > { %p5956_p8 = pneg %p5955_p7 }
 0x4b8   : > { %p5962_p13 = por %p5961_p12, %p5960_p11 }
 0x4ba   : > { %p5963_p0 = pnand %p5962_p13, %p5956_p8 }
 0x4bc   : > { %5966 = shalt.err (!%p5963_p0)
}
 0x4bd   : > { %5757 = dma.vmem_to_hbm [thread:$0]  (%p6112_p5), %s5296_s10, 128, %s10703_s29, %s5277_s11   ;;  %v5536_v44 = vld [vmem:[%s10780_s4] ss:$0 sm:$0xff] }
 0x4be   : > { %s258_s14 = scalar_lea.vmem [#allocation4], %s5403_s19  ;;  %s10733_s26 = scalar_lea.hbm %s10782_s6, %s5547_s20 }
 0x4bf   : > { %s5308_s16 = sshll.u32 %s258_s14, 4  ;;  %s5282_s29 = scalar_lea.sflag [#allocation5], %s10692_s17  ;;  %s10735_s16 = int_to_ptr.vmem [resolvable:$true] %s5308_s16 }
 0x4c0   : > { %s5967_s19 = scalar_lea.vmem %s10735_s16, 128  ;;  %s6038_s25 = smov [#allocation4]  }
 0x4c1   : > { %p5968_p1 = scmp.ne.s32.totalorder %s10735_s16, %s5967_s19  ;;  %s5971_s10 = sshll.u32 %s6038_s25, 4  ;;  %s5972_s10 = int_to_ptr.vmem [resolvable:$false] %s5971_s10 }
 0x4c2   : > { %s5973_s11 = scalar_lea.vmem %s5972_s10, 256  ;;  %p5974_p4 = scmp.lt.s32.totalorder %s10735_s16, %s5972_s10 }
 0x4c3   : > { %p5969_p2 = pnand %p5968_p1, %p6112_p5  ;;  %p5975_p7 = scmp.lt.s32.totalorder %s5973_s11, %s5967_s19 }
 0x4c5   : > { %p5970_p3 = pneg %p5969_p2  ;;  %p5976_p8 = por %p5975_p7, %p5974_p4 }
 0x4c7   : > { %p5977_p9 = pnand %p5976_p8, %p5970_p3 }
 0x583   : > { %v5269_v14 = vpop.f32.mrb[16].mxu0 }
 0x584   : > { %v5270_v39 = vadd.f32 %v5536_v44, %v5269_v14  ;;  %v5754_v54 = vpop.f32.mrb[17].mxu0 }
 0x585   : > { %v5272_v35 = vpop.f32.mrb[18].mxu0 }
 0x586   : > { %5275 = vst [vmem:[%s258_s14] sm:$0xff] %v5270_v39  ;;  %v5755_v51 = vpop.f32.mrb[19].mxu0 }
 0x587   : > { %5980 = shalt.err (!%p5977_p9)
}
 0x588   : > { %s5981_s17 = scalar_lea.hbm %s10733_s26, 128  ;;  %s5985_s9 = scalar_lea.hbm %s10782_s6, 256 }
 0x589   : > { %p5982_p10 = scmp.ne.s32.totalorder %s10733_s26, %s5981_s17  ;;  %p5986_p13 = scmp.lt.u32.totalorder %s10733_s26, %s10782_s6 }
 0x58a   : > { %p5987_p0 = scmp.lt.u32.totalorder %s5985_s9, %s5981_s17  ;;  %p5989_p2 = scmp.lt.u32.totalorder %s5981_s17, %s10733_s26 }
 0x58b   : > { %p5983_p11 = pnand %p5982_p10, %p6112_p5 }
 0x58c   : > { %p5988_p1 = por %p5987_p0, %p5986_p13 }
 0x58d   : > { %p5984_p12 = pneg %p5983_p11 }
 0x58e   : > { %p5990_p3 = por %p5989_p2, %p5988_p1 }
 0x590   : > { %p5991_p4 = pnand %p5990_p3, %p5984_p12 }
 0x592   : > { %5994 = shalt.err (!%p5991_p4)
}
 0x593   : > { %5758 = dma.vmem_to_hbm [thread:$0]  (%p6112_p5), %s10735_s16, 128, %s10733_s26, %s5282_s29  }
 0x594 PF: > { %p5768_p7 = scmp.ge.s32.totalorder %s6033_s24, 2  ;;  %s5320_s14 = sand.u32 1, %s6021_s21  }
 0x595   : > { %s5321_s15 = scalar_lea.sflag [#allocation3], %s5320_s14 }
 0x596   : > { %p5762_p8 = pnand %p5768_p7, %p6116_p6 }
 0x598   : > { %6012 = dma.done.wait (!%p5762_p8), %s5321_s15, 128  }
 0x599   : > { %6014 = vsyncadd (!%p5762_p8), %s5321_s15, 4294967168  ;;  %s5330_s18 = scalar_lea.sflag [#allocation5], %s5320_s14 }
 0x59a   : > { %6016 = dma.done.wait (!%p5762_p8), %s5330_s18, 128  }
 0x59b   : > { %6018 = vsyncadd (!%p5762_p8), %s5330_s18, 4294967168  ;;  %p20_p5 = scmp.ge.s32.totalorder %s6099_s27, 4   ;;  %s12711_s21 = smov %s6025_s22 }
 0x59c   : > { %s12712_s22 = smov %s6029_s23  ;;  %s12713_s23 = smov %s6110_s30 }
 0x59d   : > { %s12714_s24 = smov %s6099_s27  ;;  %22 = sbr.rel (!%p20_p5) target bundleno = 5 (0x5), region = 92 }
 0x5a4   :  { %5335 = vsyncpa [#allocation3], 1 }
 0x5a5   :  { %5337 = vsyncpa [#allocation3 + $0x1], 1 }
 0x5a6   :  { %5338 = vsyncpa [#allocation5], 1 }
 0x5a7   :  { %5340 = vsyncpa [#allocation5 + $0x1], 1 }

</bundles_post_ra>
